<compile_context>
chip_gen: v7x
topology: tpu7x:2x2x1
jax: 0.10.0
libtpu: 0.0.40
codegen_flags: <defaults>
</compile_context>

<pallas_src>
import math

import jax
import jax.numpy as jnp
from jax.experimental import pallas as pl
from jax.experimental.pallas import tpu as pltpu

# ----------------------------- model config ---------------------------------
VOCAB = 50
VOCAB_PAD = 128      # pad vocab to lane width for the one-hot matmul
E = 128              # embedding_size
H = 128              # hidden_size
G3 = 3 * H           # per-direction gate width (r|z|n)
NUM_LAYERS = 2
BIDIR = True
D = 2 if BIDIR else 1
RNN_OUT = D * NUM_LAYERS * H   # 4H
BN_EPS = 1e-5

B = 8                # batch
T = 8                # sequence length
TB = T * B


# ------------------------------- kernel -------------------------------------
def gru_encoder_kernel(
    tok_ref, len_ref, emb_ref,
    w0ih_ref, b0ih_ref, whh0_ref, bhh0_ref,
    w1ih_ref, b1ih_ref, whh1_ref, bhh1_ref,
    fcw_ref, shift_ref,
    feat_ref,
    gi_f_scr, gi_b_scr, out_f_scr, out_b_scr,
):
    f32 = jnp.float32
    bf16 = jnp.bfloat16

    # ---- embedding lookup as a one-hot matmul on the MXU (gather-free) ----
    tok = jnp.broadcast_to(tok_ref[...], (TB, VOCAB_PAD))                # [TB, Vp]
    iota = jax.lax.broadcasted_iota(jnp.int32, (TB, VOCAB_PAD), 1)
    onehot = jnp.where(tok == iota, 1.0, 0.0).astype(bf16)               # [TB, Vp]
    x = jnp.dot(onehot, emb_ref[...],
                preferred_element_type=f32).astype(bf16)                 # [TB, E]

    # ---- per-timestep validity masks (hoisted, one compare each) ----
    len_b = jnp.broadcast_to(len_ref[...], (B, H))                       # [B, H]
    masks = [len_b > float(t) for t in range(T)]                         # bool [B, H]

    def bidir_layer(whh_ref, bhh_ref, store_outputs):
        """One bidirectional GRU layer over the gi_f/gi_b scratches.

        Fwd step t and bwd step T-1-t share an iteration; their recurrent
        projections are fused into a single block-diagonal [B,2H]x[2H,6H]
        matmul (K=256 fills the v6e/v7x MXU).
        """
        bhh = bhh_ref[...]                                               # [1, 6H]
        h_f = jnp.zeros((B, H), f32)
        h_b = jnp.zeros((B, H), f32)
        for i in range(T):
            tf, tb = i, T - 1 - i
            h_cat = jnp.concatenate([h_f, h_b], axis=-1).astype(bf16)    # [B, 2H]
            gh = jnp.dot(h_cat, whh_ref[...],
                         preferred_element_type=f32) + bhh               # [B, 6H]
            gh_f = gh[:, 0:G3]
            gh_b = gh[:, G3:2 * G3]
            gi_f = gi_f_scr[pl.ds(tf * B, B), :]                         # [B, 3H]
            gi_b = gi_b_scr[pl.ds(tb * B, B), :]                         # [B, 3H]

            # PyTorch GRU gate order: r, z, n.  One sigmoid over the
            # contiguous r|z slice per direction; blend as n + z*(h - n).
            rz_f = jax.nn.sigmoid(gi_f[:, 0:2 * H] + gh_f[:, 0:2 * H])
            n_f = jnp.tanh(gi_f[:, 2 * H:G3] + rz_f[:, 0:H] * gh_f[:, 2 * H:G3])
            hn_f = n_f + rz_f[:, H:2 * H] * (h_f - n_f)

            rz_b = jax.nn.sigmoid(gi_b[:, 0:2 * H] + gh_b[:, 0:2 * H])
            n_b = jnp.tanh(gi_b[:, 2 * H:G3] + rz_b[:, 0:H] * gh_b[:, 2 * H:G3])
            hn_b = n_b + rz_b[:, H:2 * H] * (h_b - n_b)

            h_f = jnp.where(masks[tf], hn_f, h_f)    # freeze fwd h after length
            h_b = jnp.where(masks[tb], hn_b, h_b)    # bwd h starts at length-1
            if store_outputs:
                out_f_scr[pl.ds(tf * B, B), :] = jnp.where(masks[tf], h_f, 0.0)
                out_b_scr[pl.ds(tb * B, B), :] = jnp.where(masks[tb], h_b, 0.0)
        return h_f, h_b

    # ================================ layer 0 ================================
    # one fused [TB,E]x[E,6H] input-to-hidden projection for both directions
    gi0 = jnp.dot(x, w0ih_ref[...], preferred_element_type=f32) + b0ih_ref[...]
    gi_f_scr[...] = gi0[:, 0:G3]
    gi_b_scr[...] = gi0[:, G3:2 * G3]
    h0f, h0b = bidir_layer(whh0_ref, bhh0_ref, store_outputs=True)

    # ================================ layer 1 ================================
    # one fused [TB,2H]x[2H,6H] projection (K=256) on the layer-0 outputs
    o0 = jnp.concatenate([out_f_scr[...], out_b_scr[...]], axis=-1).astype(bf16)
    gi1 = jnp.dot(o0, w1ih_ref[...], preferred_element_type=f32) + b1ih_ref[...]
    gi_f_scr[...] = gi1[:, 0:G3]
    gi_b_scr[...] = gi1[:, G3:2 * G3]
    h1f, h1b = bidir_layer(whh1_ref, bhh1_ref, store_outputs=False)

    # hidden.permute(1,0,2).reshape(B,-1) -> [l0_fwd, l0_bwd, l1_fwd, l1_bwd]
    hidden = jnp.concatenate([h0f, h0b, h1f, h1b], axis=-1).astype(bf16)  # [B, 4H]

    # fc1 -> bn1 (eval stats folded into fcw/shift) -> ReLU
    z = jnp.dot(hidden, fcw_ref[...], preferred_element_type=f32) + shift_ref[...]
    feat_ref[...] = jnp.maximum(z, 0.0)


# ---------------------- one-time parameter preparation ------------------------
def prepare_params(params):
    """Cast/reshape/pack parameters into kernel-ready form (done once)."""
    bf = jnp.bfloat16
    emb = jnp.pad(params["embedding"],
                  ((0, VOCAB_PAD - VOCAB), (0, 0))).astype(bf)           # [Vp, E]

    w0f_ih, w0f_hh, b0f_ih, b0f_hh = params["gru"][(0, 0)]
    w0b_ih, w0b_hh, b0b_ih, b0b_hh = params["gru"][(0, 1)]
    w1f_ih, w1f_hh, b1f_ih, b1f_hh = params["gru"][(1, 0)]
    w1b_ih, w1b_hh, b1b_ih, b1b_hh = params["gru"][(1, 1)]

    def blockdiag(wf, wb):
        z = jnp.zeros_like(wf)
        top = jnp.concatenate([wf, z], axis=1)
        bot = jnp.concatenate([z, wb], axis=1)
        return jnp.concatenate([top, bot], axis=0)                       # [2H, 6H]

    # fused input-to-hidden weights (fwd | bwd stacked along N)
    w0ih = jnp.concatenate([w0f_ih, w0b_ih], axis=1).astype(bf)          # [E, 6H]
    b0ih = jnp.concatenate([b0f_ih, b0b_ih], axis=1)                     # [1, 6H]
    w1ih = jnp.concatenate([w1f_ih, w1b_ih], axis=1).astype(bf)          # [2H, 6H]
    b1ih = jnp.concatenate([b1f_ih, b1b_ih], axis=1)                     # [1, 6H]

    # block-diagonal recurrent weights (one K=256 matmul per step)
    whh0 = blockdiag(w0f_hh, w0b_hh).astype(bf)                          # [2H, 6H]
    bhh0 = jnp.concatenate([b0f_hh, b0b_hh], axis=1)                     # [1, 6H]
    whh1 = blockdiag(w1f_hh, w1b_hh).astype(bf)                          # [2H, 6H]
    bhh1 = jnp.concatenate([b1f_hh, b1b_hh], axis=1)                     # [1, 6H]

    # Fold eval-mode BatchNorm (+ fc bias) into a scaled fc weight and a shift.
    scale = params["bn_g"] * jax.lax.rsqrt(params["bn_v"] + BN_EPS)      # [1, H]
    shift = (params["fc_b"] - params["bn_m"]) * scale + params["bn_b"]   # [1, H]
    fcw = (params["fc_w"] * scale).astype(bf)                            # [4H, H]

    return (emb, w0ih, b0ih, whh0, bhh0, w1ih, b1ih, whh1, bhh1, fcw, shift)


# ------------------------------- wrapper -------------------------------------
@jax.jit
def gru_encoder_forward(kernel_params, tokens, lengths, src_key_padding_mask):
    # src_key_padding_mask is accepted for API parity with the PyTorch module
    # but is unused by its forward().
    del src_key_padding_mask

    # Layout-only glue: time-major int32 tokens [TB,1] and lengths [B,1];
    # all lane broadcasts happen inside the kernel.
    tok = jnp.transpose(tokens, (1, 0)).reshape(TB, 1).astype(jnp.int32)
    len_col = lengths.astype(jnp.float32).reshape(B, 1)

    args = (tok, len_col) + tuple(kernel_params)
    feat = pl.pallas_call(
        gru_encoder_kernel,
        out_shape=jax.ShapeDtypeStruct((B, H), jnp.float32),
        in_specs=[pl.BlockSpec(memory_space=pltpu.MemorySpace.VMEM)] * len(args),
        out_specs=pl.BlockSpec(memory_space=pltpu.MemorySpace.VMEM),
        scratch_shapes=[
            pltpu.VMEM((TB, G3), jnp.float32),   # gi (fwd), reused by layer 1
            pltpu.VMEM((TB, G3), jnp.float32),   # gi (bwd), reused by layer 1
            pltpu.VMEM((TB, H), jnp.float32),    # layer-0 fwd outputs
            pltpu.VMEM((TB, H), jnp.float32),    # layer-0 bwd outputs
        ],
    )(*args)
    return feat


# --------------------------- parameter init ----------------------------------
def init_params(key):
    keys = jax.random.split(key, 24)
    ki = iter(range(24))

    params = {}
    params["embedding"] = jax.random.normal(keys[next(ki)], (VOCAB, E), jnp.float32)

    bound = 1.0 / math.sqrt(H)
    gru = {}
    for layer in range(NUM_LAYERS):
        in_dim = E if layer == 0 else D * H
        for direction in range(D):
            w_ih = jax.random.uniform(keys[next(ki)], (in_dim, 3 * H), jnp.float32, -bound, bound)
            w_hh = jax.random.uniform(keys[next(ki)], (H, 3 * H), jnp.float32, -bound, bound)
            b_ih = jax.random.uniform(keys[next(ki)], (1, 3 * H), jnp.float32, -bound, bound)
            b_hh = jax.random.uniform(keys[next(ki)], (1, 3 * H), jnp.float32, -bound, bound)
            gru[(layer, direction)] = (w_ih, w_hh, b_ih, b_hh)
    params["gru"] = gru

    fc_bound = 1.0 / math.sqrt(RNN_OUT)
    params["fc_w"] = jax.random.uniform(keys[next(ki)], (RNN_OUT, H), jnp.float32, -fc_bound, fc_bound)
    params["fc_b"] = jax.random.uniform(keys[next(ki)], (1, H), jnp.float32, -fc_bound, fc_bound)
    # non-trivial eval-mode BN stats so the scale/shift path is exercised
    params["bn_g"] = jax.random.uniform(keys[next(ki)], (1, H), jnp.float32, 0.5, 1.5)
    params["bn_b"] = 0.1 * jax.random.normal(keys[next(ki)], (1, H), jnp.float32)
    params["bn_m"] = 0.1 * jax.random.normal(keys[next(ki)], (1, H), jnp.float32)
    params["bn_v"] = jax.random.uniform(keys[next(ki)], (1, H), jnp.float32, 0.5, 1.5)
    return params


# ------------------------- pure-JAX reference --------------------------------
# Implements the module math directly (embedding gather, per-direction GRU with
# packed-sequence masking, concat hidden, fc -> BN -> ReLU) with the same
# mixed-precision policy as the kernel: bf16 matmul operands, f32 accumulation,
# f32 elementwise math.
def gru_encoder_reference(params, tokens, lengths):
    bf, f32 = jnp.bfloat16, jnp.float32

    def mm(a, w):
        return jnp.dot(a.astype(bf), w.astype(bf), preferred_element_type=f32)

    emb = jnp.take(params["embedding"], tokens, axis=0)                  # [B, T, E]
    x = jnp.transpose(emb, (1, 0, 2))                                    # [T, B, E]
    mask = (jnp.arange(T)[:, None] < lengths[None, :]).astype(f32)[:, :, None]

    def cell(x_t, h, p):
        w_ih, w_hh, b_ih, b_hh = p
        gi = mm(x_t, w_ih) + b_ih
        gh = mm(h, w_hh) + b_hh
        r = jax.nn.sigmoid(gi[:, 0:H] + gh[:, 0:H])
        z = jax.nn.sigmoid(gi[:, H:2 * H] + gh[:, H:2 * H])
        n = jnp.tanh(gi[:, 2 * H:] + r * gh[:, 2 * H:])
        return (1.0 - z) * n + z * h

    def run(xs, p, reverse):
        h = jnp.zeros((B, H), f32)
        outs = [None] * T
        order = range(T - 1, -1, -1) if reverse else range(T)
        for t in order:
            m = mask[t]
            h = m * cell(xs[t], h, p) + (1.0 - m) * h
            outs[t] = h * m
        return outs, h

    xs0 = [x[t] for t in range(T)]
    o0f, h0f = run(xs0, params["gru"][(0, 0)], False)
    o0b, h0b = run(xs0, params["gru"][(0, 1)], True)
    xs1 = [jnp.concatenate([o0f[t], o0b[t]], axis=-1) for t in range(T)]
    _, h1f = run(xs1, params["gru"][(1, 0)], False)
    _, h1b = run(xs1, params["gru"][(1, 1)], True)

    hidden = jnp.concatenate([h0f, h0b, h1f, h1b], axis=-1)
    z = mm(hidden, params["fc_w"]) + params["fc_b"]
    zn = (z - params["bn_m"]) * jax.lax.rsqrt(params["bn_v"] + BN_EPS) \
        * params["bn_g"] + params["bn_b"]
    return jnp.maximum(zn, 0.0)


# --------------------------------- main ---------------------------------------
if __name__ == "__main__":
    key = jax.random.PRNGKey(0)
    k_param, k_tok = jax.random.split(key)

    params = init_params(k_param)
    tokens = jax.random.randint(k_tok, (B, T), 0, VOCAB, dtype=jnp.int32)
    lengths = jnp.array([8, 5, 7, 3, 8, 6, 2, 4], dtype=jnp.int32)
    # src_key_padding_mask (True at padded positions) — unused by forward().
    src_key_padding_mask = jnp.arange(T)[None, :] >= lengths[:, None]

    kernel_params = prepare_params(params)
    feat = gru_encoder_forward(kernel_params, tokens, lengths, src_key_padding_mask)
    feat = jax.block_until_ready(feat)

    ref = jax.block_until_ready(gru_encoder_reference(params, tokens, lengths))

    assert feat.shape == (B, H) and feat.dtype == jnp.float32
    if not jnp.allclose(feat, ref, rtol=2e-2, atol=2e-2):
        max_err = float(jnp.max(jnp.abs(feat - ref)))
        raise AssertionError(f"Pallas kernel mismatch vs reference, max abs err={max_err}")

    print("KERNEL_OK")
</pallas_src>

<mosaic_0001>
module attributes {stable_mosaic.version = 11 : i64} {
  func.func @gru_encoder_kernel(%arg0: memref<64x1xi32, #tpu.memory_space<vmem>>, %arg1: memref<8x1xf32, #tpu.memory_space<vmem>>, %arg2: memref<128x128xbf16, #tpu.memory_space<vmem>>, %arg3: memref<128x768xbf16, #tpu.memory_space<vmem>>, %arg4: memref<1x768xf32, #tpu.memory_space<vmem>>, %arg5: memref<256x768xbf16, #tpu.memory_space<vmem>>, %arg6: memref<1x768xf32, #tpu.memory_space<vmem>>, %arg7: memref<256x768xbf16, #tpu.memory_space<vmem>>, %arg8: memref<1x768xf32, #tpu.memory_space<vmem>>, %arg9: memref<256x768xbf16, #tpu.memory_space<vmem>>, %arg10: memref<1x768xf32, #tpu.memory_space<vmem>>, %arg11: memref<512x128xbf16, #tpu.memory_space<vmem>>, %arg12: memref<1x128xf32, #tpu.memory_space<vmem>>, %arg13: memref<8x128xf32, #tpu.memory_space<vmem>>, %arg14: memref<64x384xf32, #tpu.memory_space<vmem>>, %arg15: memref<64x384xf32, #tpu.memory_space<vmem>>, %arg16: memref<64x128xf32, #tpu.memory_space<vmem>>, %arg17: memref<64x128xf32, #tpu.memory_space<vmem>>) attributes {dimension_semantics = [], scalar_prefetch = 0 : i64, scratch_operands = 4 : i64, tpu.core_type = #tpu.core_type<tc>} {
    %c0 = arith.constant 0 : index
    %c0_0 = arith.constant 0 : index
    %0 = vector.load %arg0[%c0, %c0_0] : memref<64x1xi32, #tpu.memory_space<vmem>>, vector<64x1xi32>
    %1 = vector.shape_cast %0 : vector<64x1xi32> to vector<64x1xi32>
    %2 = vector.broadcast %1 : vector<64x1xi32> to vector<64x128xi32>
    %3 = tpu.iota {dimensions = array<i32: 1>} : vector<64x128xi32>
    %4 = arith.cmpi eq, %2, %3 : vector<64x128xi32>
    %cst = arith.constant 1.000000e+00 : f32
    %cst_1 = arith.constant 0.000000e+00 : f32
    %5 = vector.broadcast %cst : f32 to vector<64x128xf32>
    %6 = vector.broadcast %cst_1 : f32 to vector<64x128xf32>
    %7 = arith.select %4, %5, %6 : vector<64x128xi1>, vector<64x128xf32>
    %8 = arith.truncf %7 : vector<64x128xf32> to vector<64x128xbf16>
    %c0_2 = arith.constant 0 : index
    %c0_3 = arith.constant 0 : index
    %9 = vector.load %arg2[%c0_2, %c0_3] : memref<128x128xbf16, #tpu.memory_space<vmem>>, vector<128x128xbf16>
    %cst_4 = arith.constant dense<0.000000e+00> : vector<64x128xf32>
    %10 = tpu.matmul %8, %9, %cst_4 {dimension_numbers = #tpu.dot_dimension_numbers<[1], [0], [0], [1], [0, 0, 1, 1], [], []>} : vector<64x128xbf16>, vector<128x128xbf16>, vector<64x128xf32> -> vector<64x128xf32>
    %11 = arith.truncf %10 : vector<64x128xf32> to vector<64x128xbf16>
    %c0_5 = arith.constant 0 : index
    %c0_6 = arith.constant 0 : index
    %12 = vector.load %arg1[%c0_5, %c0_6] : memref<8x1xf32, #tpu.memory_space<vmem>>, vector<8x1xf32>
    %13 = vector.shape_cast %12 : vector<8x1xf32> to vector<8x1xf32>
    %14 = vector.broadcast %13 : vector<8x1xf32> to vector<8x128xf32>
    %cst_7 = arith.constant 0.000000e+00 : f32
    %15 = vector.broadcast %cst_7 : f32 to vector<8x128xf32>
    %16 = arith.cmpf ogt, %14, %15 : vector<8x128xf32>
    %cst_8 = arith.constant 1.000000e+00 : f32
    %17 = vector.broadcast %cst_8 : f32 to vector<8x128xf32>
    %18 = arith.cmpf ogt, %14, %17 : vector<8x128xf32>
    %cst_9 = arith.constant 2.000000e+00 : f32
    %19 = vector.broadcast %cst_9 : f32 to vector<8x128xf32>
    %20 = arith.cmpf ogt, %14, %19 : vector<8x128xf32>
    %cst_10 = arith.constant 3.000000e+00 : f32
    %21 = vector.broadcast %cst_10 : f32 to vector<8x128xf32>
    %22 = arith.cmpf ogt, %14, %21 : vector<8x128xf32>
    %cst_11 = arith.constant 4.000000e+00 : f32
    %23 = vector.broadcast %cst_11 : f32 to vector<8x128xf32>
    %24 = arith.cmpf ogt, %14, %23 : vector<8x128xf32>
    %cst_12 = arith.constant 5.000000e+00 : f32
    %25 = vector.broadcast %cst_12 : f32 to vector<8x128xf32>
    %26 = arith.cmpf ogt, %14, %25 : vector<8x128xf32>
    %cst_13 = arith.constant 6.000000e+00 : f32
    %27 = vector.broadcast %cst_13 : f32 to vector<8x128xf32>
    %28 = arith.cmpf ogt, %14, %27 : vector<8x128xf32>
    %cst_14 = arith.constant 7.000000e+00 : f32
    %29 = vector.broadcast %cst_14 : f32 to vector<8x128xf32>
    %30 = arith.cmpf ogt, %14, %29 : vector<8x128xf32>
    %c0_15 = arith.constant 0 : index
    %c0_16 = arith.constant 0 : index
    %31 = vector.load %arg3[%c0_15, %c0_16] : memref<128x768xbf16, #tpu.memory_space<vmem>>, vector<128x768xbf16>
    %cst_17 = arith.constant dense<0.000000e+00> : vector<64x768xf32>
    %32 = tpu.matmul %11, %31, %cst_17 {dimension_numbers = #tpu.dot_dimension_numbers<[1], [0], [0], [1], [0, 0, 1, 1], [], []>} : vector<64x128xbf16>, vector<128x768xbf16>, vector<64x768xf32> -> vector<64x768xf32>
    %c0_18 = arith.constant 0 : index
    %c0_19 = arith.constant 0 : index
    %33 = vector.load %arg4[%c0_18, %c0_19] : memref<1x768xf32, #tpu.memory_space<vmem>>, vector<1x768xf32>
    %34 = vector.broadcast %33 : vector<1x768xf32> to vector<64x768xf32>
    %35 = arith.addf %32, %34 : vector<64x768xf32>
    %36 = vector.extract_strided_slice %35 {offsets = [0, 0], sizes = [64, 384], strides = [1, 1]} : vector<64x768xf32> to vector<64x384xf32>
    %c0_20 = arith.constant 0 : index
    %c0_21 = arith.constant 0 : index
    %37 = vector.load %arg14[%c0_20, %c0_21] : memref<64x384xf32, #tpu.memory_space<vmem>>, vector<64x384xf32>
    tpu.vector_store %arg14[%c0_20, %c0_21], %36 {strides = array<i32>} : memref<64x384xf32, #tpu.memory_space<vmem>>, vector<64x384xf32>,
    %38 = vector.extract_strided_slice %35 {offsets = [0, 384], sizes = [64, 384], strides = [1, 1]} : vector<64x768xf32> to vector<64x384xf32>
    %c0_22 = arith.constant 0 : index
    %c0_23 = arith.constant 0 : index
    %39 = vector.load %arg15[%c0_22, %c0_23] : memref<64x384xf32, #tpu.memory_space<vmem>>, vector<64x384xf32>
    tpu.vector_store %arg15[%c0_22, %c0_23], %38 {strides = array<i32>} : memref<64x384xf32, #tpu.memory_space<vmem>>, vector<64x384xf32>,
    %c0_24 = arith.constant 0 : index
    %c0_25 = arith.constant 0 : index
    %40 = vector.load %arg6[%c0_24, %c0_25] : memref<1x768xf32, #tpu.memory_space<vmem>>, vector<1x768xf32>
    %cst_26 = arith.constant 0.000000e+00 : f32
    %41 = vector.broadcast %cst_26 : f32 to vector<8x128xf32>
    %cst_27 = arith.constant 0.000000e+00 : f32
    %42 = vector.broadcast %cst_27 : f32 to vector<8x128xf32>
    %43 = tpu.concatenate %41, %42 in 1 : vector<8x128xf32>, vector<8x128xf32> -> vector<8x256xf32>
    %44 = arith.truncf %43 : vector<8x256xf32> to vector<8x256xbf16>
    %c0_28 = arith.constant 0 : index
    %c0_29 = arith.constant 0 : index
    %45 = vector.load %arg5[%c0_28, %c0_29] : memref<256x768xbf16, #tpu.memory_space<vmem>>, vector<256x768xbf16>
    %cst_30 = arith.constant dense<0.000000e+00> : vector<8x768xf32>
    %46 = tpu.matmul %44, %45, %cst_30 {dimension_numbers = #tpu.dot_dimension_numbers<[1], [0], [0], [1], [0, 0, 1, 1], [], []>} : vector<8x256xbf16>, vector<256x768xbf16>, vector<8x768xf32> -> vector<8x768xf32>
    %47 = vector.broadcast %40 : vector<1x768xf32> to vector<8x768xf32>
    %48 = arith.addf %46, %47 : vector<8x768xf32>
    %49 = vector.extract_strided_slice %48 {offsets = [0, 0], sizes = [8, 384], strides = [1, 1]} : vector<8x768xf32> to vector<8x384xf32>
    %50 = vector.extract_strided_slice %48 {offsets = [0, 384], sizes = [8, 384], strides = [1, 1]} : vector<8x768xf32> to vector<8x384xf32>
    %c0_31 = arith.constant 0 : index
    %c0_32 = arith.constant 0 : index
    %51 = vector.load %arg14[%c0_31, %c0_32] : memref<64x384xf32, #tpu.memory_space<vmem>>, vector<8x384xf32>
    %c56 = arith.constant 56 : index
    %c0_33 = arith.constant 0 : index
    %52 = vector.load %arg15[%c56, %c0_33] : memref<64x384xf32, #tpu.memory_space<vmem>>, vector<8x384xf32>
    %53 = vector.extract_strided_slice %51 {offsets = [0, 0], sizes = [8, 256], strides = [1, 1]} : vector<8x384xf32> to vector<8x256xf32>
    %54 = vector.extract_strided_slice %49 {offsets = [0, 0], sizes = [8, 256], strides = [1, 1]} : vector<8x384xf32> to vector<8x256xf32>
    %55 = arith.addf %53, %54 : vector<8x256xf32>
    %56 = arith.negf %55 : vector<8x256xf32>
    %57 = math.exp %56 : vector<8x256xf32>
    %cst_34 = arith.constant 1.000000e+00 : f32
    %58 = vector.broadcast %cst_34 : f32 to vector<8x256xf32>
    %59 = arith.addf %58, %57 : vector<8x256xf32>
    %60 = arith.divf %58, %59 : vector<8x256xf32>
    %61 = vector.extract_strided_slice %51 {offsets = [0, 256], sizes = [8, 128], strides = [1, 1]} : vector<8x384xf32> to vector<8x128xf32>
    %62 = vector.extract_strided_slice %60 {offsets = [0, 0], sizes = [8, 128], strides = [1, 1]} : vector<8x256xf32> to vector<8x128xf32>
    %63 = vector.extract_strided_slice %49 {offsets = [0, 256], sizes = [8, 128], strides = [1, 1]} : vector<8x384xf32> to vector<8x128xf32>
    %64 = arith.mulf %62, %63 : vector<8x128xf32>
    %65 = arith.addf %61, %64 : vector<8x128xf32>
    %66 = math.tanh %65 : vector<8x128xf32>
    %67 = vector.extract_strided_slice %60 {offsets = [0, 128], sizes = [8, 128], strides = [1, 1]} : vector<8x256xf32> to vector<8x128xf32>
    %68 = arith.subf %41, %66 : vector<8x128xf32>
    %69 = arith.mulf %67, %68 : vector<8x128xf32>
    %70 = arith.addf %66, %69 : vector<8x128xf32>
    %71 = vector.extract_strided_slice %52 {offsets = [0, 0], sizes = [8, 256], strides = [1, 1]} : vector<8x384xf32> to vector<8x256xf32>
    %72 = vector.extract_strided_slice %50 {offsets = [0, 0], sizes = [8, 256], strides = [1, 1]} : vector<8x384xf32> to vector<8x256xf32>
    %73 = arith.addf %71, %72 : vector<8x256xf32>
    %74 = arith.negf %73 : vector<8x256xf32>
    %75 = math.exp %74 : vector<8x256xf32>
    %cst_35 = arith.constant 1.000000e+00 : f32
    %76 = vector.broadcast %cst_35 : f32 to vector<8x256xf32>
    %77 = arith.addf %76, %75 : vector<8x256xf32>
    %78 = arith.divf %76, %77 : vector<8x256xf32>
    %79 = vector.extract_strided_slice %52 {offsets = [0, 256], sizes = [8, 128], strides = [1, 1]} : vector<8x384xf32> to vector<8x128xf32>
    %80 = vector.extract_strided_slice %78 {offsets = [0, 0], sizes = [8, 128], strides = [1, 1]} : vector<8x256xf32> to vector<8x128xf32>
    %81 = vector.extract_strided_slice %50 {offsets = [0, 256], sizes = [8, 128], strides = [1, 1]} : vector<8x384xf32> to vector<8x128xf32>
    %82 = arith.mulf %80, %81 : vector<8x128xf32>
    %83 = arith.addf %79, %82 : vector<8x128xf32>
    %84 = math.tanh %83 : vector<8x128xf32>
    %85 = vector.extract_strided_slice %78 {offsets = [0, 128], sizes = [8, 128], strides = [1, 1]} : vector<8x256xf32> to vector<8x128xf32>
    %86 = arith.subf %42, %84 : vector<8x128xf32>
    %87 = arith.mulf %85, %86 : vector<8x128xf32>
    %88 = arith.addf %84, %87 : vector<8x128xf32>
    %89 = arith.select %16, %70, %41 : vector<8x128xi1>, vector<8x128xf32>
    %90 = arith.select %30, %88, %42 : vector<8x128xi1>, vector<8x128xf32>
    %cst_36 = arith.constant 0.000000e+00 : f32
    %91 = vector.broadcast %cst_36 : f32 to vector<8x128xf32>
    %92 = arith.select %16, %89, %91 : vector<8x128xi1>, vector<8x128xf32>
    %c0_37 = arith.constant 0 : index
    %c0_38 = arith.constant 0 : index
    %93 = vector.load %arg16[%c0_37, %c0_38] : memref<64x128xf32, #tpu.memory_space<vmem>>, vector<8x128xf32>
    tpu.vector_store %arg16[%c0_37, %c0_38], %92 {strides = array<i32>} : memref<64x128xf32, #tpu.memory_space<vmem>>, vector<8x128xf32>,
    %cst_39 = arith.constant 0.000000e+00 : f32
    %94 = vector.broadcast %cst_39 : f32 to vector<8x128xf32>
    %95 = arith.select %30, %90, %94 : vector<8x128xi1>, vector<8x128xf32>
    %c56_40 = arith.constant 56 : index
    %c0_41 = arith.constant 0 : index
    %96 = vector.load %arg17[%c56_40, %c0_41] : memref<64x128xf32, #tpu.memory_space<vmem>>, vector<8x128xf32>
    tpu.vector_store %arg17[%c56_40, %c0_41], %95 {strides = array<i32>} : memref<64x128xf32, #tpu.memory_space<vmem>>, vector<8x128xf32>,
    %97 = tpu.concatenate %89, %90 in 1 : vector<8x128xf32>, vector<8x128xf32> -> vector<8x256xf32>
    %98 = arith.truncf %97 : vector<8x256xf32> to vector<8x256xbf16>
    %c0_42 = arith.constant 0 : index
    %c0_43 = arith.constant 0 : index
    %99 = vector.load %arg5[%c0_42, %c0_43] : memref<256x768xbf16, #tpu.memory_space<vmem>>, vector<256x768xbf16>
    %cst_44 = arith.constant dense<0.000000e+00> : vector<8x768xf32>
    %100 = tpu.matmul %98, %99, %cst_44 {dimension_numbers = #tpu.dot_dimension_numbers<[1], [0], [0], [1], [0, 0, 1, 1], [], []>} : vector<8x256xbf16>, vector<256x768xbf16>, vector<8x768xf32> -> vector<8x768xf32>
    %101 = vector.broadcast %40 : vector<1x768xf32> to vector<8x768xf32>
    %102 = arith.addf %100, %101 : vector<8x768xf32>
    %103 = vector.extract_strided_slice %102 {offsets = [0, 0], sizes = [8, 384], strides = [1, 1]} : vector<8x768xf32> to vector<8x384xf32>
    %104 = vector.extract_strided_slice %102 {offsets = [0, 384], sizes = [8, 384], strides = [1, 1]} : vector<8x768xf32> to vector<8x384xf32>
    %c8 = arith.constant 8 : index
    %c0_45 = arith.constant 0 : index
    %105 = vector.load %arg14[%c8, %c0_45] : memref<64x384xf32, #tpu.memory_space<vmem>>, vector<8x384xf32>
    %c48 = arith.constant 48 : index
    %c0_46 = arith.constant 0 : index
    %106 = vector.load %arg15[%c48, %c0_46] : memref<64x384xf32, #tpu.memory_space<vmem>>, vector<8x384xf32>
    %107 = vector.extract_strided_slice %105 {offsets = [0, 0], sizes = [8, 256], strides = [1, 1]} : vector<8x384xf32> to vector<8x256xf32>
    %108 = vector.extract_strided_slice %103 {offsets = [0, 0], sizes = [8, 256], strides = [1, 1]} : vector<8x384xf32> to vector<8x256xf32>
    %109 = arith.addf %107, %108 : vector<8x256xf32>
    %110 = arith.negf %109 : vector<8x256xf32>
    %111 = math.exp %110 : vector<8x256xf32>
    %cst_47 = arith.constant 1.000000e+00 : f32
    %112 = vector.broadcast %cst_47 : f32 to vector<8x256xf32>
    %113 = arith.addf %112, %111 : vector<8x256xf32>
    %114 = arith.divf %112, %113 : vector<8x256xf32>
    %115 = vector.extract_strided_slice %105 {offsets = [0, 256], sizes = [8, 128], strides = [1, 1]} : vector<8x384xf32> to vector<8x128xf32>
    %116 = vector.extract_strided_slice %114 {offsets = [0, 0], sizes = [8, 128], strides = [1, 1]} : vector<8x256xf32> to vector<8x128xf32>
    %117 = vector.extract_strided_slice %103 {offsets = [0, 256], sizes = [8, 128], strides = [1, 1]} : vector<8x384xf32> to vector<8x128xf32>
    %118 = arith.mulf %116, %117 : vector<8x128xf32>
    %119 = arith.addf %115, %118 : vector<8x128xf32>
    %120 = math.tanh %119 : vector<8x128xf32>
    %121 = vector.extract_strided_slice %114 {offsets = [0, 128], sizes = [8, 128], strides = [1, 1]} : vector<8x256xf32> to vector<8x128xf32>
    %122 = arith.subf %89, %120 : vector<8x128xf32>
    %123 = arith.mulf %121, %122 : vector<8x128xf32>
    %124 = arith.addf %120, %123 : vector<8x128xf32>
    %125 = vector.extract_strided_slice %106 {offsets = [0, 0], sizes = [8, 256], strides = [1, 1]} : vector<8x384xf32> to vector<8x256xf32>
    %126 = vector.extract_strided_slice %104 {offsets = [0, 0], sizes = [8, 256], strides = [1, 1]} : vector<8x384xf32> to vector<8x256xf32>
    %127 = arith.addf %125, %126 : vector<8x256xf32>
    %128 = arith.negf %127 : vector<8x256xf32>
    %129 = math.exp %128 : vector<8x256xf32>
    %cst_48 = arith.constant 1.000000e+00 : f32
    %130 = vector.broadcast %cst_48 : f32 to vector<8x256xf32>
    %131 = arith.addf %130, %129 : vector<8x256xf32>
    %132 = arith.divf %130, %131 : vector<8x256xf32>
    %133 = vector.extract_strided_slice %106 {offsets = [0, 256], sizes = [8, 128], strides = [1, 1]} : vector<8x384xf32> to vector<8x128xf32>
    %134 = vector.extract_strided_slice %132 {offsets = [0, 0], sizes = [8, 128], strides = [1, 1]} : vector<8x256xf32> to vector<8x128xf32>
    %135 = vector.extract_strided_slice %104 {offsets = [0, 256], sizes = [8, 128], strides = [1, 1]} : vector<8x384xf32> to vector<8x128xf32>
    %136 = arith.mulf %134, %135 : vector<8x128xf32>
    %137 = arith.addf %133, %136 : vector<8x128xf32>
    %138 = math.tanh %137 : vector<8x128xf32>
    %139 = vector.extract_strided_slice %132 {offsets = [0, 128], sizes = [8, 128], strides = [1, 1]} : vector<8x256xf32> to vector<8x128xf32>
    %140 = arith.subf %90, %138 : vector<8x128xf32>
    %141 = arith.mulf %139, %140 : vector<8x128xf32>
    %142 = arith.addf %138, %141 : vector<8x128xf32>
    %143 = arith.select %18, %124, %89 : vector<8x128xi1>, vector<8x128xf32>
    %144 = arith.select %28, %142, %90 : vector<8x128xi1>, vector<8x128xf32>
    %cst_49 = arith.constant 0.000000e+00 : f32
    %145 = vector.broadcast %cst_49 : f32 to vector<8x128xf32>
    %146 = arith.select %18, %143, %145 : vector<8x128xi1>, vector<8x128xf32>
    %c8_50 = arith.constant 8 : index
    %c0_51 = arith.constant 0 : index
    %147 = vector.load %arg16[%c8_50, %c0_51] : memref<64x128xf32, #tpu.memory_space<vmem>>, vector<8x128xf32>
    tpu.vector_store %arg16[%c8_50, %c0_51], %146 {strides = array<i32>} : memref<64x128xf32, #tpu.memory_space<vmem>>, vector<8x128xf32>,
    %cst_52 = arith.constant 0.000000e+00 : f32
    %148 = vector.broadcast %cst_52 : f32 to vector<8x128xf32>
    %149 = arith.select %28, %144, %148 : vector<8x128xi1>, vector<8x128xf32>
    %c48_53 = arith.constant 48 : index
    %c0_54 = arith.constant 0 : index
    %150 = vector.load %arg17[%c48_53, %c0_54] : memref<64x128xf32, #tpu.memory_space<vmem>>, vector<8x128xf32>
    tpu.vector_store %arg17[%c48_53, %c0_54], %149 {strides = array<i32>} : memref<64x128xf32, #tpu.memory_space<vmem>>, vector<8x128xf32>,
    %151 = tpu.concatenate %143, %144 in 1 : vector<8x128xf32>, vector<8x128xf32> -> vector<8x256xf32>
    %152 = arith.truncf %151 : vector<8x256xf32> to vector<8x256xbf16>
    %c0_55 = arith.constant 0 : index
    %c0_56 = arith.constant 0 : index
    %153 = vector.load %arg5[%c0_55, %c0_56] : memref<256x768xbf16, #tpu.memory_space<vmem>>, vector<256x768xbf16>
    %cst_57 = arith.constant dense<0.000000e+00> : vector<8x768xf32>
    %154 = tpu.matmul %152, %153, %cst_57 {dimension_numbers = #tpu.dot_dimension_numbers<[1], [0], [0], [1], [0, 0, 1, 1], [], []>} : vector<8x256xbf16>, vector<256x768xbf16>, vector<8x768xf32> -> vector<8x768xf32>
    %155 = vector.broadcast %40 : vector<1x768xf32> to vector<8x768xf32>
    %156 = arith.addf %154, %155 : vector<8x768xf32>
    %157 = vector.extract_strided_slice %156 {offsets = [0, 0], sizes = [8, 384], strides = [1, 1]} : vector<8x768xf32> to vector<8x384xf32>
    %158 = vector.extract_strided_slice %156 {offsets = [0, 384], sizes = [8, 384], strides = [1, 1]} : vector<8x768xf32> to vector<8x384xf32>
    %c16 = arith.constant 16 : index
    %c0_58 = arith.constant 0 : index
    %159 = vector.load %arg14[%c16, %c0_58] : memref<64x384xf32, #tpu.memory_space<vmem>>, vector<8x384xf32>
    %c40 = arith.constant 40 : index
    %c0_59 = arith.constant 0 : index
    %160 = vector.load %arg15[%c40, %c0_59] : memref<64x384xf32, #tpu.memory_space<vmem>>, vector<8x384xf32>
    %161 = vector.extract_strided_slice %159 {offsets = [0, 0], sizes = [8, 256], strides = [1, 1]} : vector<8x384xf32> to vector<8x256xf32>
    %162 = vector.extract_strided_slice %157 {offsets = [0, 0], sizes = [8, 256], strides = [1, 1]} : vector<8x384xf32> to vector<8x256xf32>
    %163 = arith.addf %161, %162 : vector<8x256xf32>
    %164 = arith.negf %163 : vector<8x256xf32>
    %165 = math.exp %164 : vector<8x256xf32>
    %cst_60 = arith.constant 1.000000e+00 : f32
    %166 = vector.broadcast %cst_60 : f32 to vector<8x256xf32>
    %167 = arith.addf %166, %165 : vector<8x256xf32>
    %168 = arith.divf %166, %167 : vector<8x256xf32>
    %169 = vector.extract_strided_slice %159 {offsets = [0, 256], sizes = [8, 128], strides = [1, 1]} : vector<8x384xf32> to vector<8x128xf32>
    %170 = vector.extract_strided_slice %168 {offsets = [0, 0], sizes = [8, 128], strides = [1, 1]} : vector<8x256xf32> to vector<8x128xf32>
    %171 = vector.extract_strided_slice %157 {offsets = [0, 256], sizes = [8, 128], strides = [1, 1]} : vector<8x384xf32> to vector<8x128xf32>
    %172 = arith.mulf %170, %171 : vector<8x128xf32>
    %173 = arith.addf %169, %172 : vector<8x128xf32>
    %174 = math.tanh %173 : vector<8x128xf32>
    %175 = vector.extract_strided_slice %168 {offsets = [0, 128], sizes = [8, 128], strides = [1, 1]} : vector<8x256xf32> to vector<8x128xf32>
    %176 = arith.subf %143, %174 : vector<8x128xf32>
    %177 = arith.mulf %175, %176 : vector<8x128xf32>
    %178 = arith.addf %174, %177 : vector<8x128xf32>
    %179 = vector.extract_strided_slice %160 {offsets = [0, 0], sizes = [8, 256], strides = [1, 1]} : vector<8x384xf32> to vector<8x256xf32>
    %180 = vector.extract_strided_slice %158 {offsets = [0, 0], sizes = [8, 256], strides = [1, 1]} : vector<8x384xf32> to vector<8x256xf32>
    %181 = arith.addf %179, %180 : vector<8x256xf32>
    %182 = arith.negf %181 : vector<8x256xf32>
    %183 = math.exp %182 : vector<8x256xf32>
    %cst_61 = arith.constant 1.000000e+00 : f32
    %184 = vector.broadcast %cst_61 : f32 to vector<8x256xf32>
    %185 = arith.addf %184, %183 : vector<8x256xf32>
    %186 = arith.divf %184, %185 : vector<8x256xf32>
    %187 = vector.extract_strided_slice %160 {offsets = [0, 256], sizes = [8, 128], strides = [1, 1]} : vector<8x384xf32> to vector<8x128xf32>
    %188 = vector.extract_strided_slice %186 {offsets = [0, 0], sizes = [8, 128], strides = [1, 1]} : vector<8x256xf32> to vector<8x128xf32>
    %189 = vector.extract_strided_slice %158 {offsets = [0, 256], sizes = [8, 128], strides = [1, 1]} : vector<8x384xf32> to vector<8x128xf32>
    %190 = arith.mulf %188, %189 : vector<8x128xf32>
    %191 = arith.addf %187, %190 : vector<8x128xf32>
    %192 = math.tanh %191 : vector<8x128xf32>
    %193 = vector.extract_strided_slice %186 {offsets = [0, 128], sizes = [8, 128], strides = [1, 1]} : vector<8x256xf32> to vector<8x128xf32>
    %194 = arith.subf %144, %192 : vector<8x128xf32>
    %195 = arith.mulf %193, %194 : vector<8x128xf32>
    %196 = arith.addf %192, %195 : vector<8x128xf32>
    %197 = arith.select %20, %178, %143 : vector<8x128xi1>, vector<8x128xf32>
    %198 = arith.select %26, %196, %144 : vector<8x128xi1>, vector<8x128xf32>
    %cst_62 = arith.constant 0.000000e+00 : f32
    %199 = vector.broadcast %cst_62 : f32 to vector<8x128xf32>
    %200 = arith.select %20, %197, %199 : vector<8x128xi1>, vector<8x128xf32>
    %c16_63 = arith.constant 16 : index
    %c0_64 = arith.constant 0 : index
    %201 = vector.load %arg16[%c16_63, %c0_64] : memref<64x128xf32, #tpu.memory_space<vmem>>, vector<8x128xf32>
    tpu.vector_store %arg16[%c16_63, %c0_64], %200 {strides = array<i32>} : memref<64x128xf32, #tpu.memory_space<vmem>>, vector<8x128xf32>,
    %cst_65 = arith.constant 0.000000e+00 : f32
    %202 = vector.broadcast %cst_65 : f32 to vector<8x128xf32>
    %203 = arith.select %26, %198, %202 : vector<8x128xi1>, vector<8x128xf32>
    %c40_66 = arith.constant 40 : index
    %c0_67 = arith.constant 0 : index
    %204 = vector.load %arg17[%c40_66, %c0_67] : memref<64x128xf32, #tpu.memory_space<vmem>>, vector<8x128xf32>
    tpu.vector_store %arg17[%c40_66, %c0_67], %203 {strides = array<i32>} : memref<64x128xf32, #tpu.memory_space<vmem>>, vector<8x128xf32>,
    %205 = tpu.concatenate %197, %198 in 1 : vector<8x128xf32>, vector<8x128xf32> -> vector<8x256xf32>
    %206 = arith.truncf %205 : vector<8x256xf32> to vector<8x256xbf16>
    %c0_68 = arith.constant 0 : index
    %c0_69 = arith.constant 0 : index
    %207 = vector.load %arg5[%c0_68, %c0_69] : memref<256x768xbf16, #tpu.memory_space<vmem>>, vector<256x768xbf16>
    %cst_70 = arith.constant dense<0.000000e+00> : vector<8x768xf32>
    %208 = tpu.matmul %206, %207, %cst_70 {dimension_numbers = #tpu.dot_dimension_numbers<[1], [0], [0], [1], [0, 0, 1, 1], [], []>} : vector<8x256xbf16>, vector<256x768xbf16>, vector<8x768xf32> -> vector<8x768xf32>
    %209 = vector.broadcast %40 : vector<1x768xf32> to vector<8x768xf32>
    %210 = arith.addf %208, %209 : vector<8x768xf32>
    %211 = vector.extract_strided_slice %210 {offsets = [0, 0], sizes = [8, 384], strides = [1, 1]} : vector<8x768xf32> to vector<8x384xf32>
    %212 = vector.extract_strided_slice %210 {offsets = [0, 384], sizes = [8, 384], strides = [1, 1]} : vector<8x768xf32> to vector<8x384xf32>
    %c24 = arith.constant 24 : index
    %c0_71 = arith.constant 0 : index
    %213 = vector.load %arg14[%c24, %c0_71] : memref<64x384xf32, #tpu.memory_space<vmem>>, vector<8x384xf32>
    %c32 = arith.constant 32 : index
    %c0_72 = arith.constant 0 : index
    %214 = vector.load %arg15[%c32, %c0_72] : memref<64x384xf32, #tpu.memory_space<vmem>>, vector<8x384xf32>
    %215 = vector.extract_strided_slice %213 {offsets = [0, 0], sizes = [8, 256], strides = [1, 1]} : vector<8x384xf32> to vector<8x256xf32>
    %216 = vector.extract_strided_slice %211 {offsets = [0, 0], sizes = [8, 256], strides = [1, 1]} : vector<8x384xf32> to vector<8x256xf32>
    %217 = arith.addf %215, %216 : vector<8x256xf32>
    %218 = arith.negf %217 : vector<8x256xf32>
    %219 = math.exp %218 : vector<8x256xf32>
    %cst_73 = arith.constant 1.000000e+00 : f32
    %220 = vector.broadcast %cst_73 : f32 to vector<8x256xf32>
    %221 = arith.addf %220, %219 : vector<8x256xf32>
    %222 = arith.divf %220, %221 : vector<8x256xf32>
    %223 = vector.extract_strided_slice %213 {offsets = [0, 256], sizes = [8, 128], strides = [1, 1]} : vector<8x384xf32> to vector<8x128xf32>
    %224 = vector.extract_strided_slice %222 {offsets = [0, 0], sizes = [8, 128], strides = [1, 1]} : vector<8x256xf32> to vector<8x128xf32>
    %225 = vector.extract_strided_slice %211 {offsets = [0, 256], sizes = [8, 128], strides = [1, 1]} : vector<8x384xf32> to vector<8x128xf32>
    %226 = arith.mulf %224, %225 : vector<8x128xf32>
    %227 = arith.addf %223, %226 : vector<8x128xf32>
    %228 = math.tanh %227 : vector<8x128xf32>
    %229 = vector.extract_strided_slice %222 {offsets = [0, 128], sizes = [8, 128], strides = [1, 1]} : vector<8x256xf32> to vector<8x128xf32>
    %230 = arith.subf %197, %228 : vector<8x128xf32>
    %231 = arith.mulf %229, %230 : vector<8x128xf32>
    %232 = arith.addf %228, %231 : vector<8x128xf32>
    %233 = vector.extract_strided_slice %214 {offsets = [0, 0], sizes = [8, 256], strides = [1, 1]} : vector<8x384xf32> to vector<8x256xf32>
    %234 = vector.extract_strided_slice %212 {offsets = [0, 0], sizes = [8, 256], strides = [1, 1]} : vector<8x384xf32> to vector<8x256xf32>
    %235 = arith.addf %233, %234 : vector<8x256xf32>
    %236 = arith.negf %235 : vector<8x256xf32>
    %237 = math.exp %236 : vector<8x256xf32>
    %cst_74 = arith.constant 1.000000e+00 : f32
    %238 = vector.broadcast %cst_74 : f32 to vector<8x256xf32>
    %239 = arith.addf %238, %237 : vector<8x256xf32>
    %240 = arith.divf %238, %239 : vector<8x256xf32>
    %241 = vector.extract_strided_slice %214 {offsets = [0, 256], sizes = [8, 128], strides = [1, 1]} : vector<8x384xf32> to vector<8x128xf32>
    %242 = vector.extract_strided_slice %240 {offsets = [0, 0], sizes = [8, 128], strides = [1, 1]} : vector<8x256xf32> to vector<8x128xf32>
    %243 = vector.extract_strided_slice %212 {offsets = [0, 256], sizes = [8, 128], strides = [1, 1]} : vector<8x384xf32> to vector<8x128xf32>
    %244 = arith.mulf %242, %243 : vector<8x128xf32>
    %245 = arith.addf %241, %244 : vector<8x128xf32>
    %246 = math.tanh %245 : vector<8x128xf32>
    %247 = vector.extract_strided_slice %240 {offsets = [0, 128], sizes = [8, 128], strides = [1, 1]} : vector<8x256xf32> to vector<8x128xf32>
    %248 = arith.subf %198, %246 : vector<8x128xf32>
    %249 = arith.mulf %247, %248 : vector<8x128xf32>
    %250 = arith.addf %246, %249 : vector<8x128xf32>
    %251 = arith.select %22, %232, %197 : vector<8x128xi1>, vector<8x128xf32>
    %252 = arith.select %24, %250, %198 : vector<8x128xi1>, vector<8x128xf32>
    %cst_75 = arith.constant 0.000000e+00 : f32
    %253 = vector.broadcast %cst_75 : f32 to vector<8x128xf32>
    %254 = arith.select %22, %251, %253 : vector<8x128xi1>, vector<8x128xf32>
    %c24_76 = arith.constant 24 : index
    %c0_77 = arith.constant 0 : index
    %255 = vector.load %arg16[%c24_76, %c0_77] : memref<64x128xf32, #tpu.memory_space<vmem>>, vector<8x128xf32>
    tpu.vector_store %arg16[%c24_76, %c0_77], %254 {strides = array<i32>} : memref<64x128xf32, #tpu.memory_space<vmem>>, vector<8x128xf32>,
    %cst_78 = arith.constant 0.000000e+00 : f32
    %256 = vector.broadcast %cst_78 : f32 to vector<8x128xf32>
    %257 = arith.select %24, %252, %256 : vector<8x128xi1>, vector<8x128xf32>
    %c32_79 = arith.constant 32 : index
    %c0_80 = arith.constant 0 : index
    %258 = vector.load %arg17[%c32_79, %c0_80] : memref<64x128xf32, #tpu.memory_space<vmem>>, vector<8x128xf32>
    tpu.vector_store %arg17[%c32_79, %c0_80], %257 {strides = array<i32>} : memref<64x128xf32, #tpu.memory_space<vmem>>, vector<8x128xf32>,
    %259 = tpu.concatenate %251, %252 in 1 : vector<8x128xf32>, vector<8x128xf32> -> vector<8x256xf32>
    %260 = arith.truncf %259 : vector<8x256xf32> to vector<8x256xbf16>
    %c0_81 = arith.constant 0 : index
    %c0_82 = arith.constant 0 : index
    %261 = vector.load %arg5[%c0_81, %c0_82] : memref<256x768xbf16, #tpu.memory_space<vmem>>, vector<256x768xbf16>
    %cst_83 = arith.constant dense<0.000000e+00> : vector<8x768xf32>
    %262 = tpu.matmul %260, %261, %cst_83 {dimension_numbers = #tpu.dot_dimension_numbers<[1], [0], [0], [1], [0, 0, 1, 1], [], []>} : vector<8x256xbf16>, vector<256x768xbf16>, vector<8x768xf32> -> vector<8x768xf32>
    %263 = vector.broadcast %40 : vector<1x768xf32> to vector<8x768xf32>
    %264 = arith.addf %262, %263 : vector<8x768xf32>
    %265 = vector.extract_strided_slice %264 {offsets = [0, 0], sizes = [8, 384], strides = [1, 1]} : vector<8x768xf32> to vector<8x384xf32>
    %266 = vector.extract_strided_slice %264 {offsets = [0, 384], sizes = [8, 384], strides = [1, 1]} : vector<8x768xf32> to vector<8x384xf32>
    %c32_84 = arith.constant 32 : index
    %c0_85 = arith.constant 0 : index
    %267 = vector.load %arg14[%c32_84, %c0_85] : memref<64x384xf32, #tpu.memory_space<vmem>>, vector<8x384xf32>
    %c24_86 = arith.constant 24 : index
    %c0_87 = arith.constant 0 : index
    %268 = vector.load %arg15[%c24_86, %c0_87] : memref<64x384xf32, #tpu.memory_space<vmem>>, vector<8x384xf32>
    %269 = vector.extract_strided_slice %267 {offsets = [0, 0], sizes = [8, 256], strides = [1, 1]} : vector<8x384xf32> to vector<8x256xf32>
    %270 = vector.extract_strided_slice %265 {offsets = [0, 0], sizes = [8, 256], strides = [1, 1]} : vector<8x384xf32> to vector<8x256xf32>
    %271 = arith.addf %269, %270 : vector<8x256xf32>
    %272 = arith.negf %271 : vector<8x256xf32>
    %273 = math.exp %272 : vector<8x256xf32>
    %cst_88 = arith.constant 1.000000e+00 : f32
    %274 = vector.broadcast %cst_88 : f32 to vector<8x256xf32>
    %275 = arith.addf %274, %273 : vector<8x256xf32>
    %276 = arith.divf %274, %275 : vector<8x256xf32>
    %277 = vector.extract_strided_slice %267 {offsets = [0, 256], sizes = [8, 128], strides = [1, 1]} : vector<8x384xf32> to vector<8x128xf32>
    %278 = vector.extract_strided_slice %276 {offsets = [0, 0], sizes = [8, 128], strides = [1, 1]} : vector<8x256xf32> to vector<8x128xf32>
    %279 = vector.extract_strided_slice %265 {offsets = [0, 256], sizes = [8, 128], strides = [1, 1]} : vector<8x384xf32> to vector<8x128xf32>
    %280 = arith.mulf %278, %279 : vector<8x128xf32>
    %281 = arith.addf %277, %280 : vector<8x128xf32>
    %282 = math.tanh %281 : vector<8x128xf32>
    %283 = vector.extract_strided_slice %276 {offsets = [0, 128], sizes = [8, 128], strides = [1, 1]} : vector<8x256xf32> to vector<8x128xf32>
    %284 = arith.subf %251, %282 : vector<8x128xf32>
    %285 = arith.mulf %283, %284 : vector<8x128xf32>
    %286 = arith.addf %282, %285 : vector<8x128xf32>
    %287 = vector.extract_strided_slice %268 {offsets = [0, 0], sizes = [8, 256], strides = [1, 1]} : vector<8x384xf32> to vector<8x256xf32>
    %288 = vector.extract_strided_slice %266 {offsets = [0, 0], sizes = [8, 256], strides = [1, 1]} : vector<8x384xf32> to vector<8x256xf32>
    %289 = arith.addf %287, %288 : vector<8x256xf32>
    %290 = arith.negf %289 : vector<8x256xf32>
    %291 = math.exp %290 : vector<8x256xf32>
    %cst_89 = arith.constant 1.000000e+00 : f32
    %292 = vector.broadcast %cst_89 : f32 to vector<8x256xf32>
    %293 = arith.addf %292, %291 : vector<8x256xf32>
    %294 = arith.divf %292, %293 : vector<8x256xf32>
    %295 = vector.extract_strided_slice %268 {offsets = [0, 256], sizes = [8, 128], strides = [1, 1]} : vector<8x384xf32> to vector<8x128xf32>
    %296 = vector.extract_strided_slice %294 {offsets = [0, 0], sizes = [8, 128], strides = [1, 1]} : vector<8x256xf32> to vector<8x128xf32>
    %297 = vector.extract_strided_slice %266 {offsets = [0, 256], sizes = [8, 128], strides = [1, 1]} : vector<8x384xf32> to vector<8x128xf32>
    %298 = arith.mulf %296, %297 : vector<8x128xf32>
    %299 = arith.addf %295, %298 : vector<8x128xf32>
    %300 = math.tanh %299 : vector<8x128xf32>
    %301 = vector.extract_strided_slice %294 {offsets = [0, 128], sizes = [8, 128], strides = [1, 1]} : vector<8x256xf32> to vector<8x128xf32>
    %302 = arith.subf %252, %300 : vector<8x128xf32>
    %303 = arith.mulf %301, %302 : vector<8x128xf32>
    %304 = arith.addf %300, %303 : vector<8x128xf32>
    %305 = arith.select %24, %286, %251 : vector<8x128xi1>, vector<8x128xf32>
    %306 = arith.select %22, %304, %252 : vector<8x128xi1>, vector<8x128xf32>
    %cst_90 = arith.constant 0.000000e+00 : f32
    %307 = vector.broadcast %cst_90 : f32 to vector<8x128xf32>
    %308 = arith.select %24, %305, %307 : vector<8x128xi1>, vector<8x128xf32>
    %c32_91 = arith.constant 32 : index
    %c0_92 = arith.constant 0 : index
    %309 = vector.load %arg16[%c32_91, %c0_92] : memref<64x128xf32, #tpu.memory_space<vmem>>, vector<8x128xf32>
    tpu.vector_store %arg16[%c32_91, %c0_92], %308 {strides = array<i32>} : memref<64x128xf32, #tpu.memory_space<vmem>>, vector<8x128xf32>,
    %cst_93 = arith.constant 0.000000e+00 : f32
    %310 = vector.broadcast %cst_93 : f32 to vector<8x128xf32>
    %311 = arith.select %22, %306, %310 : vector<8x128xi1>, vector<8x128xf32>
    %c24_94 = arith.constant 24 : index
    %c0_95 = arith.constant 0 : index
    %312 = vector.load %arg17[%c24_94, %c0_95] : memref<64x128xf32, #tpu.memory_space<vmem>>, vector<8x128xf32>
    tpu.vector_store %arg17[%c24_94, %c0_95], %311 {strides = array<i32>} : memref<64x128xf32, #tpu.memory_space<vmem>>, vector<8x128xf32>,
    %313 = tpu.concatenate %305, %306 in 1 : vector<8x128xf32>, vector<8x128xf32> -> vector<8x256xf32>
    %314 = arith.truncf %313 : vector<8x256xf32> to vector<8x256xbf16>
    %c0_96 = arith.constant 0 : index
    %c0_97 = arith.constant 0 : index
    %315 = vector.load %arg5[%c0_96, %c0_97] : memref<256x768xbf16, #tpu.memory_space<vmem>>, vector<256x768xbf16>
    %cst_98 = arith.constant dense<0.000000e+00> : vector<8x768xf32>
    %316 = tpu.matmul %314, %315, %cst_98 {dimension_numbers = #tpu.dot_dimension_numbers<[1], [0], [0], [1], [0, 0, 1, 1], [], []>} : vector<8x256xbf16>, vector<256x768xbf16>, vector<8x768xf32> -> vector<8x768xf32>
    %317 = vector.broadcast %40 : vector<1x768xf32> to vector<8x768xf32>
    %318 = arith.addf %316, %317 : vector<8x768xf32>
    %319 = vector.extract_strided_slice %318 {offsets = [0, 0], sizes = [8, 384], strides = [1, 1]} : vector<8x768xf32> to vector<8x384xf32>
    %320 = vector.extract_strided_slice %318 {offsets = [0, 384], sizes = [8, 384], strides = [1, 1]} : vector<8x768xf32> to vector<8x384xf32>
    %c40_99 = arith.constant 40 : index
    %c0_100 = arith.constant 0 : index
    %321 = vector.load %arg14[%c40_99, %c0_100] : memref<64x384xf32, #tpu.memory_space<vmem>>, vector<8x384xf32>
    %c16_101 = arith.constant 16 : index
    %c0_102 = arith.constant 0 : index
    %322 = vector.load %arg15[%c16_101, %c0_102] : memref<64x384xf32, #tpu.memory_space<vmem>>, vector<8x384xf32>
    %323 = vector.extract_strided_slice %321 {offsets = [0, 0], sizes = [8, 256], strides = [1, 1]} : vector<8x384xf32> to vector<8x256xf32>
    %324 = vector.extract_strided_slice %319 {offsets = [0, 0], sizes = [8, 256], strides = [1, 1]} : vector<8x384xf32> to vector<8x256xf32>
    %325 = arith.addf %323, %324 : vector<8x256xf32>
    %326 = arith.negf %325 : vector<8x256xf32>
    %327 = math.exp %326 : vector<8x256xf32>
    %cst_103 = arith.constant 1.000000e+00 : f32
    %328 = vector.broadcast %cst_103 : f32 to vector<8x256xf32>
    %329 = arith.addf %328, %327 : vector<8x256xf32>
    %330 = arith.divf %328, %329 : vector<8x256xf32>
    %331 = vector.extract_strided_slice %321 {offsets = [0, 256], sizes = [8, 128], strides = [1, 1]} : vector<8x384xf32> to vector<8x128xf32>
    %332 = vector.extract_strided_slice %330 {offsets = [0, 0], sizes = [8, 128], strides = [1, 1]} : vector<8x256xf32> to vector<8x128xf32>
    %333 = vector.extract_strided_slice %319 {offsets = [0, 256], sizes = [8, 128], strides = [1, 1]} : vector<8x384xf32> to vector<8x128xf32>
    %334 = arith.mulf %332, %333 : vector<8x128xf32>
    %335 = arith.addf %331, %334 : vector<8x128xf32>
    %336 = math.tanh %335 : vector<8x128xf32>
    %337 = vector.extract_strided_slice %330 {offsets = [0, 128], sizes = [8, 128], strides = [1, 1]} : vector<8x256xf32> to vector<8x128xf32>
    %338 = arith.subf %305, %336 : vector<8x128xf32>
    %339 = arith.mulf %337, %338 : vector<8x128xf32>
    %340 = arith.addf %336, %339 : vector<8x128xf32>
    %341 = vector.extract_strided_slice %322 {offsets = [0, 0], sizes = [8, 256], strides = [1, 1]} : vector<8x384xf32> to vector<8x256xf32>
    %342 = vector.extract_strided_slice %320 {offsets = [0, 0], sizes = [8, 256], strides = [1, 1]} : vector<8x384xf32> to vector<8x256xf32>
    %343 = arith.addf %341, %342 : vector<8x256xf32>
    %344 = arith.negf %343 : vector<8x256xf32>
    %345 = math.exp %344 : vector<8x256xf32>
    %cst_104 = arith.constant 1.000000e+00 : f32
    %346 = vector.broadcast %cst_104 : f32 to vector<8x256xf32>
    %347 = arith.addf %346, %345 : vector<8x256xf32>
    %348 = arith.divf %346, %347 : vector<8x256xf32>
    %349 = vector.extract_strided_slice %322 {offsets = [0, 256], sizes = [8, 128], strides = [1, 1]} : vector<8x384xf32> to vector<8x128xf32>
    %350 = vector.extract_strided_slice %348 {offsets = [0, 0], sizes = [8, 128], strides = [1, 1]} : vector<8x256xf32> to vector<8x128xf32>
    %351 = vector.extract_strided_slice %320 {offsets = [0, 256], sizes = [8, 128], strides = [1, 1]} : vector<8x384xf32> to vector<8x128xf32>
    %352 = arith.mulf %350, %351 : vector<8x128xf32>
    %353 = arith.addf %349, %352 : vector<8x128xf32>
    %354 = math.tanh %353 : vector<8x128xf32>
    %355 = vector.extract_strided_slice %348 {offsets = [0, 128], sizes = [8, 128], strides = [1, 1]} : vector<8x256xf32> to vector<8x128xf32>
    %356 = arith.subf %306, %354 : vector<8x128xf32>
    %357 = arith.mulf %355, %356 : vector<8x128xf32>
    %358 = arith.addf %354, %357 : vector<8x128xf32>
    %359 = arith.select %26, %340, %305 : vector<8x128xi1>, vector<8x128xf32>
    %360 = arith.select %20, %358, %306 : vector<8x128xi1>, vector<8x128xf32>
    %cst_105 = arith.constant 0.000000e+00 : f32
    %361 = vector.broadcast %cst_105 : f32 to vector<8x128xf32>
    %362 = arith.select %26, %359, %361 : vector<8x128xi1>, vector<8x128xf32>
    %c40_106 = arith.constant 40 : index
    %c0_107 = arith.constant 0 : index
    %363 = vector.load %arg16[%c40_106, %c0_107] : memref<64x128xf32, #tpu.memory_space<vmem>>, vector<8x128xf32>
    tpu.vector_store %arg16[%c40_106, %c0_107], %362 {strides = array<i32>} : memref<64x128xf32, #tpu.memory_space<vmem>>, vector<8x128xf32>,
    %cst_108 = arith.constant 0.000000e+00 : f32
    %364 = vector.broadcast %cst_108 : f32 to vector<8x128xf32>
    %365 = arith.select %20, %360, %364 : vector<8x128xi1>, vector<8x128xf32>
    %c16_109 = arith.constant 16 : index
    %c0_110 = arith.constant 0 : index
    %366 = vector.load %arg17[%c16_109, %c0_110] : memref<64x128xf32, #tpu.memory_space<vmem>>, vector<8x128xf32>
    tpu.vector_store %arg17[%c16_109, %c0_110], %365 {strides = array<i32>} : memref<64x128xf32, #tpu.memory_space<vmem>>, vector<8x128xf32>,
    %367 = tpu.concatenate %359, %360 in 1 : vector<8x128xf32>, vector<8x128xf32> -> vector<8x256xf32>
    %368 = arith.truncf %367 : vector<8x256xf32> to vector<8x256xbf16>
    %c0_111 = arith.constant 0 : index
    %c0_112 = arith.constant 0 : index
    %369 = vector.load %arg5[%c0_111, %c0_112] : memref<256x768xbf16, #tpu.memory_space<vmem>>, vector<256x768xbf16>
    %cst_113 = arith.constant dense<0.000000e+00> : vector<8x768xf32>
    %370 = tpu.matmul %368, %369, %cst_113 {dimension_numbers = #tpu.dot_dimension_numbers<[1], [0], [0], [1], [0, 0, 1, 1], [], []>} : vector<8x256xbf16>, vector<256x768xbf16>, vector<8x768xf32> -> vector<8x768xf32>
    %371 = vector.broadcast %40 : vector<1x768xf32> to vector<8x768xf32>
    %372 = arith.addf %370, %371 : vector<8x768xf32>
    %373 = vector.extract_strided_slice %372 {offsets = [0, 0], sizes = [8, 384], strides = [1, 1]} : vector<8x768xf32> to vector<8x384xf32>
    %374 = vector.extract_strided_slice %372 {offsets = [0, 384], sizes = [8, 384], strides = [1, 1]} : vector<8x768xf32> to vector<8x384xf32>
    %c48_114 = arith.constant 48 : index
    %c0_115 = arith.constant 0 : index
    %375 = vector.load %arg14[%c48_114, %c0_115] : memref<64x384xf32, #tpu.memory_space<vmem>>, vector<8x384xf32>
    %c8_116 = arith.constant 8 : index
    %c0_117 = arith.constant 0 : index
    %376 = vector.load %arg15[%c8_116, %c0_117] : memref<64x384xf32, #tpu.memory_space<vmem>>, vector<8x384xf32>
    %377 = vector.extract_strided_slice %375 {offsets = [0, 0], sizes = [8, 256], strides = [1, 1]} : vector<8x384xf32> to vector<8x256xf32>
    %378 = vector.extract_strided_slice %373 {offsets = [0, 0], sizes = [8, 256], strides = [1, 1]} : vector<8x384xf32> to vector<8x256xf32>
    %379 = arith.addf %377, %378 : vector<8x256xf32>
    %380 = arith.negf %379 : vector<8x256xf32>
    %381 = math.exp %380 : vector<8x256xf32>
    %cst_118 = arith.constant 1.000000e+00 : f32
    %382 = vector.broadcast %cst_118 : f32 to vector<8x256xf32>
    %383 = arith.addf %382, %381 : vector<8x256xf32>
    %384 = arith.divf %382, %383 : vector<8x256xf32>
    %385 = vector.extract_strided_slice %375 {offsets = [0, 256], sizes = [8, 128], strides = [1, 1]} : vector<8x384xf32> to vector<8x128xf32>
    %386 = vector.extract_strided_slice %384 {offsets = [0, 0], sizes = [8, 128], strides = [1, 1]} : vector<8x256xf32> to vector<8x128xf32>
    %387 = vector.extract_strided_slice %373 {offsets = [0, 256], sizes = [8, 128], strides = [1, 1]} : vector<8x384xf32> to vector<8x128xf32>
    %388 = arith.mulf %386, %387 : vector<8x128xf32>
    %389 = arith.addf %385, %388 : vector<8x128xf32>
    %390 = math.tanh %389 : vector<8x128xf32>
    %391 = vector.extract_strided_slice %384 {offsets = [0, 128], sizes = [8, 128], strides = [1, 1]} : vector<8x256xf32> to vector<8x128xf32>
    %392 = arith.subf %359, %390 : vector<8x128xf32>
    %393 = arith.mulf %391, %392 : vector<8x128xf32>
    %394 = arith.addf %390, %393 : vector<8x128xf32>
    %395 = vector.extract_strided_slice %376 {offsets = [0, 0], sizes = [8, 256], strides = [1, 1]} : vector<8x384xf32> to vector<8x256xf32>
    %396 = vector.extract_strided_slice %374 {offsets = [0, 0], sizes = [8, 256], strides = [1, 1]} : vector<8x384xf32> to vector<8x256xf32>
    %397 = arith.addf %395, %396 : vector<8x256xf32>
    %398 = arith.negf %397 : vector<8x256xf32>
    %399 = math.exp %398 : vector<8x256xf32>
    %cst_119 = arith.constant 1.000000e+00 : f32
    %400 = vector.broadcast %cst_119 : f32 to vector<8x256xf32>
    %401 = arith.addf %400, %399 : vector<8x256xf32>
    %402 = arith.divf %400, %401 : vector<8x256xf32>
    %403 = vector.extract_strided_slice %376 {offsets = [0, 256], sizes = [8, 128], strides = [1, 1]} : vector<8x384xf32> to vector<8x128xf32>
    %404 = vector.extract_strided_slice %402 {offsets = [0, 0], sizes = [8, 128], strides = [1, 1]} : vector<8x256xf32> to vector<8x128xf32>
    %405 = vector.extract_strided_slice %374 {offsets = [0, 256], sizes = [8, 128], strides = [1, 1]} : vector<8x384xf32> to vector<8x128xf32>
    %406 = arith.mulf %404, %405 : vector<8x128xf32>
    %407 = arith.addf %403, %406 : vector<8x128xf32>
    %408 = math.tanh %407 : vector<8x128xf32>
    %409 = vector.extract_strided_slice %402 {offsets = [0, 128], sizes = [8, 128], strides = [1, 1]} : vector<8x256xf32> to vector<8x128xf32>
    %410 = arith.subf %360, %408 : vector<8x128xf32>
    %411 = arith.mulf %409, %410 : vector<8x128xf32>
    %412 = arith.addf %408, %411 : vector<8x128xf32>
    %413 = arith.select %28, %394, %359 : vector<8x128xi1>, vector<8x128xf32>
    %414 = arith.select %18, %412, %360 : vector<8x128xi1>, vector<8x128xf32>
    %cst_120 = arith.constant 0.000000e+00 : f32
    %415 = vector.broadcast %cst_120 : f32 to vector<8x128xf32>
    %416 = arith.select %28, %413, %415 : vector<8x128xi1>, vector<8x128xf32>
    %c48_121 = arith.constant 48 : index
    %c0_122 = arith.constant 0 : index
    %417 = vector.load %arg16[%c48_121, %c0_122] : memref<64x128xf32, #tpu.memory_space<vmem>>, vector<8x128xf32>
    tpu.vector_store %arg16[%c48_121, %c0_122], %416 {strides = array<i32>} : memref<64x128xf32, #tpu.memory_space<vmem>>, vector<8x128xf32>,
    %cst_123 = arith.constant 0.000000e+00 : f32
    %418 = vector.broadcast %cst_123 : f32 to vector<8x128xf32>
    %419 = arith.select %18, %414, %418 : vector<8x128xi1>, vector<8x128xf32>
    %c8_124 = arith.constant 8 : index
    %c0_125 = arith.constant 0 : index
    %420 = vector.load %arg17[%c8_124, %c0_125] : memref<64x128xf32, #tpu.memory_space<vmem>>, vector<8x128xf32>
    tpu.vector_store %arg17[%c8_124, %c0_125], %419 {strides = array<i32>} : memref<64x128xf32, #tpu.memory_space<vmem>>, vector<8x128xf32>,
    %421 = tpu.concatenate %413, %414 in 1 : vector<8x128xf32>, vector<8x128xf32> -> vector<8x256xf32>
    %422 = arith.truncf %421 : vector<8x256xf32> to vector<8x256xbf16>
    %c0_126 = arith.constant 0 : index
    %c0_127 = arith.constant 0 : index
    %423 = vector.load %arg5[%c0_126, %c0_127] : memref<256x768xbf16, #tpu.memory_space<vmem>>, vector<256x768xbf16>
    %cst_128 = arith.constant dense<0.000000e+00> : vector<8x768xf32>
    %424 = tpu.matmul %422, %423, %cst_128 {dimension_numbers = #tpu.dot_dimension_numbers<[1], [0], [0], [1], [0, 0, 1, 1], [], []>} : vector<8x256xbf16>, vector<256x768xbf16>, vector<8x768xf32> -> vector<8x768xf32>
    %425 = vector.broadcast %40 : vector<1x768xf32> to vector<8x768xf32>
    %426 = arith.addf %424, %425 : vector<8x768xf32>
    %427 = vector.extract_strided_slice %426 {offsets = [0, 0], sizes = [8, 384], strides = [1, 1]} : vector<8x768xf32> to vector<8x384xf32>
    %428 = vector.extract_strided_slice %426 {offsets = [0, 384], sizes = [8, 384], strides = [1, 1]} : vector<8x768xf32> to vector<8x384xf32>
    %c56_129 = arith.constant 56 : index
    %c0_130 = arith.constant 0 : index
    %429 = vector.load %arg14[%c56_129, %c0_130] : memref<64x384xf32, #tpu.memory_space<vmem>>, vector<8x384xf32>
    %c0_131 = arith.constant 0 : index
    %c0_132 = arith.constant 0 : index
    %430 = vector.load %arg15[%c0_131, %c0_132] : memref<64x384xf32, #tpu.memory_space<vmem>>, vector<8x384xf32>
    %431 = vector.extract_strided_slice %429 {offsets = [0, 0], sizes = [8, 256], strides = [1, 1]} : vector<8x384xf32> to vector<8x256xf32>
    %432 = vector.extract_strided_slice %427 {offsets = [0, 0], sizes = [8, 256], strides = [1, 1]} : vector<8x384xf32> to vector<8x256xf32>
    %433 = arith.addf %431, %432 : vector<8x256xf32>
    %434 = arith.negf %433 : vector<8x256xf32>
    %435 = math.exp %434 : vector<8x256xf32>
    %cst_133 = arith.constant 1.000000e+00 : f32
    %436 = vector.broadcast %cst_133 : f32 to vector<8x256xf32>
    %437 = arith.addf %436, %435 : vector<8x256xf32>
    %438 = arith.divf %436, %437 : vector<8x256xf32>
    %439 = vector.extract_strided_slice %429 {offsets = [0, 256], sizes = [8, 128], strides = [1, 1]} : vector<8x384xf32> to vector<8x128xf32>
    %440 = vector.extract_strided_slice %438 {offsets = [0, 0], sizes = [8, 128], strides = [1, 1]} : vector<8x256xf32> to vector<8x128xf32>
    %441 = vector.extract_strided_slice %427 {offsets = [0, 256], sizes = [8, 128], strides = [1, 1]} : vector<8x384xf32> to vector<8x128xf32>
    %442 = arith.mulf %440, %441 : vector<8x128xf32>
    %443 = arith.addf %439, %442 : vector<8x128xf32>
    %444 = math.tanh %443 : vector<8x128xf32>
    %445 = vector.extract_strided_slice %438 {offsets = [0, 128], sizes = [8, 128], strides = [1, 1]} : vector<8x256xf32> to vector<8x128xf32>
    %446 = arith.subf %413, %444 : vector<8x128xf32>
    %447 = arith.mulf %445, %446 : vector<8x128xf32>
    %448 = arith.addf %444, %447 : vector<8x128xf32>
    %449 = vector.extract_strided_slice %430 {offsets = [0, 0], sizes = [8, 256], strides = [1, 1]} : vector<8x384xf32> to vector<8x256xf32>
    %450 = vector.extract_strided_slice %428 {offsets = [0, 0], sizes = [8, 256], strides = [1, 1]} : vector<8x384xf32> to vector<8x256xf32>
    %451 = arith.addf %449, %450 : vector<8x256xf32>
    %452 = arith.negf %451 : vector<8x256xf32>
    %453 = math.exp %452 : vector<8x256xf32>
    %cst_134 = arith.constant 1.000000e+00 : f32
    %454 = vector.broadcast %cst_134 : f32 to vector<8x256xf32>
    %455 = arith.addf %454, %453 : vector<8x256xf32>
    %456 = arith.divf %454, %455 : vector<8x256xf32>
    %457 = vector.extract_strided_slice %430 {offsets = [0, 256], sizes = [8, 128], strides = [1, 1]} : vector<8x384xf32> to vector<8x128xf32>
    %458 = vector.extract_strided_slice %456 {offsets = [0, 0], sizes = [8, 128], strides = [1, 1]} : vector<8x256xf32> to vector<8x128xf32>
    %459 = vector.extract_strided_slice %428 {offsets = [0, 256], sizes = [8, 128], strides = [1, 1]} : vector<8x384xf32> to vector<8x128xf32>
    %460 = arith.mulf %458, %459 : vector<8x128xf32>
    %461 = arith.addf %457, %460 : vector<8x128xf32>
    %462 = math.tanh %461 : vector<8x128xf32>
    %463 = vector.extract_strided_slice %456 {offsets = [0, 128], sizes = [8, 128], strides = [1, 1]} : vector<8x256xf32> to vector<8x128xf32>
    %464 = arith.subf %414, %462 : vector<8x128xf32>
    %465 = arith.mulf %463, %464 : vector<8x128xf32>
    %466 = arith.addf %462, %465 : vector<8x128xf32>
    %467 = arith.select %30, %448, %413 : vector<8x128xi1>, vector<8x128xf32>
    %468 = arith.select %16, %466, %414 : vector<8x128xi1>, vector<8x128xf32>
    %cst_135 = arith.constant 0.000000e+00 : f32
    %469 = vector.broadcast %cst_135 : f32 to vector<8x128xf32>
    %470 = arith.select %30, %467, %469 : vector<8x128xi1>, vector<8x128xf32>
    %c56_136 = arith.constant 56 : index
    %c0_137 = arith.constant 0 : index
    %471 = vector.load %arg16[%c56_136, %c0_137] : memref<64x128xf32, #tpu.memory_space<vmem>>, vector<8x128xf32>
    tpu.vector_store %arg16[%c56_136, %c0_137], %470 {strides = array<i32>} : memref<64x128xf32, #tpu.memory_space<vmem>>, vector<8x128xf32>,
    %cst_138 = arith.constant 0.000000e+00 : f32
    %472 = vector.broadcast %cst_138 : f32 to vector<8x128xf32>
    %473 = arith.select %16, %468, %472 : vector<8x128xi1>, vector<8x128xf32>
    %c0_139 = arith.constant 0 : index
    %c0_140 = arith.constant 0 : index
    %474 = vector.load %arg17[%c0_139, %c0_140] : memref<64x128xf32, #tpu.memory_space<vmem>>, vector<8x128xf32>
    tpu.vector_store %arg17[%c0_139, %c0_140], %473 {strides = array<i32>} : memref<64x128xf32, #tpu.memory_space<vmem>>, vector<8x128xf32>,
    %c0_141 = arith.constant 0 : index
    %c0_142 = arith.constant 0 : index
    %475 = vector.load %arg16[%c0_141, %c0_142] : memref<64x128xf32, #tpu.memory_space<vmem>>, vector<64x128xf32>
    %c0_143 = arith.constant 0 : index
    %c0_144 = arith.constant 0 : index
    %476 = vector.load %arg17[%c0_143, %c0_144] : memref<64x128xf32, #tpu.memory_space<vmem>>, vector<64x128xf32>
    %477 = tpu.concatenate %475, %476 in 1 : vector<64x128xf32>, vector<64x128xf32> -> vector<64x256xf32>
    %478 = arith.truncf %477 : vector<64x256xf32> to vector<64x256xbf16>
    %c0_145 = arith.constant 0 : index
    %c0_146 = arith.constant 0 : index
    %479 = vector.load %arg7[%c0_145, %c0_146] : memref<256x768xbf16, #tpu.memory_space<vmem>>, vector<256x768xbf16>
    %cst_147 = arith.constant dense<0.000000e+00> : vector<64x768xf32>
    %480 = tpu.matmul %478, %479, %cst_147 {dimension_numbers = #tpu.dot_dimension_numbers<[1], [0], [0], [1], [0, 0, 1, 1], [], []>} : vector<64x256xbf16>, vector<256x768xbf16>, vector<64x768xf32> -> vector<64x768xf32>
    %c0_148 = arith.constant 0 : index
    %c0_149 = arith.constant 0 : index
    %481 = vector.load %arg8[%c0_148, %c0_149] : memref<1x768xf32, #tpu.memory_space<vmem>>, vector<1x768xf32>
    %482 = vector.broadcast %481 : vector<1x768xf32> to vector<64x768xf32>
    %483 = arith.addf %480, %482 : vector<64x768xf32>
    %484 = vector.extract_strided_slice %483 {offsets = [0, 0], sizes = [64, 384], strides = [1, 1]} : vector<64x768xf32> to vector<64x384xf32>
    %c0_150 = arith.constant 0 : index
    %c0_151 = arith.constant 0 : index
    %485 = vector.load %arg14[%c0_150, %c0_151] : memref<64x384xf32, #tpu.memory_space<vmem>>, vector<64x384xf32>
    tpu.vector_store %arg14[%c0_150, %c0_151], %484 {strides = array<i32>} : memref<64x384xf32, #tpu.memory_space<vmem>>, vector<64x384xf32>,
    %486 = vector.extract_strided_slice %483 {offsets = [0, 384], sizes = [64, 384], strides = [1, 1]} : vector<64x768xf32> to vector<64x384xf32>
    %c0_152 = arith.constant 0 : index
    %c0_153 = arith.constant 0 : index
    %487 = vector.load %arg15[%c0_152, %c0_153] : memref<64x384xf32, #tpu.memory_space<vmem>>, vector<64x384xf32>
    tpu.vector_store %arg15[%c0_152, %c0_153], %486 {strides = array<i32>} : memref<64x384xf32, #tpu.memory_space<vmem>>, vector<64x384xf32>,
    %c0_154 = arith.constant 0 : index
    %c0_155 = arith.constant 0 : index
    %488 = vector.load %arg10[%c0_154, %c0_155] : memref<1x768xf32, #tpu.memory_space<vmem>>, vector<1x768xf32>
    %cst_156 = arith.constant 0.000000e+00 : f32
    %489 = vector.broadcast %cst_156 : f32 to vector<8x128xf32>
    %cst_157 = arith.constant 0.000000e+00 : f32
    %490 = vector.broadcast %cst_157 : f32 to vector<8x128xf32>
    %491 = tpu.concatenate %489, %490 in 1 : vector<8x128xf32>, vector<8x128xf32> -> vector<8x256xf32>
    %492 = arith.truncf %491 : vector<8x256xf32> to vector<8x256xbf16>
    %c0_158 = arith.constant 0 : index
    %c0_159 = arith.constant 0 : index
    %493 = vector.load %arg9[%c0_158, %c0_159] : memref<256x768xbf16, #tpu.memory_space<vmem>>, vector<256x768xbf16>
    %cst_160 = arith.constant dense<0.000000e+00> : vector<8x768xf32>
    %494 = tpu.matmul %492, %493, %cst_160 {dimension_numbers = #tpu.dot_dimension_numbers<[1], [0], [0], [1], [0, 0, 1, 1], [], []>} : vector<8x256xbf16>, vector<256x768xbf16>, vector<8x768xf32> -> vector<8x768xf32>
    %495 = vector.broadcast %488 : vector<1x768xf32> to vector<8x768xf32>
    %496 = arith.addf %494, %495 : vector<8x768xf32>
    %497 = vector.extract_strided_slice %496 {offsets = [0, 0], sizes = [8, 384], strides = [1, 1]} : vector<8x768xf32> to vector<8x384xf32>
    %498 = vector.extract_strided_slice %496 {offsets = [0, 384], sizes = [8, 384], strides = [1, 1]} : vector<8x768xf32> to vector<8x384xf32>
    %c0_161 = arith.constant 0 : index
    %c0_162 = arith.constant 0 : index
    %499 = vector.load %arg14[%c0_161, %c0_162] : memref<64x384xf32, #tpu.memory_space<vmem>>, vector<8x384xf32>
    %c56_163 = arith.constant 56 : index
    %c0_164 = arith.constant 0 : index
    %500 = vector.load %arg15[%c56_163, %c0_164] : memref<64x384xf32, #tpu.memory_space<vmem>>, vector<8x384xf32>
    %501 = vector.extract_strided_slice %499 {offsets = [0, 0], sizes = [8, 256], strides = [1, 1]} : vector<8x384xf32> to vector<8x256xf32>
    %502 = vector.extract_strided_slice %497 {offsets = [0, 0], sizes = [8, 256], strides = [1, 1]} : vector<8x384xf32> to vector<8x256xf32>
    %503 = arith.addf %501, %502 : vector<8x256xf32>
    %504 = arith.negf %503 : vector<8x256xf32>
    %505 = math.exp %504 : vector<8x256xf32>
    %cst_165 = arith.constant 1.000000e+00 : f32
    %506 = vector.broadcast %cst_165 : f32 to vector<8x256xf32>
    %507 = arith.addf %506, %505 : vector<8x256xf32>
    %508 = arith.divf %506, %507 : vector<8x256xf32>
    %509 = vector.extract_strided_slice %499 {offsets = [0, 256], sizes = [8, 128], strides = [1, 1]} : vector<8x384xf32> to vector<8x128xf32>
    %510 = vector.extract_strided_slice %508 {offsets = [0, 0], sizes = [8, 128], strides = [1, 1]} : vector<8x256xf32> to vector<8x128xf32>
    %511 = vector.extract_strided_slice %497 {offsets = [0, 256], sizes = [8, 128], strides = [1, 1]} : vector<8x384xf32> to vector<8x128xf32>
    %512 = arith.mulf %510, %511 : vector<8x128xf32>
    %513 = arith.addf %509, %512 : vector<8x128xf32>
    %514 = math.tanh %513 : vector<8x128xf32>
    %515 = vector.extract_strided_slice %508 {offsets = [0, 128], sizes = [8, 128], strides = [1, 1]} : vector<8x256xf32> to vector<8x128xf32>
    %516 = arith.subf %489, %514 : vector<8x128xf32>
    %517 = arith.mulf %515, %516 : vector<8x128xf32>
    %518 = arith.addf %514, %517 : vector<8x128xf32>
    %519 = vector.extract_strided_slice %500 {offsets = [0, 0], sizes = [8, 256], strides = [1, 1]} : vector<8x384xf32> to vector<8x256xf32>
    %520 = vector.extract_strided_slice %498 {offsets = [0, 0], sizes = [8, 256], strides = [1, 1]} : vector<8x384xf32> to vector<8x256xf32>
    %521 = arith.addf %519, %520 : vector<8x256xf32>
    %522 = arith.negf %521 : vector<8x256xf32>
    %523 = math.exp %522 : vector<8x256xf32>
    %cst_166 = arith.constant 1.000000e+00 : f32
    %524 = vector.broadcast %cst_166 : f32 to vector<8x256xf32>
    %525 = arith.addf %524, %523 : vector<8x256xf32>
    %526 = arith.divf %524, %525 : vector<8x256xf32>
    %527 = vector.extract_strided_slice %500 {offsets = [0, 256], sizes = [8, 128], strides = [1, 1]} : vector<8x384xf32> to vector<8x128xf32>
    %528 = vector.extract_strided_slice %526 {offsets = [0, 0], sizes = [8, 128], strides = [1, 1]} : vector<8x256xf32> to vector<8x128xf32>
    %529 = vector.extract_strided_slice %498 {offsets = [0, 256], sizes = [8, 128], strides = [1, 1]} : vector<8x384xf32> to vector<8x128xf32>
    %530 = arith.mulf %528, %529 : vector<8x128xf32>
    %531 = arith.addf %527, %530 : vector<8x128xf32>
    %532 = math.tanh %531 : vector<8x128xf32>
    %533 = vector.extract_strided_slice %526 {offsets = [0, 128], sizes = [8, 128], strides = [1, 1]} : vector<8x256xf32> to vector<8x128xf32>
    %534 = arith.subf %490, %532 : vector<8x128xf32>
    %535 = arith.mulf %533, %534 : vector<8x128xf32>
    %536 = arith.addf %532, %535 : vector<8x128xf32>
    %537 = arith.select %16, %518, %489 : vector<8x128xi1>, vector<8x128xf32>
    %538 = arith.select %30, %536, %490 : vector<8x128xi1>, vector<8x128xf32>
    %539 = tpu.concatenate %537, %538 in 1 : vector<8x128xf32>, vector<8x128xf32> -> vector<8x256xf32>
    %540 = arith.truncf %539 : vector<8x256xf32> to vector<8x256xbf16>
    %c0_167 = arith.constant 0 : index
    %c0_168 = arith.constant 0 : index
    %541 = vector.load %arg9[%c0_167, %c0_168] : memref<256x768xbf16, #tpu.memory_space<vmem>>, vector<256x768xbf16>
    %cst_169 = arith.constant dense<0.000000e+00> : vector<8x768xf32>
    %542 = tpu.matmul %540, %541, %cst_169 {dimension_numbers = #tpu.dot_dimension_numbers<[1], [0], [0], [1], [0, 0, 1, 1], [], []>} : vector<8x256xbf16>, vector<256x768xbf16>, vector<8x768xf32> -> vector<8x768xf32>
    %543 = vector.broadcast %488 : vector<1x768xf32> to vector<8x768xf32>
    %544 = arith.addf %542, %543 : vector<8x768xf32>
    %545 = vector.extract_strided_slice %544 {offsets = [0, 0], sizes = [8, 384], strides = [1, 1]} : vector<8x768xf32> to vector<8x384xf32>
    %546 = vector.extract_strided_slice %544 {offsets = [0, 384], sizes = [8, 384], strides = [1, 1]} : vector<8x768xf32> to vector<8x384xf32>
    %c8_170 = arith.constant 8 : index
    %c0_171 = arith.constant 0 : index
    %547 = vector.load %arg14[%c8_170, %c0_171] : memref<64x384xf32, #tpu.memory_space<vmem>>, vector<8x384xf32>
    %c48_172 = arith.constant 48 : index
    %c0_173 = arith.constant 0 : index
    %548 = vector.load %arg15[%c48_172, %c0_173] : memref<64x384xf32, #tpu.memory_space<vmem>>, vector<8x384xf32>
    %549 = vector.extract_strided_slice %547 {offsets = [0, 0], sizes = [8, 256], strides = [1, 1]} : vector<8x384xf32> to vector<8x256xf32>
    %550 = vector.extract_strided_slice %545 {offsets = [0, 0], sizes = [8, 256], strides = [1, 1]} : vector<8x384xf32> to vector<8x256xf32>
    %551 = arith.addf %549, %550 : vector<8x256xf32>
    %552 = arith.negf %551 : vector<8x256xf32>
    %553 = math.exp %552 : vector<8x256xf32>
    %cst_174 = arith.constant 1.000000e+00 : f32
    %554 = vector.broadcast %cst_174 : f32 to vector<8x256xf32>
    %555 = arith.addf %554, %553 : vector<8x256xf32>
    %556 = arith.divf %554, %555 : vector<8x256xf32>
    %557 = vector.extract_strided_slice %547 {offsets = [0, 256], sizes = [8, 128], strides = [1, 1]} : vector<8x384xf32> to vector<8x128xf32>
    %558 = vector.extract_strided_slice %556 {offsets = [0, 0], sizes = [8, 128], strides = [1, 1]} : vector<8x256xf32> to vector<8x128xf32>
    %559 = vector.extract_strided_slice %545 {offsets = [0, 256], sizes = [8, 128], strides = [1, 1]} : vector<8x384xf32> to vector<8x128xf32>
    %560 = arith.mulf %558, %559 : vector<8x128xf32>
    %561 = arith.addf %557, %560 : vector<8x128xf32>
    %562 = math.tanh %561 : vector<8x128xf32>
    %563 = vector.extract_strided_slice %556 {offsets = [0, 128], sizes = [8, 128], strides = [1, 1]} : vector<8x256xf32> to vector<8x128xf32>
    %564 = arith.subf %537, %562 : vector<8x128xf32>
    %565 = arith.mulf %563, %564 : vector<8x128xf32>
    %566 = arith.addf %562, %565 : vector<8x128xf32>
    %567 = vector.extract_strided_slice %548 {offsets = [0, 0], sizes = [8, 256], strides = [1, 1]} : vector<8x384xf32> to vector<8x256xf32>
    %568 = vector.extract_strided_slice %546 {offsets = [0, 0], sizes = [8, 256], strides = [1, 1]} : vector<8x384xf32> to vector<8x256xf32>
    %569 = arith.addf %567, %568 : vector<8x256xf32>
    %570 = arith.negf %569 : vector<8x256xf32>
    %571 = math.exp %570 : vector<8x256xf32>
    %cst_175 = arith.constant 1.000000e+00 : f32
    %572 = vector.broadcast %cst_175 : f32 to vector<8x256xf32>
    %573 = arith.addf %572, %571 : vector<8x256xf32>
    %574 = arith.divf %572, %573 : vector<8x256xf32>
    %575 = vector.extract_strided_slice %548 {offsets = [0, 256], sizes = [8, 128], strides = [1, 1]} : vector<8x384xf32> to vector<8x128xf32>
    %576 = vector.extract_strided_slice %574 {offsets = [0, 0], sizes = [8, 128], strides = [1, 1]} : vector<8x256xf32> to vector<8x128xf32>
    %577 = vector.extract_strided_slice %546 {offsets = [0, 256], sizes = [8, 128], strides = [1, 1]} : vector<8x384xf32> to vector<8x128xf32>
    %578 = arith.mulf %576, %577 : vector<8x128xf32>
    %579 = arith.addf %575, %578 : vector<8x128xf32>
    %580 = math.tanh %579 : vector<8x128xf32>
    %581 = vector.extract_strided_slice %574 {offsets = [0, 128], sizes = [8, 128], strides = [1, 1]} : vector<8x256xf32> to vector<8x128xf32>
    %582 = arith.subf %538, %580 : vector<8x128xf32>
    %583 = arith.mulf %581, %582 : vector<8x128xf32>
    %584 = arith.addf %580, %583 : vector<8x128xf32>
    %585 = arith.select %18, %566, %537 : vector<8x128xi1>, vector<8x128xf32>
    %586 = arith.select %28, %584, %538 : vector<8x128xi1>, vector<8x128xf32>
    %587 = tpu.concatenate %585, %586 in 1 : vector<8x128xf32>, vector<8x128xf32> -> vector<8x256xf32>
    %588 = arith.truncf %587 : vector<8x256xf32> to vector<8x256xbf16>
    %c0_176 = arith.constant 0 : index
    %c0_177 = arith.constant 0 : index
    %589 = vector.load %arg9[%c0_176, %c0_177] : memref<256x768xbf16, #tpu.memory_space<vmem>>, vector<256x768xbf16>
    %cst_178 = arith.constant dense<0.000000e+00> : vector<8x768xf32>
    %590 = tpu.matmul %588, %589, %cst_178 {dimension_numbers = #tpu.dot_dimension_numbers<[1], [0], [0], [1], [0, 0, 1, 1], [], []>} : vector<8x256xbf16>, vector<256x768xbf16>, vector<8x768xf32> -> vector<8x768xf32>
    %591 = vector.broadcast %488 : vector<1x768xf32> to vector<8x768xf32>
    %592 = arith.addf %590, %591 : vector<8x768xf32>
    %593 = vector.extract_strided_slice %592 {offsets = [0, 0], sizes = [8, 384], strides = [1, 1]} : vector<8x768xf32> to vector<8x384xf32>
    %594 = vector.extract_strided_slice %592 {offsets = [0, 384], sizes = [8, 384], strides = [1, 1]} : vector<8x768xf32> to vector<8x384xf32>
    %c16_179 = arith.constant 16 : index
    %c0_180 = arith.constant 0 : index
    %595 = vector.load %arg14[%c16_179, %c0_180] : memref<64x384xf32, #tpu.memory_space<vmem>>, vector<8x384xf32>
    %c40_181 = arith.constant 40 : index
    %c0_182 = arith.constant 0 : index
    %596 = vector.load %arg15[%c40_181, %c0_182] : memref<64x384xf32, #tpu.memory_space<vmem>>, vector<8x384xf32>
    %597 = vector.extract_strided_slice %595 {offsets = [0, 0], sizes = [8, 256], strides = [1, 1]} : vector<8x384xf32> to vector<8x256xf32>
    %598 = vector.extract_strided_slice %593 {offsets = [0, 0], sizes = [8, 256], strides = [1, 1]} : vector<8x384xf32> to vector<8x256xf32>
    %599 = arith.addf %597, %598 : vector<8x256xf32>
    %600 = arith.negf %599 : vector<8x256xf32>
    %601 = math.exp %600 : vector<8x256xf32>
    %cst_183 = arith.constant 1.000000e+00 : f32
    %602 = vector.broadcast %cst_183 : f32 to vector<8x256xf32>
    %603 = arith.addf %602, %601 : vector<8x256xf32>
    %604 = arith.divf %602, %603 : vector<8x256xf32>
    %605 = vector.extract_strided_slice %595 {offsets = [0, 256], sizes = [8, 128], strides = [1, 1]} : vector<8x384xf32> to vector<8x128xf32>
    %606 = vector.extract_strided_slice %604 {offsets = [0, 0], sizes = [8, 128], strides = [1, 1]} : vector<8x256xf32> to vector<8x128xf32>
    %607 = vector.extract_strided_slice %593 {offsets = [0, 256], sizes = [8, 128], strides = [1, 1]} : vector<8x384xf32> to vector<8x128xf32>
    %608 = arith.mulf %606, %607 : vector<8x128xf32>
    %609 = arith.addf %605, %608 : vector<8x128xf32>
    %610 = math.tanh %609 : vector<8x128xf32>
    %611 = vector.extract_strided_slice %604 {offsets = [0, 128], sizes = [8, 128], strides = [1, 1]} : vector<8x256xf32> to vector<8x128xf32>
    %612 = arith.subf %585, %610 : vector<8x128xf32>
    %613 = arith.mulf %611, %612 : vector<8x128xf32>
    %614 = arith.addf %610, %613 : vector<8x128xf32>
    %615 = vector.extract_strided_slice %596 {offsets = [0, 0], sizes = [8, 256], strides = [1, 1]} : vector<8x384xf32> to vector<8x256xf32>
    %616 = vector.extract_strided_slice %594 {offsets = [0, 0], sizes = [8, 256], strides = [1, 1]} : vector<8x384xf32> to vector<8x256xf32>
    %617 = arith.addf %615, %616 : vector<8x256xf32>
    %618 = arith.negf %617 : vector<8x256xf32>
    %619 = math.exp %618 : vector<8x256xf32>
    %cst_184 = arith.constant 1.000000e+00 : f32
    %620 = vector.broadcast %cst_184 : f32 to vector<8x256xf32>
    %621 = arith.addf %620, %619 : vector<8x256xf32>
    %622 = arith.divf %620, %621 : vector<8x256xf32>
    %623 = vector.extract_strided_slice %596 {offsets = [0, 256], sizes = [8, 128], strides = [1, 1]} : vector<8x384xf32> to vector<8x128xf32>
    %624 = vector.extract_strided_slice %622 {offsets = [0, 0], sizes = [8, 128], strides = [1, 1]} : vector<8x256xf32> to vector<8x128xf32>
    %625 = vector.extract_strided_slice %594 {offsets = [0, 256], sizes = [8, 128], strides = [1, 1]} : vector<8x384xf32> to vector<8x128xf32>
    %626 = arith.mulf %624, %625 : vector<8x128xf32>
    %627 = arith.addf %623, %626 : vector<8x128xf32>
    %628 = math.tanh %627 : vector<8x128xf32>
    %629 = vector.extract_strided_slice %622 {offsets = [0, 128], sizes = [8, 128], strides = [1, 1]} : vector<8x256xf32> to vector<8x128xf32>
    %630 = arith.subf %586, %628 : vector<8x128xf32>
    %631 = arith.mulf %629, %630 : vector<8x128xf32>
    %632 = arith.addf %628, %631 : vector<8x128xf32>
    %633 = arith.select %20, %614, %585 : vector<8x128xi1>, vector<8x128xf32>
    %634 = arith.select %26, %632, %586 : vector<8x128xi1>, vector<8x128xf32>
    %635 = tpu.concatenate %633, %634 in 1 : vector<8x128xf32>, vector<8x128xf32> -> vector<8x256xf32>
    %636 = arith.truncf %635 : vector<8x256xf32> to vector<8x256xbf16>
    %c0_185 = arith.constant 0 : index
    %c0_186 = arith.constant 0 : index
    %637 = vector.load %arg9[%c0_185, %c0_186] : memref<256x768xbf16, #tpu.memory_space<vmem>>, vector<256x768xbf16>
    %cst_187 = arith.constant dense<0.000000e+00> : vector<8x768xf32>
    %638 = tpu.matmul %636, %637, %cst_187 {dimension_numbers = #tpu.dot_dimension_numbers<[1], [0], [0], [1], [0, 0, 1, 1], [], []>} : vector<8x256xbf16>, vector<256x768xbf16>, vector<8x768xf32> -> vector<8x768xf32>
    %639 = vector.broadcast %488 : vector<1x768xf32> to vector<8x768xf32>
    %640 = arith.addf %638, %639 : vector<8x768xf32>
    %641 = vector.extract_strided_slice %640 {offsets = [0, 0], sizes = [8, 384], strides = [1, 1]} : vector<8x768xf32> to vector<8x384xf32>
    %642 = vector.extract_strided_slice %640 {offsets = [0, 384], sizes = [8, 384], strides = [1, 1]} : vector<8x768xf32> to vector<8x384xf32>
    %c24_188 = arith.constant 24 : index
    %c0_189 = arith.constant 0 : index
    %643 = vector.load %arg14[%c24_188, %c0_189] : memref<64x384xf32, #tpu.memory_space<vmem>>, vector<8x384xf32>
    %c32_190 = arith.constant 32 : index
    %c0_191 = arith.constant 0 : index
    %644 = vector.load %arg15[%c32_190, %c0_191] : memref<64x384xf32, #tpu.memory_space<vmem>>, vector<8x384xf32>
    %645 = vector.extract_strided_slice %643 {offsets = [0, 0], sizes = [8, 256], strides = [1, 1]} : vector<8x384xf32> to vector<8x256xf32>
    %646 = vector.extract_strided_slice %641 {offsets = [0, 0], sizes = [8, 256], strides = [1, 1]} : vector<8x384xf32> to vector<8x256xf32>
    %647 = arith.addf %645, %646 : vector<8x256xf32>
    %648 = arith.negf %647 : vector<8x256xf32>
    %649 = math.exp %648 : vector<8x256xf32>
    %cst_192 = arith.constant 1.000000e+00 : f32
    %650 = vector.broadcast %cst_192 : f32 to vector<8x256xf32>
    %651 = arith.addf %650, %649 : vector<8x256xf32>
    %652 = arith.divf %650, %651 : vector<8x256xf32>
    %653 = vector.extract_strided_slice %643 {offsets = [0, 256], sizes = [8, 128], strides = [1, 1]} : vector<8x384xf32> to vector<8x128xf32>
    %654 = vector.extract_strided_slice %652 {offsets = [0, 0], sizes = [8, 128], strides = [1, 1]} : vector<8x256xf32> to vector<8x128xf32>
    %655 = vector.extract_strided_slice %641 {offsets = [0, 256], sizes = [8, 128], strides = [1, 1]} : vector<8x384xf32> to vector<8x128xf32>
    %656 = arith.mulf %654, %655 : vector<8x128xf32>
    %657 = arith.addf %653, %656 : vector<8x128xf32>
    %658 = math.tanh %657 : vector<8x128xf32>
    %659 = vector.extract_strided_slice %652 {offsets = [0, 128], sizes = [8, 128], strides = [1, 1]} : vector<8x256xf32> to vector<8x128xf32>
    %660 = arith.subf %633, %658 : vector<8x128xf32>
    %661 = arith.mulf %659, %660 : vector<8x128xf32>
    %662 = arith.addf %658, %661 : vector<8x128xf32>
    %663 = vector.extract_strided_slice %644 {offsets = [0, 0], sizes = [8, 256], strides = [1, 1]} : vector<8x384xf32> to vector<8x256xf32>
    %664 = vector.extract_strided_slice %642 {offsets = [0, 0], sizes = [8, 256], strides = [1, 1]} : vector<8x384xf32> to vector<8x256xf32>
    %665 = arith.addf %663, %664 : vector<8x256xf32>
    %666 = arith.negf %665 : vector<8x256xf32>
    %667 = math.exp %666 : vector<8x256xf32>
    %cst_193 = arith.constant 1.000000e+00 : f32
    %668 = vector.broadcast %cst_193 : f32 to vector<8x256xf32>
    %669 = arith.addf %668, %667 : vector<8x256xf32>
    %670 = arith.divf %668, %669 : vector<8x256xf32>
    %671 = vector.extract_strided_slice %644 {offsets = [0, 256], sizes = [8, 128], strides = [1, 1]} : vector<8x384xf32> to vector<8x128xf32>
    %672 = vector.extract_strided_slice %670 {offsets = [0, 0], sizes = [8, 128], strides = [1, 1]} : vector<8x256xf32> to vector<8x128xf32>
    %673 = vector.extract_strided_slice %642 {offsets = [0, 256], sizes = [8, 128], strides = [1, 1]} : vector<8x384xf32> to vector<8x128xf32>
    %674 = arith.mulf %672, %673 : vector<8x128xf32>
    %675 = arith.addf %671, %674 : vector<8x128xf32>
    %676 = math.tanh %675 : vector<8x128xf32>
    %677 = vector.extract_strided_slice %670 {offsets = [0, 128], sizes = [8, 128], strides = [1, 1]} : vector<8x256xf32> to vector<8x128xf32>
    %678 = arith.subf %634, %676 : vector<8x128xf32>
    %679 = arith.mulf %677, %678 : vector<8x128xf32>
    %680 = arith.addf %676, %679 : vector<8x128xf32>
    %681 = arith.select %22, %662, %633 : vector<8x128xi1>, vector<8x128xf32>
    %682 = arith.select %24, %680, %634 : vector<8x128xi1>, vector<8x128xf32>
    %683 = tpu.concatenate %681, %682 in 1 : vector<8x128xf32>, vector<8x128xf32> -> vector<8x256xf32>
    %684 = arith.truncf %683 : vector<8x256xf32> to vector<8x256xbf16>
    %c0_194 = arith.constant 0 : index
    %c0_195 = arith.constant 0 : index
    %685 = vector.load %arg9[%c0_194, %c0_195] : memref<256x768xbf16, #tpu.memory_space<vmem>>, vector<256x768xbf16>
    %cst_196 = arith.constant dense<0.000000e+00> : vector<8x768xf32>
    %686 = tpu.matmul %684, %685, %cst_196 {dimension_numbers = #tpu.dot_dimension_numbers<[1], [0], [0], [1], [0, 0, 1, 1], [], []>} : vector<8x256xbf16>, vector<256x768xbf16>, vector<8x768xf32> -> vector<8x768xf32>
    %687 = vector.broadcast %488 : vector<1x768xf32> to vector<8x768xf32>
    %688 = arith.addf %686, %687 : vector<8x768xf32>
    %689 = vector.extract_strided_slice %688 {offsets = [0, 0], sizes = [8, 384], strides = [1, 1]} : vector<8x768xf32> to vector<8x384xf32>
    %690 = vector.extract_strided_slice %688 {offsets = [0, 384], sizes = [8, 384], strides = [1, 1]} : vector<8x768xf32> to vector<8x384xf32>
    %c32_197 = arith.constant 32 : index
    %c0_198 = arith.constant 0 : index
    %691 = vector.load %arg14[%c32_197, %c0_198] : memref<64x384xf32, #tpu.memory_space<vmem>>, vector<8x384xf32>
    %c24_199 = arith.constant 24 : index
    %c0_200 = arith.constant 0 : index
    %692 = vector.load %arg15[%c24_199, %c0_200] : memref<64x384xf32, #tpu.memory_space<vmem>>, vector<8x384xf32>
    %693 = vector.extract_strided_slice %691 {offsets = [0, 0], sizes = [8, 256], strides = [1, 1]} : vector<8x384xf32> to vector<8x256xf32>
    %694 = vector.extract_strided_slice %689 {offsets = [0, 0], sizes = [8, 256], strides = [1, 1]} : vector<8x384xf32> to vector<8x256xf32>
    %695 = arith.addf %693, %694 : vector<8x256xf32>
    %696 = arith.negf %695 : vector<8x256xf32>
    %697 = math.exp %696 : vector<8x256xf32>
    %cst_201 = arith.constant 1.000000e+00 : f32
    %698 = vector.broadcast %cst_201 : f32 to vector<8x256xf32>
    %699 = arith.addf %698, %697 : vector<8x256xf32>
    %700 = arith.divf %698, %699 : vector<8x256xf32>
    %701 = vector.extract_strided_slice %691 {offsets = [0, 256], sizes = [8, 128], strides = [1, 1]} : vector<8x384xf32> to vector<8x128xf32>
    %702 = vector.extract_strided_slice %700 {offsets = [0, 0], sizes = [8, 128], strides = [1, 1]} : vector<8x256xf32> to vector<8x128xf32>
    %703 = vector.extract_strided_slice %689 {offsets = [0, 256], sizes = [8, 128], strides = [1, 1]} : vector<8x384xf32> to vector<8x128xf32>
    %704 = arith.mulf %702, %703 : vector<8x128xf32>
    %705 = arith.addf %701, %704 : vector<8x128xf32>
    %706 = math.tanh %705 : vector<8x128xf32>
    %707 = vector.extract_strided_slice %700 {offsets = [0, 128], sizes = [8, 128], strides = [1, 1]} : vector<8x256xf32> to vector<8x128xf32>
    %708 = arith.subf %681, %706 : vector<8x128xf32>
    %709 = arith.mulf %707, %708 : vector<8x128xf32>
    %710 = arith.addf %706, %709 : vector<8x128xf32>
    %711 = vector.extract_strided_slice %692 {offsets = [0, 0], sizes = [8, 256], strides = [1, 1]} : vector<8x384xf32> to vector<8x256xf32>
    %712 = vector.extract_strided_slice %690 {offsets = [0, 0], sizes = [8, 256], strides = [1, 1]} : vector<8x384xf32> to vector<8x256xf32>
    %713 = arith.addf %711, %712 : vector<8x256xf32>
    %714 = arith.negf %713 : vector<8x256xf32>
    %715 = math.exp %714 : vector<8x256xf32>
    %cst_202 = arith.constant 1.000000e+00 : f32
    %716 = vector.broadcast %cst_202 : f32 to vector<8x256xf32>
    %717 = arith.addf %716, %715 : vector<8x256xf32>
    %718 = arith.divf %716, %717 : vector<8x256xf32>
    %719 = vector.extract_strided_slice %692 {offsets = [0, 256], sizes = [8, 128], strides = [1, 1]} : vector<8x384xf32> to vector<8x128xf32>
    %720 = vector.extract_strided_slice %718 {offsets = [0, 0], sizes = [8, 128], strides = [1, 1]} : vector<8x256xf32> to vector<8x128xf32>
    %721 = vector.extract_strided_slice %690 {offsets = [0, 256], sizes = [8, 128], strides = [1, 1]} : vector<8x384xf32> to vector<8x128xf32>
    %722 = arith.mulf %720, %721 : vector<8x128xf32>
    %723 = arith.addf %719, %722 : vector<8x128xf32>
    %724 = math.tanh %723 : vector<8x128xf32>
    %725 = vector.extract_strided_slice %718 {offsets = [0, 128], sizes = [8, 128], strides = [1, 1]} : vector<8x256xf32> to vector<8x128xf32>
    %726 = arith.subf %682, %724 : vector<8x128xf32>
    %727 = arith.mulf %725, %726 : vector<8x128xf32>
    %728 = arith.addf %724, %727 : vector<8x128xf32>
    %729 = arith.select %24, %710, %681 : vector<8x128xi1>, vector<8x128xf32>
    %730 = arith.select %22, %728, %682 : vector<8x128xi1>, vector<8x128xf32>
    %731 = tpu.concatenate %729, %730 in 1 : vector<8x128xf32>, vector<8x128xf32> -> vector<8x256xf32>
    %732 = arith.truncf %731 : vector<8x256xf32> to vector<8x256xbf16>
    %c0_203 = arith.constant 0 : index
    %c0_204 = arith.constant 0 : index
    %733 = vector.load %arg9[%c0_203, %c0_204] : memref<256x768xbf16, #tpu.memory_space<vmem>>, vector<256x768xbf16>
    %cst_205 = arith.constant dense<0.000000e+00> : vector<8x768xf32>
    %734 = tpu.matmul %732, %733, %cst_205 {dimension_numbers = #tpu.dot_dimension_numbers<[1], [0], [0], [1], [0, 0, 1, 1], [], []>} : vector<8x256xbf16>, vector<256x768xbf16>, vector<8x768xf32> -> vector<8x768xf32>
    %735 = vector.broadcast %488 : vector<1x768xf32> to vector<8x768xf32>
    %736 = arith.addf %734, %735 : vector<8x768xf32>
    %737 = vector.extract_strided_slice %736 {offsets = [0, 0], sizes = [8, 384], strides = [1, 1]} : vector<8x768xf32> to vector<8x384xf32>
    %738 = vector.extract_strided_slice %736 {offsets = [0, 384], sizes = [8, 384], strides = [1, 1]} : vector<8x768xf32> to vector<8x384xf32>
    %c40_206 = arith.constant 40 : index
    %c0_207 = arith.constant 0 : index
    %739 = vector.load %arg14[%c40_206, %c0_207] : memref<64x384xf32, #tpu.memory_space<vmem>>, vector<8x384xf32>
    %c16_208 = arith.constant 16 : index
    %c0_209 = arith.constant 0 : index
    %740 = vector.load %arg15[%c16_208, %c0_209] : memref<64x384xf32, #tpu.memory_space<vmem>>, vector<8x384xf32>
    %741 = vector.extract_strided_slice %739 {offsets = [0, 0], sizes = [8, 256], strides = [1, 1]} : vector<8x384xf32> to vector<8x256xf32>
    %742 = vector.extract_strided_slice %737 {offsets = [0, 0], sizes = [8, 256], strides = [1, 1]} : vector<8x384xf32> to vector<8x256xf32>
    %743 = arith.addf %741, %742 : vector<8x256xf32>
    %744 = arith.negf %743 : vector<8x256xf32>
    %745 = math.exp %744 : vector<8x256xf32>
    %cst_210 = arith.constant 1.000000e+00 : f32
    %746 = vector.broadcast %cst_210 : f32 to vector<8x256xf32>
    %747 = arith.addf %746, %745 : vector<8x256xf32>
    %748 = arith.divf %746, %747 : vector<8x256xf32>
    %749 = vector.extract_strided_slice %739 {offsets = [0, 256], sizes = [8, 128], strides = [1, 1]} : vector<8x384xf32> to vector<8x128xf32>
    %750 = vector.extract_strided_slice %748 {offsets = [0, 0], sizes = [8, 128], strides = [1, 1]} : vector<8x256xf32> to vector<8x128xf32>
    %751 = vector.extract_strided_slice %737 {offsets = [0, 256], sizes = [8, 128], strides = [1, 1]} : vector<8x384xf32> to vector<8x128xf32>
    %752 = arith.mulf %750, %751 : vector<8x128xf32>
    %753 = arith.addf %749, %752 : vector<8x128xf32>
    %754 = math.tanh %753 : vector<8x128xf32>
    %755 = vector.extract_strided_slice %748 {offsets = [0, 128], sizes = [8, 128], strides = [1, 1]} : vector<8x256xf32> to vector<8x128xf32>
    %756 = arith.subf %729, %754 : vector<8x128xf32>
    %757 = arith.mulf %755, %756 : vector<8x128xf32>
    %758 = arith.addf %754, %757 : vector<8x128xf32>
    %759 = vector.extract_strided_slice %740 {offsets = [0, 0], sizes = [8, 256], strides = [1, 1]} : vector<8x384xf32> to vector<8x256xf32>
    %760 = vector.extract_strided_slice %738 {offsets = [0, 0], sizes = [8, 256], strides = [1, 1]} : vector<8x384xf32> to vector<8x256xf32>
    %761 = arith.addf %759, %760 : vector<8x256xf32>
    %762 = arith.negf %761 : vector<8x256xf32>
    %763 = math.exp %762 : vector<8x256xf32>
    %cst_211 = arith.constant 1.000000e+00 : f32
    %764 = vector.broadcast %cst_211 : f32 to vector<8x256xf32>
    %765 = arith.addf %764, %763 : vector<8x256xf32>
    %766 = arith.divf %764, %765 : vector<8x256xf32>
    %767 = vector.extract_strided_slice %740 {offsets = [0, 256], sizes = [8, 128], strides = [1, 1]} : vector<8x384xf32> to vector<8x128xf32>
    %768 = vector.extract_strided_slice %766 {offsets = [0, 0], sizes = [8, 128], strides = [1, 1]} : vector<8x256xf32> to vector<8x128xf32>
    %769 = vector.extract_strided_slice %738 {offsets = [0, 256], sizes = [8, 128], strides = [1, 1]} : vector<8x384xf32> to vector<8x128xf32>
    %770 = arith.mulf %768, %769 : vector<8x128xf32>
    %771 = arith.addf %767, %770 : vector<8x128xf32>
    %772 = math.tanh %771 : vector<8x128xf32>
    %773 = vector.extract_strided_slice %766 {offsets = [0, 128], sizes = [8, 128], strides = [1, 1]} : vector<8x256xf32> to vector<8x128xf32>
    %774 = arith.subf %730, %772 : vector<8x128xf32>
    %775 = arith.mulf %773, %774 : vector<8x128xf32>
    %776 = arith.addf %772, %775 : vector<8x128xf32>
    %777 = arith.select %26, %758, %729 : vector<8x128xi1>, vector<8x128xf32>
    %778 = arith.select %20, %776, %730 : vector<8x128xi1>, vector<8x128xf32>
    %779 = tpu.concatenate %777, %778 in 1 : vector<8x128xf32>, vector<8x128xf32> -> vector<8x256xf32>
    %780 = arith.truncf %779 : vector<8x256xf32> to vector<8x256xbf16>
    %c0_212 = arith.constant 0 : index
    %c0_213 = arith.constant 0 : index
    %781 = vector.load %arg9[%c0_212, %c0_213] : memref<256x768xbf16, #tpu.memory_space<vmem>>, vector<256x768xbf16>
    %cst_214 = arith.constant dense<0.000000e+00> : vector<8x768xf32>
    %782 = tpu.matmul %780, %781, %cst_214 {dimension_numbers = #tpu.dot_dimension_numbers<[1], [0], [0], [1], [0, 0, 1, 1], [], []>} : vector<8x256xbf16>, vector<256x768xbf16>, vector<8x768xf32> -> vector<8x768xf32>
    %783 = vector.broadcast %488 : vector<1x768xf32> to vector<8x768xf32>
    %784 = arith.addf %782, %783 : vector<8x768xf32>
    %785 = vector.extract_strided_slice %784 {offsets = [0, 0], sizes = [8, 384], strides = [1, 1]} : vector<8x768xf32> to vector<8x384xf32>
    %786 = vector.extract_strided_slice %784 {offsets = [0, 384], sizes = [8, 384], strides = [1, 1]} : vector<8x768xf32> to vector<8x384xf32>
    %c48_215 = arith.constant 48 : index
    %c0_216 = arith.constant 0 : index
    %787 = vector.load %arg14[%c48_215, %c0_216] : memref<64x384xf32, #tpu.memory_space<vmem>>, vector<8x384xf32>
    %c8_217 = arith.constant 8 : index
    %c0_218 = arith.constant 0 : index
    %788 = vector.load %arg15[%c8_217, %c0_218] : memref<64x384xf32, #tpu.memory_space<vmem>>, vector<8x384xf32>
    %789 = vector.extract_strided_slice %787 {offsets = [0, 0], sizes = [8, 256], strides = [1, 1]} : vector<8x384xf32> to vector<8x256xf32>
    %790 = vector.extract_strided_slice %785 {offsets = [0, 0], sizes = [8, 256], strides = [1, 1]} : vector<8x384xf32> to vector<8x256xf32>
    %791 = arith.addf %789, %790 : vector<8x256xf32>
    %792 = arith.negf %791 : vector<8x256xf32>
    %793 = math.exp %792 : vector<8x256xf32>
    %cst_219 = arith.constant 1.000000e+00 : f32
    %794 = vector.broadcast %cst_219 : f32 to vector<8x256xf32>
    %795 = arith.addf %794, %793 : vector<8x256xf32>
    %796 = arith.divf %794, %795 : vector<8x256xf32>
    %797 = vector.extract_strided_slice %787 {offsets = [0, 256], sizes = [8, 128], strides = [1, 1]} : vector<8x384xf32> to vector<8x128xf32>
    %798 = vector.extract_strided_slice %796 {offsets = [0, 0], sizes = [8, 128], strides = [1, 1]} : vector<8x256xf32> to vector<8x128xf32>
    %799 = vector.extract_strided_slice %785 {offsets = [0, 256], sizes = [8, 128], strides = [1, 1]} : vector<8x384xf32> to vector<8x128xf32>
    %800 = arith.mulf %798, %799 : vector<8x128xf32>
    %801 = arith.addf %797, %800 : vector<8x128xf32>
    %802 = math.tanh %801 : vector<8x128xf32>
    %803 = vector.extract_strided_slice %796 {offsets = [0, 128], sizes = [8, 128], strides = [1, 1]} : vector<8x256xf32> to vector<8x128xf32>
    %804 = arith.subf %777, %802 : vector<8x128xf32>
    %805 = arith.mulf %803, %804 : vector<8x128xf32>
    %806 = arith.addf %802, %805 : vector<8x128xf32>
    %807 = vector.extract_strided_slice %788 {offsets = [0, 0], sizes = [8, 256], strides = [1, 1]} : vector<8x384xf32> to vector<8x256xf32>
    %808 = vector.extract_strided_slice %786 {offsets = [0, 0], sizes = [8, 256], strides = [1, 1]} : vector<8x384xf32> to vector<8x256xf32>
    %809 = arith.addf %807, %808 : vector<8x256xf32>
    %810 = arith.negf %809 : vector<8x256xf32>
    %811 = math.exp %810 : vector<8x256xf32>
    %cst_220 = arith.constant 1.000000e+00 : f32
    %812 = vector.broadcast %cst_220 : f32 to vector<8x256xf32>
    %813 = arith.addf %812, %811 : vector<8x256xf32>
    %814 = arith.divf %812, %813 : vector<8x256xf32>
    %815 = vector.extract_strided_slice %788 {offsets = [0, 256], sizes = [8, 128], strides = [1, 1]} : vector<8x384xf32> to vector<8x128xf32>
    %816 = vector.extract_strided_slice %814 {offsets = [0, 0], sizes = [8, 128], strides = [1, 1]} : vector<8x256xf32> to vector<8x128xf32>
    %817 = vector.extract_strided_slice %786 {offsets = [0, 256], sizes = [8, 128], strides = [1, 1]} : vector<8x384xf32> to vector<8x128xf32>
    %818 = arith.mulf %816, %817 : vector<8x128xf32>
    %819 = arith.addf %815, %818 : vector<8x128xf32>
    %820 = math.tanh %819 : vector<8x128xf32>
    %821 = vector.extract_strided_slice %814 {offsets = [0, 128], sizes = [8, 128], strides = [1, 1]} : vector<8x256xf32> to vector<8x128xf32>
    %822 = arith.subf %778, %820 : vector<8x128xf32>
    %823 = arith.mulf %821, %822 : vector<8x128xf32>
    %824 = arith.addf %820, %823 : vector<8x128xf32>
    %825 = arith.select %28, %806, %777 : vector<8x128xi1>, vector<8x128xf32>
    %826 = arith.select %18, %824, %778 : vector<8x128xi1>, vector<8x128xf32>
    %827 = tpu.concatenate %825, %826 in 1 : vector<8x128xf32>, vector<8x128xf32> -> vector<8x256xf32>
    %828 = arith.truncf %827 : vector<8x256xf32> to vector<8x256xbf16>
    %c0_221 = arith.constant 0 : index
    %c0_222 = arith.constant 0 : index
    %829 = vector.load %arg9[%c0_221, %c0_222] : memref<256x768xbf16, #tpu.memory_space<vmem>>, vector<256x768xbf16>
    %cst_223 = arith.constant dense<0.000000e+00> : vector<8x768xf32>
    %830 = tpu.matmul %828, %829, %cst_223 {dimension_numbers = #tpu.dot_dimension_numbers<[1], [0], [0], [1], [0, 0, 1, 1], [], []>} : vector<8x256xbf16>, vector<256x768xbf16>, vector<8x768xf32> -> vector<8x768xf32>
    %831 = vector.broadcast %488 : vector<1x768xf32> to vector<8x768xf32>
    %832 = arith.addf %830, %831 : vector<8x768xf32>
    %833 = vector.extract_strided_slice %832 {offsets = [0, 0], sizes = [8, 384], strides = [1, 1]} : vector<8x768xf32> to vector<8x384xf32>
    %834 = vector.extract_strided_slice %832 {offsets = [0, 384], sizes = [8, 384], strides = [1, 1]} : vector<8x768xf32> to vector<8x384xf32>
    %c56_224 = arith.constant 56 : index
    %c0_225 = arith.constant 0 : index
    %835 = vector.load %arg14[%c56_224, %c0_225] : memref<64x384xf32, #tpu.memory_space<vmem>>, vector<8x384xf32>
    %c0_226 = arith.constant 0 : index
    %c0_227 = arith.constant 0 : index
    %836 = vector.load %arg15[%c0_226, %c0_227] : memref<64x384xf32, #tpu.memory_space<vmem>>, vector<8x384xf32>
    %837 = vector.extract_strided_slice %835 {offsets = [0, 0], sizes = [8, 256], strides = [1, 1]} : vector<8x384xf32> to vector<8x256xf32>
    %838 = vector.extract_strided_slice %833 {offsets = [0, 0], sizes = [8, 256], strides = [1, 1]} : vector<8x384xf32> to vector<8x256xf32>
    %839 = arith.addf %837, %838 : vector<8x256xf32>
    %840 = arith.negf %839 : vector<8x256xf32>
    %841 = math.exp %840 : vector<8x256xf32>
    %cst_228 = arith.constant 1.000000e+00 : f32
    %842 = vector.broadcast %cst_228 : f32 to vector<8x256xf32>
    %843 = arith.addf %842, %841 : vector<8x256xf32>
    %844 = arith.divf %842, %843 : vector<8x256xf32>
    %845 = vector.extract_strided_slice %835 {offsets = [0, 256], sizes = [8, 128], strides = [1, 1]} : vector<8x384xf32> to vector<8x128xf32>
    %846 = vector.extract_strided_slice %844 {offsets = [0, 0], sizes = [8, 128], strides = [1, 1]} : vector<8x256xf32> to vector<8x128xf32>
    %847 = vector.extract_strided_slice %833 {offsets = [0, 256], sizes = [8, 128], strides = [1, 1]} : vector<8x384xf32> to vector<8x128xf32>
    %848 = arith.mulf %846, %847 : vector<8x128xf32>
    %849 = arith.addf %845, %848 : vector<8x128xf32>
    %850 = math.tanh %849 : vector<8x128xf32>
    %851 = vector.extract_strided_slice %844 {offsets = [0, 128], sizes = [8, 128], strides = [1, 1]} : vector<8x256xf32> to vector<8x128xf32>
    %852 = arith.subf %825, %850 : vector<8x128xf32>
    %853 = arith.mulf %851, %852 : vector<8x128xf32>
    %854 = arith.addf %850, %853 : vector<8x128xf32>
    %855 = vector.extract_strided_slice %836 {offsets = [0, 0], sizes = [8, 256], strides = [1, 1]} : vector<8x384xf32> to vector<8x256xf32>
    %856 = vector.extract_strided_slice %834 {offsets = [0, 0], sizes = [8, 256], strides = [1, 1]} : vector<8x384xf32> to vector<8x256xf32>
    %857 = arith.addf %855, %856 : vector<8x256xf32>
    %858 = arith.negf %857 : vector<8x256xf32>
    %859 = math.exp %858 : vector<8x256xf32>
    %cst_229 = arith.constant 1.000000e+00 : f32
    %860 = vector.broadcast %cst_229 : f32 to vector<8x256xf32>
    %861 = arith.addf %860, %859 : vector<8x256xf32>
    %862 = arith.divf %860, %861 : vector<8x256xf32>
    %863 = vector.extract_strided_slice %836 {offsets = [0, 256], sizes = [8, 128], strides = [1, 1]} : vector<8x384xf32> to vector<8x128xf32>
    %864 = vector.extract_strided_slice %862 {offsets = [0, 0], sizes = [8, 128], strides = [1, 1]} : vector<8x256xf32> to vector<8x128xf32>
    %865 = vector.extract_strided_slice %834 {offsets = [0, 256], sizes = [8, 128], strides = [1, 1]} : vector<8x384xf32> to vector<8x128xf32>
    %866 = arith.mulf %864, %865 : vector<8x128xf32>
    %867 = arith.addf %863, %866 : vector<8x128xf32>
    %868 = math.tanh %867 : vector<8x128xf32>
    %869 = vector.extract_strided_slice %862 {offsets = [0, 128], sizes = [8, 128], strides = [1, 1]} : vector<8x256xf32> to vector<8x128xf32>
    %870 = arith.subf %826, %868 : vector<8x128xf32>
    %871 = arith.mulf %869, %870 : vector<8x128xf32>
    %872 = arith.addf %868, %871 : vector<8x128xf32>
    %873 = arith.select %30, %854, %825 : vector<8x128xi1>, vector<8x128xf32>
    %874 = arith.select %16, %872, %826 : vector<8x128xi1>, vector<8x128xf32>
    %875 = tpu.concatenate %467, %468, %873, %874 in 1 : vector<8x128xf32>, vector<8x128xf32>, vector<8x128xf32>, vector<8x128xf32> -> vector<8x512xf32>
    %876 = arith.truncf %875 : vector<8x512xf32> to vector<8x512xbf16>
    %c0_230 = arith.constant 0 : index
    %c0_231 = arith.constant 0 : index
    %877 = vector.load %arg11[%c0_230, %c0_231] : memref<512x128xbf16, #tpu.memory_space<vmem>>, vector<512x128xbf16>
    %cst_232 = arith.constant dense<0.000000e+00> : vector<8x128xf32>
    %878 = tpu.matmul %876, %877, %cst_232 {dimension_numbers = #tpu.dot_dimension_numbers<[1], [0], [0], [1], [0, 0, 1, 1], [], []>} : vector<8x512xbf16>, vector<512x128xbf16>, vector<8x128xf32> -> vector<8x128xf32>
    %c0_233 = arith.constant 0 : index
    %c0_234 = arith.constant 0 : index
    %879 = vector.load %arg12[%c0_233, %c0_234] : memref<1x128xf32, #tpu.memory_space<vmem>>, vector<1x128xf32>
    %880 = vector.broadcast %879 : vector<1x128xf32> to vector<8x128xf32>
    %881 = arith.addf %878, %880 : vector<8x128xf32>
    %cst_235 = arith.constant 0.000000e+00 : f32
    %882 = vector.broadcast %cst_235 : f32 to vector<8x128xf32>
    %883 = arith.maximumf %881, %882 : vector<8x128xf32>
    %c0_236 = arith.constant 0 : index
    %c0_237 = arith.constant 0 : index
    %884 = vector.load %arg13[%c0_236, %c0_237] : memref<8x128xf32, #tpu.memory_space<vmem>>, vector<8x128xf32>
    tpu.vector_store %arg13[%c0_236, %c0_237], %883 {strides = array<i32>} : memref<8x128xf32, #tpu.memory_space<vmem>>, vector<8x128xf32>,
    return
  }
}

</mosaic_0001>

<bundles_post_ra>
// kernel: gru_encoder_forward.1
= control target key start
LH: loop header
LB: loop body
LE: loop exit
PB: predicated region body
PF: predicated region fallthrough
CT: control target
= control target key end

     0   :  { %18 = vsyncpa [#allocation7], 0  ;;  %s17185_s0 = inlined_call_operand.vmem [shape: s32[64,1], index: 0, kind: input, shape index: {}]   ;;  %s17186_s1 = inlined_call_operand.vmem [shape: f32[8,1], index: 1, kind: input, shape index: {}]   ;;  %s17187_s2 = inlined_call_operand.vmem [shape: bf16[128,128], index: 2, kind: input, shape index: {}]   ;;  %s17188_s3 = inlined_call_operand.hbm [shape: bf16[128,768], index: 3, kind: input, shape index: {}]   ;;  %s17189_s4 = inlined_call_operand.vmem [shape: f32[1,768], index: 4, kind: input, shape index: {}]   ;;  %s17190_s5 = inlined_call_operand.hbm [shape: bf16[256,768], index: 5, kind: input, shape index: {}]   ;;  %s17191_s6 = inlined_call_operand.vmem [shape: f32[1,768], index: 6, kind: input, shape index: {}]   ;;  %s17192_s7 = inlined_call_operand.hbm [shape: bf16[256,768], index: 7, kind: input, shape index: {}]   ;;  %s17193_s8 = inlined_call_operand.vmem [shape: f32[1,768], index: 8, kind: input, shape index: {}]   ;;  %s17194_s9 = inlined_call_operand.hbm [shape: bf16[256,768], index: 9, kind: input, shape index: {}]   ;;  %s17195_s10 = inlined_call_operand.vmem [shape: f32[1,768], index: 10, kind: input, shape index: {}]   ;;  %s17196_s11 = inlined_call_operand.hbm [shape: bf16[512,128], index: 11, kind: input, shape index: {}]   ;;  %s17197_s12 = inlined_call_operand.vmem [shape: f32[1,128], index: 12, kind: input, shape index: {}]   ;;  %s17198_s13 = inlined_call_operand.hbm [shape: f32[8,128], index: 13, kind: output, shape index: {}]  }
   0x1   :  { %19 = vsyncpa [#allocation10], 0 }
   0x2   :  { %20 = vsyncpa [#allocation13], 0 }
   0x3   :  { %21 = vsyncpa [#allocation8], 0  ;;  %s13165_s25 = smov [#allocation9]   ;;  %s13166_s27 = smov [#allocation12]  }
   0x4   :  { %s47_s26 = sshll.u32 %s13165_s25, 4  ;;  %s75_s28 = sshll.u32 %s13166_s27, 4  ;;  %s48_s26 = int_to_ptr.vmem [resolvable:$true] %s47_s26  ;;  %s13248_s28 = int_to_ptr.vmem [resolvable:$true] %s75_s28 }
   0x5   :  { %s13025_s14 = scalar_lea.hbm %s17190_s5, 12288 }
   0x6   :  { %p13026_p0 = scmp.ne.s32.totalorder %s17190_s5, %s13025_s14  ;;  %p13029_p1 = scmp.lt.u32.totalorder %s13025_s14, %s17190_s5 }
   0x8   :  { %p13031_p2 = pnand %p13029_p1, %p13026_p0 }
   0xa   :  { %13034 = shalt.err (!%p13031_p2)
}
   0xb   :  { %s13035_s19 = scalar_lea.vmem %s48_s26, 12288  ;;  %p13040_p4 = scmp.lt.s32.totalorder %s48_s26, %s48_s26 }
   0xc   :  { %p13036_p3 = scmp.ne.s32.totalorder %s48_s26, %s13035_s19  ;;  %p13041_p5 = scmp.lt.s32.totalorder %s13035_s19, %s13035_s19 }
   0xe   :  { %p13042_p6 = por %p13041_p5, %p13040_p4 }
  0x10   :  { %p13043_p7 = pnand %p13042_p6, %p13036_p3 }
  0x12   :  { %13046 = shalt.err (!%p13043_p7)
}
  0x13   :  { %s13167_s20 = smov 384   ;;  %s13168_s21 = smov 24  }
  0x14   :  { %53 = dma.hbm_to_vmem [thread:$0]  %s17190_s5, 12288, %s48_s26, [#allocation10], %s13167_s20, %s13167_s20, %s13168_s21  }
  0x15   :  { %s13047_s27 = scalar_lea.hbm %s17194_s9, 12288 }
  0x16   :  { %p13048_p8 = scmp.ne.s32.totalorder %s17194_s9, %s13047_s27  ;;  %p13051_p9 = scmp.lt.u32.totalorder %s13047_s27, %s17194_s9 }
  0x18   :  { %p13053_p10 = pnand %p13051_p9, %p13048_p8 }
  0x1a   :  { %13056 = shalt.err (!%p13053_p10)
}
  0x1b   :  { %s13057_s16 = scalar_lea.vmem %s13248_s28, 12288  ;;  %p13062_p12 = scmp.lt.s32.totalorder %s13248_s28, %s13248_s28 }
  0x1c   :  { %p13058_p11 = scmp.ne.s32.totalorder %s13248_s28, %s13057_s16  ;;  %p13063_p13 = scmp.lt.s32.totalorder %s13057_s16, %s13057_s16 }
  0x1e   :  { %p13064_p0 = por %p13063_p13, %p13062_p12 }
  0x20   :  { %p13065_p1 = pnand %p13064_p0, %p13058_p11 }
  0x22   :  { %13068 = shalt.err (!%p13065_p1)
}
  0x23   :  { %81 = dma.hbm_to_vmem [thread:$0]  %s17194_s9, 12288, %s13248_s28, [#allocation13], %s13167_s20, %s13167_s20, %s13168_s21  }
  0x24   :  { %s13169_s17 = smov [#allocation6]   ;;  %s13170_s19 = smov [#allocation11]  }
  0x25   :  { %s33_s18 = sshll.u32 %s13169_s17, 4  ;;  %s61_s22 = sshll.u32 %s13170_s19, 4  ;;  %s34_s18 = int_to_ptr.vmem [resolvable:$true] %s33_s18  ;;  %s13285_s22 = int_to_ptr.vmem [resolvable:$true] %s61_s22 }
  0x26   :  { %s13069_s25 = scalar_lea.hbm %s17188_s3, 6144 }
  0x27   :  { %p13070_p2 = scmp.ne.s32.totalorder %s17188_s3, %s13069_s25  ;;  %p13073_p3 = scmp.lt.u32.totalorder %s13069_s25, %s17188_s3 }
  0x29   :  { %p13075_p4 = pnand %p13073_p3, %p13070_p2 }
  0x2b   :  { %13078 = shalt.err (!%p13075_p4)
}
  0x2c   :  { %s13079_s9 = scalar_lea.vmem %s34_s18, 6144  ;;  %p13084_p6 = scmp.lt.s32.totalorder %s34_s18, %s34_s18 }
  0x2d   :  { %p13080_p5 = scmp.ne.s32.totalorder %s34_s18, %s13079_s9  ;;  %p13085_p7 = scmp.lt.s32.totalorder %s13079_s9, %s13079_s9 }
  0x2f   :  { %p13086_p8 = por %p13085_p7, %p13084_p6 }
  0x31   :  { %p13087_p9 = pnand %p13086_p8, %p13080_p5 }
  0x33   :  { %13090 = shalt.err (!%p13087_p9)
}
  0x34   :  { %39 = dma.hbm_to_vmem [thread:$0]  %s17188_s3, 6144, %s34_s18, [#allocation7], %s13167_s20, %s13167_s20, %s13168_s21  }
  0x35   :  { %s13091_s26 = scalar_lea.hbm %s17192_s7, 12288 }
  0x36   :  { %p13092_p10 = scmp.ne.s32.totalorder %s17192_s7, %s13091_s26  ;;  %p13095_p11 = scmp.lt.u32.totalorder %s13091_s26, %s17192_s7 }
  0x38   :  { %p13097_p12 = pnand %p13095_p11, %p13092_p10 }
  0x3a   :  { %13100 = shalt.err (!%p13097_p12)
}
  0x3b   :  { %s13101_s25 = scalar_lea.vmem %s13285_s22, 12288  ;;  %p13106_p0 = scmp.lt.s32.totalorder %s13285_s22, %s13285_s22 }
  0x3c   :  { %p13102_p13 = scmp.ne.s32.totalorder %s13285_s22, %s13101_s25  ;;  %p13107_p1 = scmp.lt.s32.totalorder %s13101_s25, %s13101_s25 }
  0x3e   :  { %p13108_p2 = por %p13107_p1, %p13106_p0 }
  0x40   :  { %p13109_p3 = pnand %p13108_p2, %p13102_p13 }
  0x42   :  { %13112 = shalt.err (!%p13109_p3)
}
  0x43   :  { %67 = dma.hbm_to_vmem [thread:$0]  %s17192_s7, 12288, %s13285_s22, [#allocation10], %s13167_s20, %s13167_s20, %s13168_s21  }
  0x44   :  { %s13171_s27 = smov [#allocation14]   ;;  %s13113_s9 = scalar_lea.hbm %s17196_s11, 4096 }
  0x45   :  { %s89_s29 = sshll.u32 %s13171_s27, 4  ;;  %p13114_p4 = scmp.ne.s32.totalorder %s17196_s11, %s13113_s9  ;;  %s90_s29 = int_to_ptr.vmem [resolvable:$true] %s89_s29 }
  0x46   :  { %p13117_p5 = scmp.lt.u32.totalorder %s13113_s9, %s17196_s11 }
  0x48   :  { %p13119_p6 = pnand %p13117_p5, %p13114_p4 }
  0x4a   :  { %13122 = shalt.err (!%p13119_p6)
}
  0x4b   :  { %s13123_s26 = scalar_lea.vmem %s90_s29, 4096  ;;  %p13128_p8 = scmp.lt.s32.totalorder %s90_s29, %s90_s29 }
  0x4c   :  { %p13124_p7 = scmp.ne.s32.totalorder %s90_s29, %s13123_s26  ;;  %p13129_p9 = scmp.lt.s32.totalorder %s13123_s26, %s13123_s26 }
  0x4e   :  { %p13130_p10 = por %p13129_p9, %p13128_p8 }
  0x50   :  { %p13131_p11 = pnand %p13130_p10, %p13124_p7 }
  0x52   :  { %13134 = shalt.err (!%p13131_p11)
}
  0x53   :  { %s13172_s7 = smov 64   ;;  %s13173_s20 = smov 4  }
  0x54   :  { %95 = dma.hbm_to_vmem [thread:$0]  %s17196_s11, 4096, %s90_s29, [#allocation13], %s13172_s7, %s13172_s7, %s13173_s20  }
  0x55   :  { %13157 = dma.done.wait [#allocation7], 6144  }
  0x56   :  { %13158 = vsyncadd [#allocation7], 4294961152 }
  0x57   :  { %13159 = dma.done.wait [#allocation10], 24576  }
  0x58   :  { %13160 = vsyncadd [#allocation10], 4294942720 }
  0x59   :  { %13161 = dma.done.wait [#allocation13], 16384  }
  0x5a   :  { %13162 = vsyncadd [#allocation13], 4294950912  ;;  %v13174_v0 = vmov 0   ;;  %v116_v1 = vld [vmem:[%s17185_s0 + $0x10] sm:$0xff]  ;;  %v114_v2 = vld [vmem:[%s17185_s0] sm:$0xff]  ;;  %v17199_v33 = vlaneseq  ;;  %s13177_s16 = smov [#allocation15]  }
  0x5b   :  { %11533 = vset.pattern.permute.xlu1 %v13174_v0  ;;  %11532 = vset.pattern.permute.xlu0 %v13174_v0  ;;  %v117_v3 = vld [vmem:[%s17185_s0 + $0x18] sm:$0xff]  ;;  %v115_v4 = vld [vmem:[%s17185_s0 + $0x8] sm:$0xff]  ;;  %v11534_v5 = vld [vmem:[%s17187_s2] sm:$0xff]   ;;  %v13175_v41 = vmov 1.0|1.0   ;;  %s10199_s5 = sshll.u32 %s13177_s16, 4  ;;  %s10200_s5 = int_to_ptr.vmem [resolvable:$true] %s10199_s5 }
  0x5c   :  { %667 = vmatprep.mubr.bf16.mxu1 %v13174_v0  ;;  %129 = vperm.xlu1 %11533, %v116_v1   ;;  %v11535_v6 = vld [vmem:[%s17187_s2 + $0x8] sm:$0xff]   ;;  %v118_v8 = vld [vmem:[%s17185_s0 + $0x20] sm:$0xff]  ;;  %v121_v9 = vld [vmem:[%s17185_s0 + $0x38] sm:$0xff]  ;;  %v147_v36 = vand.u32 127, %v17199_v33  ;;  %s13135_s26 = scalar_lea.vmem %s10200_s5, 128  ;;  %p13140_p13 = scmp.lt.s32.totalorder %s10200_s5, %s10200_s5 }
  0x5d   :  { %123 = vperm.xlu0 %11532, %v114_v2   ;;  %v119_v7 = vld [vmem:[%s17185_s0 + $0x28] sm:$0xff]  ;;  %11495 = vmatprep.subr.bf16.mxu0 %v11534_v5  ;;  %v11536_v10 = vld [vmem:[%s17187_s2 + $0x10] sm:$0xff]   ;;  %v11537_v12 = vld [vmem:[%s17187_s2 + $0x18] sm:$0xff]   ;;  %p13136_p12 = scmp.ne.s32.totalorder %s10200_s5, %s13135_s26  ;;  %p13141_p0 = scmp.lt.s32.totalorder %s13135_s26, %s13135_s26 }
  0x5e   :  { %11496 = vmatpush3.bf16.msra.mxu0 %v11534_v5  ;;  %v120_v11 = vld [vmem:[%s17185_s0 + $0x30] sm:$0xff]  ;;  %v301_v13 = vld [vmem:[%s17186_s1] sm:$0xff]  ;;  %v11539_v18 = vld [vmem:[%s17187_s2 + $0x28] sm:$0xff]  }
  0x5f   :  { %11497 = vmatprep.subr.bf16.mxu0 %v11535_v6  ;;  %v11538_v14 = vld [vmem:[%s17187_s2 + $0x20] sm:$0xff]   ;;  %v11548_v17 = vld [vmem:[#allocation6 + $0x34] ss:$24 sps:$4 sm:$0xff]   ;;  %v11553_v19 = vld [vmem:[#allocation6 + $0x30] ss:$24 sps:$4 sm:$0xff]   ;;  %p13142_p1 = por %p13141_p0, %p13140_p13 }
  0x60   :  { %132 = vperm.xlu1 %11533, %v117_v3   ;;  %v11542_v15 = vld [vmem:[#allocation6 + $0x4] ss:$24 sps:$4 sm:$0xff]   ;;  %v11547_v16 = vld [vmem:[#allocation6] ss:$24 sps:$4 sm:$0xff]   ;;  %v11540_v21 = vld [vmem:[%s17187_s2 + $0x30] sm:$0xff]  }
  0x61   :  { %126 = vperm.xlu0 %11532, %v115_v4   ;;  %635 = vmatprep.subr.bf16.mxu1 %v11542_v15  ;;  %v11554_v20 = vld [vmem:[#allocation6 + $0x64] ss:$24 sps:$4 sm:$0xff]   ;;  %v11559_v22 = vld [vmem:[#allocation6 + $0x60] ss:$24 sps:$4 sm:$0xff]   ;;  %v11560_v24 = vld [vmem:[#allocation6 + $0x94] ss:$24 sps:$4 sm:$0xff]   ;;  %p13143_p2 = pnand %p13142_p1, %p13136_p12 }
  0x62   :  { %11498 = vmatpush3.bf16.msra.mxu0 %v11535_v6  ;;  %636 = vmatpush1.bf16.msra.mxu1 %v11547_v16  ;;  %v11541_v23 = vld [vmem:[%s17187_s2 + $0x38] sm:$0xff]   ;;  %v11565_v25 = vld [vmem:[#allocation6 + $0x90] ss:$24 sps:$4 sm:$0xff]   ;;  %v11546_v26 = vld [vmem:[#allocation6 + $0xc] ss:$24 sps:$4 sm:$0xff]  }
  0x63   :  { %11499 = vmatprep.subr.bf16.mxu0 %v11536_v10  ;;  %637 = vmatprep.subr.bf16.mxu1 %v11548_v17  ;;  %v11566_v27 = vld [vmem:[#allocation6 + $0xc4] ss:$24 sps:$4 sm:$0xff]   ;;  %v11571_v28 = vld [vmem:[#allocation6 + $0xc0] ss:$24 sps:$4 sm:$0xff]   ;;  %v11572_v29 = vld [vmem:[#allocation6 + $0xf4] ss:$24 sps:$4 sm:$0xff]  }
  0x64   :  { %138 = vperm.xlu1 %11533, %v119_v7   ;;  %v11577_v30 = vld [vmem:[#allocation6 + $0xf0] ss:$24 sps:$4 sm:$0xff]   ;;  %v11578_v31 = vld [vmem:[#allocation6 + $0x124] ss:$24 sps:$4 sm:$0xff]   ;;  %v11583_v32 = vld [vmem:[#allocation6 + $0x120] ss:$24 sps:$4 sm:$0xff]  }
  0x65   :  { %135 = vperm.xlu0 %11532, %v118_v8   ;;  %v11544_v39 = vld [vmem:[#allocation6 + $0x8] ss:$24 sps:$4 sm:$0xff]   ;;  %v11552_v40 = vld [vmem:[#allocation6 + $0x3c] ss:$24 sps:$4 sm:$0xff]   ;;  %v11550_v44 = vld [vmem:[#allocation6 + $0x38] ss:$24 sps:$4 sm:$0xff]  }
  0x66   :  { %11500 = vmatpush3.bf16.msra.mxu0 %v11536_v10  ;;  %638 = vmatpush1.bf16.msra.mxu1 %v11553_v19  ;;  %v11558_v45 = vld [vmem:[#allocation6 + $0x6c] ss:$24 sps:$4 sm:$0xff]   ;;  %v11556_v48 = vld [vmem:[#allocation6 + $0x68] ss:$24 sps:$4 sm:$0xff]   ;;  %v11564_v49 = vld [vmem:[#allocation6 + $0x9c] ss:$24 sps:$4 sm:$0xff]  }
  0x67   :  { %11501 = vmatprep.subr.bf16.mxu0 %v11537_v12  ;;  %639 = vmatprep.subr.bf16.mxu1 %v11554_v20  ;;  %v11562_v50 = vld [vmem:[#allocation6 + $0x98] ss:$24 sps:$4 sm:$0xff]   ;;  %v11570_v51 = vld [vmem:[#allocation6 + $0xcc] ss:$24 sps:$4 sm:$0xff]   ;;  %v11568_v52 = vld [vmem:[#allocation6 + $0xc8] ss:$24 sps:$4 sm:$0xff]  }
  0x68   :  { %144 = vperm.xlu1 %11533, %v121_v9   ;;  %v11576_v53 = vld [vmem:[#allocation6 + $0xfc] ss:$24 sps:$4 sm:$0xff]   ;;  %v11574_v54 = vld [vmem:[#allocation6 + $0xf8] ss:$24 sps:$4 sm:$0xff]   ;;  %v11582_v55 = vld [vmem:[#allocation6 + $0x12c] ss:$24 sps:$4 sm:$0xff]  }
  0x69   :  { %141 = vperm.xlu0 %11532, %v120_v11   ;;  %v11580_v56 = vld [vmem:[#allocation6 + $0x128] ss:$24 sps:$4 sm:$0xff]   ;;  %v11584_v57 = vld [vmem:[#allocation6 + $0x154] ss:$24 sps:$4 sm:$0xff]   ;;  %v11586_v59 = vld [vmem:[#allocation6 + $0x158] ss:$24 sps:$4 sm:$0xff]  }
  0x6a   :  { %11502 = vmatpush3.bf16.msra.mxu0 %v11537_v12  ;;  %640 = vmatpush1.bf16.msra.mxu1 %v11559_v22  ;;  %v11588_v58 = vld [vmem:[#allocation6 + $0x15c] ss:$24 sps:$4 sm:$0xff]   ;;  %v11589_v60 = vld [vmem:[#allocation6 + $0x150] ss:$24 sps:$4 sm:$0xff]   ;;  %v13395_v6 = vld [vmem:[#allocation9] ss:$24 sps:$4 sm:$0xff]  }
  0x6b   :  { %11503 = vmatprep.subr.bf16.mxu0 %v11538_v14  ;;  %641 = vmatprep.subr.bf16.mxu1 %v11560_v24  ;;  %v11592_v61 = vld [vmem:[#allocation6 + $0x14] ss:$24 sps:$4 sm:$0xff]   ;;  %v13390_v62 = vld [vmem:[#allocation9 + $0x4] ss:$24 sps:$4 sm:$0xff]   ;;  %v11590_v5 = vld [vmem:[#allocation6 + $0x10] ss:$24 sps:$4 sm:$0xff]  }
  0x6c   :  { %v11598_v8 = vld [vmem:[#allocation6 + $0x44] ss:$24 sps:$4 sm:$0xff]   ;;  %v13399_v9 = vld [vmem:[#allocation9 + $0x34] ss:$24 sps:$4 sm:$0xff]   ;;  %v11596_v10 = vld [vmem:[#allocation6 + $0x40] ss:$24 sps:$4 sm:$0xff]  }
  0x6d   :  { %304 = vperm.xlu0 %11532, %v301_v13   ;;  %v13404_v11 = vld [vmem:[#allocation9 + $0x30] ss:$24 sps:$4 sm:$0xff]   ;;  %v11604_v13 = vld [vmem:[#allocation6 + $0x74] ss:$24 sps:$4 sm:$0xff]   ;;  %v13414_v20 = vld [vmem:[#allocation9 + $0x60] ss:$24 sps:$4 sm:$0xff]  }
  0x6e   :  { %11504 = vmatpush3.bf16.msra.mxu0 %v11538_v14  ;;  %642 = vmatpush1.bf16.msra.mxu1 %v11565_v25  ;;  %v13407_v14 = vld [vmem:[#allocation9 + $0x64] ss:$24 sps:$4 sm:$0xff]   ;;  %v11602_v19 = vld [vmem:[#allocation6 + $0x70] ss:$24 sps:$4 sm:$0xff]   ;;  %v11608_v24 = vld [vmem:[#allocation6 + $0xa0] ss:$24 sps:$4 sm:$0xff]  }
  0x6f   :  { %11505 = vmatprep.subr.bf16.mxu0 %v11539_v18  ;;  %643 = vmatprep.subr.bf16.mxu1 %v11566_v27  ;;  %v11610_v22 = vld [vmem:[#allocation6 + $0xa4] ss:$24 sps:$4 sm:$0xff]   ;;  %v13424_v25 = vld [vmem:[#allocation9 + $0x90] ss:$24 sps:$4 sm:$0xff]  }
  0x70   :  { %v13427_v27 = vld [vmem:[#allocation9 + $0xc4] ss:$24 sps:$4 sm:$0xff]  }
  0x71   :  { %v13608_v33 = vld [vmem:[#allocation9 + $0x24c] ss:$24 sps:$4 sm:$0xff]  }
  0x72   :  { %11506 = vmatpush3.bf16.msra.mxu0 %v11539_v18  ;;  %644 = vmatpush1.bf16.msra.mxu1 %v11571_v28  ;;  %v11614_v28 = vld [vmem:[#allocation6 + $0xd0] ss:$24 sps:$4 sm:$0xff]  }
  0x73   :  { %11507 = vmatprep.subr.bf16.mxu0 %v11540_v21  ;;  %645 = vmatprep.subr.bf16.mxu1 %v11572_v29  ;;  %v13432_v29 = vld [vmem:[#allocation9 + $0xc0] ss:$24 sps:$4 sm:$0xff]  }
  0x76   :  { %11508 = vmatpush3.bf16.msra.mxu0 %v11540_v21  ;;  %646 = vmatpush1.bf16.msra.mxu1 %v11577_v30  ;;  %v11622_v30 = vld [vmem:[#allocation6 + $0x104] ss:$24 sps:$4 sm:$0xff]  }
  0x77   :  { %11509 = vmatprep.subr.bf16.mxu0 %v11541_v23  ;;  %647 = vmatprep.subr.bf16.mxu1 %v11578_v31  ;;  %v13435_v31 = vld [vmem:[#allocation9 + $0xf4] ss:$24 sps:$4 sm:$0xff]  }
  0x7a   :  { %11510 = vmatpush3.bf16.msra.mxu0 %v11541_v23  ;;  %648 = vmatpush1.bf16.msra.mxu1 %v11583_v32  ;;  %v13419_v23 = vld [vmem:[#allocation9 + $0x94] ss:$24 sps:$4 sm:$0xff]   ;;  %v11620_v32 = vld [vmem:[#allocation6 + $0x100] ss:$24 sps:$4 sm:$0xff]  }
  0x7b   :  { %708 = vmatprep.subr.bf16.mxu0 %v11546_v26  ;;  %649 = vmatprep.subr.bf16.mxu1 %v11584_v57  ;;  %v11616_v26 = vld [vmem:[#allocation6 + $0xd4] ss:$24 sps:$4 sm:$0xff]  }
  0x7c   :  { %v13494_v57 = vld [vmem:[#allocation9 + $0x9c] ss:$24 sps:$4 sm:$0xff]  }
  0x7e   :  { %650 = vmatpush1.bf16.msra.mxu1 %v11589_v60  ;;  %v13505_v60 = vld [vmem:[#allocation9 + $0x244] ss:$24 sps:$4 sm:$0xff]  }
  0x7f   :  { %781 = vmatprep.subr.bf16.mxu1 %v11592_v61  ;;  %v13507_v61 = vld [vmem:[#allocation9 + $0xcc] ss:$24 sps:$4 sm:$0xff]  }
  0xdb   :  { %v130_v34 = vpop.permute.xlu1 %129 }
  0xdc   :  { %v124_v35 = vpop.permute.xlu0 %123  ;;  %vm150_vm0 = vcmp.eq.s32.totalorder %v130_v34, %v147_v36  ;;  %v13440_v34 = vld [vmem:[#allocation9 + $0xf0] ss:$24 sps:$4 sm:$0xff]  }
  0xdd   :  { %vm148_vm3 = vcmp.eq.s32.totalorder %v124_v35, %v147_v36  ;;  %v11628_v35 = vld [vmem:[#allocation6 + $0x134] ss:$24 sps:$4 sm:$0xff]  }
  0xdf   :  { %v133_v37 = vpop.permute.xlu1 %132 }
  0xe0   :  { %v127_v38 = vpop.permute.xlu0 %126  ;;  %vm151_vm1 = vcmp.eq.s32.totalorder %v133_v37, %v147_v36  ;;  %v11626_v37 = vld [vmem:[#allocation6 + $0x130] ss:$24 sps:$4 sm:$0xff]  }
  0xe1   :  { %vm149_vm2 = vcmp.eq.s32.totalorder %v127_v38, %v147_v36  ;;  %vm10220_vm4 = vmpackc.low %vm151_vm1, %vm150_vm0  ;;  %v13448_v38 = vld [vmem:[#allocation9 + $0x120] ss:$24 sps:$4 sm:$0xff]  }
  0xe2   :  { %vm10218_vm5 = vmpackc.low %vm149_vm2, %vm148_vm3 }
  0xe3   :  { %11511 = vmatprep.mubr.msk.bf16.mxu0 %vm10218_vm5, %v13175_v41  ;;  %v139_v42 = vpop.permute.xlu1 %138 }
  0xe4   :  { %v136_v43 = vpop.permute.xlu0 %135  ;;  %vm153_vm6 = vcmp.eq.s32.totalorder %v139_v42, %v147_v36  ;;  %11512 = vmatmul.mubr.msk.bf16.vlgmr.msra.gmra.mrb[0].mxu0 %vm10220_vm4, %v13175_v41  ;;  %v13456_v42 = vld [vmem:[#allocation9 + $0x150] ss:$24 sps:$4 sm:$0xff]  }
  0xe5   :  { %vm152_vm7 = vcmp.eq.s32.totalorder %v136_v43, %v147_v36  ;;  %709 = vmatpush1.bf16.msra.mxu0 %v11544_v39  ;;  %v11634_v39 = vld [vmem:[#allocation6 + $0x164] ss:$24 sps:$4 sm:$0xff]  }
  0xe6   :  { %vm10222_vm8 = vmpackc.low %vm153_vm6, %vm152_vm7  ;;  %710 = vmatprep.subr.bf16.mxu0 %v11552_v40  ;;  %v13451_v40 = vld [vmem:[#allocation9 + $0x154] ss:$24 sps:$4 sm:$0xff]   ;;  %v11640_v43 = vld [vmem:[#allocation9 + $0x184] ss:$24 sps:$4 sm:$0xff]  }
  0xe7   :  { %11515 = vmatprep.mubr.msk.bf16.mxu0 %vm10222_vm8, %v13175_v41  ;;  %v145_v46 = vpop.permute.xlu1 %144 }
  0xe8   :  { %v142_v47 = vpop.permute.xlu0 %141  ;;  %vm155_vm9 = vcmp.eq.s32.totalorder %v145_v46, %v147_v36  ;;  %v11638_v46 = vld [vmem:[#allocation9 + $0x180] ss:$24 sps:$4 sm:$0xff]  }
  0xe9   :  { %vm154_vm10 = vcmp.eq.s32.totalorder %v142_v47, %v147_v36  ;;  %711 = vmatpush1.bf16.msra.mxu0 %v11550_v44  ;;  %v13443_v36 = vld [vmem:[#allocation9 + $0x124] ss:$24 sps:$4 sm:$0xff]   ;;  %v13464_v47 = vld [vmem:[#allocation9 + $0x8] ss:$24 sps:$4 sm:$0xff]  }
  0xea   :  { %vm10224_vm11 = vmpackc.low %vm155_vm9, %vm154_vm10  ;;  %712 = vmatprep.subr.bf16.mxu0 %v11558_v45  ;;  %v13459_v44 = vld [vmem:[#allocation9 + $0xc] ss:$24 sps:$4 sm:$0xff]   ;;  %v17200_v45 = vmov 0.0|0.0  }
  0xec   :  { %11516 = vmatmul.mubr.msk.bf16.gmra.mrb[4].mxu0 %vm10224_vm11, %v13175_v41  ;;  %v11632_v41 = vld [vmem:[#allocation6 + $0x160] ss:$24 sps:$4 sm:$0xff]  }
  0xed   :  { %713 = vmatpush1.bf16.msra.mxu0 %v11556_v48  ;;  %740 = vmatprep.mubr.bf16.mxu0 %v13174_v0  ;;  %v13467_v48 = vld [vmem:[#allocation9 + $0x1b4] ss:$24 sps:$4 sm:$0xff]  }
  0xee   :  { %714 = vmatprep.subr.bf16.mxu0 %v11564_v49  ;;  %v13469_v49 = vld [vmem:[#allocation9 + $0x3c] ss:$24 sps:$4 sm:$0xff]  }
  0xf1   :  { %715 = vmatpush1.bf16.msra.mxu0 %v11562_v50  ;;  %v13473_v50 = vld [vmem:[#allocation9 + $0x1b0] ss:$24 sps:$4 sm:$0xff]  }
  0xf2   :  { %716 = vmatprep.subr.bf16.mxu0 %v11570_v51  ;;  %v13475_v51 = vld [vmem:[#allocation9 + $0x38] ss:$24 sps:$4 sm:$0xff]  }
  0xf5   :  { %717 = vmatpush1.bf16.msra.mxu0 %v11568_v52  ;;  %v13479_v52 = vld [vmem:[#allocation9 + $0x1e4] ss:$24 sps:$4 sm:$0xff]  }
  0xf6   :  { %718 = vmatprep.subr.bf16.mxu0 %v11576_v53  ;;  %v13481_v53 = vld [vmem:[#allocation9 + $0x6c] ss:$24 sps:$4 sm:$0xff]  }
  0xf9   :  { %719 = vmatpush1.bf16.msra.mxu0 %v11574_v54  ;;  %v13486_v54 = vld [vmem:[#allocation9 + $0x1e0] ss:$24 sps:$4 sm:$0xff]  }
  0xfa   :  { %720 = vmatprep.subr.bf16.mxu0 %v11582_v55  ;;  %v13488_v55 = vld [vmem:[#allocation9 + $0x68] ss:$24 sps:$4 sm:$0xff]  }
  0xfd   :  { %721 = vmatpush1.bf16.msra.mxu0 %v11580_v56  ;;  %v13492_v56 = vld [vmem:[#allocation9 + $0x214] ss:$24 sps:$4 sm:$0xff]  }
  0xfe   :  { %722 = vmatprep.subr.bf16.mxu0 %v11588_v58  ;;  %v13499_v58 = vld [vmem:[#allocation9 + $0x210] ss:$24 sps:$4 sm:$0xff]  }
 0x101   :  { %723 = vmatpush1.bf16.msra.mxu0 %v11586_v59  ;;  %v13501_v59 = vld [vmem:[#allocation9 + $0x98] ss:$24 sps:$4 sm:$0xff]  }
 0x102   :  { %1511 = vmatprep.subr.bf16.mxu0 %v13390_v62 }
 0x1b7   :  { %v11513_v63 = vpop.f32.mrb[0].mxu0 }
 0x1b8   :  { %v266_v1 = vpop.f32.mrb[1].mxu0 }
 0x1b9   :  { %v11514_v2 = vpop.f32.mrb[2].mxu0 }
 0x1ba   :  { %v13393_v3 = vpack.c.bf16 %v11514_v2, %v11513_v63  ;;  %v269_v4 = vpop.f32.mrb[3].mxu0  ;;  %v13512_v63 = vld [vmem:[#allocation9 + $0x240] ss:$24 sps:$4 sm:$0xff]   ;;  %v13518_v2 = vld [vmem:[#allocation9 + $0x274] ss:$24 sps:$4 sm:$0xff]  }
 0x1bb   :  { %v13397_v7 = vpack.c.bf16 %v269_v4, %v266_v1  ;;  %v13514_v1 = vld [vmem:[#allocation9 + $0xc8] ss:$24 sps:$4 sm:$0xff]  }
 0x1bc   :  { %v13525_v4 = vld [vmem:[#allocation9 + $0x270] ss:$24 sps:$4 sm:$0xff]  }
 0x1bd   :  { %668 = vmatmul.mubr.bf16.vlgmr.msra.gmra.mrb[0].mxu1 %v13397_v7  ;;  %741 = vmatmul.mubr.bf16.vlgmr.msra.gmra.mrb[8].mxu0 %v13397_v7  ;;  %17555 = vst [vmem:[#allocation20_spill] sm:$0xff] %v13525_v4 }
 0x1be   :  { %782 = vmatpush1.bf16.msra.mxu1 %v11590_v5  ;;  %1512 = vmatpush1.bf16.msra.mxu0 %v13395_v6  ;;  %v13527_v5 = vld [vmem:[#allocation9 + $0xf8] ss:$24 sps:$4 sm:$0xff]  }
 0x1bf   :  { %v11517_v12 = vpop.f32.mrb[4].mxu0  ;;  %783 = vmatprep.subr.bf16.mxu1 %v11598_v8  ;;  %1513 = vmatprep.subr.bf16.mxu0 %v13399_v9  ;;  %v13533_v8 = vld [vmem:[#allocation9 + $0x12c] ss:$24 sps:$4 sm:$0xff]  }
 0x1c0   :  { %v282_v15 = vpop.f32.mrb[5].mxu0  ;;  %677 = vmatprep.mubr.bf16.mxu1 %v13174_v0  ;;  %750 = vmatprep.mubr.bf16.mxu0 %v13174_v0 }
 0x1c1   :  { %v11518_v16 = vpop.f32.mrb[6].mxu0 }
 0x1c2   :  { %v13411_v17 = vpack.c.bf16 %v11518_v16, %v11517_v12  ;;  %784 = vmatpush1.bf16.msra.mxu1 %v11596_v10  ;;  %1514 = vmatpush1.bf16.msra.mxu0 %v13404_v11  ;;  %v285_v18 = vpop.f32.mrb[7].mxu0  ;;  %v13538_v10 = vld [vmem:[#allocation9 + $0x2a0] ss:$24 sps:$4 sm:$0xff]  }
 0x1c3   :  { %v13416_v21 = vpack.c.bf16 %v285_v18, %v282_v15  ;;  %785 = vmatprep.subr.bf16.mxu1 %v11604_v13  ;;  %1515 = vmatprep.subr.bf16.mxu0 %v13407_v14  ;;  %17557 = vst [vmem:[#allocation22_spill] sm:$0xff] %v13538_v10  ;;  %v13540_v12 = vld [vmem:[#allocation9 + $0x128] ss:$24 sps:$4 sm:$0xff]   ;;  %v13544_v13 = vld [vmem:[#allocation9 + $0x2d4] ss:$24 sps:$4 sm:$0xff]  }
 0x1c4   :  { %17558 = vst [vmem:[#allocation23_spill] sm:$0xff] %v13544_v13  ;;  %v13546_v15 = vld [vmem:[#allocation9 + $0x15c] ss:$24 sps:$4 sm:$0xff]   ;;  %v13553_v16 = vld [vmem:[#allocation9 + $0x158] ss:$24 sps:$4 sm:$0xff]  }
 0x1c5   :  { %678 = vmatmul.mubr.bf16.gmra.mrb[4].mxu1 %v13393_v3  ;;  %751 = vmatmul.mubr.bf16.gmra.mrb[12].mxu0 %v13393_v3  ;;  %v13557_v18 = vld [vmem:[#allocation9 + $0x18c] ss:$24 sps:$4 sm:$0xff]  }
 0x1c6   :  { %786 = vmatpush1.bf16.msra.mxu1 %v11602_v19  ;;  %1516 = vmatpush1.bf16.msra.mxu0 %v13414_v20  ;;  %v13559_v19 = vld [vmem:[#allocation9 + $0x14] ss:$24 sps:$4 sm:$0xff]  }
 0x1c7   :  { %787 = vmatprep.subr.bf16.mxu1 %v11610_v22  ;;  %1517 = vmatprep.subr.bf16.mxu0 %v13419_v23  ;;  %17560 = vst [vmem:[#allocation25_spill] sm:$0xff] %v13559_v19  ;;  %v13570_v22 = vld [vmem:[#allocation9 + $0x1bc] ss:$24 sps:$4 sm:$0xff]  }
 0x1c8   :  { %687 = vmatprep.mubr.bf16.mxu1 %v13174_v0  ;;  %760 = vmatprep.mubr.bf16.mxu0 %v13174_v0 }
 0x1ca   :  { %788 = vmatpush1.bf16.msra.mxu1 %v11608_v24  ;;  %1518 = vmatpush1.bf16.msra.mxu0 %v13424_v25  ;;  %v13572_v24 = vld [vmem:[#allocation9 + $0x44] ss:$24 sps:$4 sm:$0xff]  }
 0x1cb   :  { %789 = vmatprep.subr.bf16.mxu1 %v11616_v26  ;;  %1519 = vmatprep.subr.bf16.mxu0 %v13427_v27  ;;  %17562 = vst [vmem:[#allocation27_spill] sm:$0xff] %v13572_v24  ;;  %v13577_v26 = vld [vmem:[#allocation9 + $0x1b8] ss:$24 sps:$4 sm:$0xff]  }
 0x1cd   :  { %688 = vmatmul.mubr.bf16.gmra.mrb[8].mxu1 %v13416_v21  ;;  %761 = vmatmul.mubr.bf16.gmra.mrb[16].mxu0 %v13416_v21 }
 0x1ce   :  { %790 = vmatpush1.bf16.msra.mxu1 %v11614_v28  ;;  %1520 = vmatpush1.bf16.msra.mxu0 %v13432_v29  ;;  %v13579_v28 = vld [vmem:[#allocation9 + $0x40] ss:$24 sps:$4 sm:$0xff]  }
 0x1cf   :  { %791 = vmatprep.subr.bf16.mxu1 %v11622_v30  ;;  %1521 = vmatprep.subr.bf16.mxu0 %v13435_v31  ;;  %17563 = vst [vmem:[#allocation28_spill] sm:$0xff] %v13579_v28  ;;  %v13583_v30 = vld [vmem:[#allocation9 + $0x1ec] ss:$24 sps:$4 sm:$0xff]  }
 0x1d0   :  { %697 = vmatprep.mubr.bf16.mxu1 %v13174_v0  ;;  %770 = vmatprep.mubr.bf16.mxu0 %v13174_v0 }
 0x1d2   :  { %792 = vmatpush1.bf16.msra.mxu1 %v11620_v32  ;;  %1522 = vmatpush1.bf16.msra.mxu0 %v13440_v34  ;;  %v13585_v32 = vld [vmem:[#allocation9 + $0x74] ss:$24 sps:$4 sm:$0xff]  }
 0x1d3   :  { %793 = vmatprep.subr.bf16.mxu1 %v11628_v35  ;;  %1523 = vmatprep.subr.bf16.mxu0 %v13443_v36  ;;  %17564 = vst [vmem:[#allocation29_spill] sm:$0xff] %v13585_v32  ;;  %v13590_v35 = vld [vmem:[#allocation9 + $0x1e8] ss:$24 sps:$4 sm:$0xff]  }
 0x1d5   :  { %698 = vmatmul.mubr.bf16.gmra.mrb[12].mxu1 %v13411_v17  ;;  %771 = vmatmul.mubr.bf16.gmra.mrb[20].mxu0 %v13411_v17 }
 0x1d6   :  { %794 = vmatpush1.bf16.msra.mxu1 %v11626_v37  ;;  %1524 = vmatpush1.bf16.msra.mxu0 %v13448_v38  ;;  %v13592_v37 = vld [vmem:[#allocation9 + $0x70] ss:$24 sps:$4 sm:$0xff]  }
 0x1d7   :  { %795 = vmatprep.subr.bf16.mxu1 %v11634_v39  ;;  %1525 = vmatprep.subr.bf16.mxu0 %v13451_v40  ;;  %17565 = vst [vmem:[#allocation30_spill] sm:$0xff] %v13592_v37  ;;  %v13596_v39 = vld [vmem:[#allocation9 + $0x21c] ss:$24 sps:$4 sm:$0xff]  }
 0x1d8   :  { %813 = vmatprep.mubr.bf16.mxu1 %v13174_v0  ;;  %1543 = vmatprep.mubr.bf16.mxu0 %v17200_v45 }
 0x1da   :  { %796 = vmatpush1.bf16.msra.mxu1 %v11632_v41  ;;  %1526 = vmatpush1.bf16.msra.mxu0 %v13456_v42  ;;  %v13598_v41 = vld [vmem:[#allocation9 + $0xa4] ss:$24 sps:$4 sm:$0xff]  }
 0x1db   :  { %1527 = vmatprep.subr.bf16.mxu0 %v11640_v43  ;;  %1552 = vmatprep.subr.bf16.mxu1 %v13459_v44  ;;  %17566 = vst [vmem:[#allocation31_spill] sm:$0xff] %v13598_v41  ;;  %v13602_v43 = vld [vmem:[#allocation9 + $0x218] ss:$24 sps:$4 sm:$0xff]  }
 0x1dd   :  { %814 = vmatmul.mubr.bf16.vlgmr.msra.gmra.mrb[16].mxu1 %v13397_v7  ;;  %v13531_v7 = vld [vmem:[#allocation9 + $0x2a4] ss:$24 sps:$4 sm:$0xff]  }
 0x1de   :  { %1528 = vmatpush1.bf16.msra.mxu0 %v11638_v46  ;;  %1553 = vmatpush1.bf16.msra.mxu1 %v13464_v47  ;;  %17556 = vst [vmem:[#allocation21_spill] sm:$0xff] %v13531_v7  ;;  %v13604_v46 = vld [vmem:[#allocation9 + $0xa0] ss:$24 sps:$4 sm:$0xff]  }
 0x1df   :  { %1529 = vmatprep.subr.bf16.mxu0 %v13467_v48  ;;  %1554 = vmatprep.subr.bf16.mxu1 %v13469_v49  ;;  %17567 = vst [vmem:[#allocation32_spill] sm:$0xff] %v13604_v46 }
 0x1e0   :  { %823 = vmatprep.mubr.bf16.mxu1 %v13174_v0 }
 0x1e2   :  { %1530 = vmatpush1.bf16.msra.mxu0 %v13473_v50  ;;  %1555 = vmatpush1.bf16.msra.mxu1 %v13475_v51 }
 0x1e3   :  { %1531 = vmatprep.subr.bf16.mxu0 %v13479_v52  ;;  %1556 = vmatprep.subr.bf16.mxu1 %v13481_v53 }
 0x1e5   :  { %824 = vmatmul.mubr.bf16.gmra.mrb[20].mxu1 %v13393_v3  ;;  %v13520_v3 = vld [vmem:[#allocation9 + $0xfc] ss:$24 sps:$4 sm:$0xff]  }
 0x1e6   :  { %1532 = vmatpush1.bf16.msra.mxu0 %v13486_v54  ;;  %1557 = vmatpush1.bf16.msra.mxu1 %v13488_v55 }
 0x1e7   :  { %1533 = vmatprep.subr.bf16.mxu0 %v13492_v56  ;;  %1558 = vmatprep.subr.bf16.mxu1 %v13494_v57 }
 0x1e8   :  { %833 = vmatprep.mubr.bf16.mxu1 %v13174_v0 }
 0x1ea   :  { %1534 = vmatpush1.bf16.msra.mxu0 %v13499_v58  ;;  %1559 = vmatpush1.bf16.msra.mxu1 %v13501_v59 }
 0x1eb   :  { %1535 = vmatprep.subr.bf16.mxu0 %v13505_v60  ;;  %1560 = vmatprep.subr.bf16.mxu1 %v13507_v61 }
 0x1ed   :  { %834 = vmatmul.mubr.bf16.gmra.mrb[24].mxu1 %v13416_v21  ;;  %v13566_v21 = vld [vmem:[#allocation9 + $0x10] ss:$24 sps:$4 sm:$0xff]  }
 0x1ee   :  { %1536 = vmatpush1.bf16.msra.mxu0 %v13512_v63  ;;  %1561 = vmatpush1.bf16.msra.mxu1 %v13514_v1  ;;  %17561 = vst [vmem:[#allocation26_spill] sm:$0xff] %v13566_v21 }
 0x1ef   :  { %1537 = vmatprep.subr.bf16.mxu0 %v13518_v2  ;;  %1562 = vmatprep.subr.bf16.mxu1 %v13520_v3 }
 0x1f0   :  { %843 = vmatprep.mubr.bf16.mxu1 %v13174_v0  ;;  %v13551_v0 = vld [vmem:[#allocation9 + $0x2d0] ss:$24 sps:$4 sm:$0xff]  }
 0x1f1   :  { %17559 = vst [vmem:[#allocation24_spill] sm:$0xff] %v13551_v0 }
 0x1f2   :  { %1538 = vmatpush1.bf16.msra.mxu0 %v13525_v4  ;;  %1563 = vmatpush1.bf16.msra.mxu1 %v13527_v5  ;;  %v13668_v4 = vld [vmem:[#allocation9 + $0x1c0] ss:$24 sps:$4 sm:$0xff]  }
 0x1f3   :  { %1539 = vmatprep.subr.bf16.mxu0 %v13531_v7  ;;  %1564 = vmatprep.subr.bf16.mxu1 %v13533_v8  ;;  %v13663_v7 = vld [vmem:[#allocation9 + $0x1c4] ss:$24 sps:$4 sm:$0xff]  }
 0x1f5   :  { %844 = vmatmul.mubr.bf16.gmra.mrb[28].mxu1 %v13411_v17  ;;  %v13564_v17 = vld [vmem:[#allocation9 + $0x188] ss:$24 sps:$4 sm:$0xff]  }
 0x1f6   :  { %1540 = vmatpush1.bf16.msra.mxu0 %v13538_v10  ;;  %1565 = vmatpush1.bf16.msra.mxu1 %v13540_v12  ;;  %v13652_v10 = vld [vmem:[#allocation9 + $0x160] ss:$24 sps:$4 sm:$0xff]  }
 0x1f7   :  { %1541 = vmatprep.subr.bf16.mxu0 %v13544_v13  ;;  %1566 = vmatprep.subr.bf16.mxu1 %v13546_v15  ;;  %v13646_v13 = vld [vmem:[#allocation9 + $0x164] ss:$24 sps:$4 sm:$0xff]  }
 0x1f8   :  { %1584 = vmatprep.mubr.bf16.mxu1 %v17200_v45  ;;  %17574 = vst [vmem:[#allocation39_spill] sm:$0xff] %v13646_v13 }
 0x1fa   :  { %1542 = vmatpush1.bf16.msra.mxu0 %v13551_v0  ;;  %1567 = vmatpush1.bf16.msra.mxu1 %v13553_v16  ;;  %v13640_v0 = vld [vmem:[#allocation9 + $0x130] ss:$24 sps:$4 sm:$0xff]  }
 0x1fb   :  { %1568 = vmatprep.subr.bf16.mxu1 %v13557_v18  ;;  %1593 = vmatprep.subr.bf16.mxu0 %v13559_v19  ;;  %v13634_v19 = vld [vmem:[#allocation9 + $0x134] ss:$24 sps:$4 sm:$0xff]   ;;  %17573 = vst [vmem:[#allocation38_spill] sm:$0xff] %v13640_v0 }
 0x1fc   :  { %17572 = vst [vmem:[#allocation37_spill] sm:$0xff] %v13634_v19 }
 0x1fd   :  { %1544 = vmatmul.mubr.bf16.vlgmr.msra.gmra.mrb[24].mxu0 %v17200_v45 }
 0x1fe   :  { %1569 = vmatpush1.bf16.msra.mxu1 %v13564_v17  ;;  %1594 = vmatpush1.bf16.msra.mxu0 %v13566_v21  ;;  %v13628_v21 = vld [vmem:[#allocation9 + $0x100] ss:$24 sps:$4 sm:$0xff]  }
 0x1ff   :  { %1570 = vmatprep.subr.bf16.mxu1 %v13570_v22  ;;  %1595 = vmatprep.subr.bf16.mxu0 %v13572_v24  ;;  %v13622_v24 = vld [vmem:[#allocation9 + $0x104] ss:$24 sps:$4 sm:$0xff]   ;;  %17571 = vst [vmem:[#allocation36_spill] sm:$0xff] %v13628_v21 }
 0x200   :  { %1625 = vmatprep.mubr.bf16.mxu0 %v17200_v45  ;;  %v13610_v45 = vld [vmem:[#allocation9 + $0xd4] ss:$24 sps:$4 sm:$0xff]   ;;  %17570 = vst [vmem:[#allocation35_spill] sm:$0xff] %v13622_v24 }
 0x201   :  { %17568 = vst [vmem:[#allocation33_spill] sm:$0xff] %v13610_v45 }
 0x202   :  { %1571 = vmatpush1.bf16.msra.mxu1 %v13577_v26  ;;  %1596 = vmatpush1.bf16.msra.mxu0 %v13579_v28  ;;  %v13616_v28 = vld [vmem:[#allocation9 + $0xd0] ss:$24 sps:$4 sm:$0xff]  }
 0x203   :  { %1572 = vmatprep.subr.bf16.mxu1 %v13583_v30  ;;  %1597 = vmatprep.subr.bf16.mxu0 %v13585_v32  ;;  %v13614_v32 = vld [vmem:[#allocation9 + $0x248] ss:$24 sps:$4 sm:$0xff]   ;;  %17569 = vst [vmem:[#allocation34_spill] sm:$0xff] %v13616_v28 }
 0x206   :  { %1573 = vmatpush1.bf16.msra.mxu1 %v13590_v35  ;;  %1598 = vmatpush1.bf16.msra.mxu0 %v13592_v37  ;;  %v13620_v37 = vld [vmem:[#allocation9 + $0x27c] ss:$24 sps:$4 sm:$0xff]  }
 0x207   :  { %1574 = vmatprep.subr.bf16.mxu1 %v13596_v39  ;;  %1599 = vmatprep.subr.bf16.mxu0 %v13598_v41  ;;  %v13626_v41 = vld [vmem:[#allocation9 + $0x278] ss:$24 sps:$4 sm:$0xff]  }
 0x20a   :  { %1575 = vmatpush1.bf16.msra.mxu1 %v13602_v43  ;;  %1600 = vmatpush1.bf16.msra.mxu0 %v13604_v46  ;;  %v13632_v46 = vld [vmem:[#allocation9 + $0x2ac] ss:$24 sps:$4 sm:$0xff]  }
 0x20b   :  { %1576 = vmatprep.subr.bf16.mxu1 %v13608_v33  ;;  %1601 = vmatprep.subr.bf16.mxu0 %v13610_v45  ;;  %v13638_v45 = vld [vmem:[#allocation9 + $0x2a8] ss:$24 sps:$4 sm:$0xff]  }
 0x20e   :  { %1577 = vmatpush1.bf16.msra.mxu1 %v13614_v32  ;;  %1602 = vmatpush1.bf16.msra.mxu0 %v13616_v28  ;;  %v13644_v28 = vld [vmem:[#allocation9 + $0x2dc] ss:$24 sps:$4 sm:$0xff]  }
 0x20f   :  { %1578 = vmatprep.subr.bf16.mxu1 %v13620_v37  ;;  %1603 = vmatprep.subr.bf16.mxu0 %v13622_v24  ;;  %v13650_v24 = vld [vmem:[#allocation9 + $0x2d8] ss:$24 sps:$4 sm:$0xff]  }
 0x212   :  { %1579 = vmatpush1.bf16.msra.mxu1 %v13626_v41  ;;  %1604 = vmatpush1.bf16.msra.mxu0 %v13628_v21  ;;  %v13656_v21 = vld [vmem:[#allocation9 + $0x194] ss:$24 sps:$4 sm:$0xff]  }
 0x213   :  { %1580 = vmatprep.subr.bf16.mxu1 %v13632_v46  ;;  %1605 = vmatprep.subr.bf16.mxu0 %v13634_v19  ;;  %17575 = vst [vmem:[#allocation40_spill] sm:$0xff] %v13656_v21  ;;  %v13660_v19 = vld [vmem:[#allocation9 + $0x190] ss:$24 sps:$4 sm:$0xff]  }
 0x216   :  { %1581 = vmatpush1.bf16.msra.mxu1 %v13638_v45  ;;  %1606 = vmatpush1.bf16.msra.mxu0 %v13640_v0  ;;  %v17576_v0 = vmov 0.0|0.0  }
 0x217   :  { %1582 = vmatprep.subr.bf16.mxu1 %v13644_v28  ;;  %1607 = vmatprep.subr.bf16.mxu0 %v13646_v13  ;;  %v13672_v13 = vld [vmem:[#allocation9 + $0x1f4] ss:$24 sps:$4 sm:$0xff]  }
 0x21a   :  { %1583 = vmatpush1.bf16.msra.mxu1 %v13650_v24  ;;  %1608 = vmatpush1.bf16.msra.mxu0 %v13652_v10 }
 0x21b   :  { %1609 = vmatprep.subr.bf16.mxu0 %v13656_v21  ;;  %2262 = vmatprep.subr.bf16.mxu1 %v13390_v62  ;;  %v13676_v21 = vld [vmem:[#allocation9 + $0x1f0] ss:$24 sps:$4 sm:$0xff]   ;;  %v13680_v62 = vld [vmem:[#allocation9 + $0x224] ss:$24 sps:$4 sm:$0xff]  }
 0x21d   :  { %1585 = vmatmul.mubr.bf16.vlgmr.msra.gmra.mrb[32].mxu1 %v17576_v0 }
 0x21e   :  { %1610 = vmatpush1.bf16.msra.mxu0 %v13660_v19  ;;  %2263 = vmatpush1.bf16.msra.mxu1 %v13395_v6  ;;  %v13684_v6 = vld [vmem:[#allocation9 + $0x220] ss:$24 sps:$4 sm:$0xff]  }
 0x21f   :  { %1611 = vmatprep.subr.bf16.mxu0 %v13663_v7  ;;  %2264 = vmatprep.subr.bf16.mxu1 %v13399_v9  ;;  %v13688_v9 = vld [vmem:[#allocation9 + $0x254] ss:$24 sps:$4 sm:$0xff]  }
 0x222   :  { %1612 = vmatpush1.bf16.msra.mxu0 %v13668_v4  ;;  %2265 = vmatpush1.bf16.msra.mxu1 %v13404_v11  ;;  %v13692_v11 = vld [vmem:[#allocation9 + $0x250] ss:$24 sps:$4 sm:$0xff]  }
 0x223   :  { %1613 = vmatprep.subr.bf16.mxu0 %v13672_v13  ;;  %2266 = vmatprep.subr.bf16.mxu1 %v13407_v14  ;;  %v13696_v14 = vld [vmem:[#allocation9 + $0x284] ss:$24 sps:$4 sm:$0xff]  }
 0x226   :  { %1614 = vmatpush1.bf16.msra.mxu0 %v13676_v21  ;;  %2267 = vmatpush1.bf16.msra.mxu1 %v13414_v20  ;;  %v13700_v20 = vld [vmem:[#allocation9 + $0x280] ss:$24 sps:$4 sm:$0xff]  }
 0x227   :  { %1615 = vmatprep.subr.bf16.mxu0 %v13680_v62  ;;  %2268 = vmatprep.subr.bf16.mxu1 %v13419_v23  ;;  %v13704_v23 = vld [vmem:[#allocation9 + $0x2b4] ss:$24 sps:$4 sm:$0xff]  }
 0x22a   :  { %1616 = vmatpush1.bf16.msra.mxu0 %v13684_v6  ;;  %2269 = vmatpush1.bf16.msra.mxu1 %v13424_v25  ;;  %v13708_v25 = vld [vmem:[#allocation9 + $0x2b0] ss:$24 sps:$4 sm:$0xff]  }
 0x22b   :  { %1617 = vmatprep.subr.bf16.mxu0 %v13688_v9  ;;  %2270 = vmatprep.subr.bf16.mxu1 %v13427_v27  ;;  %v13712_v27 = vld [vmem:[#allocation9 + $0x2e4] ss:$24 sps:$4 sm:$0xff]  }
 0x22e   :  { %1618 = vmatpush1.bf16.msra.mxu0 %v13692_v11  ;;  %2271 = vmatpush1.bf16.msra.mxu1 %v13432_v29  ;;  %v13716_v29 = vld [vmem:[#allocation9 + $0x2e0] ss:$24 sps:$4 sm:$0xff]  }
 0x22f   :  { %1619 = vmatprep.subr.bf16.mxu0 %v13696_v14  ;;  %2272 = vmatprep.subr.bf16.mxu1 %v13435_v31  ;;  %v17577_v31 = vlaneseq }
 0x232   :  { %1620 = vmatpush1.bf16.msra.mxu0 %v13700_v20  ;;  %2273 = vmatpush1.bf16.msra.mxu1 %v13440_v34  ;;  %v13757_v34 = vshrl.u32 %v17577_v31, 7 }
 0x233   :  { %1621 = vmatprep.subr.bf16.mxu0 %v13704_v23  ;;  %2274 = vmatprep.subr.bf16.mxu1 %v13443_v36 }
 0x234   :  { %v13760_v36 = vsub.s32 3, %v13757_v34 }
 0x236   :  { %1622 = vmatpush1.bf16.msra.mxu0 %v13708_v25  ;;  %2275 = vmatpush1.bf16.msra.mxu1 %v13448_v38  ;;  %17578 = vst [vmem:[#allocation41_spill] sm:$0xff] %v13760_v36  ;;  %v13768_v38 = vsub.s32 0, %v13757_v34 }
 0x237   :  { %1623 = vmatprep.subr.bf16.mxu0 %v13712_v27  ;;  %2276 = vmatprep.subr.bf16.mxu1 %v13451_v40  ;;  %v13771_v40 = vsub.s32 2, %v13757_v34 }
 0x238   :  { %17579 = vst [vmem:[#allocation42_spill] sm:$0xff] %v13768_v38 }
 0x239   :  { %17580 = vst [vmem:[#allocation43_spill] sm:$0xff] %v13771_v40 }
 0x23a   :  { %1624 = vmatpush1.bf16.msra.mxu0 %v13716_v29  ;;  %2277 = vmatpush1.bf16.msra.mxu1 %v13456_v42  ;;  %v13774_v42 = vsub.s32 1, %v13757_v34 }
 0x23b   :  { %2303 = vmatprep.subr.bf16.mxu0 %v13459_v44 }
 0x23c   :  { %17581 = vst [vmem:[#allocation44_spill] sm:$0xff] %v13774_v42 }
 0x23d   :  { %1626 = vmatmul.mubr.bf16.vlgmr.msra.gmra.mrb[28].mxu0 %v17576_v0  ;;  %v13892_v0 = vsub.s32 5, %v13757_v34 }
 0x23e   :  { %2304 = vmatpush1.bf16.msra.mxu0 %v13464_v47 }
 0x23f   :  { %2305 = vmatprep.subr.bf16.mxu0 %v13469_v49  ;;  %17604 = vst [vmem:[#allocation67_spill] sm:$0xff] %v13892_v0 }
 0x242   :  { %2306 = vmatpush1.bf16.msra.mxu0 %v13475_v51 }
 0x243   :  { %2307 = vmatprep.subr.bf16.mxu0 %v13481_v53 }
 0x246   :  { %2308 = vmatpush1.bf16.msra.mxu0 %v13488_v55 }
 0x247   :  { %2309 = vmatprep.subr.bf16.mxu0 %v13494_v57 }
 0x24a   :  { %2310 = vmatpush1.bf16.msra.mxu0 %v13501_v59 }
 0x24b   :  { %2311 = vmatprep.subr.bf16.mxu0 %v13507_v61 }
 0x24e   :  { %2312 = vmatpush1.bf16.msra.mxu0 %v13514_v1 }
 0x24f   :  { %2313 = vmatprep.subr.bf16.mxu0 %v13520_v3 }
 0x252   :  { %2314 = vmatpush1.bf16.msra.mxu0 %v13527_v5 }
 0x253   :  { %2315 = vmatprep.subr.bf16.mxu0 %v13533_v8 }
 0x256   :  { %2316 = vmatpush1.bf16.msra.mxu0 %v13540_v12 }
 0x257   :  { %2317 = vmatprep.subr.bf16.mxu0 %v13546_v15  ;;  %v13807_v15 = vld [vmem:[#allocation9 + $0x184] ss:$24 sps:$4 sm:$0xff]  }
 0x258   :  { %2278 = vmatprep.subr.bf16.mxu1 %v13807_v15 }
 0x25a   :  { %2318 = vmatpush1.bf16.msra.mxu0 %v13553_v16 }
 0x25b   :  { %2319 = vmatprep.subr.bf16.mxu0 %v13557_v18 }
 0x25e   :  { %2320 = vmatpush1.bf16.msra.mxu0 %v13564_v17  ;;  %v13815_v17 = vld [vmem:[#allocation9 + $0x180] ss:$24 sps:$4 sm:$0xff]  }
 0x25f   :  { %2321 = vmatprep.subr.bf16.mxu0 %v13570_v22  ;;  %2279 = vmatpush1.bf16.msra.mxu1 %v13815_v17 }
 0x260   :  { %2280 = vmatprep.subr.bf16.mxu1 %v13467_v48 }
 0x262   :  { %2322 = vmatpush1.bf16.msra.mxu0 %v13577_v26 }
 0x263   :  { %2323 = vmatprep.subr.bf16.mxu0 %v13583_v30  ;;  %2281 = vmatpush1.bf16.msra.mxu1 %v13473_v50 }
 0x264   :  { %2282 = vmatprep.subr.bf16.mxu1 %v13479_v52 }
 0x266   :  { %2324 = vmatpush1.bf16.msra.mxu0 %v13590_v35 }
 0x267   :  { %2325 = vmatprep.subr.bf16.mxu0 %v13596_v39  ;;  %2283 = vmatpush1.bf16.msra.mxu1 %v13486_v54 }
 0x268   :  { %2284 = vmatprep.subr.bf16.mxu1 %v13492_v56 }
 0x26a   :  { %2326 = vmatpush1.bf16.msra.mxu0 %v13602_v43 }
 0x26b   :  { %2327 = vmatprep.subr.bf16.mxu0 %v13608_v33  ;;  %v13765_v33 = vld [vmem:[%s17189_s4] sm:$0x3f]  ;;  %2285 = vmatpush1.bf16.msra.mxu1 %v13499_v58 }
 0x26c   :  { %v13778_v44 = vrot.slane %v13765_v33, %v13760_v36  ;;  %v13786_v49 = vrot.slane %v13765_v33, %v13768_v38  ;;  %v13790_v51 = vrot.slane %v13765_v33, %v13771_v40  ;;  %v13796_v57 = vrot.slane %v13765_v33, %v13774_v42  ;;  %2286 = vmatprep.subr.bf16.mxu1 %v13505_v60 }
 0x26e   :  { %2328 = vmatpush1.bf16.msra.mxu0 %v13614_v32 }
 0x26f   :  { %2329 = vmatprep.subr.bf16.mxu0 %v13620_v37  ;;  %2287 = vmatpush1.bf16.msra.mxu1 %v13512_v63 }
 0x270   :  { %2288 = vmatprep.subr.bf16.mxu1 %v13518_v2 }
 0x272   :  { %2330 = vmatpush1.bf16.msra.mxu0 %v13626_v41 }
 0x273   :  { %2331 = vmatprep.subr.bf16.mxu0 %v13632_v46 }
 0x276   :  { %2332 = vmatpush1.bf16.msra.mxu0 %v13638_v45 }
 0x277   :  { %2333 = vmatprep.subr.bf16.mxu0 %v13644_v28 }
 0x27a   :  { %2334 = vmatpush1.bf16.msra.mxu0 %v13650_v24 }
 0x290   :  { %v13780_v45 = vpop.f32.mrb[0].mxu1  ;;  %v13782_v47 = vpop.f32.mrb[8].mxu0 }
 0x291   :  { %v13792_v53 = vpop.f32.mrb[1].mxu1  ;;  %v744_v55 = vpop.f32.mrb[9].mxu0 }
 0x292   :  { %v13799_v59 = vadd.f32 %v744_v55, %v13778_v44  ;;  %v673_v61 = vpop.f32.mrb[2].mxu1  ;;  %v746_v1 = vpop.f32.mrb[10].mxu0 }
 0x293   :  { %v13802_v3 = vadd.f32 %v673_v61, %v13786_v49  ;;  %v13805_v5 = vadd.f32 %v746_v1, %v13790_v51  ;;  %v675_v8 = vpop.f32.mrb[3].mxu1  ;;  %v748_v12 = vpop.f32.mrb[11].mxu0 }
 0x294   :  { %17582 = vst [vmem:[#allocation45_spill] sm:$0xff] %v13799_v59  ;;  %v13810_v16 = vadd.f32 %v675_v8, %v13796_v57  ;;  %v13813_v18 = vadd.f32 %v748_v12, %v13778_v44 }
 0x296   :  { %17583 = vst [vmem:[#allocation46_spill] sm:$0xff] %v13813_v18 }
 0x298   :  { %v679_v22 = vpop.f32.mrb[4].mxu1  ;;  %v752_v24 = vpop.f32.mrb[12].mxu0 }
 0x299   :  { %v13821_v26 = vadd.f32 %v679_v22, %v13786_v49  ;;  %v13824_v28 = vadd.f32 %v752_v24, %v13790_v51  ;;  %v681_v30 = vpop.f32.mrb[5].mxu1  ;;  %v754_v32 = vpop.f32.mrb[13].mxu0 }
 0x29a   :  { %v13827_v35 = vadd.f32 %v681_v30, %v13796_v57  ;;  %v13830_v37 = vadd.f32 %v754_v32, %v13778_v44  ;;  %v683_v39 = vpop.f32.mrb[6].mxu1  ;;  %v756_v41 = vpop.f32.mrb[14].mxu0 }
 0x29b   :  { %17584 = vst [vmem:[#allocation47_spill] sm:$0xff] %v13821_v26  ;;  %17585 = vst [vmem:[#allocation48_spill] sm:$0xff] %v13824_v28  ;;  %v13834_v48 = vadd.f32 %v683_v39, %v13786_v49  ;;  %v13837_v43 = vadd.f32 %v756_v41, %v13790_v51  ;;  %v685_v46 = vpop.f32.mrb[7].mxu1  ;;  %v758_v31 = vpop.f32.mrb[15].mxu0  ;;  %v14202_v28 = vld [vmem:[#allocation9 + $0x218] ss:$24 sps:$4 sm:$0xff]  }
 0x29c   :  { %17586 = vst [vmem:[#allocation49_spill] sm:$0xff] %v13827_v35  ;;  %17587 = vst [vmem:[#allocation50_spill] sm:$0xff] %v13830_v37  ;;  %v13841_v55 = vadd.f32 %v685_v46, %v13796_v57  ;;  %v13844_v61 = vadd.f32 %v758_v31, %v13778_v44  ;;  %v14209_v35 = vld [vmem:[#allocation9 + $0x244] ss:$24 sps:$4 sm:$0xff]   ;;  %v14211_v26 = vld [vmem:[#allocation9 + $0x248] ss:$24 sps:$4 sm:$0xff]  }
 0x29d   :  { %17588 = vst [vmem:[#allocation51_spill] sm:$0xff] %v13834_v48  ;;  %17589 = vst [vmem:[#allocation52_spill] sm:$0xff] %v13837_v43  ;;  %v14195_v48 = vld [vmem:[#allocation9 + $0x214] ss:$24 sps:$4 sm:$0xff]  }
 0x29e   :  { %17590 = vst [vmem:[#allocation53_spill] sm:$0xff] %v13841_v55  ;;  %17591 = vst [vmem:[#allocation54_spill] sm:$0xff] %v13844_v61  ;;  %v672_v61 = vadd.f32 %v13792_v53, %v13796_v57 }
 0x2a0   :  { %v689_v50 = vpop.f32.mrb[8].mxu1  ;;  %v762_v1 = vpop.f32.mrb[16].mxu0 }
 0x2a1   :  { %v13849_v8 = vadd.f32 %v689_v50, %v13786_v49  ;;  %v13852_v12 = vadd.f32 %v762_v1, %v13790_v51  ;;  %v691_v22 = vpop.f32.mrb[9].mxu1  ;;  %v764_v52 = vpop.f32.mrb[17].mxu0 }
 0x2a2   :  { %v13855_v24 = vadd.f32 %v691_v22, %v13796_v57  ;;  %v13858_v30 = vadd.f32 %v764_v52, %v13778_v44  ;;  %v693_v32 = vpop.f32.mrb[10].mxu1  ;;  %v766_v54 = vpop.f32.mrb[18].mxu0 }
 0x2a3   :  { %17592 = vst [vmem:[#allocation55_spill] sm:$0xff] %v13849_v8  ;;  %17593 = vst [vmem:[#allocation56_spill] sm:$0xff] %v13852_v12  ;;  %v13862_v56 = vadd.f32 %v693_v32, %v13786_v49  ;;  %v13865_v39 = vadd.f32 %v766_v54, %v13790_v51  ;;  %v695_v41 = vpop.f32.mrb[11].mxu1  ;;  %v768_v46 = vpop.f32.mrb[19].mxu0  ;;  %v13883_v54 = vsub.s32 4, %v13757_v34 }
 0x2a4   :  { %17594 = vst [vmem:[#allocation57_spill] sm:$0xff] %v13855_v24  ;;  %17595 = vst [vmem:[#allocation58_spill] sm:$0xff] %v13858_v30  ;;  %v13869_v31 = vadd.f32 %v695_v41, %v13796_v57  ;;  %v13872_v50 = vadd.f32 %v768_v46, %v13778_v44 }
 0x2a5   :  { %17596 = vst [vmem:[#allocation59_spill] sm:$0xff] %v13862_v56  ;;  %17597 = vst [vmem:[#allocation60_spill] sm:$0xff] %v13865_v39  ;;  %v13909_v34 = vrot.slane %v13765_v33, %v13883_v54  ;;  %v17616_v39 = vld [vmem:[#allocation25_spill] sm:$0xff] }
 0x2a6   :  { %17598 = vst [vmem:[#allocation61_spill] sm:$0xff] %v13869_v31  ;;  %17599 = vst [vmem:[#allocation62_spill] sm:$0xff] %v13872_v50  ;;  %v14207_v50 = vld [vmem:[#allocation9 + $0x240] ss:$24 sps:$4 sm:$0xff]  }
 0x2a7   :  { %17602 = vst [vmem:[#allocation65_spill] sm:$0xff] %v13883_v54 }
 0x2a8   :  { %v699_v58 = vpop.f32.mrb[12].mxu1  ;;  %v772_v1 = vpop.f32.mrb[20].mxu0 }
 0x2a9   :  { %v13877_v22 = vadd.f32 %v699_v58, %v13786_v49  ;;  %v13880_v52 = vadd.f32 %v772_v1, %v13790_v51  ;;  %v701_v32 = vpop.f32.mrb[13].mxu1  ;;  %v774_v60 = vpop.f32.mrb[21].mxu0  ;;  %v17605_v58 = vld [vmem:[#allocation20_spill] sm:$0xff] }
 0x2aa   :  { %v13886_v41 = vadd.f32 %v701_v32, %v13796_v57  ;;  %v13889_v63 = vadd.f32 %v774_v60, %v13778_v44  ;;  %v703_v2 = vpop.f32.mrb[14].mxu1  ;;  %v776_v46 = vpop.f32.mrb[22].mxu0  ;;  %2289 = vmatpush1.bf16.msra.mxu1 %v17605_v58  ;;  %v17608_v32 = vld [vmem:[#allocation21_spill] sm:$0xff]  ;;  %v13913_v58 = vrot.slane %v13765_v33, %v13892_v0 }
 0x2ab   :  { %17600 = vst [vmem:[#allocation63_spill] sm:$0xff] %v13877_v22  ;;  %17601 = vst [vmem:[#allocation64_spill] sm:$0xff] %v13880_v52  ;;  %v13896_v1 = vadd.f32 %v703_v2, %v13786_v49  ;;  %v13899_v59 = vadd.f32 %v776_v46, %v13790_v51  ;;  %v705_v52 = vpop.f32.mrb[15].mxu1  ;;  %v13901_v18 = vpop.f32.mrb[23].mxu0  ;;  %2290 = vmatprep.subr.bf16.mxu1 %v17608_v32  ;;  %v17610_v2 = vld [vmem:[#allocation22_spill] sm:$0xff]  ;;  %v17611_v46 = vld [vmem:[#allocation23_spill] sm:$0xff] }
 0x2ac   :  { %17603 = vst [vmem:[#allocation66_spill] sm:$0xff] %v13886_v41  ;;  %v13905_v60 = vadd.f32 %v705_v52, %v13796_v57  ;;  %v17614_v41 = vld [vmem:[#allocation24_spill] sm:$0xff] }
 0x2ad   :  { %17606 = vst [vmem:[#allocation20_spill] sm:$0xff] %v13896_v1  ;;  %17607 = vst [vmem:[#allocation68_spill] sm:$0xff] %v13899_v59 }
 0x2ae   :  { %17609 = vst [vmem:[#allocation21_spill] sm:$0xff] %v13905_v60  ;;  %2291 = vmatpush1.bf16.msra.mxu1 %v17610_v2 }
 0x2af   :  { %2292 = vmatprep.subr.bf16.mxu1 %v17611_v46 }
 0x2b0   :  { %v815_v59 = vpop.f32.mrb[16].mxu1 }
 0x2b1   :  { %v13918_v1 = vadd.f32 %v815_v59, %v13909_v34  ;;  %v817_v32 = vpop.f32.mrb[17].mxu1 }
 0x2b2   :  { %v13921_v52 = vadd.f32 %v817_v32, %v13913_v58  ;;  %v819_v60 = vpop.f32.mrb[18].mxu1  ;;  %2293 = vmatpush1.bf16.msra.mxu1 %v17614_v41 }
 0x2b3   :  { %17612 = vst [vmem:[#allocation22_spill] sm:$0xff] %v13918_v1  ;;  %v13925_v22 = vadd.f32 %v819_v60, %v13909_v34  ;;  %v821_v33 = vpop.f32.mrb[19].mxu1  ;;  %2344 = vmatprep.subr.bf16.mxu1 %v17616_v39 }
 0x2b4   :  { %17613 = vst [vmem:[#allocation23_spill] sm:$0xff] %v13921_v52  ;;  %v13929_v2 = vadd.f32 %v821_v33, %v13913_v58 }
 0x2b5   :  { %17615 = vst [vmem:[#allocation24_spill] sm:$0xff] %v13925_v22 }
 0x2b6   :  { %17617 = vst [vmem:[#allocation25_spill] sm:$0xff] %v13929_v2 }
 0x2b8   :  { %v825_v46 = vpop.f32.mrb[20].mxu1 }
 0x2b9   :  { %v13932_v59 = vadd.f32 %v825_v46, %v13909_v34  ;;  %v827_v1 = vpop.f32.mrb[21].mxu1 }
 0x2ba   :  { %v13935_v32 = vadd.f32 %v827_v1, %v13913_v58  ;;  %v829_v52 = vpop.f32.mrb[22].mxu1 }
 0x2bb   :  { %17618 = vst [vmem:[#allocation69_spill] sm:$0xff] %v13932_v59  ;;  %v13938_v41 = vadd.f32 %v829_v52, %v13909_v34  ;;  %v831_v60 = vpop.f32.mrb[23].mxu1 }
 0x2bc   :  { %17619 = vst [vmem:[#allocation70_spill] sm:$0xff] %v13935_v32  ;;  %v13941_v22 = vadd.f32 %v831_v60, %v13913_v58 }
 0x2bd   :  { %17620 = vst [vmem:[#allocation71_spill] sm:$0xff] %v13938_v41 }
 0x2be   :  { %17621 = vst [vmem:[#allocation72_spill] sm:$0xff] %v13941_v22 }
 0x2c0   :  { %v835_v39 = vpop.f32.mrb[24].mxu1 }
 0x2c1   :  { %v13944_v33 = vadd.f32 %v835_v39, %v13909_v34  ;;  %v837_v2 = vpop.f32.mrb[25].mxu1 }
 0x2c2   :  { %v13947_v46 = vadd.f32 %v837_v2, %v13913_v58  ;;  %v839_v59 = vpop.f32.mrb[26].mxu1  ;;  %v902_v2 = vld [vmem:[%s17191_s6] sm:$0x3f] }
 0x2c3   :  { %17622 = vst [vmem:[#allocation73_spill] sm:$0xff] %v13944_v33  ;;  %v13950_v1 = vadd.f32 %v839_v59, %v13909_v34  ;;  %v841_v32 = vpop.f32.mrb[27].mxu1  ;;  %v13965_v59 = vrot.slane %v902_v2, %v13768_v38 }
 0x2c4   :  { %17623 = vst [vmem:[#allocation74_spill] sm:$0xff] %v13947_v46  ;;  %v13953_v52 = vadd.f32 %v841_v32, %v13913_v58  ;;  %v13968_v32 = vrot.slane %v902_v2, %v13774_v42 }
 0x2c5   :  { %17624 = vst [vmem:[#allocation75_spill] sm:$0xff] %v13950_v1  ;;  %17626 = vst [vmem:[#allocation77_spill] sm:$0xff] %v13965_v59  ;;  %v14199_v1 = vld [vmem:[#allocation9 + $0x21c] ss:$24 sps:$4 sm:$0xff]  }
 0x2c6   :  { %17625 = vst [vmem:[#allocation76_spill] sm:$0xff] %v13953_v52  ;;  %v14197_v52 = vld [vmem:[#allocation9 + $0x210] ss:$24 sps:$4 sm:$0xff]  }
 0x2c8   :  { %v845_v37 = vpop.f32.mrb[28].mxu1 }
 0x2c9   :  { %v13956_v60 = vadd.f32 %v845_v37, %v13909_v34  ;;  %v847_v31 = vpop.f32.mrb[29].mxu1  ;;  %v670_v37 = vadd.f32 %v13780_v45, %v13786_v49  ;;  %v13977_v45 = vrot.slane %v902_v2, %v13771_v40  ;;  %v13980_v49 = vrot.slane %v902_v2, %v13760_v36 }
 0x2ca   :  { %v13959_v39 = vadd.f32 %v847_v31, %v13913_v58  ;;  %v849_v56 = vpop.f32.mrb[30].mxu1 }
 0x2cb   :  { %v851_v22 = vpop.f32.mrb[31].mxu1  ;;  %17627 = vst [vmem:[#allocation78_spill] sm:$0xff] %v13980_v49 }
 0x2d0   :  { %v1545_v41 = vpop.f32.mrb[24].mxu0 }
 0x2d1   :  { %v1546_v12 = vadd.f32 %v1545_v41, %v13965_v59  ;;  %v1547_v31 = vpop.f32.mrb[25].mxu0 }
 0x2d2   :  { %v1548_v24 = vadd.f32 %v1547_v31, %v13968_v32  ;;  %v1549_v8 = vpop.f32.mrb[26].mxu0 }
 0x2d3   :  { %v1640_v46 = vadd.f32 %v1546_v12, %v670_v37  ;;  %v1550_v33 = vpop.f32.mrb[27].mxu0 }
 0x2d4   :  { %v1641_v38 = vadd.f32 %v1548_v24, %v672_v61 }
 0x2d5   :  { %v10370_v43 = vmul.f32 -1.442695, %v1640_v46 }
 0x2d6   :  { %v10371_v30 = vmul.f32 -1.442695, %v1641_v38 }
 0x2d7   :  { %12513 = vpow2.f32 %v10370_v43  ;;  %v779_v43 = vadd.f32 %v13901_v18, %v13778_v44 }
 0x2d8   :  { %12515 = vpow2.f32 %v10371_v30 }
 0x2e1   :  { %v12514_v42 = vpop.eup %12513 }
 0x2e2   :  { %v1648_v55 = vadd.f32 1.0, %v12514_v42  ;;  %v12516_v57 = vpop.eup %12515 }
 0x2e3   :  { %v1649_v33 = vadd.f32 1.0, %v12516_v57 }
 0x2e4   :  { %12517 = vrcp.f32 %v1648_v55  ;;  %v743_v55 = vadd.f32 %v13782_v47, %v13790_v51  ;;  %v13991_v47 = vrot.slane %v902_v2, %v13883_v54  ;;  %v13994_v51 = vrot.slane %v902_v2, %v13892_v0  ;;  %v14187_v0 = vld [vmem:[#allocation9 + $0x1ec] ss:$24 sps:$4 sm:$0xff]   ;;  %v14190_v54 = vld [vmem:[#allocation9 + $0x1e8] ss:$24 sps:$4 sm:$0xff]  }
 0x2ee   :  { %v12518_v41 = vpop.eup %12517 }
 0x2f0   :  { %v1586_v53 = vpop.f32.mrb[32].mxu1 }
 0x2f1   :  { %v1587_v8 = vadd.f32 %v1586_v53, %v13977_v45  ;;  %v1588_v12 = vpop.f32.mrb[33].mxu1 }
 0x2f2   :  { %v1589_v38 = vadd.f32 %v1588_v12, %v13980_v49  ;;  %v1590_v42 = vpop.f32.mrb[34].mxu1 }
 0x2f3   :  { %v1654_v61 = vmul.f32 %v12518_v41, %v1587_v8  ;;  %v1591_v24 = vpop.f32.mrb[35].mxu1  ;;  %v850_v8 = vadd.f32 %v849_v56, %v13909_v34 }
 0x2f4   :  { %v1660_v30 = vadd.f32 %v1589_v38, %v779_v43 }
 0x2f5   :  { %v1655_v46 = vadd.f32 %v1654_v61, %v743_v55  ;;  %v852_v61 = vadd.f32 %v851_v22, %v13913_v58  ;;  %v17631_v58 = vmov 0 }
 0x2f6   :  { %v10372_v37 = vmul.f32 -1.442695, %v1660_v30 }
 0x2f7   :  { %12519 = vtanh.f32 %v1655_v46 }
 0x2f8   :  { %12521 = vpow2.f32 %v10372_v37 }
 0x2f9   :  { %12523 = vrcp.f32 %v1649_v33 }
 0x301   :  { %v12520_v31 = vpop.eup %12519 }
 0x302   :  { %v12522_v53 = vpop.eup %12521  ;;  %v1657_v40 = vsub.f32 0.0, %v12520_v31 }
 0x303   :  { %v12524_v36 = vpop.eup %12523  ;;  %v1668_v18 = vadd.f32 1.0, %v12522_v53 }
 0x304   :  { %v1658_v44 = vmul.f32 %v12524_v36, %v1657_v40 }
 0x305   :  { %12525 = vrcp.f32 %v1668_v18 }
 0x306   :  { %v13988_v12 = vadd.f32 %v12520_v31, %v1658_v44  ;;  %v14000_v31 = vpop.permute.xlu0 %304 }
 0x307   :  { %17629 = vst [vmem:[#allocation80_spill] sm:$0xff] %v14000_v31  ;;  %vm314_vm12 = vcmp.gt.f32.partialorder %v14000_v31, 7.0  ;;  %vm307_vm13 = vcmp.gt.f32.partialorder %v14000_v31, 0.0  ;;  %vm308_vm0 = vcmp.gt.f32.partialorder %v14000_v31, 1.0  ;;  %vm313_vm1 = vcmp.gt.f32.partialorder %v14000_v31, 6.0 }
 0x308   :  { %17628 = vst [vmem:[#allocation79_spill] sm:$0xff] %v13988_v12  ;;  %vm14011_vm14 = vmpackc.low %vm314_vm12, %vm314_vm12  ;;  %v10474_v18 = vpack.c.bf16 %v13988_v12, %v13988_v12  ;;  %vm309_vm2 = vcmp.gt.f32.partialorder %v14000_v31, 2.0  ;;  %vm312_vm3 = vcmp.gt.f32.partialorder %v14000_v31, 5.0  ;;  %vm310_vm4 = vcmp.gt.f32.partialorder %v14000_v31, 3.0 }
 0x309   :  { %v17632_v58 = vsel %vm14011_vm14, 4294967295, %v17631_v58  ;;  %vm14024_vm15 = vmpackc.low %vm307_vm13, %vm307_vm13  ;;  %vm311_vm5 = vcmp.gt.f32.partialorder %v14000_v31, 4.0  ;;  %v15771_v31 = vld [vmem:[#allocation12 + $0x15c] ss:$24 sps:$4 sm:$0xff]  }
 0x30a   :  { %17633 = vst [vmem:[#allocation82_spill] sm:$0xff] %v17632_v58  ;;  %v14178_v58 = vld [vmem:[#allocation9 + $0x1b8] ss:$24 sps:$4 sm:$0xff]   ;;  %vm15471_vm6 = vmpackc.low %vm308_vm0, %vm307_vm13 }
 0x30b   :  { %vm15502_vm7 = vmpackc.low %vm310_vm4, %vm309_vm2 }
 0x30c   :  { %vm15542_vm8 = vmpackc.low %vm312_vm3, %vm311_vm5 }
 0x30d   :  { %vm15582_vm9 = vmpackc.low %vm314_vm12, %vm313_vm1 }
 0x30f   :  { %v12526_v36 = vpop.eup %12525 }
 0x310   :  { %v1627_v57 = vpop.f32.mrb[28].mxu0 }
 0x311   :  { %v1628_v41 = vadd.f32 %v1627_v57, %v13991_v47  ;;  %v1629_v43 = vpop.f32.mrb[29].mxu0  ;;  %v17634_v57 = vmov 0 }
 0x312   :  { %v1630_v38 = vadd.f32 %v1629_v43, %v13994_v51  ;;  %v1631_v42 = vpop.f32.mrb[30].mxu0  ;;  %v17635_v57 = vsel %vm14024_vm15, 4294967295, %v17634_v57  ;;  %v17639_v43 = vld [vmem:[#allocation28_spill] sm:$0xff] }
 0x313   :  { %v1661_v40 = vadd.f32 %v1628_v41, %v850_v8  ;;  %v1632_v55 = vpop.f32.mrb[31].mxu0  ;;  %17636 = vst [vmem:[#allocation83_spill] sm:$0xff] %v17635_v57  ;;  %v17637_v8 = vld [vmem:[#allocation26_spill] sm:$0xff]  ;;  %v17638_v41 = vld [vmem:[#allocation27_spill] sm:$0xff] }
 0x314   :  { %v1674_v24 = vmul.f32 %v12526_v36, %v1630_v38  ;;  %v17640_v38 = vld [vmem:[#allocation29_spill] sm:$0xff]  ;;  %v17641_v42 = vld [vmem:[#allocation30_spill] sm:$0xff]  ;;  %v17642_v36 = vld [vmem:[#allocation31_spill] sm:$0xff] }
 0x315   :  { %v10373_v30 = vmul.f32 -1.442695, %v1661_v40  ;;  %v17643_v40 = vld [vmem:[#allocation32_spill] sm:$0xff]  ;;  %v17644_v55 = vld [vmem:[#allocation33_spill] sm:$0xff]  ;;  %17655 = vst [vmem:[#allocation29_spill] sm:$0xff] %v14178_v58 }
 0x316   :  { %v1675_v33 = vadd.f32 %v1674_v24, %v852_v61  ;;  %v17645_v61 = vld [vmem:[#allocation34_spill] sm:$0xff]  ;;  %v17646_v24 = vld [vmem:[#allocation35_spill] sm:$0xff]  ;;  %17658 = vst [vmem:[#allocation32_spill] sm:$0xff] %v14187_v0  ;;  %17659 = vst [vmem:[#allocation33_spill] sm:$0xff] %v14190_v54 }
 0x317   :  { %12527 = vpow2.f32 %v10373_v30  ;;  %v17647_v30 = vld [vmem:[#allocation36_spill] sm:$0xff]  ;;  %v14175_v57 = vld [vmem:[#allocation9 + $0x1bc] ss:$24 sps:$4 sm:$0xff]   ;;  %17660 = vst [vmem:[#allocation34_spill] sm:$0xff] %v14195_v48  ;;  %17661 = vst [vmem:[#allocation35_spill] sm:$0xff] %v14197_v52 }
 0x318   :  { %12529 = vtanh.f32 %v1675_v33  ;;  %v17648_v33 = vld [vmem:[#allocation37_spill] sm:$0xff]  ;;  %17654 = vst [vmem:[#allocation28_spill] sm:$0xff] %v14175_v57  ;;  %17662 = vst [vmem:[#allocation36_spill] sm:$0xff] %v14199_v1 }
 0x319   :  { %17663 = vst [vmem:[#allocation37_spill] sm:$0xff] %v14202_v28 }
 0x321   :  { %v12528_v2 = vpop.eup %12527 }
 0x322   :  { %v1669_v46 = vadd.f32 1.0, %v12528_v2  ;;  %v12530_v56 = vpop.eup %12529  ;;  %v17649_v2 = vld [vmem:[#allocation38_spill] sm:$0xff] }
 0x323   :  { %v1677_v34 = vsub.f32 0.0, %v12530_v56  ;;  %17664 = vst [vmem:[#allocation38_spill] sm:$0xff] %v14207_v50 }
 0x324   :  { %12531 = vrcp.f32 %v1669_v46  ;;  %v17650_v46 = vld [vmem:[#allocation39_spill] sm:$0xff] }
 0x325   :  { %17665 = vst [vmem:[#allocation39_spill] sm:$0xff] %v14209_v35 }
 0x32e   :  { %v12532_v37 = vpop.eup %12531 }
 0x32f   :  { %v1678_v53 = vmul.f32 %v12532_v37, %v1677_v34  ;;  %v14112_v34 = vld [vmem:[#allocation9 + $0xc4] ss:$24 sps:$4 sm:$0xff]  }
 0x330   :  { %v14115_v37 = vld [vmem:[#allocation9 + $0xcc] ss:$24 sps:$4 sm:$0xff]  }
 0x331   :  { %v14003_v44 = vadd.f32 %v12530_v56, %v1678_v53  ;;  %v17651_v56 = vld [vmem:[#allocation40_spill] sm:$0xff]  ;;  %v14118_v53 = vld [vmem:[#allocation9 + $0xc0] ss:$24 sps:$4 sm:$0xff]  }
 0x332   :  { %17666 = vst [vmem:[#allocation40_spill] sm:$0xff] %v14211_v26 }
 0x333   :  { %17630 = vst [vmem:[#allocation81_spill] sm:$0xff] %v14003_v44  ;;  %v10471_v22 = vpack.c.bf16 %v14003_v44, %v14003_v44 }
 0x335   :  { %10472 = vmatprep.mubr.msk.bf16.mxu1 %vm14011_vm14, %v10471_v22  ;;  %10478 = vmatprep.mubr.msk.bf16.mxu0 %vm14011_vm14, %v10471_v22 }
 0x336   :  { %10475 = vmatmul.mubr.msk.bf16.vlgmr.msra.gmra.mrb[36].mxu1 %vm14024_vm15, %v10474_v18  ;;  %10481 = vmatmul.mubr.msk.bf16.vlgmr.msra.gmra.mrb[32].mxu0 %vm14024_vm15, %v10474_v18 }
 0x337   :  { %2345 = vmatpush1.bf16.msra.mxu1 %v17637_v8  ;;  %10484 = vmatprep.mubr.msk.bf16.mxu1 %vm14011_vm14, %v10471_v22  ;;  %v14122_v22 = vld [vmem:[#allocation9 + $0xc8] ss:$24 sps:$4 sm:$0xff]   ;;  %v14127_v8 = vld [vmem:[#allocation9 + $0xfc] ss:$24 sps:$4 sm:$0xff]  }
 0x338   :  { %2346 = vmatprep.subr.bf16.mxu1 %v17638_v41  ;;  %v14130_v41 = vld [vmem:[#allocation9 + $0xf0] ss:$24 sps:$4 sm:$0xff]  }
 0x33b   :  { %2347 = vmatpush1.bf16.msra.mxu1 %v17639_v43  ;;  %v14134_v43 = vld [vmem:[#allocation9 + $0xf8] ss:$24 sps:$4 sm:$0xff]  }
 0x33c   :  { %2348 = vmatprep.subr.bf16.mxu1 %v17640_v38  ;;  %v14136_v38 = vld [vmem:[#allocation9 + $0x124] ss:$24 sps:$4 sm:$0xff]  }
 0x33f   :  { %2349 = vmatpush1.bf16.msra.mxu1 %v17641_v42  ;;  %v14139_v42 = vld [vmem:[#allocation9 + $0x12c] ss:$24 sps:$4 sm:$0xff]  }
 0x340   :  { %2350 = vmatprep.subr.bf16.mxu1 %v17642_v36  ;;  %v14142_v36 = vld [vmem:[#allocation9 + $0x120] ss:$24 sps:$4 sm:$0xff]  }
 0x343   :  { %2351 = vmatpush1.bf16.msra.mxu1 %v17643_v40  ;;  %v14146_v40 = vld [vmem:[#allocation9 + $0x128] ss:$24 sps:$4 sm:$0xff]  }
 0x344   :  { %2352 = vmatprep.subr.bf16.mxu1 %v17644_v55  ;;  %v14151_v55 = vld [vmem:[#allocation9 + $0x154] ss:$24 sps:$4 sm:$0xff]  }
 0x347   :  { %2353 = vmatpush1.bf16.msra.mxu1 %v17645_v61  ;;  %v14153_v61 = vld [vmem:[#allocation9 + $0x150] ss:$24 sps:$4 sm:$0xff]  }
 0x348   :  { %2354 = vmatprep.subr.bf16.mxu1 %v17646_v24  ;;  %v14155_v24 = vld [vmem:[#allocation9 + $0x15c] ss:$24 sps:$4 sm:$0xff]  }
 0x34b   :  { %2355 = vmatpush1.bf16.msra.mxu1 %v17647_v30  ;;  %v14158_v30 = vld [vmem:[#allocation9 + $0x158] ss:$24 sps:$4 sm:$0xff]  }
 0x34c   :  { %2356 = vmatprep.subr.bf16.mxu1 %v17648_v33  ;;  %v14164_v33 = vld [vmem:[#allocation9 + $0x18c] ss:$24 sps:$4 sm:$0xff]  }
 0x34f   :  { %2357 = vmatpush1.bf16.msra.mxu1 %v17649_v2  ;;  %v14166_v2 = vld [vmem:[#allocation9 + $0x188] ss:$24 sps:$4 sm:$0xff]  }
 0x350   :  { %2358 = vmatprep.subr.bf16.mxu1 %v17650_v46  ;;  %v14171_v46 = vld [vmem:[#allocation9 + $0x1b4] ss:$24 sps:$4 sm:$0xff]  }
 0x351   :  { %17652 = vst [vmem:[#allocation26_spill] sm:$0xff] %v14171_v46 }
 0x353   :  { %2359 = vmatpush1.bf16.msra.mxu1 %v13652_v10  ;;  %v14071_v10 = vld [vmem:[#allocation9 + $0x8] ss:$24 sps:$4 sm:$0xff]  }
 0x354   :  { %2360 = vmatprep.subr.bf16.mxu1 %v17651_v56  ;;  %v14173_v56 = vld [vmem:[#allocation9 + $0x1b0] ss:$24 sps:$4 sm:$0xff]  }
 0x355   :  { %17653 = vst [vmem:[#allocation27_spill] sm:$0xff] %v14173_v56 }
 0x357   :  { %2361 = vmatpush1.bf16.msra.mxu1 %v13660_v19  ;;  %v14075_v19 = vld [vmem:[#allocation9 + $0x34] ss:$24 sps:$4 sm:$0xff]  }
 0x358   :  { %2362 = vmatprep.subr.bf16.mxu1 %v13663_v7  ;;  %v14069_v7 = vld [vmem:[#allocation9 + $0x4] ss:$24 sps:$4 sm:$0xff]  }
 0x359   :  { %3015 = vmatprep.subr.bf16.mxu0 %v14069_v7 }
 0x35b   :  { %2363 = vmatpush1.bf16.msra.mxu1 %v13668_v4  ;;  %v14067_v4 = vld [vmem:[#allocation9] ss:$24 sps:$4 sm:$0xff]  }
 0x35c   :  { %2364 = vmatprep.subr.bf16.mxu1 %v13672_v13  ;;  %v14073_v13 = vld [vmem:[#allocation9 + $0xc] ss:$24 sps:$4 sm:$0xff]   ;;  %3016 = vmatpush1.bf16.msra.mxu0 %v14067_v4 }
 0x35d   :  { %3017 = vmatprep.subr.bf16.mxu0 %v14075_v19 }
 0x35f   :  { %2365 = vmatpush1.bf16.msra.mxu1 %v13676_v21  ;;  %v14078_v21 = vld [vmem:[#allocation9 + $0x3c] ss:$24 sps:$4 sm:$0xff]  }
 0x360   :  { %2366 = vmatprep.subr.bf16.mxu1 %v13680_v62  ;;  %v14082_v62 = vld [vmem:[#allocation9 + $0x30] ss:$24 sps:$4 sm:$0xff]  }
 0x361   :  { %3018 = vmatpush1.bf16.msra.mxu0 %v14082_v62 }
 0x363   :  { %2367 = vmatpush1.bf16.msra.mxu1 %v13684_v6  ;;  %v14086_v6 = vld [vmem:[#allocation9 + $0x38] ss:$24 sps:$4 sm:$0xff]  }
 0x364   :  { %2368 = vmatprep.subr.bf16.mxu1 %v13688_v9  ;;  %v14088_v9 = vld [vmem:[#allocation9 + $0x64] ss:$24 sps:$4 sm:$0xff]  }
 0x365   :  { %3019 = vmatprep.subr.bf16.mxu0 %v14088_v9 }
 0x367   :  { %2369 = vmatpush1.bf16.msra.mxu1 %v13692_v11  ;;  %v14091_v11 = vld [vmem:[#allocation9 + $0x6c] ss:$24 sps:$4 sm:$0xff]  }
 0x368   :  { %2370 = vmatprep.subr.bf16.mxu1 %v13696_v14  ;;  %v14094_v14 = vld [vmem:[#allocation9 + $0x60] ss:$24 sps:$4 sm:$0xff]  }
 0x369   :  { %3020 = vmatpush1.bf16.msra.mxu0 %v14094_v14 }
 0x36b   :  { %2371 = vmatpush1.bf16.msra.mxu1 %v13700_v20  ;;  %v14098_v20 = vld [vmem:[#allocation9 + $0x68] ss:$24 sps:$4 sm:$0xff]  }
 0x36c   :  { %2372 = vmatprep.subr.bf16.mxu1 %v13704_v23  ;;  %v14100_v23 = vld [vmem:[#allocation9 + $0x94] ss:$24 sps:$4 sm:$0xff]  }
 0x36d   :  { %3021 = vmatprep.subr.bf16.mxu0 %v14100_v23 }
 0x36f   :  { %2373 = vmatpush1.bf16.msra.mxu1 %v13708_v25  ;;  %v14103_v25 = vld [vmem:[#allocation9 + $0x9c] ss:$24 sps:$4 sm:$0xff]  }
 0x370   :  { %2374 = vmatprep.subr.bf16.mxu1 %v13712_v27  ;;  %v14106_v27 = vld [vmem:[#allocation9 + $0x90] ss:$24 sps:$4 sm:$0xff]  }
 0x371   :  { %3022 = vmatpush1.bf16.msra.mxu0 %v14106_v27 }
 0x372   :  { %3023 = vmatprep.subr.bf16.mxu0 %v14112_v34 }
 0x373   :  { %2375 = vmatpush1.bf16.msra.mxu1 %v13716_v29  ;;  %v14110_v29 = vld [vmem:[#allocation9 + $0x98] ss:$24 sps:$4 sm:$0xff]  }
 0x374   :  { %3056 = vmatprep.subr.bf16.mxu1 %v14073_v13 }
 0x375   :  { %3024 = vmatpush1.bf16.msra.mxu0 %v14118_v53 }
 0x376   :  { %10487 = vmatmul.mubr.msk.bf16.vlgmr.msra.gmra.mrb[40].mxu1 %vm14024_vm15, %v10474_v18  ;;  %v14124_v18 = vld [vmem:[#allocation9 + $0xf4] ss:$24 sps:$4 sm:$0xff]  }
 0x377   :  { %3057 = vmatpush1.bf16.msra.mxu1 %v14071_v10  ;;  %3025 = vmatprep.subr.bf16.mxu0 %v14124_v18 }
 0x378   :  { %3058 = vmatprep.subr.bf16.mxu1 %v14078_v21 }
 0x379   :  { %3026 = vmatpush1.bf16.msra.mxu0 %v14130_v41 }
 0x37a   :  { %3027 = vmatprep.subr.bf16.mxu0 %v14136_v38 }
 0x37b   :  { %3059 = vmatpush1.bf16.msra.mxu1 %v14086_v6 }
 0x37c   :  { %3060 = vmatprep.subr.bf16.mxu1 %v14091_v11 }
 0x37d   :  { %3028 = vmatpush1.bf16.msra.mxu0 %v14142_v36 }
 0x37e   :  { %3029 = vmatprep.subr.bf16.mxu0 %v14151_v55 }
 0x37f   :  { %3061 = vmatpush1.bf16.msra.mxu1 %v14098_v20 }
 0x380   :  { %3062 = vmatprep.subr.bf16.mxu1 %v14103_v25 }
 0x381   :  { %3030 = vmatpush1.bf16.msra.mxu0 %v14153_v61 }
 0x382   :  { %3031 = vmatprep.subr.bf16.mxu0 %v13807_v15  ;;  %v14183_v15 = vld [vmem:[#allocation9 + $0x1e4] ss:$24 sps:$4 sm:$0xff]  }
 0x383   :  { %3063 = vmatpush1.bf16.msra.mxu1 %v14110_v29  ;;  %17656 = vst [vmem:[#allocation30_spill] sm:$0xff] %v14183_v15 }
 0x384   :  { %3064 = vmatprep.subr.bf16.mxu1 %v14115_v37 }
 0x385   :  { %3032 = vmatpush1.bf16.msra.mxu0 %v13815_v17  ;;  %v14185_v17 = vld [vmem:[#allocation9 + $0x1e0] ss:$24 sps:$4 sm:$0xff]  }
 0x386   :  { %3033 = vmatprep.subr.bf16.mxu0 %v14171_v46  ;;  %17657 = vst [vmem:[#allocation31_spill] sm:$0xff] %v14185_v17  ;;  %v14228_v46 = vld [vmem:[#allocation9 + $0x2a4] ss:$24 sps:$4 sm:$0xff]  }
 0x387   :  { %3065 = vmatpush1.bf16.msra.mxu1 %v14122_v22  ;;  %17672 = vst [vmem:[#allocation89_spill] sm:$0xff] %v14228_v46 }
 0x388   :  { %3066 = vmatprep.subr.bf16.mxu1 %v14127_v8 }
 0x389   :  { %3034 = vmatpush1.bf16.msra.mxu0 %v14173_v56  ;;  %v14226_v56 = vld [vmem:[#allocation9 + $0x278] ss:$24 sps:$4 sm:$0xff]  }
 0x38a   :  { %3035 = vmatprep.subr.bf16.mxu0 %v14183_v15  ;;  %v14215_v15 = vld [vmem:[#allocation9 + $0x274] ss:$24 sps:$4 sm:$0xff]   ;;  %17671 = vst [vmem:[#allocation88_spill] sm:$0xff] %v14226_v56 }
 0x38b   :  { %3067 = vmatpush1.bf16.msra.mxu1 %v14134_v43  ;;  %17668 = vst [vmem:[#allocation85_spill] sm:$0xff] %v14215_v15 }
 0x38c   :  { %3068 = vmatprep.subr.bf16.mxu1 %v14139_v42 }
 0x38d   :  { %3036 = vmatpush1.bf16.msra.mxu0 %v14185_v17  ;;  %v14213_v17 = vld [vmem:[#allocation9 + $0x24c] ss:$24 sps:$4 sm:$0xff]  }
 0x38e   :  { %3037 = vmatprep.subr.bf16.mxu0 %v14195_v48  ;;  %17667 = vst [vmem:[#allocation84_spill] sm:$0xff] %v14213_v17  ;;  %v14218_v48 = vld [vmem:[#allocation9 + $0x27c] ss:$24 sps:$4 sm:$0xff]  }
 0x38f   :  { %3069 = vmatpush1.bf16.msra.mxu1 %v14146_v40  ;;  %17669 = vst [vmem:[#allocation86_spill] sm:$0xff] %v14218_v48 }
 0x390   :  { %3070 = vmatprep.subr.bf16.mxu1 %v14155_v24 }
 0x391   :  { %3038 = vmatpush1.bf16.msra.mxu0 %v14197_v52  ;;  %v14222_v52 = vld [vmem:[#allocation9 + $0x270] ss:$24 sps:$4 sm:$0xff]  }
 0x392   :  { %3039 = vmatprep.subr.bf16.mxu0 %v14209_v35  ;;  %17670 = vst [vmem:[#allocation87_spill] sm:$0xff] %v14222_v52  ;;  %v14234_v35 = vld [vmem:[#allocation9 + $0x2a0] ss:$24 sps:$4 sm:$0xff]  }
 0x393   :  { %3071 = vmatpush1.bf16.msra.mxu1 %v14158_v30  ;;  %17674 = vst [vmem:[#allocation91_spill] sm:$0xff] %v14234_v35 }
 0x394   :  { %3072 = vmatprep.subr.bf16.mxu1 %v14164_v33 }
 0x395   :  { %3040 = vmatpush1.bf16.msra.mxu0 %v14207_v50  ;;  %v14238_v50 = vld [vmem:[#allocation9 + $0x2a8] ss:$24 sps:$4 sm:$0xff]  }
 0x396   :  { %3041 = vmatprep.subr.bf16.mxu0 %v14215_v15  ;;  %17675 = vst [vmem:[#allocation92_spill] sm:$0xff] %v14238_v50  ;;  %v14243_v15 = vld [vmem:[#allocation9 + $0x2dc] ss:$24 sps:$4 sm:$0xff]  }
 0x397   :  { %3073 = vmatpush1.bf16.msra.mxu1 %v14166_v2  ;;  %17677 = vst [vmem:[#allocation94_spill] sm:$0xff] %v14243_v15 }
 0x398   :  { %3074 = vmatprep.subr.bf16.mxu1 %v14175_v57 }
 0x399   :  { %3042 = vmatpush1.bf16.msra.mxu0 %v14222_v52  ;;  %v14250_v52 = vld [vmem:[#allocation9 + $0x2d8] ss:$24 sps:$4 sm:$0xff]  }
 0x39a   :  { %3043 = vmatprep.subr.bf16.mxu0 %v14228_v46  ;;  %17679 = vst [vmem:[#allocation96_spill] sm:$0xff] %v14250_v52  ;;  %v14255_v46 = vld [vmem:[#allocation9 + $0x14] ss:$24 sps:$4 sm:$0xff]  }
 0x39b   :  { %3075 = vmatpush1.bf16.msra.mxu1 %v14178_v58  ;;  %17680 = vst [vmem:[#allocation97_spill] sm:$0xff] %v14255_v46 }
 0x39c   :  { %3076 = vmatprep.subr.bf16.mxu1 %v14187_v0 }
 0x39d   :  { %3044 = vmatpush1.bf16.msra.mxu0 %v14234_v35 }
 0x39f   :  { %3077 = vmatpush1.bf16.msra.mxu1 %v14190_v54 }
 0x3a0   :  { %3078 = vmatprep.subr.bf16.mxu1 %v14199_v1 }
 0x3a3   :  { %3079 = vmatpush1.bf16.msra.mxu1 %v14202_v28  ;;  %v14231_v28 = vld [vmem:[#allocation9 + $0x2ac] ss:$24 sps:$4 sm:$0xff]  }
 0x3a4   :  { %3080 = vmatprep.subr.bf16.mxu1 %v14213_v17  ;;  %17673 = vst [vmem:[#allocation90_spill] sm:$0xff] %v14231_v28 }
 0x3a7   :  { %3081 = vmatpush1.bf16.msra.mxu1 %v14211_v26  ;;  %v14240_v26 = vld [vmem:[#allocation9 + $0x2d4] ss:$24 sps:$4 sm:$0xff]  }
 0x3a8   :  { %3082 = vmatprep.subr.bf16.mxu1 %v14218_v48  ;;  %17676 = vst [vmem:[#allocation93_spill] sm:$0xff] %v14240_v26  ;;  %v14246_v48 = vld [vmem:[#allocation9 + $0x2d0] ss:$24 sps:$4 sm:$0xff]   ;;  %3045 = vmatprep.subr.bf16.mxu0 %v14240_v26 }
 0x3a9   :  { %17678 = vst [vmem:[#allocation95_spill] sm:$0xff] %v14246_v48  ;;  %3046 = vmatpush1.bf16.msra.mxu0 %v14246_v48 }
 0x3aa   :  { %3097 = vmatprep.subr.bf16.mxu0 %v14255_v46 }
 0x3ab   :  { %3083 = vmatpush1.bf16.msra.mxu1 %v14226_v56 }
 0x3ac   :  { %3084 = vmatprep.subr.bf16.mxu1 %v14231_v28 }
 0x3af   :  { %3085 = vmatpush1.bf16.msra.mxu1 %v14238_v50 }
 0x3b0   :  { %3086 = vmatprep.subr.bf16.mxu1 %v14243_v15 }
 0x3b3   :  { %3087 = vmatpush1.bf16.msra.mxu1 %v14250_v52 }
 0x3b4   :  { %3768 = vmatprep.subr.bf16.mxu1 %v14069_v7 }
 0x409   :  { %v2296_v35 = vpop.f32.mrb[36].mxu1  ;;  %v2337_v28 = vpop.f32.mrb[32].mxu0 }
 0x40a   :  { %v2297_v50 = vadd.f32 %v2296_v35, %v13965_v59  ;;  %v2298_v56 = vpop.f32.mrb[37].mxu1  ;;  %v2339_v26 = vpop.f32.mrb[33].mxu0 }
 0x40b   :  { %v2299_v17 = vadd.f32 %v2298_v56, %v13968_v32  ;;  %v2340_v15 = vadd.f32 %v2339_v26, %v13980_v49  ;;  %v2300_v1 = vpop.f32.mrb[38].mxu1  ;;  %v2341_v48 = vpop.f32.mrb[34].mxu0  ;;  %v2338_v26 = vadd.f32 %v2337_v28, %v13977_v45 }
 0x40c   :  { %v2391_v52 = vadd.f32 %v2297_v50, %v13802_v3  ;;  %v2301_v54 = vpop.f32.mrb[39].mxu1  ;;  %v2342_v0 = vpop.f32.mrb[35].mxu0 }
 0x40d   :  { %v2392_v7 = vadd.f32 %v2299_v17, %v13810_v16  ;;  %v2411_v46 = vadd.f32 %v2340_v15, %v13889_v63  ;;  %v1680_v54 = vsel %vm307_vm13, %v13988_v12, 0.0  ;;  %v14691_v12 = vld [vmem:[#allocation9 + $0x2a4] ss:$24 sps:$4 sm:$0xff]  }
 0x40e   :  { %v10488_v58 = vmul.f32 -1.442695, %v2391_v52 }
 0x40f   :  { %v10489_v57 = vmul.f32 -1.442695, %v2392_v7  ;;  %v10490_v0 = vmul.f32 -1.442695, %v2411_v46 }
 0x410   :  { %12533 = vpow2.f32 %v10488_v58 }
 0x411   :  { %12535 = vpow2.f32 %v10489_v57 }
 0x41a   :  { %v12534_v35 = vpop.eup %12533 }
 0x41b   :  { %v2399_v59 = vadd.f32 1.0, %v12534_v35  ;;  %v12536_v56 = vpop.eup %12535 }
 0x41c   :  { %v2400_v50 = vadd.f32 1.0, %v12536_v56 }
 0x41d   :  { %12537 = vrcp.f32 %v2399_v59 }
 0x427   :  { %v12538_v1 = vpop.eup %12537 }
 0x428   :  { %v2405_v48 = vmul.f32 %v12538_v1, %v2338_v26 }
 0x42a   :  { %v2406_v3 = vadd.f32 %v2405_v48, %v13805_v5 }
 0x42c   :  { %12539 = vtanh.f32 %v2406_v3 }
 0x42d   :  { %12541 = vrcp.f32 %v2400_v50 }
 0x42e   :  { %12543 = vpow2.f32 %v10490_v0 }
 0x436   :  { %v12540_v16 = vpop.eup %12539 }
 0x437   :  { %v2408_v63 = vsub.f32 %v1680_v54, %v12540_v16  ;;  %v12542_v52 = vpop.eup %12541 }
 0x438   :  { %v12544_v58 = vpop.eup %12543 }
 0x439   :  { %v2409_v59 = vmul.f32 %v12542_v52, %v2408_v63  ;;  %v2419_v28 = vadd.f32 1.0, %v12544_v58  ;;  %v1681_v63 = vsel %vm314_vm12, %v14003_v44, 0.0 }
 0x43b   :  { %v14270_v57 = vadd.f32 %v12540_v16, %v2409_v59  ;;  %12545 = vrcp.f32 %v2419_v28 }
 0x43d   :  { %17681 = vst [vmem:[#allocation98_spill] sm:$0xff] %v14270_v57 }
 0x445   :  { %v12546_v35 = vpop.eup %12545 }
 0x449   :  { %v2378_v15 = vpop.f32.mrb[40].mxu1 }
 0x44a   :  { %v2379_v5 = vadd.f32 %v2378_v15, %v13991_v47  ;;  %v2380_v17 = vpop.f32.mrb[41].mxu1 }
 0x44b   :  { %v2381_v46 = vadd.f32 %v2380_v17, %v13994_v51  ;;  %v2382_v7 = vpop.f32.mrb[42].mxu1 }
 0x44c   :  { %v2412_v56 = vadd.f32 %v2379_v5, %v13956_v60  ;;  %v2383_v26 = vpop.f32.mrb[43].mxu1  ;;  %v14295_v5 = vld [vmem:[#allocation9 + $0x10] ss:$24 sps:$4 sm:$0xff]   ;;  %v14309_v7 = vld [vmem:[#allocation9 + $0x74] ss:$24 sps:$4 sm:$0xff]  }
 0x44d   :  { %v2425_v1 = vmul.f32 %v12546_v35, %v2381_v46  ;;  %v14301_v46 = vld [vmem:[#allocation9 + $0x44] ss:$24 sps:$4 sm:$0xff]   ;;  %v14314_v35 = vld [vmem:[#allocation9 + $0x70] ss:$24 sps:$4 sm:$0xff]   ;;  %v14322_v26 = vld [vmem:[#allocation9 + $0xa0] ss:$24 sps:$4 sm:$0xff]  }
 0x44e   :  { %v10491_v48 = vmul.f32 -1.442695, %v2412_v56  ;;  %v14317_v56 = vld [vmem:[#allocation9 + $0xa4] ss:$24 sps:$4 sm:$0xff]  }
 0x44f   :  { %v2426_v3 = vadd.f32 %v2425_v1, %v13959_v39  ;;  %v14286_v39 = vsel %vm308_vm0, %v14270_v57, %v1680_v54  ;;  %v14306_v54 = vld [vmem:[#allocation9 + $0x40] ss:$24 sps:$4 sm:$0xff]   ;;  %v14372_v1 = vld [vmem:[#allocation9 + $0x1f4] ss:$24 sps:$4 sm:$0xff]  }
 0x450   :  { %12547 = vpow2.f32 %v10491_v48  ;;  %v14299_v17 = vpack.c.bf16 %v14286_v39, %v14286_v39  ;;  %v14381_v48 = vld [vmem:[#allocation9 + $0x220] ss:$24 sps:$4 sm:$0xff]   ;;  %v17716_v57 = vld [vmem:[#allocation48_spill] sm:$0xff] }
 0x451   :  { %12549 = vtanh.f32 %v2426_v3  ;;  %v14387_v3 = vld [vmem:[#allocation9 + $0x250] ss:$24 sps:$4 sm:$0xff]  }
 0x45a   :  { %v12548_v50 = vpop.eup %12547 }
 0x45b   :  { %v2420_v0 = vadd.f32 1.0, %v12548_v50  ;;  %v12550_v16 = vpop.eup %12549  ;;  %v14390_v50 = vld [vmem:[#allocation9 + $0x284] ss:$24 sps:$4 sm:$0xff]  }
 0x45c   :  { %v2428_v52 = vsub.f32 %v1681_v63, %v12550_v16 }
 0x45d   :  { %12551 = vrcp.f32 %v2420_v0  ;;  %v14393_v0 = vld [vmem:[#allocation9 + $0x280] ss:$24 sps:$4 sm:$0xff]  }
 0x467   :  { %v12552_v59 = vpop.eup %12551 }
 0x468   :  { %v2429_v58 = vmul.f32 %v12552_v59, %v2428_v52  ;;  %v14402_v52 = vld [vmem:[#allocation9 + $0x2e4] ss:$24 sps:$4 sm:$0xff]   ;;  %v14405_v59 = vld [vmem:[#allocation9 + $0x2e0] ss:$24 sps:$4 sm:$0xff]  }
 0x46a   :  { %v14280_v60 = vadd.f32 %v12550_v16, %v2429_v58  ;;  %v14396_v16 = vld [vmem:[#allocation9 + $0x2b4] ss:$24 sps:$4 sm:$0xff]   ;;  %v17699_v58 = vld [vmem:[#allocation30_spill] sm:$0xff] }
 0x46c   :  { %17682 = vst [vmem:[#allocation99_spill] sm:$0xff] %v14280_v60  ;;  %v14291_v28 = vsel %vm313_vm1, %v14280_v60, %v1681_v63  ;;  %v14399_v63 = vld [vmem:[#allocation9 + $0x2b0] ss:$24 sps:$4 sm:$0xff]  }
 0x46d   :  { %v2438_v15 = vpack.c.bf16 %v14291_v28, %v14291_v28 }
 0x46f   :  { %3047 = vmatprep.mubr.bf16.mxu0 %v2438_v15  ;;  %3088 = vmatprep.mubr.bf16.mxu1 %v2438_v15 }
 0x470   :  { %3048 = vmatmul.mubr.bf16.vlgmr.msra.gmra.mrb[36].mxu0 %v14299_v17  ;;  %3089 = vmatmul.mubr.bf16.vlgmr.msra.gmra.mrb[44].mxu1 %v14299_v17 }
 0x471   :  { %3098 = vmatpush1.bf16.msra.mxu0 %v14295_v5  ;;  %3129 = vmatprep.mubr.bf16.mxu0 %v2438_v15  ;;  %v17700_v15 = vld [vmem:[#allocation31_spill] sm:$0xff] }
 0x472   :  { %3099 = vmatprep.subr.bf16.mxu0 %v14301_v46  ;;  %3769 = vmatpush1.bf16.msra.mxu1 %v14067_v4  ;;  %v14325_v4 = vld [vmem:[#allocation9 + $0xd4] ss:$24 sps:$4 sm:$0xff]  }
 0x473   :  { %3770 = vmatprep.subr.bf16.mxu1 %v14075_v19  ;;  %v14330_v19 = vld [vmem:[#allocation9 + $0xd0] ss:$24 sps:$4 sm:$0xff]  }
 0x475   :  { %3100 = vmatpush1.bf16.msra.mxu0 %v14306_v54 }
 0x476   :  { %3101 = vmatprep.subr.bf16.mxu0 %v14309_v7  ;;  %3771 = vmatpush1.bf16.msra.mxu1 %v14082_v62  ;;  %v14333_v62 = vld [vmem:[#allocation9 + $0x104] ss:$24 sps:$4 sm:$0xff]  }
 0x477   :  { %3772 = vmatprep.subr.bf16.mxu1 %v14088_v9  ;;  %v14338_v9 = vld [vmem:[#allocation9 + $0x100] ss:$24 sps:$4 sm:$0xff]  }
 0x479   :  { %3102 = vmatpush1.bf16.msra.mxu0 %v14314_v35 }
 0x47a   :  { %3103 = vmatprep.subr.bf16.mxu0 %v14317_v56  ;;  %3773 = vmatpush1.bf16.msra.mxu1 %v14094_v14  ;;  %v14341_v14 = vld [vmem:[#allocation9 + $0x134] ss:$24 sps:$4 sm:$0xff]  }
 0x47b   :  { %3774 = vmatprep.subr.bf16.mxu1 %v14100_v23  ;;  %v14346_v23 = vld [vmem:[#allocation9 + $0x130] ss:$24 sps:$4 sm:$0xff]  }
 0x47d   :  { %3104 = vmatpush1.bf16.msra.mxu0 %v14322_v26 }
 0x47e   :  { %3105 = vmatprep.subr.bf16.mxu0 %v14325_v4  ;;  %3775 = vmatpush1.bf16.msra.mxu1 %v14106_v27  ;;  %v14349_v27 = vld [vmem:[#allocation9 + $0x164] ss:$24 sps:$4 sm:$0xff]  }
 0x47f   :  { %3776 = vmatprep.subr.bf16.mxu1 %v14112_v34  ;;  %v14354_v34 = vld [vmem:[#allocation9 + $0x160] ss:$24 sps:$4 sm:$0xff]  }
 0x481   :  { %3106 = vmatpush1.bf16.msra.mxu0 %v14330_v19 }
 0x482   :  { %3107 = vmatprep.subr.bf16.mxu0 %v14333_v62  ;;  %3777 = vmatpush1.bf16.msra.mxu1 %v14118_v53  ;;  %v14357_v53 = vld [vmem:[#allocation9 + $0x194] ss:$24 sps:$4 sm:$0xff]  }
 0x483   :  { %3778 = vmatprep.subr.bf16.mxu1 %v14124_v18  ;;  %v14362_v18 = vld [vmem:[#allocation9 + $0x190] ss:$24 sps:$4 sm:$0xff]  }
 0x485   :  { %3108 = vmatpush1.bf16.msra.mxu0 %v14338_v9 }
 0x486   :  { %3109 = vmatprep.subr.bf16.mxu0 %v14341_v14  ;;  %3779 = vmatpush1.bf16.msra.mxu1 %v14130_v41  ;;  %v14365_v41 = vld [vmem:[#allocation9 + $0x1c4] ss:$24 sps:$4 sm:$0xff]  }
 0x487   :  { %3780 = vmatprep.subr.bf16.mxu1 %v14136_v38  ;;  %v14369_v38 = vld [vmem:[#allocation9 + $0x1c0] ss:$24 sps:$4 sm:$0xff]  }
 0x489   :  { %3110 = vmatpush1.bf16.msra.mxu0 %v14346_v23 }
 0x48a   :  { %3111 = vmatprep.subr.bf16.mxu0 %v14349_v27  ;;  %3781 = vmatpush1.bf16.msra.mxu1 %v14142_v36  ;;  %v14375_v36 = vld [vmem:[#allocation9 + $0x1f0] ss:$24 sps:$4 sm:$0xff]  }
 0x48b   :  { %3782 = vmatprep.subr.bf16.mxu1 %v14151_v55  ;;  %v14378_v55 = vld [vmem:[#allocation9 + $0x224] ss:$24 sps:$4 sm:$0xff]  }
 0x48d   :  { %3112 = vmatpush1.bf16.msra.mxu0 %v14354_v34 }
 0x48e   :  { %3113 = vmatprep.subr.bf16.mxu0 %v14357_v53  ;;  %3783 = vmatpush1.bf16.msra.mxu1 %v14153_v61  ;;  %v14384_v61 = vld [vmem:[#allocation9 + $0x254] ss:$24 sps:$4 sm:$0xff]  }
 0x491   :  { %3114 = vmatpush1.bf16.msra.mxu0 %v14362_v18 }
 0x492   :  { %3115 = vmatprep.subr.bf16.mxu0 %v14365_v41 }
 0x495   :  { %3116 = vmatpush1.bf16.msra.mxu0 %v14369_v38 }
 0x496   :  { %3117 = vmatprep.subr.bf16.mxu0 %v14372_v1 }
 0x499   :  { %3118 = vmatpush1.bf16.msra.mxu0 %v14375_v36 }
 0x49a   :  { %3119 = vmatprep.subr.bf16.mxu0 %v14378_v55 }
 0x49d   :  { %3120 = vmatpush1.bf16.msra.mxu0 %v14381_v48 }
 0x49e   :  { %3121 = vmatprep.subr.bf16.mxu0 %v14384_v61 }
 0x4a1   :  { %3122 = vmatpush1.bf16.msra.mxu0 %v14387_v3 }
 0x4a2   :  { %3123 = vmatprep.subr.bf16.mxu0 %v14390_v50 }
 0x4a5   :  { %3124 = vmatpush1.bf16.msra.mxu0 %v14393_v0 }
 0x4a6   :  { %3125 = vmatprep.subr.bf16.mxu0 %v14396_v16 }
 0x4a9   :  { %3126 = vmatpush1.bf16.msra.mxu0 %v14399_v63 }
 0x4aa   :  { %3127 = vmatprep.subr.bf16.mxu0 %v14402_v52 }
 0x4ad   :  { %3128 = vmatpush1.bf16.msra.mxu0 %v14405_v59 }
 0x4ae   :  { %3809 = vmatprep.subr.bf16.mxu0 %v14073_v13  ;;  %v17684_v13 = vld [vmem:[#allocation29_spill] sm:$0xff] }
 0x4b0   :  { %3130 = vmatmul.mubr.bf16.vlgmr.msra.gmra.mrb[40].mxu0 %v14299_v17  ;;  %v17701_v17 = vld [vmem:[#allocation34_spill] sm:$0xff] }
 0x4b1   :  { %3810 = vmatpush1.bf16.msra.mxu0 %v14071_v10  ;;  %v17683_v10 = vld [vmem:[#allocation28_spill] sm:$0xff] }
 0x4b2   :  { %3811 = vmatprep.subr.bf16.mxu0 %v14078_v21  ;;  %v17685_v21 = vld [vmem:[#allocation32_spill] sm:$0xff] }
 0x4b5   :  { %3812 = vmatpush1.bf16.msra.mxu0 %v14086_v6  ;;  %v17686_v6 = vld [vmem:[#allocation33_spill] sm:$0xff] }
 0x4b6   :  { %3813 = vmatprep.subr.bf16.mxu0 %v14091_v11  ;;  %v17687_v11 = vld [vmem:[#allocation36_spill] sm:$0xff] }
 0x4b9   :  { %3814 = vmatpush1.bf16.msra.mxu0 %v14098_v20  ;;  %v17688_v20 = vld [vmem:[#allocation37_spill] sm:$0xff] }
 0x4ba   :  { %3815 = vmatprep.subr.bf16.mxu0 %v14103_v25  ;;  %v17689_v25 = vld [vmem:[#allocation84_spill] sm:$0xff] }
 0x4bd   :  { %3816 = vmatpush1.bf16.msra.mxu0 %v14110_v29  ;;  %v17690_v29 = vld [vmem:[#allocation40_spill] sm:$0xff] }
 0x4be   :  { %3817 = vmatprep.subr.bf16.mxu0 %v14115_v37  ;;  %v17691_v37 = vld [vmem:[#allocation86_spill] sm:$0xff] }
 0x4c1   :  { %3818 = vmatpush1.bf16.msra.mxu0 %v14122_v22  ;;  %v17692_v22 = vld [vmem:[#allocation88_spill] sm:$0xff] }
 0x4c2   :  { %3819 = vmatprep.subr.bf16.mxu0 %v14127_v8  ;;  %v17693_v8 = vld [vmem:[#allocation90_spill] sm:$0xff] }
 0x4c5   :  { %3820 = vmatpush1.bf16.msra.mxu0 %v14134_v43  ;;  %v17694_v43 = vld [vmem:[#allocation92_spill] sm:$0xff] }
 0x4c6   :  { %3821 = vmatprep.subr.bf16.mxu0 %v14139_v42  ;;  %v17695_v42 = vld [vmem:[#allocation94_spill] sm:$0xff] }
 0x4c9   :  { %3822 = vmatpush1.bf16.msra.mxu0 %v14146_v40  ;;  %v17696_v40 = vld [vmem:[#allocation96_spill] sm:$0xff] }
 0x4ca   :  { %3823 = vmatprep.subr.bf16.mxu0 %v14155_v24  ;;  %v14442_v24 = vld [vmem:[#allocation9 + $0x184] ss:$24 sps:$4 sm:$0xff]  }
 0x4cb   :  { %3784 = vmatprep.subr.bf16.mxu1 %v14442_v24 }
 0x4cd   :  { %3824 = vmatpush1.bf16.msra.mxu0 %v14158_v30  ;;  %v14444_v30 = vld [vmem:[#allocation9 + $0x180] ss:$24 sps:$4 sm:$0xff]  }
 0x4ce   :  { %3825 = vmatprep.subr.bf16.mxu0 %v14164_v33  ;;  %3785 = vmatpush1.bf16.msra.mxu1 %v14444_v30  ;;  %v17697_v33 = vld [vmem:[#allocation26_spill] sm:$0xff] }
 0x4cf   :  { %3786 = vmatprep.subr.bf16.mxu1 %v17697_v33 }
 0x4d1   :  { %3826 = vmatpush1.bf16.msra.mxu0 %v14166_v2  ;;  %v17698_v2 = vld [vmem:[#allocation27_spill] sm:$0xff] }
 0x4d2   :  { %3827 = vmatprep.subr.bf16.mxu0 %v17683_v10  ;;  %3787 = vmatpush1.bf16.msra.mxu1 %v17698_v2  ;;  %v17702_v10 = vld [vmem:[#allocation35_spill] sm:$0xff] }
 0x4d3   :  { %3788 = vmatprep.subr.bf16.mxu1 %v17699_v58  ;;  %17738 = vst [vmem:[#allocation35_spill] sm:$0xff] %v14691_v12 }
 0x4d5   :  { %3828 = vmatpush1.bf16.msra.mxu0 %v17684_v13  ;;  %v17703_v13 = vld [vmem:[#allocation39_spill] sm:$0xff] }
 0x4d6   :  { %3829 = vmatprep.subr.bf16.mxu0 %v17685_v21  ;;  %3789 = vmatpush1.bf16.msra.mxu1 %v17700_v15  ;;  %v17704_v21 = vld [vmem:[#allocation38_spill] sm:$0xff] }
 0x4d7   :  { %3790 = vmatprep.subr.bf16.mxu1 %v17701_v17 }
 0x4d9   :  { %3830 = vmatpush1.bf16.msra.mxu0 %v17686_v6  ;;  %v17705_v6 = vld [vmem:[#allocation85_spill] sm:$0xff] }
 0x4da   :  { %3831 = vmatprep.subr.bf16.mxu0 %v17687_v11  ;;  %3791 = vmatpush1.bf16.msra.mxu1 %v17702_v10  ;;  %v17706_v11 = vld [vmem:[#allocation87_spill] sm:$0xff] }
 0x4db   :  { %3792 = vmatprep.subr.bf16.mxu1 %v17703_v13  ;;  %v17713_v13 = vld [vmem:[#allocation47_spill] sm:$0xff] }
 0x4dd   :  { %3832 = vmatpush1.bf16.msra.mxu0 %v17688_v20  ;;  %v17707_v20 = vld [vmem:[#allocation89_spill] sm:$0xff] }
 0x4de   :  { %3833 = vmatprep.subr.bf16.mxu0 %v17689_v25  ;;  %3793 = vmatpush1.bf16.msra.mxu1 %v17704_v21  ;;  %v17708_v25 = vld [vmem:[#allocation91_spill] sm:$0xff] }
 0x4df   :  { %3794 = vmatprep.subr.bf16.mxu1 %v17705_v6 }
 0x4e1   :  { %3834 = vmatpush1.bf16.msra.mxu0 %v17690_v29  ;;  %v17709_v29 = vld [vmem:[#allocation93_spill] sm:$0xff] }
 0x4e2   :  { %3835 = vmatprep.subr.bf16.mxu0 %v17691_v37  ;;  %3795 = vmatpush1.bf16.msra.mxu1 %v17706_v11  ;;  %v17710_v37 = vld [vmem:[#allocation95_spill] sm:$0xff] }
 0x4e3   :  { %3796 = vmatprep.subr.bf16.mxu1 %v17707_v20  ;;  %v17714_v20 = vld [vmem:[#allocation49_spill] sm:$0xff] }
 0x4e5   :  { %3836 = vmatpush1.bf16.msra.mxu0 %v17692_v22  ;;  %v17711_v22 = vld [vmem:[#allocation97_spill] sm:$0xff] }
 0x4e6   :  { %3837 = vmatprep.subr.bf16.mxu0 %v17693_v8  ;;  %3797 = vmatpush1.bf16.msra.mxu1 %v17708_v25 }
 0x4e7   :  { %3798 = vmatprep.subr.bf16.mxu1 %v17709_v29  ;;  %v17715_v29 = vld [vmem:[#allocation62_spill] sm:$0xff] }
 0x4e9   :  { %3838 = vmatpush1.bf16.msra.mxu0 %v17694_v43 }
 0x4ea   :  { %3839 = vmatprep.subr.bf16.mxu0 %v17695_v42  ;;  %3799 = vmatpush1.bf16.msra.mxu1 %v17710_v37  ;;  %v17712_v42 = vld [vmem:[#allocation77_spill] sm:$0xff] }
 0x4eb   :  { %3850 = vmatprep.subr.bf16.mxu1 %v17711_v22 }
 0x4ed   :  { %3840 = vmatpush1.bf16.msra.mxu0 %v17696_v40 }
 0x543   :  { %v3049_v8 = vpop.f32.mrb[36].mxu0  ;;  %v3090_v43 = vpop.f32.mrb[44].mxu1 }
 0x544   :  { %v3050_v40 = vadd.f32 %v3049_v8, %v17712_v42  ;;  %v3051_v33 = vpop.f32.mrb[37].mxu0  ;;  %v3092_v2 = vpop.f32.mrb[45].mxu1 }
 0x545   :  { %v3052_v58 = vadd.f32 %v3051_v33, %v13968_v32  ;;  %v3093_v15 = vadd.f32 %v3092_v2, %v13980_v49  ;;  %v3053_v17 = vpop.f32.mrb[38].mxu0  ;;  %v3094_v10 = vpop.f32.mrb[46].mxu1  ;;  %v3091_v2 = vadd.f32 %v3090_v43, %v13977_v45 }
 0x546   :  { %v3144_v21 = vadd.f32 %v3050_v40, %v17713_v13  ;;  %v3054_v6 = vpop.f32.mrb[39].mxu0  ;;  %v3095_v11 = vpop.f32.mrb[47].mxu1 }
 0x547   :  { %v3145_v25 = vadd.f32 %v3052_v58, %v17714_v20  ;;  %v3164_v37 = vadd.f32 %v3093_v15, %v17715_v29 }
 0x548   :  { %v10588_v22 = vmul.f32 -1.442695, %v3144_v21 }
 0x549   :  { %v10589_v44 = vmul.f32 -1.442695, %v3145_v25  ;;  %v10590_v6 = vmul.f32 -1.442695, %v3164_v37 }
 0x54a   :  { %12553 = vpow2.f32 %v10588_v22 }
 0x54b   :  { %12555 = vpow2.f32 %v10589_v44 }
 0x554   :  { %v12554_v8 = vpop.eup %12553 }
 0x555   :  { %v3152_v60 = vadd.f32 1.0, %v12554_v8  ;;  %v12556_v33 = vpop.eup %12555  ;;  %v17718_v8 = vld [vmem:[#allocation75_spill] sm:$0xff] }
 0x556   :  { %v3153_v13 = vadd.f32 1.0, %v12556_v33 }
 0x557   :  { %12557 = vrcp.f32 %v3152_v60 }
 0x561   :  { %v12558_v17 = vpop.eup %12557 }
 0x562   :  { %v3158_v10 = vmul.f32 %v12558_v17, %v3091_v2 }
 0x564   :  { %v3159_v40 = vadd.f32 %v3158_v10, %v17716_v57 }
 0x566   :  { %12559 = vtanh.f32 %v3159_v40  ;;  %v17719_v40 = vld [vmem:[#allocation76_spill] sm:$0xff] }
 0x567   :  { %12561 = vrcp.f32 %v3153_v13 }
 0x568   :  { %12563 = vpow2.f32 %v10590_v6 }
 0x570   :  { %v12560_v58 = vpop.eup %12559 }
 0x571   :  { %v3161_v15 = vsub.f32 %v14286_v39, %v12560_v58  ;;  %v12562_v21 = vpop.eup %12561 }
 0x572   :  { %v12564_v20 = vpop.eup %12563 }
 0x573   :  { %v3162_v11 = vmul.f32 %v12562_v21, %v3161_v15  ;;  %v3172_v60 = vadd.f32 1.0, %v12564_v20 }
 0x575   :  { %v14472_v44 = vadd.f32 %v12560_v58, %v3162_v11  ;;  %12565 = vrcp.f32 %v3172_v60 }
 0x577   :  { %17717 = vst [vmem:[#allocation28_spill] sm:$0xff] %v14472_v44 }
 0x57f   :  { %v12566_v37 = vpop.eup %12565 }
 0x583   :  { %v3131_v43 = vpop.f32.mrb[40].mxu0 }
 0x584   :  { %v3132_v25 = vadd.f32 %v3131_v43, %v13991_v47  ;;  %v3133_v29 = vpop.f32.mrb[41].mxu0  ;;  %v14487_v43 = vsel %vm309_vm2, %v14472_v44, %v14286_v39  ;;  %v14530_v39 = vld [vmem:[#allocation9 + $0x4] ss:$24 sps:$4 sm:$0xff]   ;;  %v14689_v44 = vld [vmem:[#allocation9 + $0x278] ss:$24 sps:$4 sm:$0xff]  }
 0x585   :  { %v3134_v57 = vadd.f32 %v3133_v29, %v13994_v51  ;;  %v3135_v22 = vpop.f32.mrb[42].mxu0  ;;  %4521 = vmatprep.subr.bf16.mxu0 %v14530_v39  ;;  %17737 = vst [vmem:[#allocation34_spill] sm:$0xff] %v14689_v44 }
 0x586   :  { %v3165_v33 = vadd.f32 %v3132_v25, %v17718_v8  ;;  %v3136_v2 = vpop.f32.mrb[43].mxu0  ;;  %v14629_v22 = vld [vmem:[#allocation9 + $0x188] ss:$24 sps:$4 sm:$0xff]  }
 0x587   :  { %v3178_v17 = vmul.f32 %v12566_v37, %v3134_v57  ;;  %v3190_v57 = vpack.c.bf16 %v14487_v43, %v14487_v43  ;;  %v14634_v37 = vld [vmem:[#allocation9 + $0x1b4] ss:$24 sps:$4 sm:$0xff]   ;;  %v14636_v8 = vld [vmem:[#allocation9 + $0x1b0] ss:$24 sps:$4 sm:$0xff]  }
 0x588   :  { %v10591_v10 = vmul.f32 -1.442695, %v3165_v33  ;;  %17721 = vst [vmem:[#allocation32_spill] sm:$0xff] %v14634_v37  ;;  %17722 = vst [vmem:[#allocation33_spill] sm:$0xff] %v14636_v8  ;;  %v14638_v33 = vld [vmem:[#allocation9 + $0x1bc] ss:$24 sps:$4 sm:$0xff]  }
 0x589   :  { %v3179_v13 = vadd.f32 %v3178_v17, %v17719_v40  ;;  %v14641_v2 = vld [vmem:[#allocation9 + $0x1b8] ss:$24 sps:$4 sm:$0xff]   ;;  %v14650_v17 = vld [vmem:[#allocation9 + $0x1ec] ss:$24 sps:$4 sm:$0xff]  }
 0x58a   :  { %12567 = vpow2.f32 %v10591_v10  ;;  %v14653_v10 = vld [vmem:[#allocation9 + $0x1e8] ss:$24 sps:$4 sm:$0xff]   ;;  %v14658_v40 = vld [vmem:[#allocation9 + $0x214] ss:$24 sps:$4 sm:$0xff]  }
 0x58b   :  { %12569 = vtanh.f32 %v3179_v13  ;;  %17725 = vst [vmem:[#allocation84_spill] sm:$0xff] %v14653_v10  ;;  %17726 = vst [vmem:[#allocation40_spill] sm:$0xff] %v14658_v40  ;;  %v14660_v13 = vld [vmem:[#allocation9 + $0x210] ss:$24 sps:$4 sm:$0xff]  }
 0x58c   :  { %17727 = vst [vmem:[#allocation86_spill] sm:$0xff] %v14660_v13 }
 0x594   :  { %v12568_v6 = vpop.eup %12567 }
 0x595   :  { %v3173_v58 = vadd.f32 1.0, %v12568_v6  ;;  %v12570_v15 = vpop.eup %12569  ;;  %v14662_v6 = vld [vmem:[#allocation9 + $0x21c] ss:$24 sps:$4 sm:$0xff]  }
 0x596   :  { %v3181_v21 = vsub.f32 %v14291_v28, %v12570_v15  ;;  %17728 = vst [vmem:[#allocation88_spill] sm:$0xff] %v14662_v6 }
 0x597   :  { %12571 = vrcp.f32 %v3173_v58  ;;  %v14665_v58 = vld [vmem:[#allocation9 + $0x218] ss:$24 sps:$4 sm:$0xff]  }
 0x598   :  { %17729 = vst [vmem:[#allocation90_spill] sm:$0xff] %v14665_v58 }
 0x5a1   :  { %v12572_v11 = vpop.eup %12571 }
 0x5a2   :  { %v3182_v20 = vmul.f32 %v12572_v11, %v3181_v21  ;;  %v14672_v21 = vld [vmem:[#allocation9 + $0x244] ss:$24 sps:$4 sm:$0xff]   ;;  %v14674_v11 = vld [vmem:[#allocation9 + $0x248] ss:$24 sps:$4 sm:$0xff]  }
 0x5a3   :  { %17731 = vst [vmem:[#allocation94_spill] sm:$0xff] %v14672_v21  ;;  %17732 = vst [vmem:[#allocation96_spill] sm:$0xff] %v14674_v11 }
 0x5a4   :  { %v14480_v60 = vadd.f32 %v12570_v15, %v3182_v20  ;;  %v14670_v15 = vld [vmem:[#allocation9 + $0x240] ss:$24 sps:$4 sm:$0xff]   ;;  %v14676_v20 = vld [vmem:[#allocation9 + $0x24c] ss:$24 sps:$4 sm:$0xff]  }
 0x5a5   :  { %17730 = vst [vmem:[#allocation92_spill] sm:$0xff] %v14670_v15  ;;  %17733 = vst [vmem:[#allocation26_spill] sm:$0xff] %v14676_v20 }
 0x5a6   :  { %17720 = vst [vmem:[#allocation29_spill] sm:$0xff] %v14480_v60  ;;  %v14493_v25 = vsel %vm312_vm3, %v14480_v60, %v14291_v28  ;;  %v14532_v28 = vld [vmem:[#allocation9] ss:$24 sps:$4 sm:$0xff]   ;;  %v14685_v60 = vld [vmem:[#allocation9 + $0x270] ss:$24 sps:$4 sm:$0xff]  }
 0x5a7   :  { %v3191_v29 = vpack.c.bf16 %v14493_v25, %v14493_v25  ;;  %17736 = vst [vmem:[#allocation31_spill] sm:$0xff] %v14685_v60 }
 0x5a9   :  { %3800 = vmatprep.mubr.bf16.mxu1 %v3191_v29  ;;  %3841 = vmatprep.mubr.bf16.mxu0 %v3191_v29 }
 0x5aa   :  { %3801 = vmatmul.mubr.bf16.vlgmr.msra.gmra.mrb[48].mxu1 %v3190_v57  ;;  %3842 = vmatmul.mubr.bf16.vlgmr.msra.gmra.mrb[44].mxu0 %v3190_v57 }
 0x5ab   :  { %3851 = vmatpush1.bf16.msra.mxu1 %v14295_v5  ;;  %3882 = vmatprep.mubr.bf16.mxu1 %v3191_v29  ;;  %v14534_v5 = vld [vmem:[#allocation9 + $0xc] ss:$24 sps:$4 sm:$0xff]  }
 0x5ac   :  { %3852 = vmatprep.subr.bf16.mxu1 %v14301_v46  ;;  %v14537_v46 = vld [vmem:[#allocation9 + $0x8] ss:$24 sps:$4 sm:$0xff]   ;;  %4522 = vmatpush1.bf16.msra.mxu0 %v14532_v28  ;;  %v14678_v29 = vld [vmem:[#allocation9 + $0x274] ss:$24 sps:$4 sm:$0xff]  }
 0x5ad   :  { %17734 = vst [vmem:[#allocation27_spill] sm:$0xff] %v14678_v29 }
 0x5af   :  { %3853 = vmatpush1.bf16.msra.mxu1 %v14306_v54  ;;  %v14542_v54 = vld [vmem:[#allocation9 + $0x34] ss:$24 sps:$4 sm:$0xff]  }
 0x5b0   :  { %3854 = vmatprep.subr.bf16.mxu1 %v14309_v7  ;;  %v14544_v7 = vld [vmem:[#allocation9 + $0x30] ss:$24 sps:$4 sm:$0xff]   ;;  %4523 = vmatprep.subr.bf16.mxu0 %v14542_v54 }
 0x5b1   :  { %4524 = vmatpush1.bf16.msra.mxu0 %v14544_v7 }
 0x5b3   :  { %3855 = vmatpush1.bf16.msra.mxu1 %v14314_v35  ;;  %v14546_v35 = vld [vmem:[#allocation9 + $0x3c] ss:$24 sps:$4 sm:$0xff]  }
 0x5b4   :  { %3856 = vmatprep.subr.bf16.mxu1 %v14317_v56  ;;  %v14549_v56 = vld [vmem:[#allocation9 + $0x38] ss:$24 sps:$4 sm:$0xff]  }
 0x5b7   :  { %3857 = vmatpush1.bf16.msra.mxu1 %v14322_v26  ;;  %v14554_v26 = vld [vmem:[#allocation9 + $0x64] ss:$24 sps:$4 sm:$0xff]  }
 0x5b8   :  { %3858 = vmatprep.subr.bf16.mxu1 %v14325_v4  ;;  %v14556_v4 = vld [vmem:[#allocation9 + $0x60] ss:$24 sps:$4 sm:$0xff]   ;;  %4525 = vmatprep.subr.bf16.mxu0 %v14554_v26 }
 0x5b9   :  { %4526 = vmatpush1.bf16.msra.mxu0 %v14556_v4 }
 0x5bb   :  { %3859 = vmatpush1.bf16.msra.mxu1 %v14330_v19  ;;  %v14558_v19 = vld [vmem:[#allocation9 + $0x6c] ss:$24 sps:$4 sm:$0xff]  }
 0x5bc   :  { %3860 = vmatprep.subr.bf16.mxu1 %v14333_v62  ;;  %v14561_v62 = vld [vmem:[#allocation9 + $0x68] ss:$24 sps:$4 sm:$0xff]  }
 0x5bf   :  { %3861 = vmatpush1.bf16.msra.mxu1 %v14338_v9  ;;  %v14563_v9 = vld [vmem:[#allocation9 + $0x94] ss:$24 sps:$4 sm:$0xff]  }
 0x5c0   :  { %3862 = vmatprep.subr.bf16.mxu1 %v14341_v14  ;;  %v14567_v14 = vld [vmem:[#allocation9 + $0x90] ss:$24 sps:$4 sm:$0xff]   ;;  %4527 = vmatprep.subr.bf16.mxu0 %v14563_v9 }
 0x5c1   :  { %4528 = vmatpush1.bf16.msra.mxu0 %v14567_v14 }
 0x5c3   :  { %3863 = vmatpush1.bf16.msra.mxu1 %v14346_v23  ;;  %v14569_v23 = vld [vmem:[#allocation9 + $0x9c] ss:$24 sps:$4 sm:$0xff]  }
 0x5c4   :  { %3864 = vmatprep.subr.bf16.mxu1 %v14349_v27  ;;  %v14573_v27 = vld [vmem:[#allocation9 + $0x98] ss:$24 sps:$4 sm:$0xff]  }
 0x5c7   :  { %3865 = vmatpush1.bf16.msra.mxu1 %v14354_v34  ;;  %v14575_v34 = vld [vmem:[#allocation9 + $0xc4] ss:$24 sps:$4 sm:$0xff]  }
 0x5c8   :  { %3866 = vmatprep.subr.bf16.mxu1 %v14357_v53  ;;  %v14578_v53 = vld [vmem:[#allocation9 + $0xcc] ss:$24 sps:$4 sm:$0xff]   ;;  %4529 = vmatprep.subr.bf16.mxu0 %v14575_v34 }
 0x5cb   :  { %3867 = vmatpush1.bf16.msra.mxu1 %v14362_v18  ;;  %v14581_v18 = vld [vmem:[#allocation9 + $0xc0] ss:$24 sps:$4 sm:$0xff]  }
 0x5cc   :  { %3868 = vmatprep.subr.bf16.mxu1 %v14365_v41  ;;  %v14585_v41 = vld [vmem:[#allocation9 + $0xc8] ss:$24 sps:$4 sm:$0xff]   ;;  %4530 = vmatpush1.bf16.msra.mxu0 %v14581_v18 }
 0x5cf   :  { %3869 = vmatpush1.bf16.msra.mxu1 %v14369_v38  ;;  %v14587_v38 = vld [vmem:[#allocation9 + $0xf4] ss:$24 sps:$4 sm:$0xff]  }
 0x5d0   :  { %3870 = vmatprep.subr.bf16.mxu1 %v14372_v1  ;;  %v14590_v1 = vld [vmem:[#allocation9 + $0xfc] ss:$24 sps:$4 sm:$0xff]   ;;  %4531 = vmatprep.subr.bf16.mxu0 %v14587_v38 }
 0x5d3   :  { %3871 = vmatpush1.bf16.msra.mxu1 %v14375_v36  ;;  %v14593_v36 = vld [vmem:[#allocation9 + $0xf0] ss:$24 sps:$4 sm:$0xff]  }
 0x5d4   :  { %3872 = vmatprep.subr.bf16.mxu1 %v14378_v55  ;;  %v14597_v55 = vld [vmem:[#allocation9 + $0xf8] ss:$24 sps:$4 sm:$0xff]   ;;  %4532 = vmatpush1.bf16.msra.mxu0 %v14593_v36 }
 0x5d7   :  { %3873 = vmatpush1.bf16.msra.mxu1 %v14381_v48  ;;  %v14599_v48 = vld [vmem:[#allocation9 + $0x124] ss:$24 sps:$4 sm:$0xff]  }
 0x5d8   :  { %3874 = vmatprep.subr.bf16.mxu1 %v14384_v61  ;;  %v14602_v61 = vld [vmem:[#allocation9 + $0x12c] ss:$24 sps:$4 sm:$0xff]   ;;  %4533 = vmatprep.subr.bf16.mxu0 %v14599_v48 }
 0x5db   :  { %3875 = vmatpush1.bf16.msra.mxu1 %v14387_v3  ;;  %v14605_v3 = vld [vmem:[#allocation9 + $0x120] ss:$24 sps:$4 sm:$0xff]  }
 0x5dc   :  { %3876 = vmatprep.subr.bf16.mxu1 %v14390_v50  ;;  %v14609_v50 = vld [vmem:[#allocation9 + $0x128] ss:$24 sps:$4 sm:$0xff]   ;;  %4534 = vmatpush1.bf16.msra.mxu0 %v14605_v3 }
 0x5df   :  { %3877 = vmatpush1.bf16.msra.mxu1 %v14393_v0  ;;  %v14614_v0 = vld [vmem:[#allocation9 + $0x154] ss:$24 sps:$4 sm:$0xff]  }
 0x5e0   :  { %3878 = vmatprep.subr.bf16.mxu1 %v14396_v16  ;;  %v14616_v16 = vld [vmem:[#allocation9 + $0x150] ss:$24 sps:$4 sm:$0xff]   ;;  %4535 = vmatprep.subr.bf16.mxu0 %v14614_v0 }
 0x5e1   :  { %4536 = vmatpush1.bf16.msra.mxu0 %v14616_v16 }
 0x5e2   :  { %4537 = vmatprep.subr.bf16.mxu0 %v14442_v24  ;;  %v14646_v24 = vld [vmem:[#allocation9 + $0x1e4] ss:$24 sps:$4 sm:$0xff]  }
 0x5e3   :  { %3879 = vmatpush1.bf16.msra.mxu1 %v14399_v63  ;;  %v14618_v63 = vld [vmem:[#allocation9 + $0x15c] ss:$24 sps:$4 sm:$0xff]   ;;  %17723 = vst [vmem:[#allocation36_spill] sm:$0xff] %v14646_v24 }
 0x5e4   :  { %3880 = vmatprep.subr.bf16.mxu1 %v14402_v52  ;;  %v14621_v52 = vld [vmem:[#allocation9 + $0x158] ss:$24 sps:$4 sm:$0xff]  }
 0x5e5   :  { %4538 = vmatpush1.bf16.msra.mxu0 %v14444_v30  ;;  %v14648_v30 = vld [vmem:[#allocation9 + $0x1e0] ss:$24 sps:$4 sm:$0xff]  }
 0x5e6   :  { %4539 = vmatprep.subr.bf16.mxu0 %v14634_v37  ;;  %17724 = vst [vmem:[#allocation37_spill] sm:$0xff] %v14648_v30 }
 0x5e7   :  { %3881 = vmatpush1.bf16.msra.mxu1 %v14405_v59  ;;  %v14627_v59 = vld [vmem:[#allocation9 + $0x18c] ss:$24 sps:$4 sm:$0xff]  }
 0x5e8   :  { %4562 = vmatprep.subr.bf16.mxu1 %v14534_v5 }
 0x5e9   :  { %4540 = vmatpush1.bf16.msra.mxu0 %v14636_v8 }
 0x5ea   :  { %3883 = vmatmul.mubr.bf16.vlgmr.msra.gmra.mrb[52].mxu1 %v3190_v57  ;;  %4541 = vmatprep.subr.bf16.mxu0 %v14646_v24  ;;  %v14681_v57 = vld [vmem:[#allocation9 + $0x27c] ss:$24 sps:$4 sm:$0xff]  }
 0x5eb   :  { %4563 = vmatpush1.bf16.msra.mxu1 %v14537_v46  ;;  %17735 = vst [vmem:[#allocation30_spill] sm:$0xff] %v14681_v57 }
 0x5ec   :  { %4564 = vmatprep.subr.bf16.mxu1 %v14546_v35 }
 0x5ed   :  { %4542 = vmatpush1.bf16.msra.mxu0 %v14648_v30  ;;  %v14709_v30 = vld [vmem:[#allocation9 + $0x2d0] ss:$24 sps:$4 sm:$0xff]  }
 0x5ee   :  { %4543 = vmatprep.subr.bf16.mxu0 %v14658_v40  ;;  %v14703_v40 = vld [vmem:[#allocation9 + $0x2d4] ss:$24 sps:$4 sm:$0xff]   ;;  %17744 = vst [vmem:[#allocation91_spill] sm:$0xff] %v14709_v30 }
 0x5ef   :  { %4565 = vmatpush1.bf16.msra.mxu1 %v14549_v56  ;;  %17742 = vst [vmem:[#allocation87_spill] sm:$0xff] %v14703_v40 }
 0x5f0   :  { %4566 = vmatprep.subr.bf16.mxu1 %v14558_v19 }
 0x5f1   :  { %4544 = vmatpush1.bf16.msra.mxu0 %v14660_v13  ;;  %v14694_v13 = vld [vmem:[#allocation9 + $0x2ac] ss:$24 sps:$4 sm:$0xff]  }
 0x5f2   :  { %4545 = vmatprep.subr.bf16.mxu0 %v14672_v21  ;;  %17739 = vst [vmem:[#allocation39_spill] sm:$0xff] %v14694_v13  ;;  %v14697_v21 = vld [vmem:[#allocation9 + $0x2a0] ss:$24 sps:$4 sm:$0xff]  }
 0x5f3   :  { %4567 = vmatpush1.bf16.msra.mxu1 %v14561_v62  ;;  %17740 = vst [vmem:[#allocation38_spill] sm:$0xff] %v14697_v21 }
 0x5f4   :  { %4568 = vmatprep.subr.bf16.mxu1 %v14569_v23 }
 0x5f5   :  { %4546 = vmatpush1.bf16.msra.mxu0 %v14670_v15  ;;  %v14701_v15 = vld [vmem:[#allocation9 + $0x2a8] ss:$24 sps:$4 sm:$0xff]  }
 0x5f6   :  { %4547 = vmatprep.subr.bf16.mxu0 %v14678_v29  ;;  %17741 = vst [vmem:[#allocation85_spill] sm:$0xff] %v14701_v15  ;;  %v14706_v29 = vld [vmem:[#allocation9 + $0x2dc] ss:$24 sps:$4 sm:$0xff]  }
 0x5f7   :  { %4569 = vmatpush1.bf16.msra.mxu1 %v14573_v27  ;;  %17743 = vst [vmem:[#allocation89_spill] sm:$0xff] %v14706_v29 }
 0x5f8   :  { %4570 = vmatprep.subr.bf16.mxu1 %v14578_v53 }
 0x5f9   :  { %4548 = vmatpush1.bf16.msra.mxu0 %v14685_v60  ;;  %v14713_v60 = vld [vmem:[#allocation9 + $0x2d8] ss:$24 sps:$4 sm:$0xff]  }
 0x5fa   :  { %4549 = vmatprep.subr.bf16.mxu0 %v14691_v12  ;;  %17745 = vst [vmem:[#allocation93_spill] sm:$0xff] %v14713_v60  ;;  %v14718_v12 = vld [vmem:[#allocation9 + $0x14] ss:$24 sps:$4 sm:$0xff]  }
 0x5fb   :  { %4571 = vmatpush1.bf16.msra.mxu1 %v14585_v41  ;;  %17746 = vst [vmem:[#allocation95_spill] sm:$0xff] %v14718_v12 }
 0x5fc   :  { %4572 = vmatprep.subr.bf16.mxu1 %v14590_v1 }
 0x5fd   :  { %4550 = vmatpush1.bf16.msra.mxu0 %v14697_v21 }
 0x5fe   :  { %4551 = vmatprep.subr.bf16.mxu0 %v14703_v40 }
 0x5ff   :  { %4573 = vmatpush1.bf16.msra.mxu1 %v14597_v55 }
 0x600   :  { %4574 = vmatprep.subr.bf16.mxu1 %v14602_v61 }
 0x601   :  { %4552 = vmatpush1.bf16.msra.mxu0 %v14709_v30 }
 0x602   :  { %4603 = vmatprep.subr.bf16.mxu0 %v14718_v12 }
 0x603   :  { %4575 = vmatpush1.bf16.msra.mxu1 %v14609_v50 }
 0x604   :  { %4576 = vmatprep.subr.bf16.mxu1 %v14618_v63 }
 0x607   :  { %4577 = vmatpush1.bf16.msra.mxu1 %v14621_v52 }
 0x608   :  { %4578 = vmatprep.subr.bf16.mxu1 %v14627_v59 }
 0x60b   :  { %4579 = vmatpush1.bf16.msra.mxu1 %v14629_v22 }
 0x60c   :  { %4580 = vmatprep.subr.bf16.mxu1 %v14638_v33 }
 0x60f   :  { %4581 = vmatpush1.bf16.msra.mxu1 %v14641_v2 }
 0x610   :  { %4582 = vmatprep.subr.bf16.mxu1 %v14650_v17 }
 0x613   :  { %4583 = vmatpush1.bf16.msra.mxu1 %v14653_v10 }
 0x614   :  { %4584 = vmatprep.subr.bf16.mxu1 %v14662_v6 }
 0x617   :  { %4585 = vmatpush1.bf16.msra.mxu1 %v14665_v58  ;;  %v17749_v58 = vld [vmem:[#allocation58_spill] sm:$0xff] }
 0x618   :  { %4586 = vmatprep.subr.bf16.mxu1 %v14676_v20  ;;  %v17748_v20 = vld [vmem:[#allocation53_spill] sm:$0xff] }
 0x61b   :  { %4587 = vmatpush1.bf16.msra.mxu1 %v14674_v11 }
 0x61c   :  { %4588 = vmatprep.subr.bf16.mxu1 %v14681_v57 }
 0x61f   :  { %4589 = vmatpush1.bf16.msra.mxu1 %v14689_v44  ;;  %v17747_v44 = vld [vmem:[#allocation51_spill] sm:$0xff] }
 0x620   :  { %4590 = vmatprep.subr.bf16.mxu1 %v14694_v13 }
 0x623   :  { %4591 = vmatpush1.bf16.msra.mxu1 %v14701_v15 }
 0x624   :  { %4592 = vmatprep.subr.bf16.mxu1 %v14706_v29 }
 0x627   :  { %4593 = vmatpush1.bf16.msra.mxu1 %v14713_v60 }
 0x628   :  { %5274 = vmatprep.subr.bf16.mxu1 %v14530_v39 }
 0x67d   :  { %v3802_v21 = vpop.f32.mrb[48].mxu1  ;;  %v3843_v24 = vpop.f32.mrb[44].mxu0 }
 0x67e   :  { %v3803_v8 = vadd.f32 %v3802_v21, %v17712_v42  ;;  %v3804_v37 = vpop.f32.mrb[49].mxu1  ;;  %v3845_v40 = vpop.f32.mrb[45].mxu0 }
 0x67f   :  { %v3805_v15 = vadd.f32 %v3804_v37, %v13968_v32  ;;  %v3846_v29 = vadd.f32 %v3845_v40, %v13980_v49  ;;  %v3806_v13 = vpop.f32.mrb[50].mxu1  ;;  %v3847_v30 = vpop.f32.mrb[46].mxu0  ;;  %v3844_v40 = vadd.f32 %v3843_v24, %v13977_v45  ;;  %v17750_v49 = vld [vmem:[#allocation52_spill] sm:$0xff] }
 0x680   :  { %v3897_v60 = vadd.f32 %v3803_v8, %v17747_v44  ;;  %v3807_v57 = vpop.f32.mrb[51].mxu1  ;;  %v3848_v11 = vpop.f32.mrb[47].mxu0 }
 0x681   :  { %v3898_v39 = vadd.f32 %v3805_v15, %v17748_v20  ;;  %v3917_v12 = vadd.f32 %v3846_v29, %v17749_v58 }
 0x682   :  { %v10688_v6 = vmul.f32 -1.442695, %v3897_v60 }
 0x683   :  { %v10689_v10 = vmul.f32 -1.442695, %v3898_v39  ;;  %v10690_v11 = vmul.f32 -1.442695, %v3917_v12 }
 0x684   :  { %12573 = vpow2.f32 %v10688_v6 }
 0x685   :  { %12575 = vpow2.f32 %v10689_v10 }
 0x68e   :  { %v12574_v21 = vpop.eup %12573 }
 0x68f   :  { %v3905_v42 = vadd.f32 1.0, %v12574_v21  ;;  %v12576_v37 = vpop.eup %12575  ;;  %v17752_v21 = vld [vmem:[#allocation73_spill] sm:$0xff] }
 0x690   :  { %v3906_v8 = vadd.f32 1.0, %v12576_v37 }
 0x691   :  { %12577 = vrcp.f32 %v3905_v42 }
 0x69b   :  { %v12578_v13 = vpop.eup %12577 }
 0x69c   :  { %v3911_v30 = vmul.f32 %v12578_v13, %v3844_v40 }
 0x69e   :  { %v3912_v44 = vadd.f32 %v3911_v30, %v17750_v49 }
 0x6a0   :  { %12579 = vtanh.f32 %v3912_v44  ;;  %v17753_v44 = vld [vmem:[#allocation74_spill] sm:$0xff] }
 0x6a1   :  { %12581 = vrcp.f32 %v3906_v8 }
 0x6a2   :  { %12583 = vpow2.f32 %v10690_v11 }
 0x6aa   :  { %v12580_v58 = vpop.eup %12579 }
 0x6ab   :  { %v3914_v60 = vsub.f32 %v14487_v43, %v12580_v58  ;;  %v12582_v6 = vpop.eup %12581 }
 0x6ac   :  { %v12584_v20 = vpop.eup %12583 }
 0x6ad   :  { %v3915_v15 = vmul.f32 %v12582_v6, %v3914_v60  ;;  %v3925_v42 = vadd.f32 1.0, %v12584_v20 }
 0x6af   :  { %v14731_v10 = vadd.f32 %v12580_v58, %v3915_v15  ;;  %12585 = vrcp.f32 %v3925_v42 }
 0x6b1   :  { %17751 = vst [vmem:[#allocation97_spill] sm:$0xff] %v14731_v10 }
 0x6b9   :  { %v12586_v12 = vpop.eup %12585 }
 0x6bd   :  { %v3884_v24 = vpop.f32.mrb[52].mxu1 }
 0x6be   :  { %v3885_v29 = vadd.f32 %v3884_v24, %v13991_v47  ;;  %v3886_v57 = vpop.f32.mrb[53].mxu1  ;;  %v14746_v24 = vsel %vm310_vm4, %v14731_v10, %v14487_v43  ;;  %v14767_v43 = vld [vmem:[#allocation9 + $0x40] ss:$24 sps:$4 sm:$0xff]  }
 0x6bf   :  { %v3887_v49 = vadd.f32 %v3886_v57, %v13994_v51  ;;  %v3888_v39 = vpop.f32.mrb[54].mxu1  ;;  %v15148_v10 = vld [vmem:[#allocation9 + $0x278] ss:$24 sps:$4 sm:$0xff]  }
 0x6c0   :  { %v3918_v37 = vadd.f32 %v3885_v29, %v17752_v21  ;;  %v3889_v40 = vpop.f32.mrb[55].mxu1  ;;  %v14760_v39 = vpack.c.bf16 %v14746_v24, %v14746_v24  ;;  %v14775_v21 = vld [vmem:[#allocation9 + $0x70] ss:$24 sps:$4 sm:$0xff]  }
 0x6c1   :  { %v3931_v13 = vmul.f32 %v12586_v12, %v3887_v49  ;;  %v14756_v49 = vld [vmem:[#allocation9 + $0x10] ss:$24 sps:$4 sm:$0xff]   ;;  %v14762_v12 = vld [vmem:[#allocation9 + $0x44] ss:$24 sps:$4 sm:$0xff]   ;;  %v14783_v40 = vld [vmem:[#allocation9 + $0xa0] ss:$24 sps:$4 sm:$0xff]  }
 0x6c2   :  { %v10691_v30 = vmul.f32 -1.442695, %v3918_v37  ;;  %v14778_v37 = vld [vmem:[#allocation9 + $0xa4] ss:$24 sps:$4 sm:$0xff]  }
 0x6c3   :  { %v3932_v8 = vadd.f32 %v3931_v13, %v17753_v44  ;;  %v14833_v13 = vld [vmem:[#allocation9 + $0x1f4] ss:$24 sps:$4 sm:$0xff]   ;;  %v14848_v44 = vld [vmem:[#allocation9 + $0x250] ss:$24 sps:$4 sm:$0xff]  }
 0x6c4   :  { %12587 = vpow2.f32 %v10691_v30  ;;  %v14842_v30 = vld [vmem:[#allocation9 + $0x220] ss:$24 sps:$4 sm:$0xff]  }
 0x6c5   :  { %12589 = vtanh.f32 %v3932_v8  ;;  %v14851_v8 = vld [vmem:[#allocation9 + $0x284] ss:$24 sps:$4 sm:$0xff]  }
 0x6ce   :  { %v12588_v11 = vpop.eup %12587 }
 0x6cf   :  { %v3926_v58 = vadd.f32 1.0, %v12588_v11  ;;  %v12590_v60 = vpop.eup %12589  ;;  %v14854_v11 = vld [vmem:[#allocation9 + $0x280] ss:$24 sps:$4 sm:$0xff]  }
 0x6d0   :  { %v3934_v6 = vsub.f32 %v14493_v25, %v12590_v60 }
 0x6d1   :  { %12591 = vrcp.f32 %v3926_v58  ;;  %v14857_v58 = vld [vmem:[#allocation9 + $0x2b4] ss:$24 sps:$4 sm:$0xff]  }
 0x6db   :  { %v12592_v15 = vpop.eup %12591 }
 0x6dc   :  { %v3935_v20 = vmul.f32 %v12592_v15, %v3934_v6  ;;  %v14863_v6 = vld [vmem:[#allocation9 + $0x2e4] ss:$24 sps:$4 sm:$0xff]   ;;  %v14866_v15 = vld [vmem:[#allocation9 + $0x2e0] ss:$24 sps:$4 sm:$0xff]  }
 0x6de   :  { %v14739_v42 = vadd.f32 %v12590_v60, %v3935_v20  ;;  %v14860_v60 = vld [vmem:[#allocation9 + $0x2b0] ss:$24 sps:$4 sm:$0xff]   ;;  %v17774_v20 = vld [vmem:[#allocation27_spill] sm:$0xff] }
 0x6e0   :  { %17754 = vst [vmem:[#allocation47_spill] sm:$0xff] %v14739_v42  ;;  %v14752_v29 = vsel %vm311_vm5, %v14739_v42, %v14493_v25  ;;  %v14770_v25 = vld [vmem:[#allocation9 + $0x74] ss:$24 sps:$4 sm:$0xff]  }
 0x6e1   :  { %v3944_v57 = vpack.c.bf16 %v14752_v29, %v14752_v29  ;;  %v17786_v42 = vld [vmem:[#allocation56_spill] sm:$0xff] }
 0x6e3   :  { %4553 = vmatprep.mubr.bf16.mxu0 %v3944_v57  ;;  %4594 = vmatprep.mubr.bf16.mxu1 %v3944_v57 }
 0x6e4   :  { %4554 = vmatmul.mubr.bf16.vlgmr.msra.gmra.mrb[48].mxu0 %v14760_v39  ;;  %4595 = vmatmul.mubr.bf16.vlgmr.msra.gmra.mrb[56].mxu1 %v14760_v39 }
 0x6e5   :  { %4604 = vmatpush1.bf16.msra.mxu0 %v14756_v49  ;;  %4635 = vmatprep.mubr.bf16.mxu0 %v3944_v57  ;;  %v17775_v57 = vld [vmem:[#allocation31_spill] sm:$0xff] }
 0x6e6   :  { %4605 = vmatprep.subr.bf16.mxu0 %v14762_v12  ;;  %5275 = vmatpush1.bf16.msra.mxu1 %v14532_v28  ;;  %v14786_v28 = vld [vmem:[#allocation9 + $0xd4] ss:$24 sps:$4 sm:$0xff]  }
 0x6e7   :  { %5276 = vmatprep.subr.bf16.mxu1 %v14542_v54  ;;  %v14791_v54 = vld [vmem:[#allocation9 + $0xd0] ss:$24 sps:$4 sm:$0xff]  }
 0x6e9   :  { %4606 = vmatpush1.bf16.msra.mxu0 %v14767_v43 }
 0x6ea   :  { %4607 = vmatprep.subr.bf16.mxu0 %v14770_v25  ;;  %5277 = vmatpush1.bf16.msra.mxu1 %v14544_v7  ;;  %v14794_v7 = vld [vmem:[#allocation9 + $0x104] ss:$24 sps:$4 sm:$0xff]  }
 0x6eb   :  { %5278 = vmatprep.subr.bf16.mxu1 %v14554_v26  ;;  %v14799_v26 = vld [vmem:[#allocation9 + $0x100] ss:$24 sps:$4 sm:$0xff]  }
 0x6ed   :  { %4608 = vmatpush1.bf16.msra.mxu0 %v14775_v21 }
 0x6ee   :  { %4609 = vmatprep.subr.bf16.mxu0 %v14778_v37  ;;  %5279 = vmatpush1.bf16.msra.mxu1 %v14556_v4  ;;  %v14802_v4 = vld [vmem:[#allocation9 + $0x134] ss:$24 sps:$4 sm:$0xff]  }
 0x6ef   :  { %5280 = vmatprep.subr.bf16.mxu1 %v14563_v9  ;;  %v14807_v9 = vld [vmem:[#allocation9 + $0x130] ss:$24 sps:$4 sm:$0xff]  }
 0x6f1   :  { %4610 = vmatpush1.bf16.msra.mxu0 %v14783_v40 }
 0x6f2   :  { %4611 = vmatprep.subr.bf16.mxu0 %v14786_v28  ;;  %5281 = vmatpush1.bf16.msra.mxu1 %v14567_v14  ;;  %v14810_v14 = vld [vmem:[#allocation9 + $0x164] ss:$24 sps:$4 sm:$0xff]  }
 0x6f3   :  { %5282 = vmatprep.subr.bf16.mxu1 %v14575_v34  ;;  %v14815_v34 = vld [vmem:[#allocation9 + $0x160] ss:$24 sps:$4 sm:$0xff]  }
 0x6f5   :  { %4612 = vmatpush1.bf16.msra.mxu0 %v14791_v54 }
 0x6f6   :  { %4613 = vmatprep.subr.bf16.mxu0 %v14794_v7  ;;  %5283 = vmatpush1.bf16.msra.mxu1 %v14581_v18  ;;  %v14818_v18 = vld [vmem:[#allocation9 + $0x194] ss:$24 sps:$4 sm:$0xff]  }
 0x6f7   :  { %5284 = vmatprep.subr.bf16.mxu1 %v14587_v38  ;;  %v14823_v38 = vld [vmem:[#allocation9 + $0x190] ss:$24 sps:$4 sm:$0xff]  }
 0x6f9   :  { %4614 = vmatpush1.bf16.msra.mxu0 %v14799_v26 }
 0x6fa   :  { %4615 = vmatprep.subr.bf16.mxu0 %v14802_v4  ;;  %5285 = vmatpush1.bf16.msra.mxu1 %v14593_v36  ;;  %v14826_v36 = vld [vmem:[#allocation9 + $0x1c4] ss:$24 sps:$4 sm:$0xff]  }
 0x6fb   :  { %5286 = vmatprep.subr.bf16.mxu1 %v14599_v48  ;;  %v14830_v48 = vld [vmem:[#allocation9 + $0x1c0] ss:$24 sps:$4 sm:$0xff]  }
 0x6fd   :  { %4616 = vmatpush1.bf16.msra.mxu0 %v14807_v9 }
 0x6fe   :  { %4617 = vmatprep.subr.bf16.mxu0 %v14810_v14  ;;  %5287 = vmatpush1.bf16.msra.mxu1 %v14605_v3  ;;  %v14836_v3 = vld [vmem:[#allocation9 + $0x1f0] ss:$24 sps:$4 sm:$0xff]  }
 0x6ff   :  { %5288 = vmatprep.subr.bf16.mxu1 %v14614_v0  ;;  %v14839_v0 = vld [vmem:[#allocation9 + $0x224] ss:$24 sps:$4 sm:$0xff]  }
 0x701   :  { %4618 = vmatpush1.bf16.msra.mxu0 %v14815_v34 }
 0x702   :  { %4619 = vmatprep.subr.bf16.mxu0 %v14818_v18  ;;  %5289 = vmatpush1.bf16.msra.mxu1 %v14616_v16  ;;  %v14845_v16 = vld [vmem:[#allocation9 + $0x254] ss:$24 sps:$4 sm:$0xff]  }
 0x705   :  { %4620 = vmatpush1.bf16.msra.mxu0 %v14823_v38 }
 0x706   :  { %4621 = vmatprep.subr.bf16.mxu0 %v14826_v36 }
 0x709   :  { %4622 = vmatpush1.bf16.msra.mxu0 %v14830_v48 }
 0x70a   :  { %4623 = vmatprep.subr.bf16.mxu0 %v14833_v13 }
 0x70d   :  { %4624 = vmatpush1.bf16.msra.mxu0 %v14836_v3 }
 0x70e   :  { %4625 = vmatprep.subr.bf16.mxu0 %v14839_v0 }
 0x711   :  { %4626 = vmatpush1.bf16.msra.mxu0 %v14842_v30 }
 0x712   :  { %4627 = vmatprep.subr.bf16.mxu0 %v14845_v16 }
 0x715   :  { %4628 = vmatpush1.bf16.msra.mxu0 %v14848_v44 }
 0x716   :  { %4629 = vmatprep.subr.bf16.mxu0 %v14851_v8 }
 0x719   :  { %4630 = vmatpush1.bf16.msra.mxu0 %v14854_v11 }
 0x71a   :  { %4631 = vmatprep.subr.bf16.mxu0 %v14857_v58 }
 0x71d   :  { %4632 = vmatpush1.bf16.msra.mxu0 %v14860_v60 }
 0x71e   :  { %4633 = vmatprep.subr.bf16.mxu0 %v14863_v6 }
 0x721   :  { %4634 = vmatpush1.bf16.msra.mxu0 %v14866_v15 }
 0x722   :  { %5315 = vmatprep.subr.bf16.mxu0 %v14534_v5  ;;  %v17755_v5 = vld [vmem:[#allocation84_spill] sm:$0xff] }
 0x724   :  { %4636 = vmatmul.mubr.bf16.vlgmr.msra.gmra.mrb[52].mxu0 %v14760_v39  ;;  %v17776_v39 = vld [vmem:[#allocation35_spill] sm:$0xff] }
 0x725   :  { %5316 = vmatpush1.bf16.msra.mxu0 %v14537_v46  ;;  %v17756_v46 = vld [vmem:[#allocation88_spill] sm:$0xff] }
 0x726   :  { %5317 = vmatprep.subr.bf16.mxu0 %v14546_v35  ;;  %v17757_v35 = vld [vmem:[#allocation90_spill] sm:$0xff] }
 0x729   :  { %5318 = vmatpush1.bf16.msra.mxu0 %v14549_v56  ;;  %v17758_v56 = vld [vmem:[#allocation26_spill] sm:$0xff] }
 0x72a   :  { %5319 = vmatprep.subr.bf16.mxu0 %v14558_v19  ;;  %v17759_v19 = vld [vmem:[#allocation96_spill] sm:$0xff] }
 0x72d   :  { %5320 = vmatpush1.bf16.msra.mxu0 %v14561_v62  ;;  %v17760_v62 = vld [vmem:[#allocation30_spill] sm:$0xff] }
 0x72e   :  { %5321 = vmatprep.subr.bf16.mxu0 %v14569_v23  ;;  %v17761_v23 = vld [vmem:[#allocation34_spill] sm:$0xff] }
 0x731   :  { %5322 = vmatpush1.bf16.msra.mxu0 %v14573_v27  ;;  %v17762_v27 = vld [vmem:[#allocation39_spill] sm:$0xff] }
 0x732   :  { %5323 = vmatprep.subr.bf16.mxu0 %v14578_v53  ;;  %v17763_v53 = vld [vmem:[#allocation85_spill] sm:$0xff]  ;;  %17807 = vst [vmem:[#allocation39_spill] sm:$0xff] %v15148_v10 }
 0x735   :  { %5324 = vmatpush1.bf16.msra.mxu0 %v14585_v41  ;;  %v17764_v41 = vld [vmem:[#allocation89_spill] sm:$0xff] }
 0x736   :  { %5325 = vmatprep.subr.bf16.mxu0 %v14590_v1  ;;  %v17765_v1 = vld [vmem:[#allocation93_spill] sm:$0xff] }
 0x739   :  { %5326 = vmatpush1.bf16.msra.mxu0 %v14597_v55  ;;  %v14903_v55 = vld [vmem:[#allocation9 + $0x184] ss:$24 sps:$4 sm:$0xff]  }
 0x73a   :  { %5327 = vmatprep.subr.bf16.mxu0 %v14602_v61  ;;  %v14905_v61 = vld [vmem:[#allocation9 + $0x180] ss:$24 sps:$4 sm:$0xff]   ;;  %5290 = vmatprep.subr.bf16.mxu1 %v14903_v55 }
 0x73b   :  { %5291 = vmatpush1.bf16.msra.mxu1 %v14905_v61 }
 0x73d   :  { %5328 = vmatpush1.bf16.msra.mxu0 %v14609_v50  ;;  %v17766_v50 = vld [vmem:[#allocation32_spill] sm:$0xff] }
 0x73e   :  { %5329 = vmatprep.subr.bf16.mxu0 %v14618_v63  ;;  %5292 = vmatprep.subr.bf16.mxu1 %v17766_v50  ;;  %v17767_v63 = vld [vmem:[#allocation33_spill] sm:$0xff]  ;;  %v17782_v50 = vld [vmem:[#allocation78_spill] sm:$0xff] }
 0x73f   :  { %5293 = vmatpush1.bf16.msra.mxu1 %v17767_v63 }
 0x741   :  { %5330 = vmatpush1.bf16.msra.mxu0 %v14621_v52  ;;  %v17768_v52 = vld [vmem:[#allocation36_spill] sm:$0xff] }
 0x742   :  { %5331 = vmatprep.subr.bf16.mxu0 %v14627_v59  ;;  %5294 = vmatprep.subr.bf16.mxu1 %v17768_v52  ;;  %v17769_v59 = vld [vmem:[#allocation37_spill] sm:$0xff] }
 0x743   :  { %5295 = vmatpush1.bf16.msra.mxu1 %v17769_v59 }
 0x745   :  { %5332 = vmatpush1.bf16.msra.mxu0 %v14629_v22  ;;  %v17770_v22 = vld [vmem:[#allocation40_spill] sm:$0xff] }
 0x746   :  { %5333 = vmatprep.subr.bf16.mxu0 %v14638_v33  ;;  %5296 = vmatprep.subr.bf16.mxu1 %v17770_v22  ;;  %v17771_v33 = vld [vmem:[#allocation86_spill] sm:$0xff]  ;;  %v17783_v22 = vld [vmem:[#allocation55_spill] sm:$0xff] }
 0x747   :  { %5297 = vmatpush1.bf16.msra.mxu1 %v17771_v33 }
 0x749   :  { %5334 = vmatpush1.bf16.msra.mxu0 %v14641_v2  ;;  %v17772_v2 = vld [vmem:[#allocation94_spill] sm:$0xff] }
 0x74a   :  { %5335 = vmatprep.subr.bf16.mxu0 %v14650_v17  ;;  %5298 = vmatprep.subr.bf16.mxu1 %v17772_v2  ;;  %v17773_v17 = vld [vmem:[#allocation92_spill] sm:$0xff] }
 0x74b   :  { %5299 = vmatpush1.bf16.msra.mxu1 %v17773_v17 }
 0x74c   :  { %5300 = vmatprep.subr.bf16.mxu1 %v17774_v20  ;;  %v17784_v20 = vld [vmem:[#allocation57_spill] sm:$0xff] }
 0x74d   :  { %5336 = vmatpush1.bf16.msra.mxu0 %v17755_v5  ;;  %v17777_v5 = vld [vmem:[#allocation38_spill] sm:$0xff] }
 0x74e   :  { %5337 = vmatprep.subr.bf16.mxu0 %v17756_v46  ;;  %v17778_v46 = vld [vmem:[#allocation87_spill] sm:$0xff] }
 0x74f   :  { %5301 = vmatpush1.bf16.msra.mxu1 %v17775_v57 }
 0x750   :  { %5302 = vmatprep.subr.bf16.mxu1 %v17776_v39  ;;  %v17785_v39 = vld [vmem:[#allocation54_spill] sm:$0xff] }
 0x751   :  { %5338 = vmatpush1.bf16.msra.mxu0 %v17757_v35  ;;  %v17779_v35 = vld [vmem:[#allocation91_spill] sm:$0xff] }
 0x752   :  { %5339 = vmatprep.subr.bf16.mxu0 %v17758_v56  ;;  %v17780_v56 = vld [vmem:[#allocation95_spill] sm:$0xff] }
 0x753   :  { %5303 = vmatpush1.bf16.msra.mxu1 %v17777_v5 }
 0x754   :  { %5304 = vmatprep.subr.bf16.mxu1 %v17778_v46 }
 0x755   :  { %5340 = vmatpush1.bf16.msra.mxu0 %v17759_v19 }
 0x756   :  { %5341 = vmatprep.subr.bf16.mxu0 %v17760_v62 }
 0x757   :  { %5305 = vmatpush1.bf16.msra.mxu1 %v17779_v35 }
 0x758   :  { %5356 = vmatprep.subr.bf16.mxu1 %v17780_v56 }
 0x759   :  { %5342 = vmatpush1.bf16.msra.mxu0 %v17761_v23  ;;  %v17781_v23 = vld [vmem:[#allocation77_spill] sm:$0xff] }
 0x75a   :  { %5343 = vmatprep.subr.bf16.mxu0 %v17762_v27 }
 0x75d   :  { %5344 = vmatpush1.bf16.msra.mxu0 %v17763_v53 }
 0x75e   :  { %5345 = vmatprep.subr.bf16.mxu0 %v17764_v41 }
 0x761   :  { %5346 = vmatpush1.bf16.msra.mxu0 %v17765_v1 }
 0x7b7   :  { %v4555_v19 = vpop.f32.mrb[48].mxu0  ;;  %v4596_v62 = vpop.f32.mrb[56].mxu1 }
 0x7b8   :  { %v4556_v27 = vadd.f32 %v4555_v19, %v17781_v23  ;;  %v4557_v53 = vpop.f32.mrb[49].mxu0  ;;  %v4598_v41 = vpop.f32.mrb[57].mxu1 }
 0x7b9   :  { %v4558_v1 = vadd.f32 %v4557_v53, %v13968_v32  ;;  %v4599_v63 = vadd.f32 %v4598_v41, %v17782_v50  ;;  %v4559_v52 = vpop.f32.mrb[50].mxu0  ;;  %v4600_v59 = vpop.f32.mrb[58].mxu1  ;;  %v4597_v41 = vadd.f32 %v4596_v62, %v13977_v45 }
 0x7ba   :  { %v4650_v33 = vadd.f32 %v4556_v27, %v17783_v22  ;;  %v4560_v2 = vpop.f32.mrb[51].mxu0  ;;  %v4601_v17 = vpop.f32.mrb[59].mxu1 }
 0x7bb   :  { %v4651_v57 = vadd.f32 %v4558_v1, %v17784_v20  ;;  %v4670_v5 = vadd.f32 %v4599_v63, %v17785_v39 }
 0x7bc   :  { %v10788_v46 = vmul.f32 -1.442695, %v4650_v33 }
 0x7bd   :  { %v10789_v35 = vmul.f32 -1.442695, %v4651_v57  ;;  %v10790_v2 = vmul.f32 -1.442695, %v4670_v5 }
 0x7be   :  { %12593 = vpow2.f32 %v10788_v46 }
 0x7bf   :  { %12595 = vpow2.f32 %v10789_v35 }
 0x7c8   :  { %v12594_v56 = vpop.eup %12593 }
 0x7c9   :  { %v4658_v19 = vadd.f32 1.0, %v12594_v56  ;;  %v12596_v53 = vpop.eup %12595 }
 0x7ca   :  { %v4659_v22 = vadd.f32 1.0, %v12596_v53 }
 0x7cb   :  { %12597 = vrcp.f32 %v4658_v19  ;;  %v17788_v19 = vld [vmem:[#allocation71_spill] sm:$0xff] }
 0x7d5   :  { %v12598_v52 = vpop.eup %12597 }
 0x7d6   :  { %v4664_v59 = vmul.f32 %v12598_v52, %v4597_v41 }
 0x7d8   :  { %v4665_v27 = vadd.f32 %v4664_v59, %v17786_v42 }
 0x7da   :  { %12599 = vtanh.f32 %v4665_v27  ;;  %v17789_v27 = vld [vmem:[#allocation72_spill] sm:$0xff] }
 0x7db   :  { %12601 = vrcp.f32 %v4659_v22 }
 0x7dc   :  { %12603 = vpow2.f32 %v10790_v2 }
 0x7e4   :  { %v12600_v1 = vpop.eup %12599 }
 0x7e5   :  { %v4667_v63 = vsub.f32 %v14746_v24, %v12600_v1  ;;  %v12602_v33 = vpop.eup %12601 }
 0x7e6   :  { %v12604_v20 = vpop.eup %12603 }
 0x7e7   :  { %v4668_v17 = vmul.f32 %v12602_v33, %v4667_v63  ;;  %v4678_v39 = vadd.f32 1.0, %v12604_v20 }
 0x7e9   :  { %v14933_v57 = vadd.f32 %v12600_v1, %v4668_v17  ;;  %12605 = vrcp.f32 %v4678_v39 }
 0x7eb   :  { %17787 = vst [vmem:[#allocation49_spill] sm:$0xff] %v14933_v57 }
 0x7f3   :  { %v12606_v5 = vpop.eup %12605 }
 0x7f7   :  { %v4637_v62 = vpop.f32.mrb[52].mxu0 }
 0x7f8   :  { %v4638_v46 = vadd.f32 %v4637_v62, %v13991_v47  ;;  %v4639_v35 = vpop.f32.mrb[53].mxu0  ;;  %v14946_v62 = vsel %vm311_vm5, %v14933_v57, %v14746_v24  ;;  %v14989_v24 = vld [vmem:[#allocation9 + $0x4] ss:$24 sps:$4 sm:$0xff]   ;;  %v15144_v57 = vld [vmem:[#allocation9 + $0x270] ss:$24 sps:$4 sm:$0xff]  }
 0x7f9   :  { %v4640_v42 = vadd.f32 %v4639_v35, %v13994_v51  ;;  %v4641_v56 = vpop.f32.mrb[54].mxu0  ;;  %6027 = vmatprep.subr.bf16.mxu0 %v14989_v24  ;;  %17806 = vst [vmem:[#allocation34_spill] sm:$0xff] %v15144_v57 }
 0x7fa   :  { %v4671_v53 = vadd.f32 %v4638_v46, %v17788_v19  ;;  %v4642_v41 = vpop.f32.mrb[55].mxu0  ;;  %v15088_v56 = vld [vmem:[#allocation9 + $0x188] ss:$24 sps:$4 sm:$0xff]  }
 0x7fb   :  { %v4684_v52 = vmul.f32 %v12606_v5, %v4640_v42  ;;  %v4696_v42 = vpack.c.bf16 %v14946_v62, %v14946_v62  ;;  %v15093_v5 = vld [vmem:[#allocation9 + $0x1b4] ss:$24 sps:$4 sm:$0xff]   ;;  %v15095_v19 = vld [vmem:[#allocation9 + $0x1b0] ss:$24 sps:$4 sm:$0xff]  }
 0x7fc   :  { %v10791_v59 = vmul.f32 -1.442695, %v4671_v53  ;;  %17791 = vst [vmem:[#allocation48_spill] sm:$0xff] %v15093_v5  ;;  %17792 = vst [vmem:[#allocation75_spill] sm:$0xff] %v15095_v19  ;;  %v15097_v53 = vld [vmem:[#allocation9 + $0x1bc] ss:$24 sps:$4 sm:$0xff]  }
 0x7fd   :  { %v4685_v22 = vadd.f32 %v4684_v52, %v17789_v27  ;;  %v15100_v41 = vld [vmem:[#allocation9 + $0x1b8] ss:$24 sps:$4 sm:$0xff]   ;;  %v15109_v52 = vld [vmem:[#allocation9 + $0x1ec] ss:$24 sps:$4 sm:$0xff]  }
 0x7fe   :  { %12607 = vpow2.f32 %v10791_v59  ;;  %v15112_v59 = vld [vmem:[#allocation9 + $0x1e8] ss:$24 sps:$4 sm:$0xff]   ;;  %v15117_v27 = vld [vmem:[#allocation9 + $0x214] ss:$24 sps:$4 sm:$0xff]  }
 0x7ff   :  { %12609 = vtanh.f32 %v4685_v22  ;;  %17795 = vst [vmem:[#allocation53_spill] sm:$0xff] %v15112_v59  ;;  %17796 = vst [vmem:[#allocation58_spill] sm:$0xff] %v15117_v27  ;;  %v15119_v22 = vld [vmem:[#allocation9 + $0x210] ss:$24 sps:$4 sm:$0xff]  }
 0x800   :  { %17797 = vst [vmem:[#allocation52_spill] sm:$0xff] %v15119_v22 }
 0x808   :  { %v12608_v2 = vpop.eup %12607 }
 0x809   :  { %v4679_v1 = vadd.f32 1.0, %v12608_v2  ;;  %v12610_v63 = vpop.eup %12609  ;;  %v15121_v2 = vld [vmem:[#allocation9 + $0x21c] ss:$24 sps:$4 sm:$0xff]  }
 0x80a   :  { %v4687_v33 = vsub.f32 %v14752_v29, %v12610_v63  ;;  %17798 = vst [vmem:[#allocation73_spill] sm:$0xff] %v15121_v2 }
 0x80b   :  { %12611 = vrcp.f32 %v4679_v1  ;;  %v15124_v1 = vld [vmem:[#allocation9 + $0x218] ss:$24 sps:$4 sm:$0xff]  }
 0x80c   :  { %17799 = vst [vmem:[#allocation74_spill] sm:$0xff] %v15124_v1 }
 0x815   :  { %v12612_v17 = vpop.eup %12611 }
 0x816   :  { %v4688_v20 = vmul.f32 %v12612_v17, %v4687_v33  ;;  %v15131_v33 = vld [vmem:[#allocation9 + $0x244] ss:$24 sps:$4 sm:$0xff]   ;;  %v15133_v17 = vld [vmem:[#allocation9 + $0x248] ss:$24 sps:$4 sm:$0xff]  }
 0x817   :  { %17801 = vst [vmem:[#allocation88_spill] sm:$0xff] %v15131_v33  ;;  %17802 = vst [vmem:[#allocation90_spill] sm:$0xff] %v15133_v17 }
 0x818   :  { %v14940_v39 = vadd.f32 %v12610_v63, %v4688_v20  ;;  %v15129_v63 = vld [vmem:[#allocation9 + $0x240] ss:$24 sps:$4 sm:$0xff]   ;;  %v15135_v20 = vld [vmem:[#allocation9 + $0x24c] ss:$24 sps:$4 sm:$0xff]  }
 0x819   :  { %17800 = vst [vmem:[#allocation84_spill] sm:$0xff] %v15129_v63  ;;  %17803 = vst [vmem:[#allocation26_spill] sm:$0xff] %v15135_v20 }
 0x81a   :  { %17790 = vst [vmem:[#allocation62_spill] sm:$0xff] %v14940_v39  ;;  %v14952_v46 = vsel %vm310_vm4, %v14940_v39, %v14752_v29  ;;  %v14991_v29 = vld [vmem:[#allocation9] ss:$24 sps:$4 sm:$0xff]   ;;  %v15150_v39 = vld [vmem:[#allocation9 + $0x2a4] ss:$24 sps:$4 sm:$0xff]  }
 0x81b   :  { %v4697_v35 = vpack.c.bf16 %v14952_v46, %v14952_v46  ;;  %17808 = vst [vmem:[#allocation85_spill] sm:$0xff] %v15150_v39 }
 0x81d   :  { %5306 = vmatprep.mubr.bf16.mxu1 %v4697_v35  ;;  %5347 = vmatprep.mubr.bf16.mxu0 %v4697_v35 }
 0x81e   :  { %5307 = vmatmul.mubr.bf16.vlgmr.msra.gmra.mrb[60].mxu1 %v4696_v42  ;;  %5348 = vmatmul.mubr.bf16.vlgmr.msra.gmra.mrb[56].mxu0 %v4696_v42 }
 0x81f   :  { %5357 = vmatpush1.bf16.msra.mxu1 %v14756_v49  ;;  %5388 = vmatprep.mubr.bf16.mxu1 %v4697_v35  ;;  %v14993_v49 = vld [vmem:[#allocation9 + $0xc] ss:$24 sps:$4 sm:$0xff]  }
 0x820   :  { %5358 = vmatprep.subr.bf16.mxu1 %v14762_v12  ;;  %v14996_v12 = vld [vmem:[#allocation9 + $0x8] ss:$24 sps:$4 sm:$0xff]   ;;  %6028 = vmatpush1.bf16.msra.mxu0 %v14991_v29  ;;  %v15137_v35 = vld [vmem:[#allocation9 + $0x274] ss:$24 sps:$4 sm:$0xff]  }
 0x821   :  { %17804 = vst [vmem:[#allocation96_spill] sm:$0xff] %v15137_v35 }
 0x823   :  { %5359 = vmatpush1.bf16.msra.mxu1 %v14767_v43  ;;  %v15001_v43 = vld [vmem:[#allocation9 + $0x34] ss:$24 sps:$4 sm:$0xff]  }
 0x824   :  { %5360 = vmatprep.subr.bf16.mxu1 %v14770_v25  ;;  %v15003_v25 = vld [vmem:[#allocation9 + $0x30] ss:$24 sps:$4 sm:$0xff]   ;;  %6029 = vmatprep.subr.bf16.mxu0 %v15001_v43 }
 0x825   :  { %6030 = vmatpush1.bf16.msra.mxu0 %v15003_v25 }
 0x827   :  { %5361 = vmatpush1.bf16.msra.mxu1 %v14775_v21  ;;  %v15005_v21 = vld [vmem:[#allocation9 + $0x3c] ss:$24 sps:$4 sm:$0xff]  }
 0x828   :  { %5362 = vmatprep.subr.bf16.mxu1 %v14778_v37  ;;  %v15008_v37 = vld [vmem:[#allocation9 + $0x38] ss:$24 sps:$4 sm:$0xff]  }
 0x82b   :  { %5363 = vmatpush1.bf16.msra.mxu1 %v14783_v40  ;;  %v15013_v40 = vld [vmem:[#allocation9 + $0x64] ss:$24 sps:$4 sm:$0xff]  }
 0x82c   :  { %5364 = vmatprep.subr.bf16.mxu1 %v14786_v28  ;;  %v15015_v28 = vld [vmem:[#allocation9 + $0x60] ss:$24 sps:$4 sm:$0xff]   ;;  %6031 = vmatprep.subr.bf16.mxu0 %v15013_v40 }
 0x82d   :  { %6032 = vmatpush1.bf16.msra.mxu0 %v15015_v28 }
 0x82f   :  { %5365 = vmatpush1.bf16.msra.mxu1 %v14791_v54  ;;  %v15017_v54 = vld [vmem:[#allocation9 + $0x6c] ss:$24 sps:$4 sm:$0xff]  }
 0x830   :  { %5366 = vmatprep.subr.bf16.mxu1 %v14794_v7  ;;  %v15020_v7 = vld [vmem:[#allocation9 + $0x68] ss:$24 sps:$4 sm:$0xff]  }
 0x833   :  { %5367 = vmatpush1.bf16.msra.mxu1 %v14799_v26  ;;  %v15022_v26 = vld [vmem:[#allocation9 + $0x94] ss:$24 sps:$4 sm:$0xff]  }
 0x834   :  { %5368 = vmatprep.subr.bf16.mxu1 %v14802_v4  ;;  %v15026_v4 = vld [vmem:[#allocation9 + $0x90] ss:$24 sps:$4 sm:$0xff]   ;;  %6033 = vmatprep.subr.bf16.mxu0 %v15022_v26 }
 0x835   :  { %6034 = vmatpush1.bf16.msra.mxu0 %v15026_v4 }
 0x837   :  { %5369 = vmatpush1.bf16.msra.mxu1 %v14807_v9  ;;  %v15028_v9 = vld [vmem:[#allocation9 + $0x9c] ss:$24 sps:$4 sm:$0xff]  }
 0x838   :  { %5370 = vmatprep.subr.bf16.mxu1 %v14810_v14  ;;  %v15032_v14 = vld [vmem:[#allocation9 + $0x98] ss:$24 sps:$4 sm:$0xff]  }
 0x83b   :  { %5371 = vmatpush1.bf16.msra.mxu1 %v14815_v34  ;;  %v15034_v34 = vld [vmem:[#allocation9 + $0xc4] ss:$24 sps:$4 sm:$0xff]  }
 0x83c   :  { %5372 = vmatprep.subr.bf16.mxu1 %v14818_v18  ;;  %v15037_v18 = vld [vmem:[#allocation9 + $0xcc] ss:$24 sps:$4 sm:$0xff]   ;;  %6035 = vmatprep.subr.bf16.mxu0 %v15034_v34 }
 0x83f   :  { %5373 = vmatpush1.bf16.msra.mxu1 %v14823_v38  ;;  %v15040_v38 = vld [vmem:[#allocation9 + $0xc0] ss:$24 sps:$4 sm:$0xff]  }
 0x840   :  { %5374 = vmatprep.subr.bf16.mxu1 %v14826_v36  ;;  %v15044_v36 = vld [vmem:[#allocation9 + $0xc8] ss:$24 sps:$4 sm:$0xff]   ;;  %6036 = vmatpush1.bf16.msra.mxu0 %v15040_v38 }
 0x843   :  { %5375 = vmatpush1.bf16.msra.mxu1 %v14830_v48  ;;  %v15046_v48 = vld [vmem:[#allocation9 + $0xf4] ss:$24 sps:$4 sm:$0xff]  }
 0x844   :  { %5376 = vmatprep.subr.bf16.mxu1 %v14833_v13  ;;  %v15049_v13 = vld [vmem:[#allocation9 + $0xfc] ss:$24 sps:$4 sm:$0xff]   ;;  %6037 = vmatprep.subr.bf16.mxu0 %v15046_v48 }
 0x847   :  { %5377 = vmatpush1.bf16.msra.mxu1 %v14836_v3  ;;  %v15052_v3 = vld [vmem:[#allocation9 + $0xf0] ss:$24 sps:$4 sm:$0xff]  }
 0x848   :  { %5378 = vmatprep.subr.bf16.mxu1 %v14839_v0  ;;  %v15056_v0 = vld [vmem:[#allocation9 + $0xf8] ss:$24 sps:$4 sm:$0xff]   ;;  %6038 = vmatpush1.bf16.msra.mxu0 %v15052_v3 }
 0x84b   :  { %5379 = vmatpush1.bf16.msra.mxu1 %v14842_v30  ;;  %v15058_v30 = vld [vmem:[#allocation9 + $0x124] ss:$24 sps:$4 sm:$0xff]  }
 0x84c   :  { %5380 = vmatprep.subr.bf16.mxu1 %v14845_v16  ;;  %v15061_v16 = vld [vmem:[#allocation9 + $0x12c] ss:$24 sps:$4 sm:$0xff]   ;;  %6039 = vmatprep.subr.bf16.mxu0 %v15058_v30 }
 0x84f   :  { %5381 = vmatpush1.bf16.msra.mxu1 %v14848_v44  ;;  %v15064_v44 = vld [vmem:[#allocation9 + $0x120] ss:$24 sps:$4 sm:$0xff]  }
 0x850   :  { %5382 = vmatprep.subr.bf16.mxu1 %v14851_v8  ;;  %v15068_v8 = vld [vmem:[#allocation9 + $0x128] ss:$24 sps:$4 sm:$0xff]   ;;  %6040 = vmatpush1.bf16.msra.mxu0 %v15064_v44 }
 0x853   :  { %5383 = vmatpush1.bf16.msra.mxu1 %v14854_v11  ;;  %v15073_v11 = vld [vmem:[#allocation9 + $0x154] ss:$24 sps:$4 sm:$0xff]  }
 0x854   :  { %5384 = vmatprep.subr.bf16.mxu1 %v14857_v58  ;;  %v15075_v58 = vld [vmem:[#allocation9 + $0x150] ss:$24 sps:$4 sm:$0xff]   ;;  %6041 = vmatprep.subr.bf16.mxu0 %v15073_v11 }
 0x855   :  { %6042 = vmatpush1.bf16.msra.mxu0 %v15075_v58 }
 0x856   :  { %6043 = vmatprep.subr.bf16.mxu0 %v14903_v55  ;;  %v15105_v55 = vld [vmem:[#allocation9 + $0x1e4] ss:$24 sps:$4 sm:$0xff]  }
 0x857   :  { %5385 = vmatpush1.bf16.msra.mxu1 %v14860_v60  ;;  %v15077_v60 = vld [vmem:[#allocation9 + $0x15c] ss:$24 sps:$4 sm:$0xff]   ;;  %17793 = vst [vmem:[#allocation76_spill] sm:$0xff] %v15105_v55 }
 0x858   :  { %5386 = vmatprep.subr.bf16.mxu1 %v14863_v6  ;;  %v15080_v6 = vld [vmem:[#allocation9 + $0x158] ss:$24 sps:$4 sm:$0xff]  }
 0x859   :  { %6044 = vmatpush1.bf16.msra.mxu0 %v14905_v61  ;;  %v15107_v61 = vld [vmem:[#allocation9 + $0x1e0] ss:$24 sps:$4 sm:$0xff]  }
 0x85a   :  { %6045 = vmatprep.subr.bf16.mxu0 %v15093_v5  ;;  %17794 = vst [vmem:[#allocation51_spill] sm:$0xff] %v15107_v61 }
 0x85b   :  { %5387 = vmatpush1.bf16.msra.mxu1 %v14866_v15  ;;  %v15086_v15 = vld [vmem:[#allocation9 + $0x18c] ss:$24 sps:$4 sm:$0xff]  }
 0x85c   :  { %6068 = vmatprep.subr.bf16.mxu1 %v14993_v49 }
 0x85d   :  { %6046 = vmatpush1.bf16.msra.mxu0 %v15095_v19 }
 0x85e   :  { %5389 = vmatmul.mubr.bf16.vlgmr.msra.gmra.mrb[64].mxu1 %v4696_v42  ;;  %6047 = vmatprep.subr.bf16.mxu0 %v15105_v55  ;;  %v15140_v42 = vld [vmem:[#allocation9 + $0x27c] ss:$24 sps:$4 sm:$0xff]  }
 0x85f   :  { %6069 = vmatpush1.bf16.msra.mxu1 %v14996_v12  ;;  %17805 = vst [vmem:[#allocation30_spill] sm:$0xff] %v15140_v42 }
 0x860   :  { %6070 = vmatprep.subr.bf16.mxu1 %v15005_v21 }
 0x861   :  { %6048 = vmatpush1.bf16.msra.mxu0 %v15107_v61  ;;  %v15168_v61 = vld [vmem:[#allocation9 + $0x2d0] ss:$24 sps:$4 sm:$0xff]  }
 0x862   :  { %6049 = vmatprep.subr.bf16.mxu0 %v15117_v27  ;;  %v15162_v27 = vld [vmem:[#allocation9 + $0x2d4] ss:$24 sps:$4 sm:$0xff]   ;;  %17814 = vst [vmem:[#allocation37_spill] sm:$0xff] %v15168_v61 }
 0x863   :  { %6071 = vmatpush1.bf16.msra.mxu1 %v15008_v37  ;;  %17812 = vst [vmem:[#allocation33_spill] sm:$0xff] %v15162_v27 }
 0x864   :  { %6072 = vmatprep.subr.bf16.mxu1 %v15017_v54 }
 0x865   :  { %6050 = vmatpush1.bf16.msra.mxu0 %v15119_v22  ;;  %v15153_v22 = vld [vmem:[#allocation9 + $0x2ac] ss:$24 sps:$4 sm:$0xff]  }
 0x866   :  { %6051 = vmatprep.subr.bf16.mxu0 %v15131_v33  ;;  %17809 = vst [vmem:[#allocation89_spill] sm:$0xff] %v15153_v22  ;;  %v15156_v33 = vld [vmem:[#allocation9 + $0x2a0] ss:$24 sps:$4 sm:$0xff]  }
 0x867   :  { %6073 = vmatpush1.bf16.msra.mxu1 %v15020_v7  ;;  %17810 = vst [vmem:[#allocation93_spill] sm:$0xff] %v15156_v33 }
 0x868   :  { %6074 = vmatprep.subr.bf16.mxu1 %v15028_v9 }
 0x869   :  { %6052 = vmatpush1.bf16.msra.mxu0 %v15129_v63  ;;  %v15160_v63 = vld [vmem:[#allocation9 + $0x2a8] ss:$24 sps:$4 sm:$0xff]  }
 0x86a   :  { %6053 = vmatprep.subr.bf16.mxu0 %v15137_v35  ;;  %17811 = vst [vmem:[#allocation32_spill] sm:$0xff] %v15160_v63  ;;  %v15165_v35 = vld [vmem:[#allocation9 + $0x2dc] ss:$24 sps:$4 sm:$0xff]  }
 0x86b   :  { %6075 = vmatpush1.bf16.msra.mxu1 %v15032_v14  ;;  %17813 = vst [vmem:[#allocation36_spill] sm:$0xff] %v15165_v35 }
 0x86c   :  { %6076 = vmatprep.subr.bf16.mxu1 %v15037_v18 }
 0x86d   :  { %6054 = vmatpush1.bf16.msra.mxu0 %v15144_v57  ;;  %v15172_v57 = vld [vmem:[#allocation9 + $0x2d8] ss:$24 sps:$4 sm:$0xff]  }
 0x86e   :  { %6055 = vmatprep.subr.bf16.mxu0 %v15150_v39  ;;  %17815 = vst [vmem:[#allocation40_spill] sm:$0xff] %v15172_v57  ;;  %v15177_v39 = vld [vmem:[#allocation9 + $0x14] ss:$24 sps:$4 sm:$0xff]  }
 0x86f   :  { %6077 = vmatpush1.bf16.msra.mxu1 %v15044_v36  ;;  %17816 = vst [vmem:[#allocation86_spill] sm:$0xff] %v15177_v39 }
 0x870   :  { %6078 = vmatprep.subr.bf16.mxu1 %v15049_v13 }
 0x871   :  { %6056 = vmatpush1.bf16.msra.mxu0 %v15156_v33 }
 0x872   :  { %6057 = vmatprep.subr.bf16.mxu0 %v15162_v27 }
 0x873   :  { %6079 = vmatpush1.bf16.msra.mxu1 %v15056_v0 }
 0x874   :  { %6080 = vmatprep.subr.bf16.mxu1 %v15061_v16 }
 0x875   :  { %6058 = vmatpush1.bf16.msra.mxu0 %v15168_v61 }
 0x876   :  { %6109 = vmatprep.subr.bf16.mxu0 %v15177_v39 }
 0x877   :  { %6081 = vmatpush1.bf16.msra.mxu1 %v15068_v8 }
 0x878   :  { %6082 = vmatprep.subr.bf16.mxu1 %v15077_v60 }
 0x87b   :  { %6083 = vmatpush1.bf16.msra.mxu1 %v15080_v6 }
 0x87c   :  { %6084 = vmatprep.subr.bf16.mxu1 %v15086_v15 }
 0x87f   :  { %6085 = vmatpush1.bf16.msra.mxu1 %v15088_v56 }
 0x880   :  { %6086 = vmatprep.subr.bf16.mxu1 %v15097_v53 }
 0x883   :  { %6087 = vmatpush1.bf16.msra.mxu1 %v15100_v41 }
 0x884   :  { %6088 = vmatprep.subr.bf16.mxu1 %v15109_v52 }
 0x887   :  { %6089 = vmatpush1.bf16.msra.mxu1 %v15112_v59 }
 0x888   :  { %6090 = vmatprep.subr.bf16.mxu1 %v15121_v2 }
 0x88b   :  { %6091 = vmatpush1.bf16.msra.mxu1 %v15124_v1  ;;  %v17819_v1 = vld [vmem:[#allocation50_spill] sm:$0xff] }
 0x88c   :  { %6092 = vmatprep.subr.bf16.mxu1 %v15135_v20  ;;  %v17818_v20 = vld [vmem:[#allocation61_spill] sm:$0xff] }
 0x88f   :  { %6093 = vmatpush1.bf16.msra.mxu1 %v15133_v17 }
 0x890   :  { %6094 = vmatprep.subr.bf16.mxu1 %v15140_v42 }
 0x893   :  { %6095 = vmatpush1.bf16.msra.mxu1 %v15148_v10  ;;  %v17817_v10 = vld [vmem:[#allocation59_spill] sm:$0xff] }
 0x894   :  { %6096 = vmatprep.subr.bf16.mxu1 %v15153_v22 }
 0x897   :  { %6097 = vmatpush1.bf16.msra.mxu1 %v15160_v63 }
 0x898   :  { %6098 = vmatprep.subr.bf16.mxu1 %v15165_v35 }
 0x89b   :  { %6099 = vmatpush1.bf16.msra.mxu1 %v15172_v57 }
 0x89c   :  { %6780 = vmatprep.subr.bf16.mxu1 %v14989_v24 }
 0x8f1   :  { %v5308_v33 = vpop.f32.mrb[60].mxu1  ;;  %v5349_v55 = vpop.f32.mrb[56].mxu0 }
 0x8f2   :  { %v5309_v19 = vadd.f32 %v5308_v33, %v17781_v23  ;;  %v5310_v5 = vpop.f32.mrb[61].mxu1  ;;  %v5351_v27 = vpop.f32.mrb[57].mxu0 }
 0x8f3   :  { %v5311_v63 = vadd.f32 %v5310_v5, %v13968_v32  ;;  %v5352_v35 = vadd.f32 %v5351_v27, %v17782_v50  ;;  %v5312_v22 = vpop.f32.mrb[62].mxu1  ;;  %v5353_v61 = vpop.f32.mrb[58].mxu0  ;;  %v5350_v27 = vadd.f32 %v5349_v55, %v13977_v45  ;;  %v17820_v50 = vld [vmem:[#allocation60_spill] sm:$0xff] }
 0x8f4   :  { %v5403_v57 = vadd.f32 %v5309_v19, %v17817_v10  ;;  %v5313_v42 = vpop.f32.mrb[63].mxu1  ;;  %v5354_v17 = vpop.f32.mrb[59].mxu0 }
 0x8f5   :  { %v5404_v24 = vadd.f32 %v5311_v63, %v17818_v20  ;;  %v5423_v39 = vadd.f32 %v5352_v35, %v17819_v1 }
 0x8f6   :  { %v10888_v2 = vmul.f32 -1.442695, %v5403_v57 }
 0x8f7   :  { %v10889_v59 = vmul.f32 -1.442695, %v5404_v24  ;;  %v10890_v17 = vmul.f32 -1.442695, %v5423_v39 }
 0x8f8   :  { %12613 = vpow2.f32 %v10888_v2 }
 0x8f9   :  { %12615 = vpow2.f32 %v10889_v59 }
 0x902   :  { %v12614_v33 = vpop.eup %12613 }
 0x903   :  { %v5411_v23 = vadd.f32 1.0, %v12614_v33  ;;  %v12616_v5 = vpop.eup %12615  ;;  %v17821_v33 = vld [vmem:[#allocation69_spill] sm:$0xff] }
 0x904   :  { %v5412_v19 = vadd.f32 1.0, %v12616_v5 }
 0x905   :  { %12617 = vrcp.f32 %v5411_v23 }
 0x90f   :  { %v12618_v22 = vpop.eup %12617 }
 0x910   :  { %v5417_v61 = vmul.f32 %v12618_v22, %v5350_v27 }
 0x912   :  { %v5418_v10 = vadd.f32 %v5417_v61, %v17820_v50 }
 0x914   :  { %12619 = vtanh.f32 %v5418_v10  ;;  %v17822_v10 = vld [vmem:[#allocation70_spill] sm:$0xff] }
 0x915   :  { %12621 = vrcp.f32 %v5412_v19 }
 0x916   :  { %12623 = vpow2.f32 %v10890_v17 }
 0x91e   :  { %v12620_v1 = vpop.eup %12619 }
 0x91f   :  { %v5420_v57 = vsub.f32 %v14946_v62, %v12620_v1  ;;  %v12622_v2 = vpop.eup %12621 }
 0x920   :  { %v12624_v20 = vpop.eup %12623 }
 0x921   :  { %v5421_v63 = vmul.f32 %v12622_v2, %v5420_v57  ;;  %v5431_v23 = vadd.f32 1.0, %v12624_v20 }
 0x923   :  { %v15190_v59 = vadd.f32 %v12620_v1, %v5421_v63  ;;  %12625 = vrcp.f32 %v5431_v23 }
 0x92d   :  { %v12626_v39 = vpop.eup %12625 }
 0x931   :  { %v5390_v55 = vpop.f32.mrb[64].mxu1 }
 0x932   :  { %v5391_v35 = vadd.f32 %v5390_v55, %v13991_v47  ;;  %v5392_v42 = vpop.f32.mrb[65].mxu1  ;;  %v15203_v55 = vsel %vm312_vm3, %v15190_v59, %v14946_v62  ;;  %v15224_v62 = vld [vmem:[#allocation9 + $0x40] ss:$24 sps:$4 sm:$0xff]  }
 0x933   :  { %v5393_v50 = vadd.f32 %v5392_v42, %v13994_v51  ;;  %v5394_v24 = vpop.f32.mrb[66].mxu1 }
 0x934   :  { %v5424_v5 = vadd.f32 %v5391_v35, %v17821_v33  ;;  %v5395_v27 = vpop.f32.mrb[67].mxu1  ;;  %v15217_v24 = vpack.c.bf16 %v15203_v55, %v15203_v55  ;;  %v15232_v33 = vld [vmem:[#allocation9 + $0x70] ss:$24 sps:$4 sm:$0xff]  }
 0x935   :  { %v5437_v22 = vmul.f32 %v12626_v39, %v5393_v50  ;;  %v15213_v50 = vld [vmem:[#allocation9 + $0x10] ss:$24 sps:$4 sm:$0xff]   ;;  %v15219_v39 = vld [vmem:[#allocation9 + $0x44] ss:$24 sps:$4 sm:$0xff]   ;;  %v15240_v27 = vld [vmem:[#allocation9 + $0xa0] ss:$24 sps:$4 sm:$0xff]  }
 0x936   :  { %v10891_v61 = vmul.f32 -1.442695, %v5424_v5  ;;  %v15235_v5 = vld [vmem:[#allocation9 + $0xa4] ss:$24 sps:$4 sm:$0xff]  }
 0x937   :  { %v5438_v19 = vadd.f32 %v5437_v22, %v17822_v10  ;;  %v15290_v22 = vld [vmem:[#allocation9 + $0x1f4] ss:$24 sps:$4 sm:$0xff]   ;;  %v15305_v10 = vld [vmem:[#allocation9 + $0x250] ss:$24 sps:$4 sm:$0xff]  }
 0x938   :  { %12627 = vpow2.f32 %v10891_v61  ;;  %v15299_v61 = vld [vmem:[#allocation9 + $0x220] ss:$24 sps:$4 sm:$0xff]  }
 0x939   :  { %12629 = vtanh.f32 %v5438_v19  ;;  %v15308_v19 = vld [vmem:[#allocation9 + $0x284] ss:$24 sps:$4 sm:$0xff]  }
 0x942   :  { %v12628_v17 = vpop.eup %12627 }
 0x943   :  { %v5432_v1 = vadd.f32 1.0, %v12628_v17  ;;  %v12630_v57 = vpop.eup %12629  ;;  %v15311_v17 = vld [vmem:[#allocation9 + $0x280] ss:$24 sps:$4 sm:$0xff]  }
 0x944   :  { %v5440_v2 = vsub.f32 %v14952_v46, %v12630_v57 }
 0x945   :  { %12631 = vrcp.f32 %v5432_v1  ;;  %v15314_v1 = vld [vmem:[#allocation9 + $0x2b4] ss:$24 sps:$4 sm:$0xff]  }
 0x94f   :  { %v12632_v63 = vpop.eup %12631 }
 0x950   :  { %v5441_v20 = vmul.f32 %v12632_v63, %v5440_v2  ;;  %v15320_v2 = vld [vmem:[#allocation9 + $0x2e4] ss:$24 sps:$4 sm:$0xff]   ;;  %v15323_v63 = vld [vmem:[#allocation9 + $0x2e0] ss:$24 sps:$4 sm:$0xff]  }
 0x952   :  { %v15197_v23 = vadd.f32 %v12630_v57, %v5441_v20  ;;  %v15317_v57 = vld [vmem:[#allocation9 + $0x2b0] ss:$24 sps:$4 sm:$0xff]  }
 0x953   :  { %v17842_v20 = vld [vmem:[#allocation96_spill] sm:$0xff] }
 0x954   :  { %v15209_v35 = vsel %vm309_vm2, %v15197_v23, %v14952_v46  ;;  %v15227_v46 = vld [vmem:[#allocation9 + $0x74] ss:$24 sps:$4 sm:$0xff]  }
 0x955   :  { %v5450_v42 = vpack.c.bf16 %v15209_v35, %v15209_v35 }
 0x957   :  { %6059 = vmatprep.mubr.bf16.mxu0 %v5450_v42  ;;  %6100 = vmatprep.mubr.bf16.mxu1 %v5450_v42 }
 0x958   :  { %6060 = vmatmul.mubr.bf16.vlgmr.msra.gmra.mrb[60].mxu0 %v15217_v24  ;;  %6101 = vmatmul.mubr.bf16.vlgmr.msra.gmra.mrb[68].mxu1 %v15217_v24 }
 0x959   :  { %6110 = vmatpush1.bf16.msra.mxu0 %v15213_v50  ;;  %6141 = vmatprep.mubr.bf16.mxu0 %v5450_v42  ;;  %v17843_v42 = vld [vmem:[#allocation34_spill] sm:$0xff] }
 0x95a   :  { %6111 = vmatprep.subr.bf16.mxu0 %v15219_v39  ;;  %6781 = vmatpush1.bf16.msra.mxu1 %v14991_v29  ;;  %v15243_v29 = vld [vmem:[#allocation9 + $0xd4] ss:$24 sps:$4 sm:$0xff]  }
 0x95b   :  { %6782 = vmatprep.subr.bf16.mxu1 %v15001_v43  ;;  %v15248_v43 = vld [vmem:[#allocation9 + $0xd0] ss:$24 sps:$4 sm:$0xff]  }
 0x95d   :  { %6112 = vmatpush1.bf16.msra.mxu0 %v15224_v62 }
 0x95e   :  { %6113 = vmatprep.subr.bf16.mxu0 %v15227_v46  ;;  %6783 = vmatpush1.bf16.msra.mxu1 %v15003_v25  ;;  %v15251_v25 = vld [vmem:[#allocation9 + $0x104] ss:$24 sps:$4 sm:$0xff]  }
 0x95f   :  { %6784 = vmatprep.subr.bf16.mxu1 %v15013_v40  ;;  %v15256_v40 = vld [vmem:[#allocation9 + $0x100] ss:$24 sps:$4 sm:$0xff]  }
 0x961   :  { %6114 = vmatpush1.bf16.msra.mxu0 %v15232_v33 }
 0x962   :  { %6115 = vmatprep.subr.bf16.mxu0 %v15235_v5  ;;  %6785 = vmatpush1.bf16.msra.mxu1 %v15015_v28  ;;  %v15259_v28 = vld [vmem:[#allocation9 + $0x134] ss:$24 sps:$4 sm:$0xff]  }
 0x963   :  { %6786 = vmatprep.subr.bf16.mxu1 %v15022_v26  ;;  %v15264_v26 = vld [vmem:[#allocation9 + $0x130] ss:$24 sps:$4 sm:$0xff]  }
 0x965   :  { %6116 = vmatpush1.bf16.msra.mxu0 %v15240_v27 }
 0x966   :  { %6117 = vmatprep.subr.bf16.mxu0 %v15243_v29  ;;  %6787 = vmatpush1.bf16.msra.mxu1 %v15026_v4  ;;  %v15267_v4 = vld [vmem:[#allocation9 + $0x164] ss:$24 sps:$4 sm:$0xff]  }
 0x967   :  { %6788 = vmatprep.subr.bf16.mxu1 %v15034_v34  ;;  %v15272_v34 = vld [vmem:[#allocation9 + $0x160] ss:$24 sps:$4 sm:$0xff]  }
 0x969   :  { %6118 = vmatpush1.bf16.msra.mxu0 %v15248_v43 }
 0x96a   :  { %6119 = vmatprep.subr.bf16.mxu0 %v15251_v25  ;;  %6789 = vmatpush1.bf16.msra.mxu1 %v15040_v38  ;;  %v15275_v38 = vld [vmem:[#allocation9 + $0x194] ss:$24 sps:$4 sm:$0xff]  }
 0x96b   :  { %6790 = vmatprep.subr.bf16.mxu1 %v15046_v48  ;;  %v15280_v48 = vld [vmem:[#allocation9 + $0x190] ss:$24 sps:$4 sm:$0xff]  }
 0x96d   :  { %6120 = vmatpush1.bf16.msra.mxu0 %v15256_v40 }
 0x96e   :  { %6121 = vmatprep.subr.bf16.mxu0 %v15259_v28  ;;  %6791 = vmatpush1.bf16.msra.mxu1 %v15052_v3  ;;  %v15283_v3 = vld [vmem:[#allocation9 + $0x1c4] ss:$24 sps:$4 sm:$0xff]  }
 0x96f   :  { %6792 = vmatprep.subr.bf16.mxu1 %v15058_v30  ;;  %v15287_v30 = vld [vmem:[#allocation9 + $0x1c0] ss:$24 sps:$4 sm:$0xff]  }
 0x971   :  { %6122 = vmatpush1.bf16.msra.mxu0 %v15264_v26 }
 0x972   :  { %6123 = vmatprep.subr.bf16.mxu0 %v15267_v4  ;;  %6793 = vmatpush1.bf16.msra.mxu1 %v15064_v44  ;;  %v15293_v44 = vld [vmem:[#allocation9 + $0x1f0] ss:$24 sps:$4 sm:$0xff]  }
 0x973   :  { %6794 = vmatprep.subr.bf16.mxu1 %v15073_v11  ;;  %v15296_v11 = vld [vmem:[#allocation9 + $0x224] ss:$24 sps:$4 sm:$0xff]  }
 0x975   :  { %6124 = vmatpush1.bf16.msra.mxu0 %v15272_v34 }
 0x976   :  { %6125 = vmatprep.subr.bf16.mxu0 %v15275_v38  ;;  %6795 = vmatpush1.bf16.msra.mxu1 %v15075_v58  ;;  %v15302_v58 = vld [vmem:[#allocation9 + $0x254] ss:$24 sps:$4 sm:$0xff]  }
 0x979   :  { %6126 = vmatpush1.bf16.msra.mxu0 %v15280_v48 }
 0x97a   :  { %6127 = vmatprep.subr.bf16.mxu0 %v15283_v3 }
 0x97d   :  { %6128 = vmatpush1.bf16.msra.mxu0 %v15287_v30 }
 0x97e   :  { %6129 = vmatprep.subr.bf16.mxu0 %v15290_v22 }
 0x981   :  { %6130 = vmatpush1.bf16.msra.mxu0 %v15293_v44 }
 0x982   :  { %6131 = vmatprep.subr.bf16.mxu0 %v15296_v11 }
 0x985   :  { %6132 = vmatpush1.bf16.msra.mxu0 %v15299_v61 }
 0x986   :  { %6133 = vmatprep.subr.bf16.mxu0 %v15302_v58 }
 0x989   :  { %6134 = vmatpush1.bf16.msra.mxu0 %v15305_v10 }
 0x98a   :  { %6135 = vmatprep.subr.bf16.mxu0 %v15308_v19 }
 0x98d   :  { %6136 = vmatpush1.bf16.msra.mxu0 %v15311_v17 }
 0x98e   :  { %6137 = vmatprep.subr.bf16.mxu0 %v15314_v1 }
 0x991   :  { %6138 = vmatpush1.bf16.msra.mxu0 %v15317_v57 }
 0x992   :  { %6139 = vmatprep.subr.bf16.mxu0 %v15320_v2 }
 0x995   :  { %6140 = vmatpush1.bf16.msra.mxu0 %v15323_v63 }
 0x996   :  { %6821 = vmatprep.subr.bf16.mxu0 %v14993_v49  ;;  %v17823_v49 = vld [vmem:[#allocation53_spill] sm:$0xff] }
 0x998   :  { %6142 = vmatmul.mubr.bf16.vlgmr.msra.gmra.mrb[64].mxu0 %v15217_v24  ;;  %v17844_v24 = vld [vmem:[#allocation85_spill] sm:$0xff] }
 0x999   :  { %6822 = vmatpush1.bf16.msra.mxu0 %v14996_v12  ;;  %v17824_v12 = vld [vmem:[#allocation73_spill] sm:$0xff] }
 0x99a   :  { %6823 = vmatprep.subr.bf16.mxu0 %v15005_v21  ;;  %v17825_v21 = vld [vmem:[#allocation74_spill] sm:$0xff] }
 0x99d   :  { %6824 = vmatpush1.bf16.msra.mxu0 %v15008_v37  ;;  %v17826_v37 = vld [vmem:[#allocation26_spill] sm:$0xff] }
 0x99e   :  { %6825 = vmatprep.subr.bf16.mxu0 %v15017_v54  ;;  %v17827_v54 = vld [vmem:[#allocation90_spill] sm:$0xff] }
 0x9a1   :  { %6826 = vmatpush1.bf16.msra.mxu0 %v15020_v7  ;;  %v17828_v7 = vld [vmem:[#allocation30_spill] sm:$0xff] }
 0x9a2   :  { %6827 = vmatprep.subr.bf16.mxu0 %v15028_v9  ;;  %v17829_v9 = vld [vmem:[#allocation39_spill] sm:$0xff] }
 0x9a5   :  { %6828 = vmatpush1.bf16.msra.mxu0 %v15032_v14  ;;  %v17830_v14 = vld [vmem:[#allocation89_spill] sm:$0xff] }
 0x9a6   :  { %6829 = vmatprep.subr.bf16.mxu0 %v15037_v18  ;;  %v17831_v18 = vld [vmem:[#allocation32_spill] sm:$0xff] }
 0x9a9   :  { %6830 = vmatpush1.bf16.msra.mxu0 %v15044_v36  ;;  %v17832_v36 = vld [vmem:[#allocation36_spill] sm:$0xff] }
 0x9aa   :  { %6831 = vmatprep.subr.bf16.mxu0 %v15049_v13  ;;  %v17833_v13 = vld [vmem:[#allocation40_spill] sm:$0xff] }
 0x9ad   :  { %6832 = vmatpush1.bf16.msra.mxu0 %v15056_v0  ;;  %v12192_v0 = vld [vmem:[#allocation9 + $0x184] ss:$24 sps:$4 sm:$0xff]  }
 0x9ae   :  { %6833 = vmatprep.subr.bf16.mxu0 %v15061_v16  ;;  %v12190_v16 = vld [vmem:[#allocation9 + $0x180] ss:$24 sps:$4 sm:$0xff]   ;;  %6796 = vmatprep.subr.bf16.mxu1 %v12192_v0 }
 0x9af   :  { %6797 = vmatpush1.bf16.msra.mxu1 %v12190_v16  ;;  %v17850_v0 = vld [vmem:[#allocation78_spill] sm:$0xff] }
 0x9b1   :  { %6834 = vmatpush1.bf16.msra.mxu0 %v15068_v8  ;;  %v17834_v8 = vld [vmem:[#allocation48_spill] sm:$0xff] }
 0x9b2   :  { %6835 = vmatprep.subr.bf16.mxu0 %v15077_v60  ;;  %6798 = vmatprep.subr.bf16.mxu1 %v17834_v8  ;;  %v17835_v60 = vld [vmem:[#allocation75_spill] sm:$0xff] }
 0x9b3   :  { %6799 = vmatpush1.bf16.msra.mxu1 %v17835_v60 }
 0x9b5   :  { %6836 = vmatpush1.bf16.msra.mxu0 %v15080_v6  ;;  %v17836_v6 = vld [vmem:[#allocation76_spill] sm:$0xff] }
 0x9b6   :  { %6837 = vmatprep.subr.bf16.mxu0 %v15086_v15  ;;  %6800 = vmatprep.subr.bf16.mxu1 %v17836_v6  ;;  %v17837_v15 = vld [vmem:[#allocation51_spill] sm:$0xff] }
 0x9b7   :  { %6801 = vmatpush1.bf16.msra.mxu1 %v17837_v15  ;;  %v17851_v6 = vld [vmem:[#allocation63_spill] sm:$0xff] }
 0x9b9   :  { %6838 = vmatpush1.bf16.msra.mxu0 %v15088_v56  ;;  %v17838_v56 = vld [vmem:[#allocation58_spill] sm:$0xff] }
 0x9ba   :  { %6839 = vmatprep.subr.bf16.mxu0 %v15097_v53  ;;  %6802 = vmatprep.subr.bf16.mxu1 %v17838_v56  ;;  %v17839_v53 = vld [vmem:[#allocation52_spill] sm:$0xff]  ;;  %17918 = vst [vmem:[#allocation58_spill] sm:$0xff] %v15771_v31 }
 0x9bb   :  { %6803 = vmatpush1.bf16.msra.mxu1 %v17839_v53 }
 0x9bd   :  { %6840 = vmatpush1.bf16.msra.mxu0 %v15100_v41  ;;  %v17840_v41 = vld [vmem:[#allocation88_spill] sm:$0xff] }
 0x9be   :  { %6841 = vmatprep.subr.bf16.mxu0 %v15109_v52  ;;  %6804 = vmatprep.subr.bf16.mxu1 %v17840_v41  ;;  %v17841_v52 = vld [vmem:[#allocation84_spill] sm:$0xff]  ;;  %v17852_v41 = vld [vmem:[#allocation66_spill] sm:$0xff] }
 0x9bf   :  { %6805 = vmatpush1.bf16.msra.mxu1 %v17841_v52 }
 0x9c0   :  { %6806 = vmatprep.subr.bf16.mxu1 %v17842_v20  ;;  %v17853_v20 = vld [vmem:[#allocation46_spill] sm:$0xff] }
 0x9c1   :  { %6842 = vmatpush1.bf16.msra.mxu0 %v17823_v49  ;;  %v17845_v49 = vld [vmem:[#allocation93_spill] sm:$0xff] }
 0x9c2   :  { %6843 = vmatprep.subr.bf16.mxu0 %v17824_v12  ;;  %v17846_v12 = vld [vmem:[#allocation33_spill] sm:$0xff] }
 0x9c3   :  { %6807 = vmatpush1.bf16.msra.mxu1 %v17843_v42 }
 0x9c4   :  { %6808 = vmatprep.subr.bf16.mxu1 %v17844_v24 }
 0x9c5   :  { %6844 = vmatpush1.bf16.msra.mxu0 %v17825_v21  ;;  %v17847_v21 = vld [vmem:[#allocation37_spill] sm:$0xff] }
 0x9c6   :  { %6845 = vmatprep.subr.bf16.mxu0 %v17826_v37  ;;  %v17848_v37 = vld [vmem:[#allocation86_spill] sm:$0xff] }
 0x9c7   :  { %6809 = vmatpush1.bf16.msra.mxu1 %v17845_v49 }
 0x9c8   :  { %6810 = vmatprep.subr.bf16.mxu1 %v17846_v12 }
 0x9c9   :  { %6846 = vmatpush1.bf16.msra.mxu0 %v17827_v54 }
 0x9ca   :  { %6847 = vmatprep.subr.bf16.mxu0 %v17828_v7 }
 0x9cb   :  { %6811 = vmatpush1.bf16.msra.mxu1 %v17847_v21 }
 0x9cc   :  { %6862 = vmatprep.subr.bf16.mxu1 %v17848_v37 }
 0x9cd   :  { %6848 = vmatpush1.bf16.msra.mxu0 %v17829_v9  ;;  %v17849_v9 = vld [vmem:[#allocation77_spill] sm:$0xff] }
 0x9ce   :  { %6849 = vmatprep.subr.bf16.mxu0 %v17830_v14 }
 0x9d1   :  { %6850 = vmatpush1.bf16.msra.mxu0 %v17831_v18 }
 0x9d2   :  { %6851 = vmatprep.subr.bf16.mxu0 %v17832_v36 }
 0x9d5   :  { %6852 = vmatpush1.bf16.msra.mxu0 %v17833_v13 }
 0xa2b   :  { %v6061_v54 = vpop.f32.mrb[60].mxu0  ;;  %v6102_v7 = vpop.f32.mrb[68].mxu1 }
 0xa2c   :  { %v6062_v14 = vadd.f32 %v6061_v54, %v17849_v9  ;;  %v6063_v18 = vpop.f32.mrb[61].mxu0  ;;  %v6104_v36 = vpop.f32.mrb[69].mxu1  ;;  %v6103_v54 = vadd.f32 %v6102_v7, %v13977_v45 }
 0xa2d   :  { %v6064_v13 = vadd.f32 %v6063_v18, %v13968_v32  ;;  %v6105_v16 = vadd.f32 %v6104_v36, %v17850_v0  ;;  %v6065_v8 = vpop.f32.mrb[62].mxu0  ;;  %v6106_v60 = vpop.f32.mrb[70].mxu1 }
 0xa2e   :  { %v6156_v15 = vadd.f32 %v6062_v14, %v17851_v6  ;;  %v6066_v56 = vpop.f32.mrb[63].mxu0  ;;  %v6107_v53 = vpop.f32.mrb[71].mxu1  ;;  %v17854_v8 = vld [vmem:[#allocation64_spill] sm:$0xff] }
 0xa2f   :  { %v6157_v52 = vadd.f32 %v6064_v13, %v17852_v41  ;;  %v6176_v42 = vadd.f32 %v6105_v16, %v17853_v20 }
 0xa30   :  { %v10988_v24 = vmul.f32 -1.442695, %v6156_v15 }
 0xa31   :  { %v10989_v49 = vmul.f32 -1.442695, %v6157_v52  ;;  %v10990_v6 = vmul.f32 -1.442695, %v6176_v42 }
 0xa32   :  { %12633 = vpow2.f32 %v10988_v24 }
 0xa33   :  { %12635 = vpow2.f32 %v10989_v49 }
 0xa3c   :  { %v12634_v12 = vpop.eup %12633 }
 0xa3d   :  { %v6164_v21 = vadd.f32 1.0, %v12634_v12  ;;  %v12636_v37 = vpop.eup %12635 }
 0xa3e   :  { %v6165_v60 = vadd.f32 1.0, %v12636_v37 }
 0xa3f   :  { %12637 = vrcp.f32 %v6164_v21  ;;  %v17855_v21 = vld [vmem:[#allocation24_spill] sm:$0xff] }
 0xa49   :  { %v12638_v18 = vpop.eup %12637 }
 0xa4a   :  { %v6170_v36 = vmul.f32 %v12638_v18, %v6103_v54 }
 0xa4c   :  { %v6171_v14 = vadd.f32 %v6170_v36, %v17854_v8  ;;  %v17856_v8 = vld [vmem:[#allocation25_spill] sm:$0xff] }
 0xa4e   :  { %12639 = vtanh.f32 %v6171_v14 }
 0xa4f   :  { %12641 = vrcp.f32 %v6165_v60 }
 0xa50   :  { %12643 = vpow2.f32 %v10990_v6 }
 0xa58   :  { %v12640_v13 = vpop.eup %12639 }
 0xa59   :  { %v6173_v16 = vsub.f32 %v15203_v55, %v12640_v13  ;;  %v12642_v15 = vpop.eup %12641 }
 0xa5a   :  { %v12644_v53 = vpop.eup %12643 }
 0xa5b   :  { %v6174_v56 = vmul.f32 %v12642_v15, %v6173_v16  ;;  %v6184_v52 = vadd.f32 1.0, %v12644_v53 }
 0xa5d   :  { %v15384_v41 = vadd.f32 %v12640_v13, %v6174_v56  ;;  %12645 = vrcp.f32 %v6184_v52 }
 0xa5f   :  { %v15397_v52 = vsel %vm313_vm1, %v15384_v41, %v15203_v55  ;;  %v12193_v55 = vld [vmem:[#allocation11] ss:$24 sps:$4 sm:$0xff]  }
 0xa60   :  { %17857 = vst [vmem:[#allocation94_spill] sm:$0xff] %v15397_v52 }
 0xa67   :  { %v12646_v42 = vpop.eup %12645 }
 0xa6b   :  { %v6143_v7 = vpop.f32.mrb[64].mxu0 }
 0xa6c   :  { %v6144_v20 = vadd.f32 %v6143_v7, %v13991_v47  ;;  %v6145_v24 = vpop.f32.mrb[65].mxu0 }
 0xa6d   :  { %v6146_v49 = vadd.f32 %v6145_v24, %v13994_v51  ;;  %v6147_v12 = vpop.f32.mrb[66].mxu0  ;;  %v6202_v24 = vpack.c.bf16 %v15397_v52, %v15397_v52 }
 0xa6e   :  { %v6177_v37 = vadd.f32 %v6144_v20, %v17855_v21  ;;  %v6148_v54 = vpop.f32.mrb[67].mxu0  ;;  %v12241_v12 = vld [vmem:[#allocation11 + $0x180] ss:$24 sps:$4 sm:$0xff]   ;;  %v12249_v21 = vld [vmem:[#allocation11 + $0x1b4] ss:$24 sps:$4 sm:$0xff]  }
 0xa6f   :  { %v6190_v18 = vmul.f32 %v12646_v42, %v6146_v49  ;;  %v12246_v49 = vld [vmem:[#allocation11 + $0x18c] ss:$24 sps:$4 sm:$0xff]   ;;  %v12244_v42 = vld [vmem:[#allocation11 + $0x188] ss:$24 sps:$4 sm:$0xff]  }
 0xa70   :  { %v10991_v36 = vmul.f32 -1.442695, %v6177_v37  ;;  %v12252_v37 = vld [vmem:[#allocation11 + $0x1bc] ss:$24 sps:$4 sm:$0xff]   ;;  %v12247_v54 = vld [vmem:[#allocation11 + $0x1b0] ss:$24 sps:$4 sm:$0xff]  }
 0xa71   :  { %v6191_v14 = vadd.f32 %v6190_v18, %v17856_v8  ;;  %v12250_v18 = vld [vmem:[#allocation11 + $0x1b8] ss:$24 sps:$4 sm:$0xff]   ;;  %v12258_v8 = vld [vmem:[#allocation11 + $0x1ec] ss:$24 sps:$4 sm:$0xff]  }
 0xa72   :  { %12647 = vpow2.f32 %v10991_v36  ;;  %v12255_v36 = vld [vmem:[#allocation11 + $0x1e4] ss:$24 sps:$4 sm:$0xff]  }
 0xa73   :  { %12649 = vtanh.f32 %v6191_v14  ;;  %v12253_v14 = vld [vmem:[#allocation11 + $0x1e0] ss:$24 sps:$4 sm:$0xff]  }
 0xa7c   :  { %v12648_v60 = vpop.eup %12647 }
 0xa7d   :  { %v6185_v6 = vadd.f32 1.0, %v12648_v60  ;;  %v12650_v13 = vpop.eup %12649  ;;  %v12256_v60 = vld [vmem:[#allocation11 + $0x1e8] ss:$24 sps:$4 sm:$0xff]  }
 0xa7e   :  { %v6193_v16 = vsub.f32 %v15209_v35, %v12650_v13 }
 0xa7f   :  { %12651 = vrcp.f32 %v6185_v6  ;;  %v12261_v6 = vld [vmem:[#allocation11 + $0x214] ss:$24 sps:$4 sm:$0xff]  }
 0xa89   :  { %v12652_v15 = vpop.eup %12651 }
 0xa8a   :  { %v6194_v56 = vmul.f32 %v12652_v15, %v6193_v16  ;;  %v12259_v16 = vld [vmem:[#allocation11 + $0x210] ss:$24 sps:$4 sm:$0xff]  }
 0xa8b   :  { %v12262_v15 = vld [vmem:[#allocation11 + $0x218] ss:$24 sps:$4 sm:$0xff]  }
 0xa8c   :  { %v15391_v53 = vadd.f32 %v12650_v13, %v6194_v56  ;;  %v12264_v13 = vld [vmem:[#allocation11 + $0x21c] ss:$24 sps:$4 sm:$0xff]  }
 0xa8d   :  { %v12267_v56 = vld [vmem:[#allocation11 + $0x244] ss:$24 sps:$4 sm:$0xff]  }
 0xa8e   :  { %v15403_v7 = vsel %vm308_vm0, %v15391_v53, %v15209_v35  ;;  %v12195_v35 = vld [vmem:[#allocation11 + $0x4] ss:$24 sps:$4 sm:$0xff]  }
 0xa8f   :  { %17858 = vst [vmem:[#allocation92_spill] sm:$0xff] %v15403_v7  ;;  %v6203_v20 = vpack.c.bf16 %v15403_v7, %v15403_v7  ;;  %7587 = vmatprep.subr.bf16.mxu0 %v12195_v35  ;;  %v12273_v35 = vld [vmem:[#allocation11 + $0x274] ss:$24 sps:$4 sm:$0xff]  }
 0xa91   :  { %6812 = vmatprep.mubr.bf16.mxu1 %v6203_v20  ;;  %6853 = vmatprep.mubr.bf16.mxu0 %v6203_v20 }
 0xa92   :  { %6813 = vmatmul.mubr.bf16.vlgmr.msra.gmra.mrb[72].mxu1 %v6202_v24  ;;  %6854 = vmatmul.mubr.bf16.vlgmr.msra.gmra.mrb[68].mxu0 %v6202_v24 }
 0xa93   :  { %6863 = vmatpush1.bf16.msra.mxu1 %v15213_v50  ;;  %6894 = vmatprep.mubr.bf16.mxu1 %v6203_v20  ;;  %v12196_v50 = vld [vmem:[#allocation11 + $0x8] ss:$24 sps:$4 sm:$0xff]   ;;  %v12270_v20 = vld [vmem:[#allocation11 + $0x24c] ss:$24 sps:$4 sm:$0xff]  }
 0xa94   :  { %6864 = vmatprep.subr.bf16.mxu1 %v15219_v39  ;;  %v12198_v39 = vld [vmem:[#allocation11 + $0xc] ss:$24 sps:$4 sm:$0xff]   ;;  %7588 = vmatpush1.bf16.msra.mxu0 %v12193_v55  ;;  %v12268_v55 = vld [vmem:[#allocation11 + $0x248] ss:$24 sps:$4 sm:$0xff]  }
 0xa97   :  { %6865 = vmatpush1.bf16.msra.mxu1 %v15224_v62  ;;  %v12201_v62 = vld [vmem:[#allocation11 + $0x34] ss:$24 sps:$4 sm:$0xff]  }
 0xa98   :  { %6866 = vmatprep.subr.bf16.mxu1 %v15227_v46  ;;  %v12204_v46 = vld [vmem:[#allocation11 + $0x3c] ss:$24 sps:$4 sm:$0xff]   ;;  %7589 = vmatprep.subr.bf16.mxu0 %v12201_v62  ;;  %v12274_v62 = vld [vmem:[#allocation11 + $0x278] ss:$24 sps:$4 sm:$0xff]  }
 0xa9b   :  { %6867 = vmatpush1.bf16.msra.mxu1 %v15232_v33  ;;  %v12199_v33 = vld [vmem:[#allocation11 + $0x30] ss:$24 sps:$4 sm:$0xff]  }
 0xa9c   :  { %6868 = vmatprep.subr.bf16.mxu1 %v15235_v5  ;;  %v12202_v5 = vld [vmem:[#allocation11 + $0x38] ss:$24 sps:$4 sm:$0xff]   ;;  %7590 = vmatpush1.bf16.msra.mxu0 %v12199_v33  ;;  %v12282_v33 = vld [vmem:[#allocation11 + $0x2ac] ss:$24 sps:$4 sm:$0xff]  }
 0xa9f   :  { %6869 = vmatpush1.bf16.msra.mxu1 %v15240_v27  ;;  %v12207_v27 = vld [vmem:[#allocation11 + $0x64] ss:$24 sps:$4 sm:$0xff]  }
 0xaa0   :  { %6870 = vmatprep.subr.bf16.mxu1 %v15243_v29  ;;  %v12210_v29 = vld [vmem:[#allocation11 + $0x6c] ss:$24 sps:$4 sm:$0xff]   ;;  %7591 = vmatprep.subr.bf16.mxu0 %v12207_v27  ;;  %v12280_v27 = vld [vmem:[#allocation11 + $0x2a8] ss:$24 sps:$4 sm:$0xff]  }
 0xaa3   :  { %6871 = vmatpush1.bf16.msra.mxu1 %v15248_v43  ;;  %v12205_v43 = vld [vmem:[#allocation11 + $0x60] ss:$24 sps:$4 sm:$0xff]  }
 0xaa4   :  { %6872 = vmatprep.subr.bf16.mxu1 %v15251_v25  ;;  %v12208_v25 = vld [vmem:[#allocation11 + $0x68] ss:$24 sps:$4 sm:$0xff]   ;;  %7592 = vmatpush1.bf16.msra.mxu0 %v12205_v43  ;;  %v12288_v43 = vld [vmem:[#allocation11 + $0x2dc] ss:$24 sps:$4 sm:$0xff]  }
 0xaa7   :  { %6873 = vmatpush1.bf16.msra.mxu1 %v15256_v40  ;;  %v12213_v40 = vld [vmem:[#allocation11 + $0x94] ss:$24 sps:$4 sm:$0xff]  }
 0xaa8   :  { %6874 = vmatprep.subr.bf16.mxu1 %v15259_v28  ;;  %v12216_v28 = vld [vmem:[#allocation11 + $0x9c] ss:$24 sps:$4 sm:$0xff]   ;;  %7593 = vmatprep.subr.bf16.mxu0 %v12213_v40  ;;  %v12286_v40 = vld [vmem:[#allocation11 + $0x2d8] ss:$24 sps:$4 sm:$0xff]  }
 0xaab   :  { %6875 = vmatpush1.bf16.msra.mxu1 %v15264_v26  ;;  %v12211_v26 = vld [vmem:[#allocation11 + $0x90] ss:$24 sps:$4 sm:$0xff]  }
 0xaac   :  { %6876 = vmatprep.subr.bf16.mxu1 %v15267_v4  ;;  %v12214_v4 = vld [vmem:[#allocation11 + $0x98] ss:$24 sps:$4 sm:$0xff]   ;;  %7594 = vmatpush1.bf16.msra.mxu0 %v12211_v26  ;;  %v15440_v26 = vld [vmem:[#allocation12 + $0x4] ss:$24 sps:$4 sm:$0xff]  }
 0xaaf   :  { %6877 = vmatpush1.bf16.msra.mxu1 %v15272_v34  ;;  %v12219_v34 = vld [vmem:[#allocation11 + $0xc4] ss:$24 sps:$4 sm:$0xff]  }
 0xab0   :  { %6878 = vmatprep.subr.bf16.mxu1 %v15275_v38  ;;  %v12222_v38 = vld [vmem:[#allocation11 + $0xcc] ss:$24 sps:$4 sm:$0xff]   ;;  %7595 = vmatprep.subr.bf16.mxu0 %v12219_v34 }
 0xab3   :  { %6879 = vmatpush1.bf16.msra.mxu1 %v15280_v48  ;;  %v12217_v48 = vld [vmem:[#allocation11 + $0xc0] ss:$24 sps:$4 sm:$0xff]  }
 0xab4   :  { %6880 = vmatprep.subr.bf16.mxu1 %v15283_v3  ;;  %v12220_v3 = vld [vmem:[#allocation11 + $0xc8] ss:$24 sps:$4 sm:$0xff]   ;;  %7596 = vmatpush1.bf16.msra.mxu0 %v12217_v48 }
 0xab7   :  { %6881 = vmatpush1.bf16.msra.mxu1 %v15287_v30  ;;  %v12225_v30 = vld [vmem:[#allocation11 + $0xf4] ss:$24 sps:$4 sm:$0xff]  }
 0xab8   :  { %6882 = vmatprep.subr.bf16.mxu1 %v15290_v22  ;;  %v12228_v22 = vld [vmem:[#allocation11 + $0xfc] ss:$24 sps:$4 sm:$0xff]   ;;  %7597 = vmatprep.subr.bf16.mxu0 %v12225_v30 }
 0xabb   :  { %6883 = vmatpush1.bf16.msra.mxu1 %v15293_v44  ;;  %v12223_v44 = vld [vmem:[#allocation11 + $0xf0] ss:$24 sps:$4 sm:$0xff]  }
 0xabc   :  { %6884 = vmatprep.subr.bf16.mxu1 %v15296_v11  ;;  %v12226_v11 = vld [vmem:[#allocation11 + $0xf8] ss:$24 sps:$4 sm:$0xff]   ;;  %7598 = vmatpush1.bf16.msra.mxu0 %v12223_v44 }
 0xabf   :  { %6885 = vmatpush1.bf16.msra.mxu1 %v15299_v61  ;;  %v12231_v61 = vld [vmem:[#allocation11 + $0x124] ss:$24 sps:$4 sm:$0xff]  }
 0xac0   :  { %6886 = vmatprep.subr.bf16.mxu1 %v15302_v58  ;;  %v12234_v58 = vld [vmem:[#allocation11 + $0x12c] ss:$24 sps:$4 sm:$0xff]   ;;  %7599 = vmatprep.subr.bf16.mxu0 %v12231_v61 }
 0xac1   :  { %v17859_v61 = vld [vmem:[#allocation20_spill] sm:$0xff] }
 0xac3   :  { %6887 = vmatpush1.bf16.msra.mxu1 %v15305_v10  ;;  %v12229_v10 = vld [vmem:[#allocation11 + $0x120] ss:$24 sps:$4 sm:$0xff]  }
 0xac4   :  { %6888 = vmatprep.subr.bf16.mxu1 %v15308_v19  ;;  %v12232_v19 = vld [vmem:[#allocation11 + $0x128] ss:$24 sps:$4 sm:$0xff]   ;;  %7600 = vmatpush1.bf16.msra.mxu0 %v12229_v10 }
 0xac7   :  { %6889 = vmatpush1.bf16.msra.mxu1 %v15311_v17  ;;  %v12237_v17 = vld [vmem:[#allocation11 + $0x154] ss:$24 sps:$4 sm:$0xff]  }
 0xac8   :  { %6890 = vmatprep.subr.bf16.mxu1 %v15314_v1  ;;  %v12240_v1 = vld [vmem:[#allocation11 + $0x15c] ss:$24 sps:$4 sm:$0xff]   ;;  %7601 = vmatprep.subr.bf16.mxu0 %v12237_v17 }
 0xac9   :  { %v17860_v17 = vld [vmem:[#allocation21_spill] sm:$0xff] }
 0xacb   :  { %6891 = vmatpush1.bf16.msra.mxu1 %v15317_v57  ;;  %v12235_v57 = vld [vmem:[#allocation11 + $0x150] ss:$24 sps:$4 sm:$0xff]  }
 0xacc   :  { %6892 = vmatprep.subr.bf16.mxu1 %v15320_v2  ;;  %v12238_v2 = vld [vmem:[#allocation11 + $0x158] ss:$24 sps:$4 sm:$0xff]   ;;  %7602 = vmatpush1.bf16.msra.mxu0 %v12235_v57 }
 0xacd   :  { %v17861_v57 = vld [vmem:[#allocation45_spill] sm:$0xff] }
 0xacf   :  { %6893 = vmatpush1.bf16.msra.mxu1 %v15323_v63  ;;  %v12243_v63 = vld [vmem:[#allocation11 + $0x184] ss:$24 sps:$4 sm:$0xff]  }
 0xad0   :  { %7660 = vmatprep.subr.bf16.mxu1 %v12198_v39  ;;  %7603 = vmatprep.subr.bf16.mxu0 %v12243_v63  ;;  %v12271_v39 = vld [vmem:[#allocation11 + $0x270] ss:$24 sps:$4 sm:$0xff]  }
 0xad1   :  { %7604 = vmatpush1.bf16.msra.mxu0 %v12241_v12 }
 0xad2   :  { %6895 = vmatmul.mubr.bf16.vlgmr.msra.gmra.mrb[76].mxu1 %v6202_v24  ;;  %7605 = vmatprep.subr.bf16.mxu0 %v12249_v21  ;;  %v12265_v24 = vld [vmem:[#allocation11 + $0x240] ss:$24 sps:$4 sm:$0xff]  }
 0xad3   :  { %7661 = vmatpush1.bf16.msra.mxu1 %v12196_v50  ;;  %v12276_v50 = vld [vmem:[#allocation11 + $0x27c] ss:$24 sps:$4 sm:$0xff]  }
 0xad4   :  { %7662 = vmatprep.subr.bf16.mxu1 %v12204_v46  ;;  %v12279_v46 = vld [vmem:[#allocation11 + $0x2a4] ss:$24 sps:$4 sm:$0xff]  }
 0xad5   :  { %7606 = vmatpush1.bf16.msra.mxu0 %v12247_v54 }
 0xad6   :  { %7607 = vmatprep.subr.bf16.mxu0 %v12255_v36 }
 0xad7   :  { %7663 = vmatpush1.bf16.msra.mxu1 %v12202_v5  ;;  %v12277_v5 = vld [vmem:[#allocation11 + $0x2a0] ss:$24 sps:$4 sm:$0xff]  }
 0xad8   :  { %7664 = vmatprep.subr.bf16.mxu1 %v12210_v29  ;;  %v12285_v29 = vld [vmem:[#allocation11 + $0x2d4] ss:$24 sps:$4 sm:$0xff]  }
 0xad9   :  { %7608 = vmatpush1.bf16.msra.mxu0 %v12253_v14 }
 0xada   :  { %7609 = vmatprep.subr.bf16.mxu0 %v12261_v6 }
 0xadb   :  { %7665 = vmatpush1.bf16.msra.mxu1 %v12208_v25  ;;  %v12283_v25 = vld [vmem:[#allocation11 + $0x2d0] ss:$24 sps:$4 sm:$0xff]  }
 0xadc   :  { %7666 = vmatprep.subr.bf16.mxu1 %v12216_v28  ;;  %v12291_v28 = vld [vmem:[#allocation11 + $0x14] ss:$24 sps:$4 sm:$0xff]  }
 0xadd   :  { %7610 = vmatpush1.bf16.msra.mxu0 %v12259_v16 }
 0xade   :  { %7611 = vmatprep.subr.bf16.mxu0 %v12267_v56 }
 0xadf   :  { %7667 = vmatpush1.bf16.msra.mxu1 %v12214_v4 }
 0xae0   :  { %7668 = vmatprep.subr.bf16.mxu1 %v12222_v38 }
 0xae1   :  { %7612 = vmatpush1.bf16.msra.mxu0 %v12265_v24 }
 0xae2   :  { %7613 = vmatprep.subr.bf16.mxu0 %v12273_v35 }
 0xae3   :  { %7669 = vmatpush1.bf16.msra.mxu1 %v12220_v3 }
 0xae4   :  { %7670 = vmatprep.subr.bf16.mxu1 %v12228_v22 }
 0xae5   :  { %7614 = vmatpush1.bf16.msra.mxu0 %v12271_v39 }
 0xae6   :  { %7615 = vmatprep.subr.bf16.mxu0 %v12279_v46 }
 0xae7   :  { %7671 = vmatpush1.bf16.msra.mxu1 %v12226_v11 }
 0xae8   :  { %7672 = vmatprep.subr.bf16.mxu1 %v12234_v58 }
 0xae9   :  { %7616 = vmatpush1.bf16.msra.mxu0 %v12277_v5  ;;  %v17865_v5 = vld [vmem:[#allocation23_spill] sm:$0xff] }
 0xaea   :  { %7617 = vmatprep.subr.bf16.mxu0 %v12285_v29 }
 0xaeb   :  { %7673 = vmatpush1.bf16.msra.mxu1 %v12232_v19 }
 0xaec   :  { %7674 = vmatprep.subr.bf16.mxu1 %v12240_v1 }
 0xaed   :  { %7618 = vmatpush1.bf16.msra.mxu0 %v12283_v25 }
 0xaee   :  { %7733 = vmatprep.subr.bf16.mxu0 %v12291_v28 }
 0xaef   :  { %7675 = vmatpush1.bf16.msra.mxu1 %v12238_v2 }
 0xaf0   :  { %7676 = vmatprep.subr.bf16.mxu1 %v12246_v49 }
 0xaf3   :  { %7677 = vmatpush1.bf16.msra.mxu1 %v12244_v42 }
 0xaf4   :  { %7678 = vmatprep.subr.bf16.mxu1 %v12252_v37  ;;  %v17862_v37 = vld [vmem:[#allocation68_spill] sm:$0xff] }
 0xaf7   :  { %7679 = vmatpush1.bf16.msra.mxu1 %v12250_v18 }
 0xaf8   :  { %7680 = vmatprep.subr.bf16.mxu1 %v12258_v8 }
 0xafb   :  { %7681 = vmatpush1.bf16.msra.mxu1 %v12256_v60 }
 0xafc   :  { %7682 = vmatprep.subr.bf16.mxu1 %v12264_v13 }
 0xaff   :  { %7683 = vmatpush1.bf16.msra.mxu1 %v12262_v15 }
 0xb00   :  { %7684 = vmatprep.subr.bf16.mxu1 %v12270_v20 }
 0xb03   :  { %7685 = vmatpush1.bf16.msra.mxu1 %v12268_v55 }
 0xb04   :  { %7686 = vmatprep.subr.bf16.mxu1 %v12276_v50  ;;  %v17864_v50 = vld [vmem:[#allocation22_spill] sm:$0xff] }
 0xb07   :  { %7687 = vmatpush1.bf16.msra.mxu1 %v12274_v62 }
 0xb08   :  { %7688 = vmatprep.subr.bf16.mxu1 %v12282_v33 }
 0xb0b   :  { %7689 = vmatpush1.bf16.msra.mxu1 %v12280_v27 }
 0xb0c   :  { %7690 = vmatprep.subr.bf16.mxu1 %v12288_v43 }
 0xb0f   :  { %7691 = vmatpush1.bf16.msra.mxu1 %v12286_v40 }
 0xb10   :  { %8462 = vmatprep.subr.bf16.mxu1 %v15440_v26 }
 0xb65   :  { %v6814_v4 = vpop.f32.mrb[72].mxu1  ;;  %v6855_v34 = vpop.f32.mrb[68].mxu0 }
 0xb66   :  { %v6815_v38 = vadd.f32 %v6814_v4, %v17849_v9  ;;  %v6816_v48 = vpop.f32.mrb[73].mxu1  ;;  %v6857_v3 = vpop.f32.mrb[69].mxu0 }
 0xb67   :  { %v6817_v30 = vadd.f32 %v6816_v48, %v13968_v32  ;;  %v6858_v22 = vadd.f32 %v6857_v3, %v17850_v0  ;;  %v6818_v44 = vpop.f32.mrb[74].mxu1  ;;  %v6859_v11 = vpop.f32.mrb[70].mxu0  ;;  %v6856_v0 = vadd.f32 %v6855_v34, %v13977_v45  ;;  %v12289_v34 = vld [vmem:[#allocation11 + $0x10] ss:$24 sps:$4 sm:$0xff]   ;;  %v17869_v3 = vld [vmem:[#allocation79_spill] sm:$0xff] }
 0xb68   :  { %v6909_v58 = vadd.f32 %v6815_v38, %v17859_v61  ;;  %v6819_v10 = vpop.f32.mrb[75].mxu1  ;;  %v6860_v19 = vpop.f32.mrb[71].mxu0  ;;  %v15465_v38 = vld [vmem:[#allocation12] ss:$24 sps:$4 sm:$0xff]   ;;  %v15485_v44 = vld [vmem:[#allocation12 + $0x34] ss:$24 sps:$4 sm:$0xff]  }
 0xb69   :  { %v6910_v1 = vadd.f32 %v6817_v30, %v17860_v17  ;;  %v6929_v2 = vadd.f32 %v6858_v22, %v17861_v57  ;;  %v17870_v30 = vld [vmem:[#allocation98_spill] sm:$0xff]  ;;  %v15506_v19 = vld [vmem:[#allocation12 + $0x30] ss:$24 sps:$4 sm:$0xff]   ;;  %v15701_v48 = vld [vmem:[#allocation12 + $0x74] ss:$24 sps:$4 sm:$0xff]  }
 0xb6a   :  { %v11088_v63 = vmul.f32 -1.442695, %v6909_v58  ;;  %v15477_v22 = vpack.c.bf16 %v17870_v30, %v17869_v3  ;;  %v17871_v11 = vld [vmem:[#allocation62_spill] sm:$0xff]  ;;  %v15630_v3 = vld [vmem:[#allocation12 + $0x1b0] ss:$24 sps:$4 sm:$0xff]   ;;  %17899 = vst [vmem:[#allocation50_spill] sm:$0xff] %v15701_v48 }
 0xb6b   :  { %v11089_v49 = vmul.f32 -1.442695, %v6910_v1  ;;  %v11090_v36 = vmul.f32 -1.442695, %v6929_v2  ;;  %v15495_v61 = vpack.c.bf16 %v17871_v11, %v15197_v23  ;;  %v12295_v10 = vld [vmem:[#allocation11 + $0x40] ss:$24 sps:$4 sm:$0xff]  }
 0xb6c   :  { %12653 = vpow2.f32 %v11088_v63  ;;  %v12303_v23 = vld [vmem:[#allocation11 + $0x74] ss:$24 sps:$4 sm:$0xff]   ;;  %v15514_v17 = vld [vmem:[#allocation12 + $0x64] ss:$24 sps:$4 sm:$0xff]   ;;  %v12301_v1 = vld [vmem:[#allocation11 + $0x70] ss:$24 sps:$4 sm:$0xff]  }
 0xb6d   :  { %12655 = vpow2.f32 %v11089_v49  ;;  %v15518_v57 = vld [vmem:[#allocation12 + $0x60] ss:$24 sps:$4 sm:$0xff]   ;;  %v17874_v2 = vld [vmem:[#allocation28_spill] sm:$0xff]  ;;  %v17875_v63 = vld [vmem:[#allocation97_spill] sm:$0xff] }
 0xb6e   :  { %v15523_v49 = vpack.c.bf16 %v17875_v63, %v17874_v2  ;;  %v12351_v30 = vld [vmem:[#allocation11 + $0x1f4] ss:$24 sps:$4 sm:$0xff]   ;;  %v12349_v11 = vld [vmem:[#allocation11 + $0x1f0] ss:$24 sps:$4 sm:$0xff]   ;;  %v12355_v2 = vld [vmem:[#allocation11 + $0x220] ss:$24 sps:$4 sm:$0xff]  }
 0xb6f   :  { %v15642_v63 = vld [vmem:[#allocation12 + $0x210] ss:$24 sps:$4 sm:$0xff]   ;;  %v15732_v58 = vld [vmem:[#allocation12 + $0xd4] ss:$24 sps:$4 sm:$0xff]  }
 0xb70   :  { %17907 = vst [vmem:[#allocation90_spill] sm:$0xff] %v15732_v58 }
 0xb76   :  { %v12654_v9 = vpop.eup %12653 }
 0xb77   :  { %v6917_v12 = vadd.f32 1.0, %v12654_v9  ;;  %v12656_v32 = vpop.eup %12655  ;;  %v12309_v9 = vld [vmem:[#allocation11 + $0xa4] ss:$24 sps:$4 sm:$0xff]  }
 0xb78   :  { %v6918_v18 = vadd.f32 1.0, %v12656_v32  ;;  %v17876_v32 = vld [vmem:[#allocation47_spill] sm:$0xff] }
 0xb79   :  { %12657 = vrcp.f32 %v6917_v12  ;;  %v15525_v12 = vld [vmem:[#allocation12 + $0x94] ss:$24 sps:$4 sm:$0xff]  }
 0xb83   :  { %v12658_v42 = vpop.eup %12657 }
 0xb84   :  { %v6923_v21 = vmul.f32 %v12658_v42, %v6856_v0  ;;  %v17877_v0 = vld [vmem:[#allocation29_spill] sm:$0xff] }
 0xb85   :  { %v15535_v42 = vpack.c.bf16 %v17877_v0, %v17876_v32  ;;  %v15645_v32 = vld [vmem:[#allocation12 + $0x244] ss:$24 sps:$4 sm:$0xff]   ;;  %v12361_v0 = vld [vmem:[#allocation11 + $0x250] ss:$24 sps:$4 sm:$0xff]  }
 0xb86   :  { %v6924_v54 = vadd.f32 %v6923_v21, %v17862_v37  ;;  %v12307_v37 = vld [vmem:[#allocation11 + $0xa0] ss:$24 sps:$4 sm:$0xff]   ;;  %v15762_v21 = vld [vmem:[#allocation12 + $0x134] ss:$24 sps:$4 sm:$0xff]  }
 0xb87   :  { %17915 = vst [vmem:[#allocation75_spill] sm:$0xff] %v15762_v21 }
 0xb88   :  { %12659 = vtanh.f32 %v6924_v54  ;;  %v15546_v54 = vld [vmem:[#allocation12 + $0x90] ss:$24 sps:$4 sm:$0xff]  }
 0xb89   :  { %12661 = vrcp.f32 %v6918_v18  ;;  %v12315_v18 = vld [vmem:[#allocation11 + $0xd4] ss:$24 sps:$4 sm:$0xff]  }
 0xb8a   :  { %12663 = vpow2.f32 %v11090_v36  ;;  %v15554_v36 = vld [vmem:[#allocation12 + $0xc4] ss:$24 sps:$4 sm:$0xff]  }
 0xb92   :  { %v12660_v8 = vpop.eup %12659 }
 0xb93   :  { %v6926_v14 = vsub.f32 %v15397_v52, %v12660_v8  ;;  %v12662_v60 = vpop.eup %12661  ;;  %v15753_v52 = vld [vmem:[#allocation12 + $0xf8] ss:$24 sps:$4 sm:$0xff]  }
 0xb94   :  { %v12664_v13 = vpop.eup %12663  ;;  %17912 = vst [vmem:[#allocation36_spill] sm:$0xff] %v15753_v52 }
 0xb95   :  { %v6927_v6 = vmul.f32 %v12662_v60, %v6926_v14  ;;  %v6937_v15 = vadd.f32 1.0, %v12664_v13  ;;  %v15558_v14 = vld [vmem:[#allocation12 + $0xc0] ss:$24 sps:$4 sm:$0xff]   ;;  %v17880_v60 = vld [vmem:[#allocation49_spill] sm:$0xff]  ;;  %v12321_v13 = vld [vmem:[#allocation11 + $0x104] ss:$24 sps:$4 sm:$0xff]  }
 0xb97   :  { %v15452_v16 = vadd.f32 %v12660_v8, %v6927_v6  ;;  %12665 = vrcp.f32 %v6937_v15  ;;  %v12313_v8 = vld [vmem:[#allocation11 + $0xd0] ss:$24 sps:$4 sm:$0xff]   ;;  %v15563_v6 = vpack.c.bf16 %v15190_v59, %v17880_v60  ;;  %v15565_v15 = vld [vmem:[#allocation12 + $0xf4] ss:$24 sps:$4 sm:$0xff]   ;;  %v12367_v60 = vld [vmem:[#allocation11 + $0x280] ss:$24 sps:$4 sm:$0xff]  }
 0xb98   :  { %v15793_v59 = vld [vmem:[#allocation12 + $0x188] ss:$24 sps:$4 sm:$0xff]  }
 0xb99   :  { %17863 = vst [vmem:[#allocation27_spill] sm:$0xff] %v15452_v16  ;;  %17924 = vst [vmem:[#allocation85_spill] sm:$0xff] %v15793_v59 }
 0xba1   :  { %v12666_v35 = vpop.eup %12665 }
 0xba5   :  { %v6896_v45 = vpop.f32.mrb[76].mxu1 }
 0xba6   :  { %v6897_v56 = vadd.f32 %v6896_v45, %v13991_v47  ;;  %v6898_v20 = vpop.f32.mrb[77].mxu1  ;;  %v17881_v45 = vld [vmem:[#allocation99_spill] sm:$0xff] }
 0xba7   :  { %v6899_v24 = vadd.f32 %v6898_v20, %v13994_v51  ;;  %v6900_v55 = vpop.f32.mrb[78].mxu1 }
 0xba8   :  { %v6930_v39 = vadd.f32 %v6897_v56, %v17864_v50  ;;  %v6901_v62 = vpop.f32.mrb[79].mxu1  ;;  %v17882_v56 = vld [vmem:[#allocation81_spill] sm:$0xff]  ;;  %v15594_v50 = vld [vmem:[#allocation12 + $0x124] ss:$24 sps:$4 sm:$0xff]  }
 0xba9   :  { %v6943_v46 = vmul.f32 %v12666_v35, %v6899_v24  ;;  %v15575_v20 = vpack.c.bf16 %v17882_v56, %v17881_v45  ;;  %v12319_v24 = vld [vmem:[#allocation11 + $0x100] ss:$24 sps:$4 sm:$0xff]   ;;  %v15586_v55 = vld [vmem:[#allocation12 + $0xf0] ss:$24 sps:$4 sm:$0xff]   ;;  %v12327_v35 = vld [vmem:[#allocation11 + $0x134] ss:$24 sps:$4 sm:$0xff]  }
 0xbaa   :  { %v11091_v33 = vmul.f32 -1.442695, %v6930_v39  ;;  %v12325_v39 = vld [vmem:[#allocation11 + $0x130] ss:$24 sps:$4 sm:$0xff]   ;;  %v15598_v62 = vld [vmem:[#allocation12 + $0x120] ss:$24 sps:$4 sm:$0xff]  }
 0xbab   :  { %v6944_v27 = vadd.f32 %v6943_v46, %v17865_v5  ;;  %v15603_v46 = vpack.c.bf16 %v15452_v16, %v15384_v41  ;;  %v15605_v5 = vld [vmem:[#allocation12 + $0x154] ss:$24 sps:$4 sm:$0xff]   ;;  %v15657_v56 = vld [vmem:[#allocation12 + $0x2a4] ss:$24 sps:$4 sm:$0xff]  }
 0xbac   :  { %12667 = vpow2.f32 %v11091_v33  ;;  %v12333_v33 = vld [vmem:[#allocation11 + $0x164] ss:$24 sps:$4 sm:$0xff]   ;;  %v12339_v41 = vld [vmem:[#allocation11 + $0x194] ss:$24 sps:$4 sm:$0xff]   ;;  %17887 = vst [vmem:[#allocation38_spill] sm:$0xff] %v15657_v56 }
 0xbad   :  { %12669 = vtanh.f32 %v6944_v27  ;;  %v12331_v27 = vld [vmem:[#allocation11 + $0x160] ss:$24 sps:$4 sm:$0xff]   ;;  %v12375_v45 = vld [vmem:[#allocation11 + $0x2b4] ss:$24 sps:$4 sm:$0xff]   ;;  %v15744_v16 = vld [vmem:[#allocation12 + $0x104] ss:$24 sps:$4 sm:$0xff]  }
 0xbae   :  { %17911 = vst [vmem:[#allocation32_spill] sm:$0xff] %v15744_v16 }
 0xbb6   :  { %v12668_v29 = vpop.eup %12667 }
 0xbb7   :  { %v6938_v43 = vadd.f32 1.0, %v12668_v29  ;;  %v12670_v25 = vpop.eup %12669  ;;  %v15614_v29 = vld [vmem:[#allocation12 + $0x150] ss:$24 sps:$4 sm:$0xff]  }
 0xbb8   :  { %v6946_v47 = vsub.f32 %v15403_v7, %v12670_v25  ;;  %v15759_v7 = vld [vmem:[#allocation12 + $0x12c] ss:$24 sps:$4 sm:$0xff]  }
 0xbb9   :  { %12671 = vrcp.f32 %v6938_v43  ;;  %v15619_v43 = vld [vmem:[#allocation12 + $0x184] ss:$24 sps:$4 sm:$0xff]   ;;  %17914 = vst [vmem:[#allocation48_spill] sm:$0xff] %v15759_v7 }
 0xbc3   :  { %v12672_v40 = vpop.eup %12671 }
 0xbc4   :  { %v6947_v28 = vmul.f32 %v12672_v40, %v6946_v47  ;;  %v12337_v47 = vld [vmem:[#allocation11 + $0x190] ss:$24 sps:$4 sm:$0xff]   ;;  %v15624_v40 = vld [vmem:[#allocation12 + $0x180] ss:$24 sps:$4 sm:$0xff]  }
 0xbc6   :  { %v15459_v51 = vadd.f32 %v12670_v25, %v6947_v28  ;;  %v17885_v25 = vmov 0.0|0.0   ;;  %v12345_v28 = vld [vmem:[#allocation11 + $0x1c4] ss:$24 sps:$4 sm:$0xff]  }
 0xbc8   :  { %17866 = vst [vmem:[#allocation31_spill] sm:$0xff] %v15459_v51  ;;  %v15463_v4 = vpack.c.bf16 %v15391_v53, %v15459_v51  ;;  %v12297_v53 = vld [vmem:[#allocation11 + $0x44] ss:$24 sps:$4 sm:$0xff]   ;;  %v15757_v51 = vld [vmem:[#allocation12 + $0x100] ss:$24 sps:$4 sm:$0xff]  }
 0xbc9   :  { %17913 = vst [vmem:[#allocation40_spill] sm:$0xff] %v15757_v51 }
 0xbca   :  { %11369 = vmatprep.mubr.msk.bf16.mxu0 %vm15471_vm6, %v15463_v4  ;;  %11393 = vmatprep.mubr.msk.bf16.mxu1 %vm15471_vm6, %v15463_v4 }
 0xbcb   :  { %11372 = vmatmul.mubr.msk.bf16.vlgmr.msra.gmra.mrb[72].mxu0 %vm15471_vm6, %v15477_v22  ;;  %11396 = vmatmul.mubr.msk.bf16.vlgmr.msra.gmra.mrb[80].mxu1 %vm15471_vm6, %v15477_v22 }
 0xbcc   :  { %7734 = vmatpush1.bf16.msra.mxu0 %v12289_v34  ;;  %8463 = vmatpush1.bf16.msra.mxu1 %v15465_v38  ;;  %v15627_v34 = vld [vmem:[#allocation12 + $0x1b4] ss:$24 sps:$4 sm:$0xff]  }
 0xbcd   :  { %11375 = vmatprep.mubr.msk.bf16.mxu0 %vm15502_vm7, %v15495_v61  ;;  %11399 = vmatprep.mubr.msk.bf16.mxu1 %vm15502_vm7, %v15495_v61 }
 0xbce   :  { %7735 = vmatprep.subr.bf16.mxu0 %v12297_v53  ;;  %8464 = vmatprep.subr.bf16.mxu1 %v15485_v44  ;;  %v15633_v53 = vld [vmem:[#allocation12 + $0x1e4] ss:$24 sps:$4 sm:$0xff]  }
 0xbd0   :  { %7736 = vmatpush1.bf16.msra.mxu0 %v12295_v10  ;;  %8465 = vmatpush1.bf16.msra.mxu1 %v15506_v19  ;;  %v15636_v10 = vld [vmem:[#allocation12 + $0x1e0] ss:$24 sps:$4 sm:$0xff]  }
 0xbd1   :  { %7737 = vmatprep.subr.bf16.mxu0 %v12303_v23  ;;  %8466 = vmatprep.subr.bf16.mxu1 %v15514_v17  ;;  %v12357_v23 = vld [vmem:[#allocation11 + $0x224] ss:$24 sps:$4 sm:$0xff]  }
 0xbd3   :  { %11378 = vmatmul.mubr.msk.bf16.gmra.mrb[76].mxu0 %vm15502_vm7, %v15523_v49  ;;  %11402 = vmatmul.mubr.msk.bf16.gmra.mrb[84].mxu1 %vm15502_vm7, %v15523_v49 }
 0xbd4   :  { %7738 = vmatpush1.bf16.msra.mxu0 %v12301_v1  ;;  %8467 = vmatpush1.bf16.msra.mxu1 %v15518_v57  ;;  %v15639_v1 = vld [vmem:[#allocation12 + $0x214] ss:$24 sps:$4 sm:$0xff]  }
 0xbd5   :  { %11381 = vmatprep.mubr.msk.bf16.mxu0 %vm15542_vm8, %v15535_v42  ;;  %11405 = vmatprep.mubr.msk.bf16.mxu1 %vm15542_vm8, %v15535_v42 }
 0xbd6   :  { %7739 = vmatprep.subr.bf16.mxu0 %v12309_v9  ;;  %8468 = vmatprep.subr.bf16.mxu1 %v15525_v12  ;;  %v12363_v9 = vld [vmem:[#allocation11 + $0x254] ss:$24 sps:$4 sm:$0xff]  }
 0xbd8   :  { %7740 = vmatpush1.bf16.msra.mxu0 %v12307_v37  ;;  %8469 = vmatpush1.bf16.msra.mxu1 %v15546_v54  ;;  %v15648_v37 = vld [vmem:[#allocation12 + $0x240] ss:$24 sps:$4 sm:$0xff]  }
 0xbd9   :  { %7741 = vmatprep.subr.bf16.mxu0 %v12315_v18  ;;  %8470 = vmatprep.subr.bf16.mxu1 %v15554_v36  ;;  %v12369_v18 = vld [vmem:[#allocation11 + $0x284] ss:$24 sps:$4 sm:$0xff]  }
 0xbdb   :  { %11384 = vmatmul.mubr.msk.bf16.gmra.mrb[80].mxu0 %vm15542_vm8, %v15563_v6  ;;  %11408 = vmatmul.mubr.msk.bf16.gmra.mrb[88].mxu1 %vm15542_vm8, %v15563_v6 }
 0xbdc   :  { %7742 = vmatpush1.bf16.msra.mxu0 %v12313_v8  ;;  %8471 = vmatpush1.bf16.msra.mxu1 %v15558_v14  ;;  %v15651_v8 = vld [vmem:[#allocation12 + $0x274] ss:$24 sps:$4 sm:$0xff]  }
 0xbdd   :  { %11387 = vmatprep.mubr.msk.bf16.mxu0 %vm15582_vm9, %v15575_v20  ;;  %11411 = vmatprep.mubr.msk.bf16.mxu1 %vm15582_vm9, %v15575_v20 }
 0xbde   :  { %7743 = vmatprep.subr.bf16.mxu0 %v12321_v13  ;;  %8472 = vmatprep.subr.bf16.mxu1 %v15565_v15  ;;  %v15654_v13 = vld [vmem:[#allocation12 + $0x270] ss:$24 sps:$4 sm:$0xff]  }
 0xbdf   :  { %17886 = vst [vmem:[#allocation35_spill] sm:$0xff] %v15654_v13 }
 0xbe0   :  { %7744 = vmatpush1.bf16.msra.mxu0 %v12319_v24  ;;  %8473 = vmatpush1.bf16.msra.mxu1 %v15586_v55  ;;  %v12373_v24 = vld [vmem:[#allocation11 + $0x2b0] ss:$24 sps:$4 sm:$0xff]  }
 0xbe1   :  { %7745 = vmatprep.subr.bf16.mxu0 %v12327_v35  ;;  %8474 = vmatprep.subr.bf16.mxu1 %v15594_v50  ;;  %v15660_v35 = vld [vmem:[#allocation12 + $0x2a0] ss:$24 sps:$4 sm:$0xff]  }
 0xbe2   :  { %17888 = vst [vmem:[#allocation87_spill] sm:$0xff] %v15660_v35 }
 0xbe3   :  { %11390 = vmatmul.mubr.msk.bf16.gmra.mrb[84].mxu0 %vm15582_vm9, %v15603_v46  ;;  %11414 = vmatmul.mubr.msk.bf16.gmra.mrb[92].mxu1 %vm15582_vm9, %v15603_v46 }
 0xbe4   :  { %7746 = vmatpush1.bf16.msra.mxu0 %v12325_v39  ;;  %8475 = vmatpush1.bf16.msra.mxu1 %v15598_v62  ;;  %v12381_v39 = vld [vmem:[#allocation11 + $0x2e4] ss:$24 sps:$4 sm:$0xff]  }
 0xbe5   :  { %11417 = vmatprep.mubr.msk.bf16.mxu0 %vm15471_vm6, %v15463_v4  ;;  %7747 = vmatprep.subr.bf16.mxu0 %v12333_v33  ;;  %v12343_v4 = vld [vmem:[#allocation11 + $0x1c0] ss:$24 sps:$4 sm:$0xff]   ;;  %v15663_v33 = vld [vmem:[#allocation12 + $0x2d4] ss:$24 sps:$4 sm:$0xff]  }
 0xbe6   :  { %8476 = vmatprep.subr.bf16.mxu1 %v15605_v5  ;;  %8494 = vmatprep.mubr.bf16.mxu1 %v17885_v25  ;;  %17889 = vst [vmem:[#allocation91_spill] sm:$0xff] %v15663_v33 }
 0xbe8   :  { %7748 = vmatpush1.bf16.msra.mxu0 %v12331_v27  ;;  %8477 = vmatpush1.bf16.msra.mxu1 %v15614_v29  ;;  %v12379_v27 = vld [vmem:[#allocation11 + $0x2e0] ss:$24 sps:$4 sm:$0xff]  }
 0xbe9   :  { %7749 = vmatprep.subr.bf16.mxu0 %v12339_v41  ;;  %8478 = vmatprep.subr.bf16.mxu1 %v15619_v43  ;;  %v15666_v41 = vld [vmem:[#allocation12 + $0x2d0] ss:$24 sps:$4 sm:$0xff]  }
 0xbea   :  { %17890 = vst [vmem:[#allocation95_spill] sm:$0xff] %v15666_v41 }
 0xbec   :  { %7750 = vmatpush1.bf16.msra.mxu0 %v12337_v47  ;;  %8479 = vmatpush1.bf16.msra.mxu1 %v15624_v40  ;;  %v15669_v47 = vld [vmem:[#allocation12 + $0xc] ss:$24 sps:$4 sm:$0xff]  }
 0xbed   :  { %7751 = vmatprep.subr.bf16.mxu0 %v12345_v28  ;;  %8480 = vmatprep.subr.bf16.mxu1 %v15627_v34  ;;  %v15671_v28 = vld [vmem:[#allocation12 + $0x14] ss:$24 sps:$4 sm:$0xff]  }
 0xbee   :  { %17891 = vst [vmem:[#allocation55_spill] sm:$0xff] %v15671_v28 }
 0xbf0   :  { %7752 = vmatpush1.bf16.msra.mxu0 %v12343_v4  ;;  %8481 = vmatpush1.bf16.msra.mxu1 %v15630_v3  ;;  %v15674_v4 = vld [vmem:[#allocation12 + $0x8] ss:$24 sps:$4 sm:$0xff]  }
 0xbf1   :  { %7753 = vmatprep.subr.bf16.mxu0 %v12351_v30  ;;  %8482 = vmatprep.subr.bf16.mxu1 %v15633_v53  ;;  %17892 = vst [vmem:[#allocation57_spill] sm:$0xff] %v15674_v4  ;;  %v15678_v30 = vld [vmem:[#allocation12 + $0x10] ss:$24 sps:$4 sm:$0xff]  }
 0xbf2   :  { %17893 = vst [vmem:[#allocation54_spill] sm:$0xff] %v15678_v30 }
 0xbf4   :  { %7754 = vmatpush1.bf16.msra.mxu0 %v12349_v11  ;;  %8483 = vmatpush1.bf16.msra.mxu1 %v15636_v10  ;;  %v15680_v11 = vld [vmem:[#allocation12 + $0x3c] ss:$24 sps:$4 sm:$0xff]  }
 0xbf5   :  { %7755 = vmatprep.subr.bf16.mxu0 %v12357_v23  ;;  %8484 = vmatprep.subr.bf16.mxu1 %v15639_v1  ;;  %17894 = vst [vmem:[#allocation56_spill] sm:$0xff] %v15680_v11  ;;  %v15682_v23 = vld [vmem:[#allocation12 + $0x44] ss:$24 sps:$4 sm:$0xff]  }
 0xbf6   :  { %17895 = vst [vmem:[#allocation71_spill] sm:$0xff] %v15682_v23 }
 0xbf8   :  { %7756 = vmatpush1.bf16.msra.mxu0 %v12355_v2  ;;  %8485 = vmatpush1.bf16.msra.mxu1 %v15642_v63  ;;  %v15692_v2 = vld [vmem:[#allocation12 + $0x38] ss:$24 sps:$4 sm:$0xff]  }
 0xbf9   :  { %7757 = vmatprep.subr.bf16.mxu0 %v12363_v9  ;;  %8486 = vmatprep.subr.bf16.mxu1 %v15645_v32  ;;  %17896 = vst [vmem:[#allocation72_spill] sm:$0xff] %v15692_v2  ;;  %v15696_v9 = vld [vmem:[#allocation12 + $0x40] ss:$24 sps:$4 sm:$0xff]  }
 0xbfa   :  { %17897 = vst [vmem:[#allocation59_spill] sm:$0xff] %v15696_v9 }
 0xbfc   :  { %7758 = vmatpush1.bf16.msra.mxu0 %v12361_v0  ;;  %8487 = vmatpush1.bf16.msra.mxu1 %v15648_v37  ;;  %v15698_v0 = vld [vmem:[#allocation12 + $0x6c] ss:$24 sps:$4 sm:$0xff]  }
 0xbfd   :  { %7759 = vmatprep.subr.bf16.mxu0 %v12369_v18  ;;  %8488 = vmatprep.subr.bf16.mxu1 %v15651_v8  ;;  %17898 = vst [vmem:[#allocation61_spill] sm:$0xff] %v15698_v0  ;;  %v15711_v18 = vld [vmem:[#allocation12 + $0x9c] ss:$24 sps:$4 sm:$0xff]  }
 0xbfe   :  { %17902 = vst [vmem:[#allocation70_spill] sm:$0xff] %v15711_v18 }
 0xc00   :  { %7760 = vmatpush1.bf16.msra.mxu0 %v12367_v60  ;;  %8489 = vmatpush1.bf16.msra.mxu1 %v15654_v13  ;;  %v15714_v60 = vld [vmem:[#allocation12 + $0xa4] ss:$24 sps:$4 sm:$0xff]  }
 0xc01   :  { %7761 = vmatprep.subr.bf16.mxu0 %v12375_v45  ;;  %8490 = vmatprep.subr.bf16.mxu1 %v15657_v56  ;;  %17903 = vst [vmem:[#allocation53_spill] sm:$0xff] %v15714_v60  ;;  %v15723_v45 = vld [vmem:[#allocation12 + $0x98] ss:$24 sps:$4 sm:$0xff]   ;;  %v15874_v13 = vld [vmem:[#allocation12 + $0x2e4] ss:$24 sps:$4 sm:$0xff]  }
 0xc02   :  { %17904 = vst [vmem:[#allocation73_spill] sm:$0xff] %v15723_v45  ;;  %v15869_v56 = vld [vmem:[#allocation12 + $0x2b0] ss:$24 sps:$4 sm:$0xff]  }
 0xc04   :  { %7762 = vmatpush1.bf16.msra.mxu0 %v12373_v24  ;;  %8491 = vmatpush1.bf16.msra.mxu1 %v15660_v35  ;;  %v15727_v24 = vld [vmem:[#allocation12 + $0xa0] ss:$24 sps:$4 sm:$0xff]   ;;  %v15862_v35 = vld [vmem:[#allocation12 + $0x2b4] ss:$24 sps:$4 sm:$0xff]  }
 0xc05   :  { %7763 = vmatprep.subr.bf16.mxu0 %v12381_v39  ;;  %8492 = vmatprep.subr.bf16.mxu1 %v15663_v33  ;;  %17905 = vst [vmem:[#allocation74_spill] sm:$0xff] %v15727_v24  ;;  %v15729_v39 = vld [vmem:[#allocation12 + $0xcc] ss:$24 sps:$4 sm:$0xff]   ;;  %v15857_v33 = vld [vmem:[#allocation12 + $0x280] ss:$24 sps:$4 sm:$0xff]  }
 0xc06   :  { %17906 = vst [vmem:[#allocation26_spill] sm:$0xff] %v15729_v39 }
 0xc08   :  { %7764 = vmatpush1.bf16.msra.mxu0 %v12379_v27  ;;  %8493 = vmatpush1.bf16.msra.mxu1 %v15666_v41  ;;  %v15741_v27 = vld [vmem:[#allocation12 + $0xfc] ss:$24 sps:$4 sm:$0xff]  }
 0xc09   :  { %8503 = vmatprep.subr.bf16.mxu0 %v15669_v47  ;;  %8544 = vmatprep.subr.bf16.mxu1 %v15671_v28  ;;  %17910 = vst [vmem:[#allocation89_spill] sm:$0xff] %v15741_v27  ;;  %v15845_v28 = vld [vmem:[#allocation12 + $0x250] ss:$24 sps:$4 sm:$0xff]   ;;  %v15850_v41 = vld [vmem:[#allocation12 + $0x284] ss:$24 sps:$4 sm:$0xff]  }
 0xc0a   :  { %17941 = vst [vmem:[#allocation22_spill] sm:$0xff] %v15845_v28  ;;  %17943 = vst [vmem:[#allocation79_spill] sm:$0xff] %v15850_v41 }
 0xc0b   :  { %11420 = vmatmul.mubr.msk.bf16.vlgmr.msra.gmra.mrb[88].mxu0 %vm15471_vm6, %v15477_v22  ;;  %8495 = vmatmul.mubr.bf16.vlgmr.msra.gmra.mrb[96].mxu1 %v17885_v25  ;;  %v15705_v22 = vld [vmem:[#allocation12 + $0x68] ss:$24 sps:$4 sm:$0xff]  }
 0xc0c   :  { %11423 = vmatprep.mubr.msk.bf16.mxu0 %vm15502_vm7, %v15495_v61  ;;  %8504 = vmatpush1.bf16.msra.mxu0 %v15674_v4  ;;  %17900 = vst [vmem:[#allocation60_spill] sm:$0xff] %v15705_v22  ;;  %v15709_v61 = vld [vmem:[#allocation12 + $0x70] ss:$24 sps:$4 sm:$0xff]  }
 0xc0d   :  { %8545 = vmatpush1.bf16.msra.mxu1 %v15678_v30  ;;  %8505 = vmatprep.subr.bf16.mxu0 %v15680_v11  ;;  %17901 = vst [vmem:[#allocation69_spill] sm:$0xff] %v15709_v61  ;;  %v15838_v30 = vld [vmem:[#allocation12 + $0x254] ss:$24 sps:$4 sm:$0xff]  }
 0xc0e   :  { %8546 = vmatprep.subr.bf16.mxu1 %v15682_v23  ;;  %8576 = vmatprep.mubr.bf16.mxu1 %v17885_v25  ;;  %v15833_v23 = vld [vmem:[#allocation12 + $0x220] ss:$24 sps:$4 sm:$0xff]   ;;  %17939 = vst [vmem:[#allocation45_spill] sm:$0xff] %v15838_v30 }
 0xc0f   :  { %17937 = vst [vmem:[#allocation20_spill] sm:$0xff] %v15833_v23 }
 0xc10   :  { %8506 = vmatpush1.bf16.msra.mxu0 %v15692_v2 }
 0xc11   :  { %8547 = vmatpush1.bf16.msra.mxu1 %v15696_v9  ;;  %8507 = vmatprep.subr.bf16.mxu0 %v15698_v0  ;;  %v15826_v9 = vld [vmem:[#allocation12 + $0x224] ss:$24 sps:$4 sm:$0xff]  }
 0xc12   :  { %8548 = vmatprep.subr.bf16.mxu1 %v15701_v48  ;;  %v15821_v48 = vld [vmem:[#allocation12 + $0x1f0] ss:$24 sps:$4 sm:$0xff]   ;;  %17935 = vst [vmem:[#allocation24_spill] sm:$0xff] %v15826_v9 }
 0xc13   :  { %11426 = vmatmul.mubr.msk.bf16.gmra.mrb[92].mxu0 %vm15502_vm7, %v15523_v49  ;;  %v15735_v49 = vld [vmem:[#allocation12 + $0xc8] ss:$24 sps:$4 sm:$0xff]   ;;  %17933 = vst [vmem:[#allocation46_spill] sm:$0xff] %v15821_v48 }
 0xc14   :  { %11429 = vmatprep.mubr.msk.bf16.mxu0 %vm15542_vm8, %v15535_v42  ;;  %8508 = vmatpush1.bf16.msra.mxu0 %v15705_v22  ;;  %17908 = vst [vmem:[#allocation30_spill] sm:$0xff] %v15735_v49  ;;  %v15739_v42 = vld [vmem:[#allocation12 + $0xd0] ss:$24 sps:$4 sm:$0xff]  }
 0xc15   :  { %8549 = vmatpush1.bf16.msra.mxu1 %v15709_v61  ;;  %8509 = vmatprep.subr.bf16.mxu0 %v15711_v18  ;;  %17909 = vst [vmem:[#allocation39_spill] sm:$0xff] %v15739_v42  ;;  %v15814_v61 = vld [vmem:[#allocation12 + $0x1f4] ss:$24 sps:$4 sm:$0xff]  }
 0xc16   :  { %8550 = vmatprep.subr.bf16.mxu1 %v15714_v60  ;;  %v15809_v60 = vld [vmem:[#allocation12 + $0x1c0] ss:$24 sps:$4 sm:$0xff]   ;;  %17931 = vst [vmem:[#allocation63_spill] sm:$0xff] %v15814_v61 }
 0xc17   :  { %17929 = vst [vmem:[#allocation77_spill] sm:$0xff] %v15809_v60 }
 0xc18   :  { %8510 = vmatpush1.bf16.msra.mxu0 %v15723_v45 }
 0xc19   :  { %8551 = vmatpush1.bf16.msra.mxu1 %v15727_v24  ;;  %8511 = vmatprep.subr.bf16.mxu0 %v15729_v39  ;;  %v15802_v24 = vld [vmem:[#allocation12 + $0x1c4] ss:$24 sps:$4 sm:$0xff]  }
 0xc1a   :  { %8552 = vmatprep.subr.bf16.mxu1 %v15732_v58  ;;  %v15787_v58 = vld [vmem:[#allocation12 + $0x18c] ss:$24 sps:$4 sm:$0xff]   ;;  %17927 = vst [vmem:[#allocation37_spill] sm:$0xff] %v15802_v24 }
 0xc1b   :  { %11432 = vmatmul.mubr.msk.bf16.gmra.mrb[96].mxu0 %vm15542_vm8, %v15563_v6  ;;  %v15765_v6 = vld [vmem:[#allocation12 + $0x128] ss:$24 sps:$4 sm:$0xff]   ;;  %17922 = vst [vmem:[#allocation96_spill] sm:$0xff] %v15787_v58 }
 0xc1c   :  { %11435 = vmatprep.mubr.msk.bf16.mxu0 %vm15582_vm9, %v15575_v20  ;;  %8512 = vmatpush1.bf16.msra.mxu0 %v15735_v49  ;;  %17916 = vst [vmem:[#allocation76_spill] sm:$0xff] %v15765_v6  ;;  %v15769_v20 = vld [vmem:[#allocation12 + $0x130] ss:$24 sps:$4 sm:$0xff]  }
 0xc1d   :  { %8553 = vmatpush1.bf16.msra.mxu1 %v15739_v42  ;;  %8513 = vmatprep.subr.bf16.mxu0 %v15741_v27  ;;  %17917 = vst [vmem:[#allocation51_spill] sm:$0xff] %v15769_v20  ;;  %v15774_v42 = vld [vmem:[#allocation12 + $0x164] ss:$24 sps:$4 sm:$0xff]  }
 0xc1e   :  { %8554 = vmatprep.subr.bf16.mxu1 %v15744_v16  ;;  %17919 = vst [vmem:[#allocation52_spill] sm:$0xff] %v15774_v42  ;;  %v15780_v16 = vld [vmem:[#allocation12 + $0x158] ss:$24 sps:$4 sm:$0xff]  }
 0xc1f   :  { %17920 = vst [vmem:[#allocation88_spill] sm:$0xff] %v15780_v16 }
 0xc20   :  { %8514 = vmatpush1.bf16.msra.mxu0 %v15753_v52 }
 0xc21   :  { %8555 = vmatpush1.bf16.msra.mxu1 %v15757_v51  ;;  %8515 = vmatprep.subr.bf16.mxu0 %v15759_v7  ;;  %v15785_v51 = vld [vmem:[#allocation12 + $0x160] ss:$24 sps:$4 sm:$0xff]  }
 0xc22   :  { %8556 = vmatprep.subr.bf16.mxu1 %v15762_v21  ;;  %17921 = vst [vmem:[#allocation84_spill] sm:$0xff] %v15785_v51  ;;  %v15790_v21 = vld [vmem:[#allocation12 + $0x194] ss:$24 sps:$4 sm:$0xff]  }
 0xc23   :  { %11438 = vmatmul.mubr.msk.bf16.gmra.mrb[100].mxu0 %vm15582_vm9, %v15603_v46  ;;  %17923 = vst [vmem:[#allocation34_spill] sm:$0xff] %v15790_v21  ;;  %v15797_v46 = vld [vmem:[#allocation12 + $0x190] ss:$24 sps:$4 sm:$0xff]  }
 0xc24   :  { %8516 = vmatpush1.bf16.msra.mxu0 %v15765_v6  ;;  %8535 = vmatprep.mubr.bf16.mxu0 %v17885_v25  ;;  %17925 = vst [vmem:[#allocation93_spill] sm:$0xff] %v15797_v46 }
 0xc25   :  { %8557 = vmatpush1.bf16.msra.mxu1 %v15769_v20  ;;  %8517 = vmatprep.subr.bf16.mxu0 %v15771_v31  ;;  %v15799_v20 = vld [vmem:[#allocation12 + $0x1bc] ss:$24 sps:$4 sm:$0xff]  }
 0xc26   :  { %8558 = vmatprep.subr.bf16.mxu1 %v15774_v42  ;;  %17926 = vst [vmem:[#allocation33_spill] sm:$0xff] %v15799_v20  ;;  %v15805_v42 = vld [vmem:[#allocation12 + $0x1b8] ss:$24 sps:$4 sm:$0xff]  }
 0xc27   :  { %17928 = vst [vmem:[#allocation86_spill] sm:$0xff] %v15805_v42 }
 0xc28   :  { %8518 = vmatpush1.bf16.msra.mxu0 %v15780_v16 }
 0xc29   :  { %8559 = vmatpush1.bf16.msra.mxu1 %v15785_v51  ;;  %8519 = vmatprep.subr.bf16.mxu0 %v15787_v58  ;;  %v15811_v51 = vld [vmem:[#allocation12 + $0x1ec] ss:$24 sps:$4 sm:$0xff]  }
 0xc2a   :  { %8560 = vmatprep.subr.bf16.mxu1 %v15790_v21  ;;  %17930 = vst [vmem:[#allocation78_spill] sm:$0xff] %v15811_v51  ;;  %v15817_v21 = vld [vmem:[#allocation12 + $0x1e8] ss:$24 sps:$4 sm:$0xff]  }
 0xc2b   :  { %17932 = vst [vmem:[#allocation66_spill] sm:$0xff] %v15817_v21 }
 0xc2c   :  { %8520 = vmatpush1.bf16.msra.mxu0 %v15793_v59 }
 0xc2d   :  { %8561 = vmatpush1.bf16.msra.mxu1 %v15797_v46  ;;  %8521 = vmatprep.subr.bf16.mxu0 %v15799_v20  ;;  %v15823_v46 = vld [vmem:[#allocation12 + $0x21c] ss:$24 sps:$4 sm:$0xff]  }
 0xc2e   :  { %8562 = vmatprep.subr.bf16.mxu1 %v15802_v24  ;;  %17934 = vst [vmem:[#allocation64_spill] sm:$0xff] %v15823_v46  ;;  %v15829_v24 = vld [vmem:[#allocation12 + $0x218] ss:$24 sps:$4 sm:$0xff]  }
 0xc2f   :  { %17936 = vst [vmem:[#allocation25_spill] sm:$0xff] %v15829_v24 }
 0xc30   :  { %8522 = vmatpush1.bf16.msra.mxu0 %v15805_v42 }
 0xc31   :  { %8563 = vmatpush1.bf16.msra.mxu1 %v15809_v60  ;;  %8523 = vmatprep.subr.bf16.mxu0 %v15811_v51  ;;  %v15835_v60 = vld [vmem:[#allocation12 + $0x24c] ss:$24 sps:$4 sm:$0xff]  }
 0xc32   :  { %8564 = vmatprep.subr.bf16.mxu1 %v15814_v61  ;;  %17938 = vst [vmem:[#allocation21_spill] sm:$0xff] %v15835_v60  ;;  %v15841_v61 = vld [vmem:[#allocation12 + $0x248] ss:$24 sps:$4 sm:$0xff]  }
 0xc33   :  { %17940 = vst [vmem:[#allocation68_spill] sm:$0xff] %v15841_v61 }
 0xc34   :  { %8524 = vmatpush1.bf16.msra.mxu0 %v15817_v21 }
 0xc35   :  { %8565 = vmatpush1.bf16.msra.mxu1 %v15821_v48  ;;  %8525 = vmatprep.subr.bf16.mxu0 %v15823_v46  ;;  %v15847_v48 = vld [vmem:[#allocation12 + $0x27c] ss:$24 sps:$4 sm:$0xff]  }
 0xc36   :  { %8566 = vmatprep.subr.bf16.mxu1 %v15826_v9  ;;  %17942 = vst [vmem:[#allocation23_spill] sm:$0xff] %v15847_v48  ;;  %v15853_v9 = vld [vmem:[#allocation12 + $0x278] ss:$24 sps:$4 sm:$0xff]  }
 0xc37   :  { %17944 = vst [vmem:[#allocation98_spill] sm:$0xff] %v15853_v9 }
 0xc38   :  { %8526 = vmatpush1.bf16.msra.mxu0 %v15829_v24 }
 0xc39   :  { %8567 = vmatpush1.bf16.msra.mxu1 %v15833_v23  ;;  %8527 = vmatprep.subr.bf16.mxu0 %v15835_v60  ;;  %v15859_v23 = vld [vmem:[#allocation12 + $0x2ac] ss:$24 sps:$4 sm:$0xff]  }
 0xc3a   :  { %8568 = vmatprep.subr.bf16.mxu1 %v15838_v30  ;;  %17945 = vst [vmem:[#allocation62_spill] sm:$0xff] %v15859_v23  ;;  %v15865_v30 = vld [vmem:[#allocation12 + $0x2a8] ss:$24 sps:$4 sm:$0xff]  }
 0xc3b   :  { %17946 = vst [vmem:[#allocation28_spill] sm:$0xff] %v15865_v30 }
 0xc3c   :  { %8528 = vmatpush1.bf16.msra.mxu0 %v15841_v61 }
 0xc3d   :  { %8569 = vmatpush1.bf16.msra.mxu1 %v15845_v28  ;;  %8529 = vmatprep.subr.bf16.mxu0 %v15847_v48  ;;  %v15871_v28 = vld [vmem:[#allocation12 + $0x2dc] ss:$24 sps:$4 sm:$0xff]  }
 0xc3e   :  { %8570 = vmatprep.subr.bf16.mxu1 %v15850_v41  ;;  %17947 = vst [vmem:[#allocation97_spill] sm:$0xff] %v15871_v28  ;;  %v15877_v41 = vld [vmem:[#allocation12 + $0x2d8] ss:$24 sps:$4 sm:$0xff]  }
 0xc3f   :  { %17948 = vst [vmem:[#allocation47_spill] sm:$0xff] %v15877_v41 }
 0xc40   :  { %8530 = vmatpush1.bf16.msra.mxu0 %v15853_v9  ;;  %v15881_v9 = vld [vmem:[#allocation12 + $0x2e0] ss:$24 sps:$4 sm:$0xff]  }
 0xc41   :  { %8571 = vmatpush1.bf16.msra.mxu1 %v15857_v33  ;;  %8531 = vmatprep.subr.bf16.mxu0 %v15859_v23 }
 0xc42   :  { %8572 = vmatprep.subr.bf16.mxu1 %v15862_v35 }
 0xc44   :  { %8532 = vmatpush1.bf16.msra.mxu0 %v15865_v30 }
 0xc45   :  { %8573 = vmatpush1.bf16.msra.mxu1 %v15869_v56  ;;  %8533 = vmatprep.subr.bf16.mxu0 %v15871_v28 }
 0xc46   :  { %8574 = vmatprep.subr.bf16.mxu1 %v15874_v13 }
 0xc48   :  { %8534 = vmatpush1.bf16.msra.mxu0 %v15877_v41 }
 0xc49   :  { %8575 = vmatpush1.bf16.msra.mxu1 %v15881_v9  ;;  %8635 = vmatprep.subr.bf16.mxu0 %v15440_v26 }
 0xc4a   :  { %8676 = vmatprep.subr.bf16.mxu1 %v15669_v47 }
 0xc4b   :  { %8536 = vmatmul.mubr.bf16.vlgmr.msra.gmra.mrb[104].mxu0 %v17885_v25 }
 0xc4c   :  { %8577 = vmatmul.mubr.bf16.vlgmr.msra.gmra.mrb[100].mxu1 %v17885_v25  ;;  %8636 = vmatpush1.bf16.msra.mxu0 %v15465_v38  ;;  %v17949_v38 = vld [vmem:[#allocation35_spill] sm:$0xff] }
 0xc4d   :  { %8677 = vmatpush1.bf16.msra.mxu1 %v15674_v4  ;;  %8637 = vmatprep.subr.bf16.mxu0 %v15485_v44  ;;  %v17950_v44 = vld [vmem:[#allocation98_spill] sm:$0xff]  ;;  %v15957_v25 = vld [vmem:[%s17193_s8] sm:$0x3f] }
 0xc4e   :  { %8678 = vmatprep.subr.bf16.mxu1 %v15680_v11 }
 0xc50   :  { %8638 = vmatpush1.bf16.msra.mxu0 %v15506_v19  ;;  %v17951_v19 = vld [vmem:[#allocation38_spill] sm:$0xff] }
 0xc51   :  { %8679 = vmatpush1.bf16.msra.mxu1 %v15692_v2  ;;  %8639 = vmatprep.subr.bf16.mxu0 %v15514_v17  ;;  %v17952_v17 = vld [vmem:[#allocation87_spill] sm:$0xff] }
 0xc52   :  { %8680 = vmatprep.subr.bf16.mxu1 %v15698_v0 }
 0xc54   :  { %8640 = vmatpush1.bf16.msra.mxu0 %v15518_v57  ;;  %v17953_v57 = vld [vmem:[#allocation91_spill] sm:$0xff] }
 0xc55   :  { %8681 = vmatpush1.bf16.msra.mxu1 %v15705_v22  ;;  %8641 = vmatprep.subr.bf16.mxu0 %v15525_v12  ;;  %v17954_v12 = vld [vmem:[#allocation95_spill] sm:$0xff] }
 0xc56   :  { %8682 = vmatprep.subr.bf16.mxu1 %v15711_v18 }
 0xc58   :  { %8642 = vmatpush1.bf16.msra.mxu0 %v15546_v54  ;;  %v17955_v54 = vld [vmem:[#allocation55_spill] sm:$0xff] }
 0xc59   :  { %8683 = vmatpush1.bf16.msra.mxu1 %v15723_v45  ;;  %8643 = vmatprep.subr.bf16.mxu0 %v15554_v36 }
 0xc5a   :  { %8684 = vmatprep.subr.bf16.mxu1 %v15729_v39 }
 0xc5c   :  { %8644 = vmatpush1.bf16.msra.mxu0 %v15558_v14 }
 0xc5d   :  { %8685 = vmatpush1.bf16.msra.mxu1 %v15735_v49  ;;  %8645 = vmatprep.subr.bf16.mxu0 %v15565_v15 }
 0xc5e   :  { %8686 = vmatprep.subr.bf16.mxu1 %v15741_v27 }
 0xc60   :  { %8646 = vmatpush1.bf16.msra.mxu0 %v15586_v55 }
 0xc61   :  { %8687 = vmatpush1.bf16.msra.mxu1 %v15753_v52  ;;  %8647 = vmatprep.subr.bf16.mxu0 %v15594_v50 }
 0xc62   :  { %8688 = vmatprep.subr.bf16.mxu1 %v15759_v7 }
 0xc64   :  { %8648 = vmatpush1.bf16.msra.mxu0 %v15598_v62 }
 0xc65   :  { %8689 = vmatpush1.bf16.msra.mxu1 %v15765_v6  ;;  %8649 = vmatprep.subr.bf16.mxu0 %v15605_v5 }
 0xc66   :  { %8690 = vmatprep.subr.bf16.mxu1 %v15771_v31 }
 0xc68   :  { %8650 = vmatpush1.bf16.msra.mxu0 %v15614_v29 }
 0xc69   :  { %8691 = vmatpush1.bf16.msra.mxu1 %v15780_v16  ;;  %8651 = vmatprep.subr.bf16.mxu0 %v15619_v43 }
 0xc6a   :  { %8692 = vmatprep.subr.bf16.mxu1 %v15787_v58 }
 0xc6c   :  { %8652 = vmatpush1.bf16.msra.mxu0 %v15624_v40 }
 0xc6d   :  { %8693 = vmatpush1.bf16.msra.mxu1 %v15793_v59  ;;  %8653 = vmatprep.subr.bf16.mxu0 %v15627_v34 }
 0xc6e   :  { %8694 = vmatprep.subr.bf16.mxu1 %v15799_v20 }
 0xc70   :  { %8654 = vmatpush1.bf16.msra.mxu0 %v15630_v3 }
 0xc71   :  { %8695 = vmatpush1.bf16.msra.mxu1 %v15805_v42  ;;  %8655 = vmatprep.subr.bf16.mxu0 %v15633_v53 }
 0xc72   :  { %8696 = vmatprep.subr.bf16.mxu1 %v15811_v51 }
 0xc74   :  { %8656 = vmatpush1.bf16.msra.mxu0 %v15636_v10 }
 0xc75   :  { %8697 = vmatpush1.bf16.msra.mxu1 %v15817_v21  ;;  %8657 = vmatprep.subr.bf16.mxu0 %v15639_v1 }
 0xc76   :  { %8698 = vmatprep.subr.bf16.mxu1 %v15823_v46  ;;  %v17959_v46 = vld [vmem:[#allocation44_spill] sm:$0xff] }
 0xc77   :  { %v15979_v21 = vrot.slane %v15957_v25, %v17959_v46 }
 0xc78   :  { %8658 = vmatpush1.bf16.msra.mxu0 %v15642_v63 }
 0xc79   :  { %8699 = vmatpush1.bf16.msra.mxu1 %v15829_v24  ;;  %8659 = vmatprep.subr.bf16.mxu0 %v15645_v32 }
 0xc7a   :  { %8700 = vmatprep.subr.bf16.mxu1 %v15835_v60 }
 0xc7c   :  { %8660 = vmatpush1.bf16.msra.mxu0 %v15648_v37 }
 0xc7d   :  { %8701 = vmatpush1.bf16.msra.mxu1 %v15841_v61  ;;  %8661 = vmatprep.subr.bf16.mxu0 %v15651_v8  ;;  %v17958_v61 = vld [vmem:[#allocation43_spill] sm:$0xff] }
 0xc7e   :  { %8702 = vmatprep.subr.bf16.mxu1 %v15847_v48  ;;  %v17957_v48 = vld [vmem:[#allocation42_spill] sm:$0xff] }
 0xc80   :  { %8662 = vmatpush1.bf16.msra.mxu0 %v17949_v38 }
 0xc81   :  { %8703 = vmatpush1.bf16.msra.mxu1 %v17950_v44  ;;  %8663 = vmatprep.subr.bf16.mxu0 %v17951_v19 }
 0xc82   :  { %8704 = vmatprep.subr.bf16.mxu1 %v15859_v23  ;;  %v17956_v23 = vld [vmem:[#allocation41_spill] sm:$0xff] }
 0xc84   :  { %8664 = vmatpush1.bf16.msra.mxu0 %v17952_v17 }
 0xc85   :  { %8705 = vmatpush1.bf16.msra.mxu1 %v15865_v30  ;;  %8665 = vmatprep.subr.bf16.mxu0 %v17953_v57  ;;  %v15961_v30 = vrot.slane %v15957_v25, %v17956_v23 }
 0xc86   :  { %8706 = vmatprep.subr.bf16.mxu1 %v15871_v28 }
 0xc88   :  { %8666 = vmatpush1.bf16.msra.mxu0 %v17954_v12 }
 0xc89   :  { %8707 = vmatpush1.bf16.msra.mxu1 %v15877_v41  ;;  %8717 = vmatprep.subr.bf16.mxu0 %v17955_v54  ;;  %v15969_v41 = vrot.slane %v15957_v25, %v17957_v48 }
 0xc8a   :  { %8808 = vmatprep.subr.bf16.mxu1 %v15440_v26  ;;  %v15973_v26 = vrot.slane %v15957_v25, %v17958_v61 }
 0xc9e   :  { %v15963_v44 = vpop.f32.mrb[72].mxu0  ;;  %v15965_v28 = vpop.f32.mrb[80].mxu1 }
 0xc9f   :  { %v15975_v60 = vpop.f32.mrb[73].mxu0  ;;  %v7696_v24 = vpop.f32.mrb[81].mxu1 }
 0xca0   :  { %v15982_v51 = vadd.f32 %v7696_v24, %v15961_v30  ;;  %v7625_v42 = vpop.f32.mrb[74].mxu0  ;;  %v7698_v20 = vpop.f32.mrb[82].mxu1  ;;  %v7624_v45 = vadd.f32 %v15975_v60, %v15979_v21 }
 0xca1   :  { %v15985_v59 = vadd.f32 %v7625_v42, %v15969_v41  ;;  %v15988_v58 = vadd.f32 %v7698_v20, %v15973_v26  ;;  %v7627_v16 = vpop.f32.mrb[75].mxu0  ;;  %v7700_v31 = vpop.f32.mrb[83].mxu1 }
 0xca2   :  { %17960 = vst [vmem:[#allocation29_spill] sm:$0xff] %v15982_v51  ;;  %v15991_v6 = vadd.f32 %v7627_v16, %v15979_v21  ;;  %v15994_v7 = vadd.f32 %v7700_v31, %v15961_v30 }
 0xca3   :  { %17961 = vst [vmem:[#allocation49_spill] sm:$0xff] %v15985_v59  ;;  %17962 = vst [vmem:[#allocation99_spill] sm:$0xff] %v15988_v58 }
 0xca4   :  { %17963 = vst [vmem:[#allocation81_spill] sm:$0xff] %v15991_v6  ;;  %17964 = vst [vmem:[#allocation35_spill] sm:$0xff] %v15994_v7 }
 0xca6   :  { %v7631_v52 = vpop.f32.mrb[76].mxu0  ;;  %v7704_v27 = vpop.f32.mrb[84].mxu1 }
 0xca7   :  { %v15997_v24 = vadd.f32 %v7631_v52, %v15969_v41  ;;  %v16000_v51 = vadd.f32 %v7704_v27, %v15973_v26  ;;  %v7633_v42 = vpop.f32.mrb[77].mxu0  ;;  %v7706_v59 = vpop.f32.mrb[85].mxu1 }
 0xca8   :  { %v16003_v20 = vadd.f32 %v7633_v42, %v15979_v21  ;;  %v16006_v58 = vadd.f32 %v7706_v59, %v15961_v30  ;;  %v7635_v16 = vpop.f32.mrb[78].mxu0  ;;  %v7708_v6 = vpop.f32.mrb[86].mxu1 }
 0xca9   :  { %17965 = vst [vmem:[#allocation38_spill] sm:$0xff] %v15997_v24  ;;  %17966 = vst [vmem:[#allocation87_spill] sm:$0xff] %v16000_v51  ;;  %v16009_v31 = vadd.f32 %v7635_v16, %v15969_v41  ;;  %v16012_v7 = vadd.f32 %v7708_v6, %v15973_v26  ;;  %v7637_v52 = vpop.f32.mrb[79].mxu0  ;;  %v7710_v24 = vpop.f32.mrb[87].mxu1 }
 0xcaa   :  { %17967 = vst [vmem:[#allocation91_spill] sm:$0xff] %v16003_v20  ;;  %17968 = vst [vmem:[#allocation95_spill] sm:$0xff] %v16006_v58  ;;  %v16015_v27 = vadd.f32 %v7637_v52, %v15979_v21  ;;  %v16018_v51 = vadd.f32 %v7710_v24, %v15961_v30 }
 0xcab   :  { %17969 = vst [vmem:[#allocation55_spill] sm:$0xff] %v16009_v31  ;;  %17970 = vst [vmem:[#allocation41_spill] sm:$0xff] %v16012_v7 }
 0xcac   :  { %17971 = vst [vmem:[#allocation42_spill] sm:$0xff] %v16015_v27  ;;  %17972 = vst [vmem:[#allocation43_spill] sm:$0xff] %v16018_v51 }
 0xcae   :  { %v7641_v42 = vpop.f32.mrb[80].mxu0  ;;  %v7714_v20 = vpop.f32.mrb[88].mxu1 }
 0xcaf   :  { %v16021_v59 = vadd.f32 %v7641_v42, %v15969_v41  ;;  %v16024_v58 = vadd.f32 %v7714_v20, %v15973_v26  ;;  %v7643_v16 = vpop.f32.mrb[81].mxu0  ;;  %v7716_v31 = vpop.f32.mrb[89].mxu1 }
 0xcb0   :  { %v16027_v6 = vadd.f32 %v7643_v16, %v15979_v21  ;;  %v16030_v7 = vadd.f32 %v7716_v31, %v15961_v30  ;;  %v7645_v52 = vpop.f32.mrb[82].mxu0  ;;  %v7718_v27 = vpop.f32.mrb[90].mxu1 }
 0xcb1   :  { %17973 = vst [vmem:[#allocation44_spill] sm:$0xff] %v16021_v59  ;;  %17974 = vst [vmem:[#allocation100_spill] sm:$0xff] %v16024_v58  ;;  %v16033_v24 = vadd.f32 %v7645_v52, %v15969_v41  ;;  %v16036_v51 = vadd.f32 %v7718_v27, %v15973_v26  ;;  %v7647_v42 = vpop.f32.mrb[83].mxu0  ;;  %v7720_v59 = vpop.f32.mrb[91].mxu1 }
 0xcb2   :  { %17975 = vst [vmem:[#allocation101_spill] sm:$0xff] %v16027_v6  ;;  %17976 = vst [vmem:[#allocation102_spill] sm:$0xff] %v16030_v7  ;;  %v16039_v20 = vadd.f32 %v7647_v42, %v15979_v21  ;;  %v16042_v58 = vadd.f32 %v7720_v59, %v15961_v30 }
 0xcb3   :  { %17977 = vst [vmem:[#allocation103_spill] sm:$0xff] %v16033_v24  ;;  %17978 = vst [vmem:[#allocation104_spill] sm:$0xff] %v16036_v51 }
 0xcb4   :  { %17979 = vst [vmem:[#allocation105_spill] sm:$0xff] %v16039_v20  ;;  %17980 = vst [vmem:[#allocation106_spill] sm:$0xff] %v16042_v58 }
 0xcb6   :  { %v7651_v16 = vpop.f32.mrb[84].mxu0  ;;  %v7724_v6 = vpop.f32.mrb[92].mxu1 }
 0xcb7   :  { %v16045_v31 = vadd.f32 %v7651_v16, %v15969_v41  ;;  %v16048_v7 = vadd.f32 %v7724_v6, %v15973_v26  ;;  %v7653_v52 = vpop.f32.mrb[85].mxu0  ;;  %v7726_v24 = vpop.f32.mrb[93].mxu1 }
 0xcb8   :  { %v16051_v27 = vadd.f32 %v7653_v52, %v15979_v21  ;;  %v16054_v51 = vadd.f32 %v7726_v24, %v15961_v30  ;;  %v7655_v42 = vpop.f32.mrb[86].mxu0  ;;  %v7728_v20 = vpop.f32.mrb[94].mxu1  ;;  %v16070_v52 = vld [vmem:[%s17195_s10] sm:$0x3f]  ;;  %v17988_v24 = vld [vmem:[#allocation65_spill] sm:$0xff] }
 0xcb9   :  { %17981 = vst [vmem:[#allocation107_spill] sm:$0xff] %v16045_v31  ;;  %17982 = vst [vmem:[#allocation108_spill] sm:$0xff] %v16048_v7  ;;  %v16057_v59 = vadd.f32 %v7655_v42, %v15969_v41  ;;  %v16060_v58 = vadd.f32 %v7728_v20, %v15973_v26  ;;  %v7657_v16 = vpop.f32.mrb[87].mxu0  ;;  %v16062_v31 = vpop.f32.mrb[95].mxu1  ;;  %v7096_v7 = vrot.slane %v15957_v25, %v17988_v24  ;;  %v17990_v20 = vld [vmem:[#allocation67_spill] sm:$0xff] }
 0xcba   :  { %17983 = vst [vmem:[#allocation109_spill] sm:$0xff] %v16051_v27  ;;  %17984 = vst [vmem:[#allocation110_spill] sm:$0xff] %v16054_v51  ;;  %v16065_v6 = vadd.f32 %v7657_v16, %v15979_v21  ;;  %v16076_v42 = vrot.slane %v16070_v52, %v17957_v48  ;;  %v16084_v16 = vrot.slane %v16070_v52, %v17959_v46 }
 0xcbb   :  { %17985 = vst [vmem:[#allocation111_spill] sm:$0xff] %v16057_v59  ;;  %17986 = vst [vmem:[#allocation112_spill] sm:$0xff] %v16060_v58  ;;  %v16080_v58 = vrot.slane %v15957_v25, %v17990_v20  ;;  %v7622_v27 = vadd.f32 %v15963_v44, %v15969_v41 }
 0xcbc   :  { %17987 = vst [vmem:[#allocation113_spill] sm:$0xff] %v16065_v6  ;;  %17989 = vst [vmem:[#allocation65_spill] sm:$0xff] %v16076_v42 }
 0xcbd   :  { %17991 = vst [vmem:[#allocation67_spill] sm:$0xff] %v16084_v16 }
 0xcde   :  { %v7767_v6 = vpop.f32.mrb[88].mxu0  ;;  %v8496_v59 = vpop.f32.mrb[96].mxu1 }
 0xcdf   :  { %v16088_v51 = vadd.f32 %v7767_v6, %v7096_v7  ;;  %v8497_v49 = vadd.f32 %v8496_v59, %v16076_v42  ;;  %v7769_v39 = vpop.f32.mrb[89].mxu0  ;;  %v8498_v48 = vpop.f32.mrb[97].mxu1 }
 0xce0   :  { %v16094_v25 = vadd.f32 %v7769_v39, %v16080_v58  ;;  %v8499_v46 = vadd.f32 %v8498_v48, %v16084_v16  ;;  %v7771_v18 = vpop.f32.mrb[90].mxu0  ;;  %v8500_v22 = vpop.f32.mrb[98].mxu1 }
 0xce1   :  { %17992 = vst [vmem:[#allocation114_spill] sm:$0xff] %v16088_v51  ;;  %v8591_v0 = vadd.f32 %v8497_v49, %v7622_v27  ;;  %v16097_v2 = vadd.f32 %v7771_v18, %v7096_v7  ;;  %v7773_v41 = vpop.f32.mrb[91].mxu0  ;;  %v8501_v44 = vpop.f32.mrb[99].mxu1 }
 0xce2   :  { %17993 = vst [vmem:[#allocation115_spill] sm:$0xff] %v16094_v25  ;;  %v8592_v6 = vadd.f32 %v8499_v46, %v7624_v45  ;;  %v16100_v59 = vadd.f32 %v7773_v41, %v16080_v58 }
 0xce3   :  { %17994 = vst [vmem:[#allocation116_spill] sm:$0xff] %v16097_v2 }
 0xce4   :  { %17995 = vst [vmem:[#allocation117_spill] sm:$0xff] %v16100_v59 }
 0xce6   :  { %v7777_v51 = vpop.f32.mrb[92].mxu0 }
 0xce7   :  { %v16102_v42 = vadd.f32 %v7777_v51, %v7096_v7  ;;  %v7779_v60 = vpop.f32.mrb[93].mxu0 }
 0xce8   :  { %v16105_v39 = vadd.f32 %v7779_v60, %v16080_v58  ;;  %v7781_v21 = vpop.f32.mrb[94].mxu0 }
 0xce9   :  { %17996 = vst [vmem:[#allocation118_spill] sm:$0xff] %v16102_v42  ;;  %v16107_v48 = vadd.f32 %v7781_v21, %v7096_v7  ;;  %v7783_v22 = vpop.f32.mrb[95].mxu0  ;;  %v11285_v42 = vmul.f32 -1.442695, %v8592_v6 }
 0xcea   :  { %17997 = vst [vmem:[#allocation119_spill] sm:$0xff] %v16105_v39  ;;  %v16110_v18 = vadd.f32 %v7783_v22, %v16080_v58  ;;  %v11284_v39 = vmul.f32 -1.442695, %v8591_v0 }
 0xceb   :  { %17998 = vst [vmem:[#allocation120_spill] sm:$0xff] %v16107_v48 }
 0xcec   :  { %17999 = vst [vmem:[#allocation121_spill] sm:$0xff] %v16110_v18  ;;  %12673 = vpow2.f32 %v11284_v39 }
 0xced   :  { %12675 = vpow2.f32 %v11285_v42 }
 0xcee   :  { %v7787_v49 = vpop.f32.mrb[96].mxu0 }
 0xcef   :  { %v16112_v27 = vadd.f32 %v7787_v49, %v7096_v7  ;;  %v7789_v45 = vpop.f32.mrb[97].mxu0 }
 0xcf0   :  { %v16115_v46 = vadd.f32 %v7789_v45, %v16080_v58  ;;  %v7791_v51 = vpop.f32.mrb[98].mxu0 }
 0xcf1   :  { %18000 = vst [vmem:[#allocation122_spill] sm:$0xff] %v16112_v27  ;;  %v16117_v41 = vadd.f32 %v7791_v51, %v7096_v7  ;;  %v7793_v44 = vpop.f32.mrb[99].mxu0  ;;  %v16129_v51 = vrot.slane %v16070_v52, %v17958_v61 }
 0xcf2   :  { %18001 = vst [vmem:[#allocation123_spill] sm:$0xff] %v16115_v46  ;;  %v16120_v60 = vadd.f32 %v7793_v44, %v16080_v58  ;;  %v16133_v44 = vrot.slane %v16070_v52, %v17988_v24 }
 0xcf3   :  { %18002 = vst [vmem:[#allocation124_spill] sm:$0xff] %v16117_v41  ;;  %18006 = vst [vmem:[#allocation128_spill] sm:$0xff] %v16129_v51 }
 0xcf4   :  { %18003 = vst [vmem:[#allocation125_spill] sm:$0xff] %v16120_v60 }
 0xcf6   :  { %v7797_v21 = vpop.f32.mrb[100].mxu0  ;;  %v12674_v45 = vpop.eup %12673 }
 0xcf7   :  { %v16122_v25 = vadd.f32 %v7797_v21, %v7096_v7  ;;  %v7799_v59 = vpop.f32.mrb[101].mxu0  ;;  %v8599_v18 = vadd.f32 1.0, %v12674_v45  ;;  %v12676_v0 = vpop.eup %12675 }
 0xcf8   :  { %v16125_v22 = vadd.f32 %v7799_v59, %v16080_v58  ;;  %v7801_v49 = vpop.f32.mrb[102].mxu0  ;;  %v16137_v59 = vrot.slane %v16070_v52, %v17956_v23  ;;  %v7695_v23 = vadd.f32 %v15965_v28, %v15973_v26  ;;  %v16150_v26 = vrot.slane %v16070_v52, %v17990_v20 }
 0xcf9   :  { %18004 = vst [vmem:[#allocation126_spill] sm:$0xff] %v16122_v25  ;;  %v7803_v2 = vpop.f32.mrb[103].mxu0  ;;  %12677 = vrcp.f32 %v8599_v18  ;;  %v7731_v18 = vadd.f32 %v16062_v31, %v15961_v30  ;;  %v7802_v61 = vadd.f32 %v7801_v49, %v7096_v7 }
 0xcfa   :  { %18005 = vst [vmem:[#allocation127_spill] sm:$0xff] %v16125_v22  ;;  %18007 = vst [vmem:[#allocation129_spill] sm:$0xff] %v16137_v59 }
 0xd03   :  { %v12678_v42 = vpop.eup %12677 }
 0xd1e   :  { %v8537_v21 = vpop.f32.mrb[104].mxu0 }
 0xd1f   :  { %v8538_v39 = vadd.f32 %v8537_v21, %v16129_v51  ;;  %v8578_v6 = vpop.f32.mrb[100].mxu1  ;;  %v8539_v45 = vpop.f32.mrb[105].mxu0  ;;  %v8600_v21 = vadd.f32 1.0, %v12676_v0 }
 0xd20   :  { %v8579_v48 = vadd.f32 %v8578_v6, %v16133_v44  ;;  %v8540_v24 = vadd.f32 %v8539_v45, %v16137_v59  ;;  %v8541_v46 = vpop.f32.mrb[106].mxu0  ;;  %v8580_v27 = vpop.f32.mrb[101].mxu1 }
 0xd21   :  { %v8605_v60 = vmul.f32 %v12678_v42, %v8538_v39  ;;  %v8542_v41 = vpop.f32.mrb[107].mxu0  ;;  %v8582_v22 = vpop.f32.mrb[102].mxu1 }
 0xd22   :  { %v8612_v25 = vadd.f32 %v8579_v48, %v7802_v61  ;;  %v8611_v51 = vadd.f32 %v8540_v24, %v7731_v18  ;;  %v8583_v16 = vpop.f32.mrb[103].mxu1  ;;  %v18011_v18 = vld [vmem:[#allocation71_spill] sm:$0xff]  ;;  %v16179_v24 = vld [vmem:[#allocation12 + $0x34] ss:$24 sps:$4 sm:$0xff]  }
 0xd23   :  { %v8606_v11 = vadd.f32 %v8605_v60, %v7695_v23  ;;  %v16176_v61 = vld [vmem:[#allocation12] ss:$24 sps:$4 sm:$0xff]  }
 0xd24   :  { %v11286_v4 = vmul.f32 -1.442695, %v8611_v51  ;;  %v11287_v30 = vmul.f32 -1.442695, %v8612_v25  ;;  %v18012_v23 = vld [vmem:[#allocation59_spill] sm:$0xff] }
 0xd25   :  { %12679 = vtanh.f32 %v8606_v11  ;;  %v8581_v11 = vadd.f32 %v8580_v27, %v16150_v26  ;;  %v18055_v27 = vld [vmem:[#allocation78_spill] sm:$0xff] }
 0xd26   :  { %12681 = vrcp.f32 %v8600_v21  ;;  %v18013_v21 = vld [vmem:[#allocation50_spill] sm:$0xff] }
 0xd27   :  { %12683 = vpow2.f32 %v11286_v4  ;;  %v7804_v4 = vadd.f32 %v7803_v2, %v16080_v58  ;;  %v18010_v58 = vld [vmem:[#allocation54_spill] sm:$0xff] }
 0xd28   :  { %12685 = vpow2.f32 %v11287_v30  ;;  %v16187_v30 = vld [vmem:[#allocation12 + $0x64] ss:$24 sps:$4 sm:$0xff]  }
 0xd29   :  { %v18056_v2 = vld [vmem:[#allocation66_spill] sm:$0xff] }
 0xd2f   :  { %v12680_v7 = vpop.eup %12679 }
 0xd30   :  { %v12682_v31 = vpop.eup %12681  ;;  %v8608_v46 = vsub.f32 0.0, %v12680_v7 }
 0xd31   :  { %v12684_v49 = vpop.eup %12683 }
 0xd32   :  { %v8619_v6 = vadd.f32 1.0, %v12684_v49  ;;  %v8609_v45 = vmul.f32 %v12682_v31, %v8608_v46  ;;  %v12686_v16 = vpop.eup %12685  ;;  %v18014_v31 = vld [vmem:[#allocation69_spill] sm:$0xff]  ;;  %v16192_v49 = vld [vmem:[#allocation12 + $0x60] ss:$24 sps:$4 sm:$0xff]  }
 0xd33   :  { %v8620_v41 = vadd.f32 1.0, %v12686_v16  ;;  %v18015_v46 = vld [vmem:[#allocation53_spill] sm:$0xff]  ;;  %v18017_v16 = vld [vmem:[#allocation90_spill] sm:$0xff] }
 0xd34   :  { %12687 = vrcp.f32 %v8619_v6  ;;  %v16146_v28 = vadd.f32 %v12680_v7, %v8609_v45  ;;  %v16184_v7 = vld [vmem:[#allocation12 + $0x30] ss:$24 sps:$4 sm:$0xff]   ;;  %v16195_v6 = vld [vmem:[#allocation12 + $0x94] ss:$24 sps:$4 sm:$0xff]   ;;  %v18016_v45 = vld [vmem:[#allocation74_spill] sm:$0xff] }
 0xd36   :  { %v16160_v20 = vpack.c.bf16 %v16146_v28, %v16146_v28 }
 0xd3e   :  { %v12688_v48 = vpop.eup %12687 }
 0xd3f   :  { %v8625_v25 = vmul.f32 %v12688_v48, %v8581_v11  ;;  %v16200_v11 = vld [vmem:[#allocation12 + $0x90] ss:$24 sps:$4 sm:$0xff]   ;;  %v18018_v48 = vld [vmem:[#allocation39_spill] sm:$0xff] }
 0xd41   :  { %v8626_v60 = vadd.f32 %v8625_v25, %v7804_v4  ;;  %v18019_v4 = vld [vmem:[#allocation32_spill] sm:$0xff] }
 0xd42   :  { %v18020_v25 = vld [vmem:[#allocation40_spill] sm:$0xff] }
 0xd43   :  { %12689 = vtanh.f32 %v8626_v60  ;;  %v18022_v60 = vld [vmem:[#allocation51_spill] sm:$0xff] }
 0xd44   :  { %12691 = vrcp.f32 %v8620_v41  ;;  %v18021_v41 = vld [vmem:[#allocation75_spill] sm:$0xff] }
 0xd4d   :  { %v12690_v22 = vpop.eup %12689 }
 0xd4e   :  { %v8628_v51 = vsub.f32 0.0, %v12690_v22  ;;  %v12692_v0 = vpop.eup %12691 }
 0xd50   :  { %v8629_v39 = vmul.f32 %v12692_v0, %v8628_v51  ;;  %v18050_v51 = vld [vmem:[#allocation88_spill] sm:$0xff] }
 0xd51   :  { %v18051_v0 = vld [vmem:[#allocation96_spill] sm:$0xff] }
 0xd52   :  { %v16154_v42 = vadd.f32 %v12690_v22, %v8629_v39  ;;  %v18023_v22 = vld [vmem:[#allocation52_spill] sm:$0xff]  ;;  %v18052_v39 = vld [vmem:[#allocation85_spill] sm:$0xff] }
 0xd54   :  { %v11289_v52 = vpack.c.bf16 %v16154_v42, %v16154_v42 }
 0xd56   :  { %11290 = vmatprep.mubr.msk.bf16.mxu0 %vm14011_vm14, %v11289_v52  ;;  %11296 = vmatprep.mubr.msk.bf16.mxu1 %vm14011_vm14, %v11289_v52 }
 0xd57   :  { %11293 = vmatmul.mubr.msk.bf16.vlgmr.msra.gmra.mrb[108].mxu0 %vm14024_vm15, %v16160_v20  ;;  %11299 = vmatmul.mubr.msk.bf16.vlgmr.msra.gmra.mrb[104].mxu1 %vm14024_vm15, %v16160_v20 }
 0xd58   :  { %8718 = vmatpush1.bf16.msra.mxu0 %v18010_v58  ;;  %11302 = vmatprep.mubr.msk.bf16.mxu0 %vm14011_vm14, %v11289_v52  ;;  %v18053_v52 = vld [vmem:[#allocation33_spill] sm:$0xff]  ;;  %v18057_v58 = vld [vmem:[#allocation64_spill] sm:$0xff] }
 0xd59   :  { %8719 = vmatprep.subr.bf16.mxu0 %v18011_v18  ;;  %8809 = vmatpush1.bf16.msra.mxu1 %v16176_v61  ;;  %v18058_v18 = vld [vmem:[#allocation25_spill] sm:$0xff] }
 0xd5a   :  { %8810 = vmatprep.subr.bf16.mxu1 %v16179_v24 }
 0xd5c   :  { %8720 = vmatpush1.bf16.msra.mxu0 %v18012_v23  ;;  %v18059_v23 = vld [vmem:[#allocation21_spill] sm:$0xff] }
 0xd5d   :  { %8721 = vmatprep.subr.bf16.mxu0 %v18013_v21  ;;  %8811 = vmatpush1.bf16.msra.mxu1 %v16184_v7  ;;  %v18060_v21 = vld [vmem:[#allocation68_spill] sm:$0xff] }
 0xd5e   :  { %8812 = vmatprep.subr.bf16.mxu1 %v16187_v30 }
 0xd60   :  { %8722 = vmatpush1.bf16.msra.mxu0 %v18014_v31  ;;  %v18061_v31 = vld [vmem:[#allocation23_spill] sm:$0xff] }
 0xd61   :  { %8723 = vmatprep.subr.bf16.mxu0 %v18015_v46  ;;  %8813 = vmatpush1.bf16.msra.mxu1 %v16192_v49  ;;  %v18062_v46 = vld [vmem:[#allocation98_spill] sm:$0xff] }
 0xd62   :  { %8814 = vmatprep.subr.bf16.mxu1 %v16195_v6 }
 0xd64   :  { %8724 = vmatpush1.bf16.msra.mxu0 %v18016_v45  ;;  %v18063_v45 = vld [vmem:[#allocation62_spill] sm:$0xff] }
 0xd65   :  { %8725 = vmatprep.subr.bf16.mxu0 %v18017_v16  ;;  %8815 = vmatpush1.bf16.msra.mxu1 %v16200_v11  ;;  %v18064_v16 = vld [vmem:[#allocation28_spill] sm:$0xff] }
 0xd66   :  { %8816 = vmatprep.subr.bf16.mxu1 %v15554_v36  ;;  %v18024_v36 = vld [vmem:[#allocation84_spill] sm:$0xff] }
 0xd68   :  { %8726 = vmatpush1.bf16.msra.mxu0 %v18018_v48  ;;  %v18065_v48 = vld [vmem:[#allocation97_spill] sm:$0xff] }
 0xd69   :  { %8727 = vmatprep.subr.bf16.mxu0 %v18019_v4  ;;  %8817 = vmatpush1.bf16.msra.mxu1 %v15558_v14  ;;  %v18025_v14 = vld [vmem:[#allocation34_spill] sm:$0xff]  ;;  %v18066_v4 = vld [vmem:[#allocation47_spill] sm:$0xff] }
 0xd6a   :  { %8818 = vmatprep.subr.bf16.mxu1 %v15565_v15  ;;  %v18026_v15 = vld [vmem:[#allocation93_spill] sm:$0xff] }
 0xd6c   :  { %8728 = vmatpush1.bf16.msra.mxu0 %v18020_v25  ;;  %v16286_v25 = vld [vmem:[#allocation12 + $0x4] ss:$24 sps:$4 sm:$0xff]  }
 0xd6d   :  { %8729 = vmatprep.subr.bf16.mxu0 %v18021_v41  ;;  %8819 = vmatpush1.bf16.msra.mxu1 %v15586_v55  ;;  %v18027_v55 = vld [vmem:[#allocation37_spill] sm:$0xff]  ;;  %18067 = vst [vmem:[#allocation82_spill] sm:$0xff] %v16286_v25 }
 0xd6e   :  { %8820 = vmatprep.subr.bf16.mxu1 %v15594_v50  ;;  %v18028_v50 = vld [vmem:[#allocation77_spill] sm:$0xff] }
 0xd70   :  { %8730 = vmatpush1.bf16.msra.mxu0 %v18022_v60 }
 0xd71   :  { %8731 = vmatprep.subr.bf16.mxu0 %v18023_v22  ;;  %8821 = vmatpush1.bf16.msra.mxu1 %v15598_v62  ;;  %v18029_v62 = vld [vmem:[#allocation63_spill] sm:$0xff]  ;;  %v18068_v22 = vld [vmem:[#allocation65_spill] sm:$0xff] }
 0xd72   :  { %8822 = vmatprep.subr.bf16.mxu1 %v15605_v5  ;;  %v18030_v5 = vld [vmem:[#allocation46_spill] sm:$0xff] }
 0xd74   :  { %8732 = vmatpush1.bf16.msra.mxu0 %v18024_v36 }
 0xd75   :  { %8733 = vmatprep.subr.bf16.mxu0 %v18025_v14  ;;  %8823 = vmatpush1.bf16.msra.mxu1 %v15614_v29  ;;  %v18031_v29 = vld [vmem:[#allocation24_spill] sm:$0xff] }
 0xd76   :  { %8824 = vmatprep.subr.bf16.mxu1 %v15619_v43  ;;  %v18032_v43 = vld [vmem:[#allocation20_spill] sm:$0xff] }
 0xd78   :  { %8734 = vmatpush1.bf16.msra.mxu0 %v18026_v15 }
 0xd79   :  { %8735 = vmatprep.subr.bf16.mxu0 %v18027_v55  ;;  %8825 = vmatpush1.bf16.msra.mxu1 %v15624_v40  ;;  %v18033_v40 = vld [vmem:[#allocation45_spill] sm:$0xff] }
 0xd7a   :  { %8826 = vmatprep.subr.bf16.mxu1 %v15627_v34  ;;  %v18034_v34 = vld [vmem:[#allocation22_spill] sm:$0xff] }
 0xd7c   :  { %8736 = vmatpush1.bf16.msra.mxu0 %v18028_v50 }
 0xd7d   :  { %8737 = vmatprep.subr.bf16.mxu0 %v18029_v62  ;;  %8827 = vmatpush1.bf16.msra.mxu1 %v15630_v3  ;;  %v18035_v3 = vld [vmem:[#allocation79_spill] sm:$0xff] }
 0xd7e   :  { %8828 = vmatprep.subr.bf16.mxu1 %v15633_v53  ;;  %v18036_v53 = vld [vmem:[#allocation57_spill] sm:$0xff] }
 0xd80   :  { %8738 = vmatpush1.bf16.msra.mxu0 %v18030_v5 }
 0xd81   :  { %8739 = vmatprep.subr.bf16.mxu0 %v18031_v29  ;;  %8829 = vmatpush1.bf16.msra.mxu1 %v15636_v10  ;;  %v18037_v10 = vld [vmem:[#allocation56_spill] sm:$0xff] }
 0xd82   :  { %8830 = vmatprep.subr.bf16.mxu1 %v15639_v1  ;;  %v18038_v1 = vld [vmem:[#allocation72_spill] sm:$0xff] }
 0xd84   :  { %8740 = vmatpush1.bf16.msra.mxu0 %v18032_v43 }
 0xd85   :  { %8741 = vmatprep.subr.bf16.mxu0 %v18033_v40  ;;  %8831 = vmatpush1.bf16.msra.mxu1 %v15642_v63  ;;  %v18039_v63 = vld [vmem:[#allocation61_spill] sm:$0xff] }
 0xd86   :  { %8832 = vmatprep.subr.bf16.mxu1 %v15645_v32  ;;  %v18040_v32 = vld [vmem:[#allocation60_spill] sm:$0xff] }
 0xd88   :  { %8742 = vmatpush1.bf16.msra.mxu0 %v18034_v34 }
 0xd89   :  { %8743 = vmatprep.subr.bf16.mxu0 %v18035_v3  ;;  %8833 = vmatpush1.bf16.msra.mxu1 %v15648_v37  ;;  %v18041_v37 = vld [vmem:[#allocation70_spill] sm:$0xff] }
 0xd8a   :  { %8834 = vmatprep.subr.bf16.mxu1 %v15651_v8  ;;  %v18042_v8 = vld [vmem:[#allocation73_spill] sm:$0xff] }
 0xd8c   :  { %8744 = vmatpush1.bf16.msra.mxu0 %v15857_v33 }
 0xd8d   :  { %8745 = vmatprep.subr.bf16.mxu0 %v15862_v35  ;;  %8835 = vmatpush1.bf16.msra.mxu1 %v17949_v38  ;;  %v18044_v38 = vld [vmem:[#allocation30_spill] sm:$0xff] }
 0xd8e   :  { %8836 = vmatprep.subr.bf16.mxu1 %v17951_v19  ;;  %v18045_v19 = vld [vmem:[#allocation89_spill] sm:$0xff] }
 0xd90   :  { %8746 = vmatpush1.bf16.msra.mxu0 %v15869_v56 }
 0xd91   :  { %8747 = vmatprep.subr.bf16.mxu0 %v15874_v13  ;;  %8837 = vmatpush1.bf16.msra.mxu1 %v17952_v17  ;;  %v18046_v17 = vld [vmem:[#allocation36_spill] sm:$0xff] }
 0xd92   :  { %8838 = vmatprep.subr.bf16.mxu1 %v17953_v57  ;;  %v18047_v57 = vld [vmem:[#allocation48_spill] sm:$0xff] }
 0xd94   :  { %8748 = vmatpush1.bf16.msra.mxu0 %v15881_v9 }
 0xd95   :  { %8849 = vmatprep.subr.bf16.mxu0 %v15669_v47  ;;  %8839 = vmatpush1.bf16.msra.mxu1 %v17954_v12  ;;  %v18043_v47 = vld [vmem:[#allocation26_spill] sm:$0xff]  ;;  %v18048_v12 = vld [vmem:[#allocation76_spill] sm:$0xff] }
 0xd96   :  { %8890 = vmatprep.subr.bf16.mxu1 %v17955_v54  ;;  %v18049_v54 = vld [vmem:[#allocation58_spill] sm:$0xff] }
 0xd97   :  { %11305 = vmatmul.mubr.msk.bf16.vlgmr.msra.gmra.mrb[112].mxu0 %vm14024_vm15, %v16160_v20  ;;  %v18054_v20 = vld [vmem:[#allocation86_spill] sm:$0xff] }
 0xd98   :  { %8850 = vmatpush1.bf16.msra.mxu0 %v18036_v53 }
 0xd99   :  { %8851 = vmatprep.subr.bf16.mxu0 %v18037_v10 }
 0xd9c   :  { %8852 = vmatpush1.bf16.msra.mxu0 %v18038_v1 }
 0xd9d   :  { %8853 = vmatprep.subr.bf16.mxu0 %v18039_v63  ;;  %v18069_v63 = vld [vmem:[#allocation67_spill] sm:$0xff] }
 0xda0   :  { %8854 = vmatpush1.bf16.msra.mxu0 %v18040_v32 }
 0xda1   :  { %8855 = vmatprep.subr.bf16.mxu0 %v18041_v37 }
 0xda4   :  { %8856 = vmatpush1.bf16.msra.mxu0 %v18042_v8 }
 0xda5   :  { %8857 = vmatprep.subr.bf16.mxu0 %v18043_v47 }
 0xda8   :  { %8858 = vmatpush1.bf16.msra.mxu0 %v18044_v38  ;;  %v18070_v38 = vld [vmem:[#allocation49_spill] sm:$0xff] }
 0xda9   :  { %8859 = vmatprep.subr.bf16.mxu0 %v18045_v19 }
 0xdac   :  { %8860 = vmatpush1.bf16.msra.mxu0 %v18046_v17 }
 0xdad   :  { %8861 = vmatprep.subr.bf16.mxu0 %v18047_v57 }
 0xdb0   :  { %8862 = vmatpush1.bf16.msra.mxu0 %v18048_v12  ;;  %v18071_v12 = vld [vmem:[#allocation81_spill] sm:$0xff] }
 0xdb1   :  { %8863 = vmatprep.subr.bf16.mxu0 %v18049_v54 }
 0xdb4   :  { %8864 = vmatpush1.bf16.msra.mxu0 %v18050_v51  ;;  %v18072_v51 = vld [vmem:[#allocation110_spill] sm:$0xff] }
 0xdb5   :  { %8865 = vmatprep.subr.bf16.mxu0 %v18051_v0 }
 0xdb8   :  { %8866 = vmatpush1.bf16.msra.mxu0 %v18052_v39 }
 0xdb9   :  { %8867 = vmatprep.subr.bf16.mxu0 %v18053_v52 }
 0xdbc   :  { %8868 = vmatpush1.bf16.msra.mxu0 %v18054_v20 }
 0xdbd   :  { %8869 = vmatprep.subr.bf16.mxu0 %v18055_v27 }
 0xdc0   :  { %8870 = vmatpush1.bf16.msra.mxu0 %v18056_v2 }
 0xdc1   :  { %8871 = vmatprep.subr.bf16.mxu0 %v18057_v58  ;;  %v18073_v58 = vld [vmem:[#allocation128_spill] sm:$0xff] }
 0xdc4   :  { %8872 = vmatpush1.bf16.msra.mxu0 %v18058_v18 }
 0xdc5   :  { %8873 = vmatprep.subr.bf16.mxu0 %v18059_v23 }
 0xdc8   :  { %8874 = vmatpush1.bf16.msra.mxu0 %v18060_v21 }
 0xdc9   :  { %8875 = vmatprep.subr.bf16.mxu0 %v18061_v31  ;;  %v18074_v31 = vld [vmem:[#allocation99_spill] sm:$0xff] }
 0xdcc   :  { %8876 = vmatpush1.bf16.msra.mxu0 %v18062_v46 }
 0xdcd   :  { %8877 = vmatprep.subr.bf16.mxu0 %v18063_v45 }
 0xdd0   :  { %8878 = vmatpush1.bf16.msra.mxu0 %v18064_v16 }
 0xdd1   :  { %8879 = vmatprep.subr.bf16.mxu0 %v18065_v48 }
 0xdd4   :  { %8880 = vmatpush1.bf16.msra.mxu0 %v18066_v4 }
 0xdd5   :  { %8981 = vmatprep.subr.bf16.mxu0 %v16286_v25 }
 0xe2a   :  { %v8669_v41 = vpop.f32.mrb[108].mxu0  ;;  %v8710_v60 = vpop.f32.mrb[104].mxu1 }
 0xe2b   :  { %v8670_v53 = vadd.f32 %v8669_v41, %v18068_v22  ;;  %v8671_v10 = vpop.f32.mrb[109].mxu0  ;;  %v8712_v1 = vpop.f32.mrb[105].mxu1  ;;  %v8711_v18 = vadd.f32 %v8710_v60, %v18073_v58  ;;  %v8631_v41 = vsel %vm307_vm13, %v16146_v28, 0.0  ;;  %v18076_v28 = vld [vmem:[#allocation126_spill] sm:$0xff] }
 0xe2c   :  { %v8672_v32 = vadd.f32 %v8671_v10, %v18069_v63  ;;  %v8713_v37 = vadd.f32 %v8712_v1, %v16137_v59  ;;  %v8673_v8 = vpop.f32.mrb[110].mxu0  ;;  %v8714_v47 = vpop.f32.mrb[106].mxu1 }
 0xe2d   :  { %v8764_v19 = vadd.f32 %v8670_v53, %v18070_v38  ;;  %v8674_v17 = vpop.f32.mrb[111].mxu0  ;;  %v8715_v57 = vpop.f32.mrb[107].mxu1 }
 0xe2e   :  { %v8765_v54 = vadd.f32 %v8672_v32, %v18071_v12  ;;  %v8784_v0 = vadd.f32 %v8713_v37, %v18072_v51 }
 0xe2f   :  { %v11306_v39 = vmul.f32 -1.442695, %v8764_v19 }
 0xe30   :  { %v11307_v52 = vmul.f32 -1.442695, %v8765_v54  ;;  %v11308_v16 = vmul.f32 -1.442695, %v8784_v0 }
 0xe31   :  { %12693 = vpow2.f32 %v11306_v39 }
 0xe32   :  { %12695 = vpow2.f32 %v11307_v52  ;;  %v18077_v52 = vld [vmem:[#allocation127_spill] sm:$0xff] }
 0xe3b   :  { %v12694_v20 = vpop.eup %12693 }
 0xe3c   :  { %v8772_v27 = vadd.f32 1.0, %v12694_v20  ;;  %v12696_v2 = vpop.eup %12695 }
 0xe3d   :  { %v8773_v45 = vadd.f32 1.0, %v12696_v2 }
 0xe3e   :  { %12697 = vrcp.f32 %v8772_v27 }
 0xe48   :  { %v12698_v23 = vpop.eup %12697 }
 0xe49   :  { %v8778_v21 = vmul.f32 %v12698_v23, %v8711_v18  ;;  %v8632_v23 = vsel %vm314_vm12, %v16154_v42, 0.0  ;;  %v16323_v42 = vld [vmem:[#allocation12 + $0x10] ss:$24 sps:$4 sm:$0xff]  }
 0xe4b   :  { %v8779_v46 = vadd.f32 %v8778_v21, %v18074_v31 }
 0xe4d   :  { %12699 = vtanh.f32 %v8779_v46 }
 0xe4e   :  { %12701 = vrcp.f32 %v8773_v45 }
 0xe4f   :  { %12703 = vpow2.f32 %v11308_v16 }
 0xe57   :  { %v12700_v48 = vpop.eup %12699 }
 0xe58   :  { %v8781_v53 = vsub.f32 %v8631_v41, %v12700_v48  ;;  %v12702_v10 = vpop.eup %12701 }
 0xe59   :  { %v12704_v32 = vpop.eup %12703 }
 0xe5a   :  { %v8782_v1 = vmul.f32 %v12702_v10, %v8781_v53  ;;  %v8792_v8 = vadd.f32 1.0, %v12704_v32  ;;  %v16326_v53 = vld [vmem:[#allocation12 + $0x44] ss:$24 sps:$4 sm:$0xff]   ;;  %v16331_v10 = vld [vmem:[#allocation12 + $0x40] ss:$24 sps:$4 sm:$0xff]  }
 0xe5b   :  { %v16339_v32 = vld [vmem:[#allocation12 + $0x70] ss:$24 sps:$4 sm:$0xff]  }
 0xe5c   :  { %v8783_v37 = vadd.f32 %v12700_v48, %v8782_v1  ;;  %12705 = vrcp.f32 %v8792_v8  ;;  %v16334_v1 = vld [vmem:[#allocation12 + $0x74] ss:$24 sps:$4 sm:$0xff]   ;;  %v16347_v8 = vld [vmem:[#allocation12 + $0xa0] ss:$24 sps:$4 sm:$0xff]  }
 0xe5e   :  { %v16302_v60 = vsel %vm308_vm0, %v8783_v37, %v8631_v41  ;;  %v16342_v37 = vld [vmem:[#allocation12 + $0xa4] ss:$24 sps:$4 sm:$0xff]  }
 0xe5f   :  { %v16319_v41 = vpack.c.bf16 %v16302_v60, %v16302_v60 }
 0xe66   :  { %v12706_v12 = vpop.eup %12705 }
 0xe6a   :  { %v8751_v47 = vpop.f32.mrb[112].mxu0 }
 0xe6b   :  { %v8752_v38 = vadd.f32 %v8751_v47, %v16133_v44  ;;  %v8753_v19 = vpop.f32.mrb[113].mxu0  ;;  %v16350_v47 = vld [vmem:[#allocation12 + $0xd4] ss:$24 sps:$4 sm:$0xff]  }
 0xe6c   :  { %v8754_v17 = vadd.f32 %v8753_v19, %v16150_v26  ;;  %v8755_v57 = vpop.f32.mrb[114].mxu0  ;;  %v16357_v19 = vld [vmem:[#allocation12 + $0xd0] ss:$24 sps:$4 sm:$0xff]  }
 0xe6d   :  { %v8785_v54 = vadd.f32 %v8752_v38, %v18076_v28  ;;  %v8756_v51 = vpop.f32.mrb[115].mxu0  ;;  %v16354_v38 = vld [vmem:[#allocation12 + $0xc4] ss:$24 sps:$4 sm:$0xff]   ;;  %v16363_v57 = vld [vmem:[#allocation12 + $0xc0] ss:$24 sps:$4 sm:$0xff]  }
 0xe6e   :  { %v8798_v0 = vmul.f32 %v12706_v12, %v8754_v17  ;;  %v16360_v17 = vld [vmem:[#allocation12 + $0x104] ss:$24 sps:$4 sm:$0xff]   ;;  %v16366_v12 = vld [vmem:[#allocation12 + $0xf4] ss:$24 sps:$4 sm:$0xff]   ;;  %v16369_v28 = vld [vmem:[#allocation12 + $0x100] ss:$24 sps:$4 sm:$0xff]  }
 0xe6f   :  { %v11309_v39 = vmul.f32 -1.442695, %v8785_v54  ;;  %v16372_v54 = vld [vmem:[#allocation12 + $0x134] ss:$24 sps:$4 sm:$0xff]   ;;  %v16375_v51 = vld [vmem:[#allocation12 + $0xf0] ss:$24 sps:$4 sm:$0xff]  }
 0xe70   :  { %v8799_v20 = vadd.f32 %v8798_v0, %v18077_v52  ;;  %v16378_v0 = vld [vmem:[#allocation12 + $0x124] ss:$24 sps:$4 sm:$0xff]  }
 0xe71   :  { %12707 = vpow2.f32 %v11309_v39  ;;  %v16381_v39 = vld [vmem:[#allocation12 + $0x130] ss:$24 sps:$4 sm:$0xff]   ;;  %v16384_v52 = vld [vmem:[#allocation12 + $0x164] ss:$24 sps:$4 sm:$0xff]  }
 0xe72   :  { %12709 = vtanh.f32 %v8799_v20  ;;  %v16387_v20 = vld [vmem:[#allocation12 + $0x120] ss:$24 sps:$4 sm:$0xff]  }
 0xe7b   :  { %v12708_v27 = vpop.eup %12707 }
 0xe7c   :  { %v12710_v2 = vpop.eup %12709  ;;  %v8793_v18 = vadd.f32 1.0, %v12708_v27  ;;  %v16390_v27 = vld [vmem:[#allocation12 + $0x154] ss:$24 sps:$4 sm:$0xff]  }
 0xe7d   :  { %v8801_v21 = vsub.f32 %v8632_v23, %v12710_v2 }
 0xe7e   :  { %12711 = vrcp.f32 %v8793_v18  ;;  %v16398_v18 = vld [vmem:[#allocation12 + $0x184] ss:$24 sps:$4 sm:$0xff]  }
 0xe88   :  { %v12712_v31 = vpop.eup %12711 }
 0xe89   :  { %v8802_v46 = vmul.f32 %v12712_v31, %v8801_v21  ;;  %v16406_v21 = vld [vmem:[#allocation12 + $0x1b4] ss:$24 sps:$4 sm:$0xff]  }
 0xe8a   :  { %v16471_v31 = vld [vmem:[#allocation12 + $0x3c] ss:$24 sps:$4 sm:$0xff]  }
 0xe8b   :  { %v8803_v45 = vadd.f32 %v12710_v2, %v8802_v46  ;;  %v16395_v2 = vld [vmem:[#allocation12 + $0x150] ss:$24 sps:$4 sm:$0xff]   ;;  %18094 = vst [vmem:[#allocation34_spill] sm:$0xff] %v16471_v31  ;;  %v16477_v46 = vld [vmem:[#allocation12 + $0x6c] ss:$24 sps:$4 sm:$0xff]  }
 0xe8c   :  { %18096 = vst [vmem:[#allocation37_spill] sm:$0xff] %v16477_v46 }
 0xe8d   :  { %v16313_v16 = vsel %vm313_vm1, %v8803_v45, %v8632_v23  ;;  %v16403_v23 = vld [vmem:[#allocation12 + $0x180] ss:$24 sps:$4 sm:$0xff]  }
 0xe8e   :  { %v8807_v48 = vpack.c.bf16 %v16313_v16, %v16313_v16  ;;  %v16480_v45 = vld [vmem:[#allocation12 + $0x68] ss:$24 sps:$4 sm:$0xff]  }
 0xe8f   :  { %18097 = vst [vmem:[#allocation77_spill] sm:$0xff] %v16480_v45 }
 0xe90   :  { %8840 = vmatprep.mubr.bf16.mxu1 %v8807_v48  ;;  %8881 = vmatprep.mubr.bf16.mxu0 %v8807_v48 }
 0xe91   :  { %8841 = vmatmul.mubr.bf16.vlgmr.msra.gmra.mrb[108].mxu1 %v16319_v41  ;;  %8882 = vmatmul.mubr.bf16.vlgmr.msra.gmra.mrb[116].mxu0 %v16319_v41 }
 0xe92   :  { %8891 = vmatpush1.bf16.msra.mxu1 %v16323_v42  ;;  %8922 = vmatprep.mubr.bf16.mxu1 %v8807_v48  ;;  %v16483_v48 = vld [vmem:[#allocation12 + $0x9c] ss:$24 sps:$4 sm:$0xff]  }
 0xe93   :  { %8892 = vmatprep.subr.bf16.mxu1 %v16326_v53  ;;  %8982 = vmatpush1.bf16.msra.mxu0 %v16176_v61  ;;  %18098 = vst [vmem:[#allocation63_spill] sm:$0xff] %v16483_v48 }
 0xe94   :  { %8983 = vmatprep.subr.bf16.mxu0 %v16179_v24 }
 0xe96   :  { %8893 = vmatpush1.bf16.msra.mxu1 %v16331_v10 }
 0xe97   :  { %8894 = vmatprep.subr.bf16.mxu1 %v16334_v1  ;;  %8984 = vmatpush1.bf16.msra.mxu0 %v16184_v7 }
 0xe98   :  { %8985 = vmatprep.subr.bf16.mxu0 %v16187_v30 }
 0xe9a   :  { %8895 = vmatpush1.bf16.msra.mxu1 %v16339_v32 }
 0xe9b   :  { %8896 = vmatprep.subr.bf16.mxu1 %v16342_v37  ;;  %8986 = vmatpush1.bf16.msra.mxu0 %v16192_v49 }
 0xe9c   :  { %8987 = vmatprep.subr.bf16.mxu0 %v16195_v6 }
 0xe9e   :  { %8897 = vmatpush1.bf16.msra.mxu1 %v16347_v8 }
 0xe9f   :  { %8898 = vmatprep.subr.bf16.mxu1 %v16350_v47  ;;  %8988 = vmatpush1.bf16.msra.mxu0 %v16200_v11 }
 0xea0   :  { %8989 = vmatprep.subr.bf16.mxu0 %v16354_v38 }
 0xea2   :  { %8899 = vmatpush1.bf16.msra.mxu1 %v16357_v19 }
 0xea3   :  { %8900 = vmatprep.subr.bf16.mxu1 %v16360_v17  ;;  %8990 = vmatpush1.bf16.msra.mxu0 %v16363_v57 }
 0xea4   :  { %8991 = vmatprep.subr.bf16.mxu0 %v16366_v12 }
 0xea6   :  { %8901 = vmatpush1.bf16.msra.mxu1 %v16369_v28 }
 0xea7   :  { %8902 = vmatprep.subr.bf16.mxu1 %v16372_v54  ;;  %8992 = vmatpush1.bf16.msra.mxu0 %v16375_v51 }
 0xea8   :  { %8993 = vmatprep.subr.bf16.mxu0 %v16378_v0 }
 0xeaa   :  { %8903 = vmatpush1.bf16.msra.mxu1 %v16381_v39 }
 0xeab   :  { %8904 = vmatprep.subr.bf16.mxu1 %v16384_v52  ;;  %8994 = vmatpush1.bf16.msra.mxu0 %v16387_v20 }
 0xeac   :  { %8995 = vmatprep.subr.bf16.mxu0 %v16390_v27 }
 0xeae   :  { %8905 = vmatpush1.bf16.msra.mxu1 %v18024_v36  ;;  %v16411_v36 = vld [vmem:[#allocation12 + $0x1b0] ss:$24 sps:$4 sm:$0xff]  }
 0xeaf   :  { %8906 = vmatprep.subr.bf16.mxu1 %v18025_v14  ;;  %8996 = vmatpush1.bf16.msra.mxu0 %v16395_v2  ;;  %18078 = vst [vmem:[#allocation83_spill] sm:$0xff] %v16411_v36  ;;  %v16414_v14 = vld [vmem:[#allocation12 + $0x1e4] ss:$24 sps:$4 sm:$0xff]  }
 0xeb0   :  { %8997 = vmatprep.subr.bf16.mxu0 %v16398_v18  ;;  %18079 = vst [vmem:[#allocation54_spill] sm:$0xff] %v16414_v14 }
 0xeb2   :  { %8907 = vmatpush1.bf16.msra.mxu1 %v18026_v15  ;;  %v16419_v15 = vld [vmem:[#allocation12 + $0x1e0] ss:$24 sps:$4 sm:$0xff]  }
 0xeb3   :  { %8908 = vmatprep.subr.bf16.mxu1 %v18027_v55  ;;  %8998 = vmatpush1.bf16.msra.mxu0 %v16403_v23  ;;  %18080 = vst [vmem:[#allocation71_spill] sm:$0xff] %v16419_v15  ;;  %v16422_v55 = vld [vmem:[#allocation12 + $0x214] ss:$24 sps:$4 sm:$0xff]  }
 0xeb4   :  { %8999 = vmatprep.subr.bf16.mxu0 %v16406_v21  ;;  %18081 = vst [vmem:[#allocation59_spill] sm:$0xff] %v16422_v55 }
 0xeb6   :  { %8909 = vmatpush1.bf16.msra.mxu1 %v18028_v50  ;;  %v16427_v50 = vld [vmem:[#allocation12 + $0x210] ss:$24 sps:$4 sm:$0xff]  }
 0xeb7   :  { %8910 = vmatprep.subr.bf16.mxu1 %v18029_v62  ;;  %9000 = vmatpush1.bf16.msra.mxu0 %v16411_v36  ;;  %18082 = vst [vmem:[#allocation50_spill] sm:$0xff] %v16427_v50  ;;  %v16430_v62 = vld [vmem:[#allocation12 + $0x244] ss:$24 sps:$4 sm:$0xff]  }
 0xeb8   :  { %9001 = vmatprep.subr.bf16.mxu0 %v16414_v14  ;;  %18083 = vst [vmem:[#allocation69_spill] sm:$0xff] %v16430_v62 }
 0xeba   :  { %8911 = vmatpush1.bf16.msra.mxu1 %v18030_v5  ;;  %v16435_v5 = vld [vmem:[#allocation12 + $0x240] ss:$24 sps:$4 sm:$0xff]  }
 0xebb   :  { %8912 = vmatprep.subr.bf16.mxu1 %v18031_v29  ;;  %9002 = vmatpush1.bf16.msra.mxu0 %v16419_v15  ;;  %18084 = vst [vmem:[#allocation53_spill] sm:$0xff] %v16435_v5  ;;  %v16438_v29 = vld [vmem:[#allocation12 + $0x274] ss:$24 sps:$4 sm:$0xff]  }
 0xebc   :  { %9003 = vmatprep.subr.bf16.mxu0 %v16422_v55  ;;  %18085 = vst [vmem:[#allocation74_spill] sm:$0xff] %v16438_v29 }
 0xebe   :  { %8913 = vmatpush1.bf16.msra.mxu1 %v18032_v43  ;;  %v16443_v43 = vld [vmem:[#allocation12 + $0x270] ss:$24 sps:$4 sm:$0xff]  }
 0xebf   :  { %8914 = vmatprep.subr.bf16.mxu1 %v18033_v40  ;;  %9004 = vmatpush1.bf16.msra.mxu0 %v16427_v50  ;;  %18086 = vst [vmem:[#allocation90_spill] sm:$0xff] %v16443_v43  ;;  %v16446_v40 = vld [vmem:[#allocation12 + $0x2a4] ss:$24 sps:$4 sm:$0xff]  }
 0xec0   :  { %9005 = vmatprep.subr.bf16.mxu0 %v16430_v62  ;;  %18087 = vst [vmem:[#allocation39_spill] sm:$0xff] %v16446_v40 }
 0xec2   :  { %8915 = vmatpush1.bf16.msra.mxu1 %v18034_v34  ;;  %v16451_v34 = vld [vmem:[#allocation12 + $0x2a0] ss:$24 sps:$4 sm:$0xff]  }
 0xec3   :  { %8916 = vmatprep.subr.bf16.mxu1 %v18035_v3  ;;  %9006 = vmatpush1.bf16.msra.mxu0 %v16435_v5  ;;  %18088 = vst [vmem:[#allocation32_spill] sm:$0xff] %v16451_v34  ;;  %v16454_v3 = vld [vmem:[#allocation12 + $0x2d4] ss:$24 sps:$4 sm:$0xff]   ;;  %v18126_v5 = vld [vmem:[#allocation106_spill] sm:$0xff] }
 0xec4   :  { %9007 = vmatprep.subr.bf16.mxu0 %v16438_v29  ;;  %18089 = vst [vmem:[#allocation40_spill] sm:$0xff] %v16454_v3  ;;  %v18125_v29 = vld [vmem:[#allocation91_spill] sm:$0xff] }
 0xec6   :  { %8917 = vmatpush1.bf16.msra.mxu1 %v15857_v33  ;;  %v16461_v33 = vld [vmem:[#allocation12 + $0x2d0] ss:$24 sps:$4 sm:$0xff]  }
 0xec7   :  { %8918 = vmatprep.subr.bf16.mxu1 %v15862_v35  ;;  %9008 = vmatpush1.bf16.msra.mxu0 %v16443_v43  ;;  %v16458_v35 = vld [vmem:[#allocation12 + $0xc] ss:$24 sps:$4 sm:$0xff]   ;;  %18091 = vst [vmem:[#allocation51_spill] sm:$0xff] %v16461_v33 }
 0xec8   :  { %9009 = vmatprep.subr.bf16.mxu0 %v16446_v40  ;;  %18090 = vst [vmem:[#allocation75_spill] sm:$0xff] %v16458_v35 }
 0xeca   :  { %8919 = vmatpush1.bf16.msra.mxu1 %v15869_v56  ;;  %v16464_v56 = vld [vmem:[#allocation12 + $0x14] ss:$24 sps:$4 sm:$0xff]  }
 0xecb   :  { %8920 = vmatprep.subr.bf16.mxu1 %v15874_v13  ;;  %9010 = vmatpush1.bf16.msra.mxu0 %v16451_v34  ;;  %18092 = vst [vmem:[#allocation52_spill] sm:$0xff] %v16464_v56  ;;  %v16468_v13 = vld [vmem:[#allocation12 + $0x8] ss:$24 sps:$4 sm:$0xff]   ;;  %v18124_v34 = vld [vmem:[#allocation38_spill] sm:$0xff] }
 0xecc   :  { %9011 = vmatprep.subr.bf16.mxu0 %v16454_v3  ;;  %18093 = vst [vmem:[#allocation84_spill] sm:$0xff] %v16468_v13 }
 0xece   :  { %8921 = vmatpush1.bf16.msra.mxu1 %v15881_v9  ;;  %v16474_v9 = vld [vmem:[#allocation12 + $0x38] ss:$24 sps:$4 sm:$0xff]  }
 0xecf   :  { %9022 = vmatprep.subr.bf16.mxu1 %v16458_v35  ;;  %9012 = vmatpush1.bf16.msra.mxu0 %v16461_v33  ;;  %18095 = vst [vmem:[#allocation93_spill] sm:$0xff] %v16474_v9 }
 0xed0   :  { %9063 = vmatprep.subr.bf16.mxu0 %v16464_v56 }
 0xed1   :  { %8923 = vmatmul.mubr.bf16.vlgmr.msra.gmra.mrb[112].mxu1 %v16319_v41  ;;  %v16486_v41 = vld [vmem:[#allocation12 + $0x98] ss:$24 sps:$4 sm:$0xff]  }
 0xed2   :  { %9023 = vmatpush1.bf16.msra.mxu1 %v16468_v13  ;;  %18099 = vst [vmem:[#allocation46_spill] sm:$0xff] %v16486_v41 }
 0xed3   :  { %9024 = vmatprep.subr.bf16.mxu1 %v16471_v31  ;;  %v16489_v31 = vld [vmem:[#allocation12 + $0xcc] ss:$24 sps:$4 sm:$0xff]  }
 0xed4   :  { %18100 = vst [vmem:[#allocation24_spill] sm:$0xff] %v16489_v31 }
 0xed6   :  { %9025 = vmatpush1.bf16.msra.mxu1 %v16474_v9  ;;  %v16492_v9 = vld [vmem:[#allocation12 + $0xc8] ss:$24 sps:$4 sm:$0xff]  }
 0xed7   :  { %9026 = vmatprep.subr.bf16.mxu1 %v16477_v46  ;;  %18101 = vst [vmem:[#allocation20_spill] sm:$0xff] %v16492_v9  ;;  %v16495_v46 = vld [vmem:[#allocation12 + $0xfc] ss:$24 sps:$4 sm:$0xff]  }
 0xed8   :  { %18102 = vst [vmem:[#allocation45_spill] sm:$0xff] %v16495_v46 }
 0xeda   :  { %9027 = vmatpush1.bf16.msra.mxu1 %v16480_v45  ;;  %v16498_v45 = vld [vmem:[#allocation12 + $0xf8] ss:$24 sps:$4 sm:$0xff]  }
 0xedb   :  { %9028 = vmatprep.subr.bf16.mxu1 %v16483_v48  ;;  %18103 = vst [vmem:[#allocation22_spill] sm:$0xff] %v16498_v45  ;;  %v16501_v48 = vld [vmem:[#allocation12 + $0x12c] ss:$24 sps:$4 sm:$0xff]  }
 0xedc   :  { %18104 = vst [vmem:[#allocation79_spill] sm:$0xff] %v16501_v48 }
 0xede   :  { %9029 = vmatpush1.bf16.msra.mxu1 %v16486_v41  ;;  %v16504_v41 = vld [vmem:[#allocation12 + $0x128] ss:$24 sps:$4 sm:$0xff]  }
 0xedf   :  { %9030 = vmatprep.subr.bf16.mxu1 %v16489_v31  ;;  %18105 = vst [vmem:[#allocation57_spill] sm:$0xff] %v16504_v41  ;;  %v16507_v31 = vld [vmem:[#allocation12 + $0x15c] ss:$24 sps:$4 sm:$0xff]  }
 0xee0   :  { %18106 = vst [vmem:[#allocation56_spill] sm:$0xff] %v16507_v31 }
 0xee2   :  { %9031 = vmatpush1.bf16.msra.mxu1 %v16492_v9  ;;  %v16510_v9 = vld [vmem:[#allocation12 + $0x158] ss:$24 sps:$4 sm:$0xff]  }
 0xee3   :  { %9032 = vmatprep.subr.bf16.mxu1 %v16495_v46  ;;  %18107 = vst [vmem:[#allocation72_spill] sm:$0xff] %v16510_v9  ;;  %v16513_v46 = vld [vmem:[#allocation12 + $0x18c] ss:$24 sps:$4 sm:$0xff]  }
 0xee4   :  { %18108 = vst [vmem:[#allocation61_spill] sm:$0xff] %v16513_v46 }
 0xee6   :  { %9033 = vmatpush1.bf16.msra.mxu1 %v16498_v45  ;;  %v16516_v45 = vld [vmem:[#allocation12 + $0x188] ss:$24 sps:$4 sm:$0xff]  }
 0xee7   :  { %9034 = vmatprep.subr.bf16.mxu1 %v16501_v48  ;;  %18109 = vst [vmem:[#allocation60_spill] sm:$0xff] %v16516_v45  ;;  %v16519_v48 = vld [vmem:[#allocation12 + $0x1bc] ss:$24 sps:$4 sm:$0xff]  }
 0xee8   :  { %18110 = vst [vmem:[#allocation70_spill] sm:$0xff] %v16519_v48 }
 0xeea   :  { %9035 = vmatpush1.bf16.msra.mxu1 %v16504_v41  ;;  %v16522_v41 = vld [vmem:[#allocation12 + $0x1b8] ss:$24 sps:$4 sm:$0xff]  }
 0xeeb   :  { %9036 = vmatprep.subr.bf16.mxu1 %v16507_v31  ;;  %18111 = vst [vmem:[#allocation73_spill] sm:$0xff] %v16522_v41  ;;  %v16525_v31 = vld [vmem:[#allocation12 + $0x1ec] ss:$24 sps:$4 sm:$0xff]  }
 0xeec   :  { %18112 = vst [vmem:[#allocation26_spill] sm:$0xff] %v16525_v31 }
 0xeee   :  { %9037 = vmatpush1.bf16.msra.mxu1 %v16510_v9  ;;  %v16528_v9 = vld [vmem:[#allocation12 + $0x1e8] ss:$24 sps:$4 sm:$0xff]  }
 0xeef   :  { %9038 = vmatprep.subr.bf16.mxu1 %v16513_v46  ;;  %18113 = vst [vmem:[#allocation30_spill] sm:$0xff] %v16528_v9  ;;  %v16531_v46 = vld [vmem:[#allocation12 + $0x21c] ss:$24 sps:$4 sm:$0xff]  }
 0xef0   :  { %18114 = vst [vmem:[#allocation89_spill] sm:$0xff] %v16531_v46 }
 0xef2   :  { %9039 = vmatpush1.bf16.msra.mxu1 %v16516_v45  ;;  %v16534_v45 = vld [vmem:[#allocation12 + $0x218] ss:$24 sps:$4 sm:$0xff]  }
 0xef3   :  { %9040 = vmatprep.subr.bf16.mxu1 %v16519_v48  ;;  %18115 = vst [vmem:[#allocation36_spill] sm:$0xff] %v16534_v45  ;;  %v16537_v48 = vld [vmem:[#allocation12 + $0x24c] ss:$24 sps:$4 sm:$0xff]  }
 0xef4   :  { %18116 = vst [vmem:[#allocation48_spill] sm:$0xff] %v16537_v48 }
 0xef6   :  { %9041 = vmatpush1.bf16.msra.mxu1 %v16522_v41  ;;  %v16540_v41 = vld [vmem:[#allocation12 + $0x248] ss:$24 sps:$4 sm:$0xff]  }
 0xef7   :  { %9042 = vmatprep.subr.bf16.mxu1 %v16525_v31  ;;  %18117 = vst [vmem:[#allocation76_spill] sm:$0xff] %v16540_v41  ;;  %v16543_v31 = vld [vmem:[#allocation12 + $0x27c] ss:$24 sps:$4 sm:$0xff]  }
 0xef8   :  { %18118 = vst [vmem:[#allocation58_spill] sm:$0xff] %v16543_v31 }
 0xefa   :  { %9043 = vmatpush1.bf16.msra.mxu1 %v16528_v9  ;;  %v16546_v9 = vld [vmem:[#allocation12 + $0x278] ss:$24 sps:$4 sm:$0xff]  }
 0xefb   :  { %9044 = vmatprep.subr.bf16.mxu1 %v16531_v46  ;;  %18119 = vst [vmem:[#allocation88_spill] sm:$0xff] %v16546_v9  ;;  %v16549_v46 = vld [vmem:[#allocation12 + $0x2ac] ss:$24 sps:$4 sm:$0xff]  }
 0xefc   :  { %18120 = vst [vmem:[#allocation96_spill] sm:$0xff] %v16549_v46 }
 0xefe   :  { %9045 = vmatpush1.bf16.msra.mxu1 %v16534_v45  ;;  %v16552_v45 = vld [vmem:[#allocation12 + $0x2a8] ss:$24 sps:$4 sm:$0xff]  }
 0xeff   :  { %9046 = vmatprep.subr.bf16.mxu1 %v16537_v48  ;;  %18121 = vst [vmem:[#allocation85_spill] sm:$0xff] %v16552_v45  ;;  %v16555_v48 = vld [vmem:[#allocation12 + $0x2dc] ss:$24 sps:$4 sm:$0xff]  }
 0xf00   :  { %18122 = vst [vmem:[#allocation33_spill] sm:$0xff] %v16555_v48 }
 0xf02   :  { %9047 = vmatpush1.bf16.msra.mxu1 %v16540_v41  ;;  %v16558_v41 = vld [vmem:[#allocation12 + $0x2d8] ss:$24 sps:$4 sm:$0xff]  }
 0xf03   :  { %9048 = vmatprep.subr.bf16.mxu1 %v16543_v31  ;;  %18123 = vst [vmem:[#allocation86_spill] sm:$0xff] %v16558_v41 }
 0xf06   :  { %9049 = vmatpush1.bf16.msra.mxu1 %v16546_v9 }
 0xf07   :  { %9050 = vmatprep.subr.bf16.mxu1 %v16549_v46 }
 0xf0a   :  { %9051 = vmatpush1.bf16.msra.mxu1 %v16552_v45 }
 0xf0b   :  { %9052 = vmatprep.subr.bf16.mxu1 %v16555_v48 }
 0xf0e   :  { %9053 = vmatpush1.bf16.msra.mxu1 %v16558_v41 }
 0xf0f   :  { %9154 = vmatprep.subr.bf16.mxu1 %v16286_v25 }
 0xf64   :  { %v8842_v31 = vpop.f32.mrb[108].mxu1  ;;  %v8883_v9 = vpop.f32.mrb[116].mxu0 }
 0xf65   :  { %v8843_v13 = vadd.f32 %v8842_v31, %v18068_v22  ;;  %v8844_v56 = vpop.f32.mrb[109].mxu1  ;;  %v8885_v46 = vpop.f32.mrb[117].mxu0 }
 0xf66   :  { %v8845_v33 = vadd.f32 %v8844_v56, %v18069_v63  ;;  %v8886_v45 = vadd.f32 %v8885_v46, %v16137_v59  ;;  %v8846_v35 = vpop.f32.mrb[110].mxu1  ;;  %v8887_v3 = vpop.f32.mrb[118].mxu0  ;;  %v8884_v46 = vadd.f32 %v8883_v9, %v18073_v58  ;;  %v18127_v59 = vld [vmem:[#allocation87_spill] sm:$0xff] }
 0xf67   :  { %v8937_v48 = vadd.f32 %v8843_v13, %v18124_v34  ;;  %v8847_v40 = vpop.f32.mrb[111].mxu1  ;;  %v8888_v43 = vpop.f32.mrb[119].mxu0 }
 0xf68   :  { %v8938_v41 = vadd.f32 %v8845_v33, %v18125_v29  ;;  %v8957_v25 = vadd.f32 %v8886_v45, %v18126_v5 }
 0xf69   :  { %v11310_v62 = vmul.f32 -1.442695, %v8937_v48 }
 0xf6a   :  { %v11311_v50 = vmul.f32 -1.442695, %v8938_v41  ;;  %v11312_v43 = vmul.f32 -1.442695, %v8957_v25  ;;  %v18128_v25 = vld [vmem:[#allocation124_spill] sm:$0xff] }
 0xf6b   :  { %12713 = vpow2.f32 %v11310_v62 }
 0xf6c   :  { %12715 = vpow2.f32 %v11311_v50 }
 0xf75   :  { %v12714_v31 = vpop.eup %12713 }
 0xf76   :  { %v8945_v22 = vadd.f32 1.0, %v12714_v31  ;;  %v12716_v56 = vpop.eup %12715 }
 0xf77   :  { %v8946_v40 = vadd.f32 1.0, %v12716_v56 }
 0xf78   :  { %12717 = vrcp.f32 %v8945_v22 }
 0xf82   :  { %v12718_v35 = vpop.eup %12717 }
 0xf83   :  { %v8951_v3 = vmul.f32 %v12718_v35, %v8884_v46 }
 0xf85   :  { %v8952_v34 = vadd.f32 %v8951_v3, %v18127_v59 }
 0xf87   :  { %12719 = vtanh.f32 %v8952_v34  ;;  %v18129_v34 = vld [vmem:[#allocation125_spill] sm:$0xff] }
 0xf88   :  { %12721 = vrcp.f32 %v8946_v40 }
 0xf89   :  { %12723 = vpow2.f32 %v11312_v43 }
 0xf91   :  { %v12720_v5 = vpop.eup %12719 }
 0xf92   :  { %v8954_v62 = vsub.f32 %v16302_v60, %v12720_v5  ;;  %v12722_v29 = vpop.eup %12721 }
 0xf93   :  { %v12724_v13 = vpop.eup %12723 }
 0xf94   :  { %v8955_v33 = vmul.f32 %v12722_v29, %v8954_v62  ;;  %v8965_v22 = vadd.f32 1.0, %v12724_v13 }
 0xf96   :  { %v8956_v50 = vadd.f32 %v12720_v5, %v8955_v33  ;;  %12725 = vrcp.f32 %v8965_v22 }
 0xfa0   :  { %v12726_v31 = vpop.eup %12725 }
 0xfa4   :  { %v8924_v45 = vpop.f32.mrb[112].mxu1 }
 0xfa5   :  { %v8925_v9 = vadd.f32 %v8924_v45, %v16133_v44  ;;  %v8926_v48 = vpop.f32.mrb[113].mxu1  ;;  %v16579_v45 = vsel %vm309_vm2, %v8956_v50, %v16302_v60  ;;  %v16622_v60 = vld [vmem:[#allocation12 + $0x160] ss:$24 sps:$4 sm:$0xff]   ;;  %v16630_v50 = vld [vmem:[#allocation12 + $0x190] ss:$24 sps:$4 sm:$0xff]  }
 0xfa6   :  { %v8927_v59 = vadd.f32 %v8926_v48, %v16150_v26  ;;  %v8928_v41 = vpop.f32.mrb[114].mxu1 }
 0xfa7   :  { %v8958_v56 = vadd.f32 %v8925_v9, %v18128_v25  ;;  %v8929_v46 = vpop.f32.mrb[115].mxu1  ;;  %v16633_v41 = vld [vmem:[#allocation12 + $0x1c4] ss:$24 sps:$4 sm:$0xff]   ;;  %v16641_v25 = vld [vmem:[#allocation12 + $0x1f4] ss:$24 sps:$4 sm:$0xff]  }
 0xfa8   :  { %v8971_v35 = vmul.f32 %v12726_v31, %v8927_v59  ;;  %v16590_v59 = vpack.c.bf16 %v16579_v45, %v16579_v45  ;;  %v16638_v31 = vld [vmem:[#allocation12 + $0x1c0] ss:$24 sps:$4 sm:$0xff]   ;;  %18131 = vst [vmem:[#allocation66_spill] sm:$0xff] %v16641_v25  ;;  %v16649_v46 = vld [vmem:[#allocation12 + $0x224] ss:$24 sps:$4 sm:$0xff]  }
 0xfa9   :  { %v11313_v3 = vmul.f32 -1.442695, %v8958_v56  ;;  %18130 = vst [vmem:[#allocation78_spill] sm:$0xff] %v16638_v31  ;;  %v16646_v56 = vld [vmem:[#allocation12 + $0x1f0] ss:$24 sps:$4 sm:$0xff]   ;;  %18133 = vst [vmem:[#allocation25_spill] sm:$0xff] %v16649_v46 }
 0xfaa   :  { %v8972_v40 = vadd.f32 %v8971_v35, %v18129_v34  ;;  %18132 = vst [vmem:[#allocation64_spill] sm:$0xff] %v16646_v56  ;;  %v16654_v35 = vld [vmem:[#allocation12 + $0x220] ss:$24 sps:$4 sm:$0xff]  }
 0xfab   :  { %12727 = vpow2.f32 %v11313_v3  ;;  %18134 = vst [vmem:[#allocation21_spill] sm:$0xff] %v16654_v35  ;;  %v16657_v3 = vld [vmem:[#allocation12 + $0x254] ss:$24 sps:$4 sm:$0xff]   ;;  %v18136_v34 = vld [vmem:[#allocation50_spill] sm:$0xff] }
 0xfac   :  { %12729 = vtanh.f32 %v8972_v40  ;;  %18135 = vst [vmem:[#allocation68_spill] sm:$0xff] %v16657_v3  ;;  %v18137_v40 = vld [vmem:[#allocation69_spill] sm:$0xff] }
 0xfb5   :  { %v12728_v43 = vpop.eup %12727 }
 0xfb6   :  { %v8966_v5 = vadd.f32 1.0, %v12728_v43  ;;  %v12730_v62 = vpop.eup %12729  ;;  %v16662_v43 = vld [vmem:[#allocation12 + $0x250] ss:$24 sps:$4 sm:$0xff]  }
 0xfb7   :  { %v8974_v29 = vsub.f32 %v16313_v16, %v12730_v62  ;;  %18138 = vst [vmem:[#allocation23_spill] sm:$0xff] %v16662_v43 }
 0xfb8   :  { %12731 = vrcp.f32 %v8966_v5  ;;  %v16665_v5 = vld [vmem:[#allocation12 + $0x284] ss:$24 sps:$4 sm:$0xff]  }
 0xfb9   :  { %18139 = vst [vmem:[#allocation98_spill] sm:$0xff] %v16665_v5 }
 0xfc2   :  { %v12732_v33 = vpop.eup %12731 }
 0xfc3   :  { %v8975_v13 = vmul.f32 %v12732_v33, %v8974_v29  ;;  %v18141_v29 = vld [vmem:[#allocation74_spill] sm:$0xff] }
 0xfc4   :  { %v16670_v33 = vld [vmem:[#allocation12 + $0x280] ss:$24 sps:$4 sm:$0xff]  }
 0xfc5   :  { %v8976_v22 = vadd.f32 %v12730_v62, %v8975_v13  ;;  %v18140_v62 = vld [vmem:[#allocation53_spill] sm:$0xff]  ;;  %18142 = vst [vmem:[#allocation62_spill] sm:$0xff] %v16670_v33 }
 0xfc6   :  { %v16673_v13 = vld [vmem:[#allocation12 + $0x2b4] ss:$24 sps:$4 sm:$0xff]  }
 0xfc7   :  { %v16584_v9 = vsel %vm312_vm3, %v8976_v22, %v16313_v16  ;;  %v16625_v16 = vld [vmem:[#allocation12 + $0x194] ss:$24 sps:$4 sm:$0xff]   ;;  %18143 = vst [vmem:[#allocation28_spill] sm:$0xff] %v16673_v13  ;;  %v18144_v22 = vld [vmem:[#allocation90_spill] sm:$0xff] }
 0xfc8   :  { %v8980_v48 = vpack.c.bf16 %v16584_v9, %v16584_v9 }
 0xfca   :  { %9013 = vmatprep.mubr.bf16.mxu0 %v8980_v48  ;;  %9054 = vmatprep.mubr.bf16.mxu1 %v8980_v48 }
 0xfcb   :  { %9014 = vmatmul.mubr.bf16.vlgmr.msra.gmra.mrb[120].mxu0 %v16590_v59  ;;  %9055 = vmatmul.mubr.bf16.vlgmr.msra.gmra.mrb[116].mxu1 %v16590_v59 }
 0xfcc   :  { %9064 = vmatpush1.bf16.msra.mxu0 %v16323_v42  ;;  %9095 = vmatprep.mubr.bf16.mxu0 %v8980_v48  ;;  %v18145_v48 = vld [vmem:[#allocation39_spill] sm:$0xff] }
 0xfcd   :  { %9065 = vmatprep.subr.bf16.mxu0 %v16326_v53  ;;  %9155 = vmatpush1.bf16.msra.mxu1 %v16176_v61 }
 0xfce   :  { %9156 = vmatprep.subr.bf16.mxu1 %v16179_v24 }
 0xfd0   :  { %9066 = vmatpush1.bf16.msra.mxu0 %v16331_v10 }
 0xfd1   :  { %9067 = vmatprep.subr.bf16.mxu0 %v16334_v1  ;;  %9157 = vmatpush1.bf16.msra.mxu1 %v16184_v7 }
 0xfd2   :  { %9158 = vmatprep.subr.bf16.mxu1 %v16187_v30 }
 0xfd4   :  { %9068 = vmatpush1.bf16.msra.mxu0 %v16339_v32 }
 0xfd5   :  { %9069 = vmatprep.subr.bf16.mxu0 %v16342_v37  ;;  %9159 = vmatpush1.bf16.msra.mxu1 %v16192_v49 }
 0xfd6   :  { %9160 = vmatprep.subr.bf16.mxu1 %v16195_v6 }
 0xfd8   :  { %9070 = vmatpush1.bf16.msra.mxu0 %v16347_v8 }
 0xfd9   :  { %9071 = vmatprep.subr.bf16.mxu0 %v16350_v47  ;;  %9161 = vmatpush1.bf16.msra.mxu1 %v16200_v11 }
 0xfda   :  { %9162 = vmatprep.subr.bf16.mxu1 %v16354_v38 }
 0xfdc   :  { %9072 = vmatpush1.bf16.msra.mxu0 %v16357_v19 }
 0xfdd   :  { %9073 = vmatprep.subr.bf16.mxu0 %v16360_v17  ;;  %9163 = vmatpush1.bf16.msra.mxu1 %v16363_v57 }
 0xfde   :  { %9164 = vmatprep.subr.bf16.mxu1 %v16366_v12 }
 0xfe0   :  { %9074 = vmatpush1.bf16.msra.mxu0 %v16369_v28 }
 0xfe1   :  { %9075 = vmatprep.subr.bf16.mxu0 %v16372_v54  ;;  %9165 = vmatpush1.bf16.msra.mxu1 %v16375_v51 }
 0xfe2   :  { %9166 = vmatprep.subr.bf16.mxu1 %v16378_v0 }
 0xfe4   :  { %9076 = vmatpush1.bf16.msra.mxu0 %v16381_v39 }
 0xfe5   :  { %9077 = vmatprep.subr.bf16.mxu0 %v16384_v52  ;;  %9167 = vmatpush1.bf16.msra.mxu1 %v16387_v20 }
 0xfe6   :  { %9168 = vmatprep.subr.bf16.mxu1 %v16390_v27 }
 0xfe8   :  { %9078 = vmatpush1.bf16.msra.mxu0 %v16622_v60 }
 0xfe9   :  { %9079 = vmatprep.subr.bf16.mxu0 %v16625_v16  ;;  %9169 = vmatpush1.bf16.msra.mxu1 %v16395_v2 }
 0xfea   :  { %9170 = vmatprep.subr.bf16.mxu1 %v16398_v18 }
 0xfec   :  { %9080 = vmatpush1.bf16.msra.mxu0 %v16630_v50 }
 0xfed   :  { %9081 = vmatprep.subr.bf16.mxu0 %v16633_v41  ;;  %9171 = vmatpush1.bf16.msra.mxu1 %v16403_v23 }
 0xfee   :  { %9172 = vmatprep.subr.bf16.mxu1 %v16406_v21 }
 0xff0   :  { %9082 = vmatpush1.bf16.msra.mxu0 %v16638_v31 }
 0xff1   :  { %9083 = vmatprep.subr.bf16.mxu0 %v16641_v25  ;;  %9173 = vmatpush1.bf16.msra.mxu1 %v16411_v36  ;;  %v18190_v36 = vld [vmem:[#allocation102_spill] sm:$0xff] }
 0xff2   :  { %9174 = vmatprep.subr.bf16.mxu1 %v16414_v14  ;;  %v18189_v14 = vld [vmem:[#allocation42_spill] sm:$0xff] }
 0xff4   :  { %9084 = vmatpush1.bf16.msra.mxu0 %v16646_v56 }
 0xff5   :  { %9085 = vmatprep.subr.bf16.mxu0 %v16649_v46  ;;  %9175 = vmatpush1.bf16.msra.mxu1 %v16419_v15  ;;  %v18188_v46 = vld [vmem:[#allocation55_spill] sm:$0xff] }
 0xff6   :  { %9176 = vmatprep.subr.bf16.mxu1 %v16422_v55  ;;  %v18187_v55 = vld [vmem:[#allocation129_spill] sm:$0xff] }
 0xff8   :  { %9086 = vmatpush1.bf16.msra.mxu0 %v16654_v35 }
 0xff9   :  { %9087 = vmatprep.subr.bf16.mxu0 %v16657_v3  ;;  %9177 = vmatpush1.bf16.msra.mxu1 %v18136_v34  ;;  %v18159_v34 = vld [vmem:[#allocation63_spill] sm:$0xff]  ;;  %v18186_v3 = vld [vmem:[#allocation65_spill] sm:$0xff] }
 0xffa   :  { %9178 = vmatprep.subr.bf16.mxu1 %v18137_v40  ;;  %v18155_v40 = vld [vmem:[#allocation34_spill] sm:$0xff] }
 0xffc   :  { %9088 = vmatpush1.bf16.msra.mxu0 %v16662_v43  ;;  %v16678_v43 = vld [vmem:[#allocation12 + $0x2b0] ss:$24 sps:$4 sm:$0xff]  }
 0xffd   :  { %9089 = vmatprep.subr.bf16.mxu0 %v16665_v5  ;;  %9179 = vmatpush1.bf16.msra.mxu1 %v18140_v62  ;;  %18146 = vst [vmem:[#allocation97_spill] sm:$0xff] %v16678_v43  ;;  %v16681_v5 = vld [vmem:[#allocation12 + $0x2e4] ss:$24 sps:$4 sm:$0xff]   ;;  %v18149_v62 = vld [vmem:[#allocation40_spill] sm:$0xff] }
 0xffe   :  { %9180 = vmatprep.subr.bf16.mxu1 %v18141_v29  ;;  %18147 = vst [vmem:[#allocation47_spill] sm:$0xff] %v16681_v5  ;;  %v18148_v29 = vld [vmem:[#allocation32_spill] sm:$0xff] }
0x1000   :  { %9090 = vmatpush1.bf16.msra.mxu0 %v16670_v33  ;;  %v16686_v33 = vld [vmem:[#allocation12 + $0x2e0] ss:$24 sps:$4 sm:$0xff]  }
0x1001   :  { %9091 = vmatprep.subr.bf16.mxu0 %v16673_v13  ;;  %9181 = vmatpush1.bf16.msra.mxu1 %v18144_v22  ;;  %18150 = vst [vmem:[#allocation67_spill] sm:$0xff] %v16686_v33  ;;  %v18151_v13 = vld [vmem:[#allocation75_spill] sm:$0xff] }
0x1002   :  { %9182 = vmatprep.subr.bf16.mxu1 %v18145_v48  ;;  %v18152_v22 = vld [vmem:[#allocation51_spill] sm:$0xff]  ;;  %v18153_v48 = vld [vmem:[#allocation52_spill] sm:$0xff] }
0x1004   :  { %9092 = vmatpush1.bf16.msra.mxu0 %v16678_v43  ;;  %v18154_v43 = vld [vmem:[#allocation84_spill] sm:$0xff] }
0x1005   :  { %9093 = vmatprep.subr.bf16.mxu0 %v16681_v5  ;;  %9183 = vmatpush1.bf16.msra.mxu1 %v18148_v29  ;;  %v18156_v5 = vld [vmem:[#allocation93_spill] sm:$0xff] }
0x1006   :  { %9184 = vmatprep.subr.bf16.mxu1 %v18149_v62  ;;  %v18157_v29 = vld [vmem:[#allocation37_spill] sm:$0xff] }
0x1007   :  { %v18158_v62 = vld [vmem:[#allocation77_spill] sm:$0xff] }
0x1008   :  { %9094 = vmatpush1.bf16.msra.mxu0 %v16686_v33  ;;  %v18160_v33 = vld [vmem:[#allocation46_spill] sm:$0xff] }
0x1009   :  { %9195 = vmatprep.subr.bf16.mxu0 %v18151_v13  ;;  %9185 = vmatpush1.bf16.msra.mxu1 %v18152_v22  ;;  %v18161_v13 = vld [vmem:[#allocation24_spill] sm:$0xff] }
0x100a   :  { %9236 = vmatprep.subr.bf16.mxu1 %v18153_v48  ;;  %v18162_v22 = vld [vmem:[#allocation20_spill] sm:$0xff]  ;;  %v18163_v48 = vld [vmem:[#allocation45_spill] sm:$0xff] }
0x100b   :  { %9096 = vmatmul.mubr.bf16.vlgmr.msra.gmra.mrb[124].mxu0 %v16590_v59  ;;  %v18164_v59 = vld [vmem:[#allocation22_spill] sm:$0xff] }
0x100c   :  { %9196 = vmatpush1.bf16.msra.mxu0 %v18154_v43  ;;  %v18165_v43 = vld [vmem:[#allocation79_spill] sm:$0xff] }
0x100d   :  { %9197 = vmatprep.subr.bf16.mxu0 %v18155_v40  ;;  %v18166_v40 = vld [vmem:[#allocation57_spill] sm:$0xff] }
0x1010   :  { %9198 = vmatpush1.bf16.msra.mxu0 %v18156_v5  ;;  %v18167_v5 = vld [vmem:[#allocation56_spill] sm:$0xff] }
0x1011   :  { %9199 = vmatprep.subr.bf16.mxu0 %v18157_v29  ;;  %v18168_v29 = vld [vmem:[#allocation72_spill] sm:$0xff] }
0x1014   :  { %9200 = vmatpush1.bf16.msra.mxu0 %v18158_v62  ;;  %v18169_v62 = vld [vmem:[#allocation61_spill] sm:$0xff] }
0x1015   :  { %9201 = vmatprep.subr.bf16.mxu0 %v18159_v34  ;;  %v18170_v34 = vld [vmem:[#allocation60_spill] sm:$0xff] }
0x1018   :  { %9202 = vmatpush1.bf16.msra.mxu0 %v18160_v33  ;;  %v18171_v33 = vld [vmem:[#allocation70_spill] sm:$0xff] }
0x1019   :  { %9203 = vmatprep.subr.bf16.mxu0 %v18161_v13  ;;  %v18172_v13 = vld [vmem:[#allocation73_spill] sm:$0xff] }
0x101c   :  { %9204 = vmatpush1.bf16.msra.mxu0 %v18162_v22  ;;  %v18173_v22 = vld [vmem:[#allocation26_spill] sm:$0xff] }
0x101d   :  { %9205 = vmatprep.subr.bf16.mxu0 %v18163_v48  ;;  %v18174_v48 = vld [vmem:[#allocation30_spill] sm:$0xff] }
0x1020   :  { %9206 = vmatpush1.bf16.msra.mxu0 %v18164_v59  ;;  %v18175_v59 = vld [vmem:[#allocation89_spill] sm:$0xff] }
0x1021   :  { %9207 = vmatprep.subr.bf16.mxu0 %v18165_v43  ;;  %v18176_v43 = vld [vmem:[#allocation36_spill] sm:$0xff] }
0x1024   :  { %9208 = vmatpush1.bf16.msra.mxu0 %v18166_v40  ;;  %v18177_v40 = vld [vmem:[#allocation48_spill] sm:$0xff] }
0x1025   :  { %9209 = vmatprep.subr.bf16.mxu0 %v18167_v5  ;;  %v18178_v5 = vld [vmem:[#allocation76_spill] sm:$0xff] }
0x1028   :  { %9210 = vmatpush1.bf16.msra.mxu0 %v18168_v29  ;;  %v18179_v29 = vld [vmem:[#allocation58_spill] sm:$0xff] }
0x1029   :  { %9211 = vmatprep.subr.bf16.mxu0 %v18169_v62  ;;  %v18180_v62 = vld [vmem:[#allocation88_spill] sm:$0xff] }
0x102c   :  { %9212 = vmatpush1.bf16.msra.mxu0 %v18170_v34  ;;  %v18181_v34 = vld [vmem:[#allocation96_spill] sm:$0xff] }
0x102d   :  { %9213 = vmatprep.subr.bf16.mxu0 %v18171_v33  ;;  %v18182_v33 = vld [vmem:[#allocation85_spill] sm:$0xff] }
0x1030   :  { %9214 = vmatpush1.bf16.msra.mxu0 %v18172_v13  ;;  %v18183_v13 = vld [vmem:[#allocation33_spill] sm:$0xff] }
0x1031   :  { %9215 = vmatprep.subr.bf16.mxu0 %v18173_v22  ;;  %v18184_v22 = vld [vmem:[#allocation86_spill] sm:$0xff] }
0x1034   :  { %9216 = vmatpush1.bf16.msra.mxu0 %v18174_v48  ;;  %v18185_v48 = vld [vmem:[#allocation82_spill] sm:$0xff] }
0x1035   :  { %9217 = vmatprep.subr.bf16.mxu0 %v18175_v59 }
0x1038   :  { %9218 = vmatpush1.bf16.msra.mxu0 %v18176_v43 }
0x1039   :  { %9219 = vmatprep.subr.bf16.mxu0 %v18177_v40 }
0x103c   :  { %9220 = vmatpush1.bf16.msra.mxu0 %v18178_v5 }
0x103d   :  { %9221 = vmatprep.subr.bf16.mxu0 %v18179_v29 }
0x1040   :  { %9222 = vmatpush1.bf16.msra.mxu0 %v18180_v62 }
0x1041   :  { %9223 = vmatprep.subr.bf16.mxu0 %v18181_v34 }
0x1044   :  { %9224 = vmatpush1.bf16.msra.mxu0 %v18182_v33 }
0x1045   :  { %9225 = vmatprep.subr.bf16.mxu0 %v18183_v13 }
0x1048   :  { %9226 = vmatpush1.bf16.msra.mxu0 %v18184_v22 }
0x1049   :  { %9327 = vmatprep.subr.bf16.mxu0 %v18185_v48 }
0x109e   :  { %v9015_v59 = vpop.f32.mrb[120].mxu0  ;;  %v9056_v43 = vpop.f32.mrb[116].mxu1 }
0x109f   :  { %v9016_v40 = vadd.f32 %v9015_v59, %v18186_v3  ;;  %v9017_v35 = vpop.f32.mrb[121].mxu0  ;;  %v9058_v5 = vpop.f32.mrb[117].mxu1 }
0x10a0   :  { %v9018_v29 = vadd.f32 %v9017_v35, %v18069_v63  ;;  %v9059_v62 = vadd.f32 %v9058_v5, %v18187_v55  ;;  %v9019_v15 = vpop.f32.mrb[122].mxu0  ;;  %v9060_v34 = vpop.f32.mrb[118].mxu1  ;;  %v9057_v5 = vadd.f32 %v9056_v43, %v18073_v58  ;;  %v18191_v55 = vld [vmem:[#allocation41_spill] sm:$0xff] }
0x10a1   :  { %v9110_v33 = vadd.f32 %v9016_v40, %v18188_v46  ;;  %v9020_v56 = vpop.f32.mrb[123].mxu0  ;;  %v9061_v13 = vpop.f32.mrb[119].mxu1 }
0x10a2   :  { %v9111_v22 = vadd.f32 %v9018_v29, %v18189_v14  ;;  %v9130_v48 = vadd.f32 %v9059_v62, %v18190_v36 }
0x10a3   :  { %v11314_v25 = vmul.f32 -1.442695, %v9110_v33 }
0x10a4   :  { %v11315_v31 = vmul.f32 -1.442695, %v9111_v22  ;;  %v11316_v40 = vmul.f32 -1.442695, %v9130_v48  ;;  %v18192_v48 = vld [vmem:[#allocation122_spill] sm:$0xff] }
0x10a5   :  { %12733 = vpow2.f32 %v11314_v25 }
0x10a6   :  { %12735 = vpow2.f32 %v11315_v31 }
0x10af   :  { %v12734_v59 = vpop.eup %12733 }
0x10b0   :  { %v9118_v3 = vadd.f32 1.0, %v12734_v59  ;;  %v12736_v35 = vpop.eup %12735 }
0x10b1   :  { %v9119_v56 = vadd.f32 1.0, %v12736_v35 }
0x10b2   :  { %12737 = vrcp.f32 %v9118_v3 }
0x10bc   :  { %v12738_v15 = vpop.eup %12737 }
0x10bd   :  { %v9124_v34 = vmul.f32 %v12738_v15, %v9057_v5 }
0x10bf   :  { %v9125_v46 = vadd.f32 %v9124_v34, %v18191_v55 }
0x10c1   :  { %12739 = vtanh.f32 %v9125_v46  ;;  %v18193_v46 = vld [vmem:[#allocation123_spill] sm:$0xff] }
0x10c2   :  { %12741 = vrcp.f32 %v9119_v56 }
0x10c3   :  { %12743 = vpow2.f32 %v11316_v40 }
0x10cb   :  { %v12740_v36 = vpop.eup %12739 }
0x10cc   :  { %v9127_v14 = vsub.f32 %v16579_v45, %v12740_v36  ;;  %v12742_v25 = vpop.eup %12741 }
0x10cd   :  { %v12744_v29 = vpop.eup %12743 }
0x10ce   :  { %v9128_v62 = vmul.f32 %v12742_v25, %v9127_v14  ;;  %v9138_v3 = vadd.f32 1.0, %v12744_v29 }
0x10d0   :  { %v9129_v31 = vadd.f32 %v12740_v36, %v9128_v62  ;;  %12745 = vrcp.f32 %v9138_v3 }
0x10da   :  { %v12746_v59 = vpop.eup %12745 }
0x10de   :  { %v9097_v33 = vpop.f32.mrb[124].mxu0 }
0x10df   :  { %v9098_v43 = vadd.f32 %v9097_v33, %v16133_v44  ;;  %v9099_v13 = vpop.f32.mrb[125].mxu0  ;;  %v16742_v33 = vsel %vm310_vm4, %v9129_v31, %v16579_v45  ;;  %v18201_v45 = vld [vmem:[#allocation59_spill] sm:$0xff]  ;;  %v18203_v31 = vld [vmem:[#allocation68_spill] sm:$0xff] }
0x10e0   :  { %v9100_v55 = vadd.f32 %v9099_v13, %v16150_v26  ;;  %v9101_v22 = vpop.f32.mrb[126].mxu0 }
0x10e1   :  { %v9131_v35 = vadd.f32 %v9098_v43, %v18192_v48  ;;  %v9102_v5 = vpop.f32.mrb[127].mxu0  ;;  %v18204_v22 = vld [vmem:[#allocation50_spill] sm:$0xff]  ;;  %v18206_v48 = vld [vmem:[#allocation23_spill] sm:$0xff] }
0x10e2   :  { %v9144_v15 = vmul.f32 %v12746_v59, %v9100_v55  ;;  %v16753_v55 = vpack.c.bf16 %v16742_v33, %v16742_v33  ;;  %v18205_v59 = vld [vmem:[#allocation69_spill] sm:$0xff] }
0x10e3   :  { %v11317_v34 = vmul.f32 -1.442695, %v9131_v35  ;;  %v18207_v35 = vld [vmem:[#allocation98_spill] sm:$0xff]  ;;  %v18208_v5 = vld [vmem:[#allocation53_spill] sm:$0xff] }
0x10e4   :  { %v9145_v56 = vadd.f32 %v9144_v15, %v18193_v46  ;;  %v18209_v15 = vld [vmem:[#allocation74_spill] sm:$0xff]  ;;  %v18211_v46 = vld [vmem:[#allocation28_spill] sm:$0xff] }
0x10e5   :  { %12747 = vpow2.f32 %v11317_v34  ;;  %v18210_v34 = vld [vmem:[#allocation62_spill] sm:$0xff] }
0x10e6   :  { %12749 = vtanh.f32 %v9145_v56  ;;  %v18212_v56 = vld [vmem:[#allocation90_spill] sm:$0xff] }
0x10ef   :  { %v12748_v40 = vpop.eup %12747 }
0x10f0   :  { %v9139_v36 = vadd.f32 1.0, %v12748_v40  ;;  %v12750_v14 = vpop.eup %12749  ;;  %v18213_v40 = vld [vmem:[#allocation39_spill] sm:$0xff] }
0x10f1   :  { %v9147_v25 = vsub.f32 %v16584_v9, %v12750_v14 }
0x10f2   :  { %12751 = vrcp.f32 %v9139_v36  ;;  %v18214_v36 = vld [vmem:[#allocation97_spill] sm:$0xff] }
0x10fc   :  { %v12752_v62 = vpop.eup %12751 }
0x10fd   :  { %v9148_v29 = vmul.f32 %v12752_v62, %v9147_v25  ;;  %v18216_v25 = vld [vmem:[#allocation32_spill] sm:$0xff] }
0x10fe   :  { %v18217_v62 = vld [vmem:[#allocation40_spill] sm:$0xff] }
0x10ff   :  { %v9149_v3 = vadd.f32 %v12750_v14, %v9148_v29  ;;  %v18215_v14 = vld [vmem:[#allocation47_spill] sm:$0xff] }
0x1100   :  { %v18218_v29 = vld [vmem:[#allocation67_spill] sm:$0xff] }
0x1101   :  { %v16747_v43 = vsel %vm311_vm5, %v9149_v3, %v16584_v9  ;;  %v18202_v9 = vld [vmem:[#allocation21_spill] sm:$0xff]  ;;  %v18219_v3 = vld [vmem:[#allocation75_spill] sm:$0xff] }
0x1102   :  { %v9153_v13 = vpack.c.bf16 %v16747_v43, %v16747_v43 }
0x1104   :  { %9186 = vmatprep.mubr.bf16.mxu1 %v9153_v13  ;;  %9227 = vmatprep.mubr.bf16.mxu0 %v9153_v13 }
0x1105   :  { %9187 = vmatmul.mubr.bf16.vlgmr.msra.gmra.mrb[120].mxu1 %v16753_v55  ;;  %9228 = vmatmul.mubr.bf16.vlgmr.msra.gmra.mrb[128].mxu0 %v16753_v55 }
0x1106   :  { %9237 = vmatpush1.bf16.msra.mxu1 %v16323_v42  ;;  %9268 = vmatprep.mubr.bf16.mxu1 %v9153_v13  ;;  %v18220_v13 = vld [vmem:[#allocation51_spill] sm:$0xff] }
0x1107   :  { %9238 = vmatprep.subr.bf16.mxu1 %v16326_v53  ;;  %9328 = vmatpush1.bf16.msra.mxu0 %v16176_v61  ;;  %v18194_v61 = vld [vmem:[#allocation78_spill] sm:$0xff] }
0x1108   :  { %9329 = vmatprep.subr.bf16.mxu0 %v16179_v24  ;;  %v18195_v24 = vld [vmem:[#allocation66_spill] sm:$0xff] }
0x110a   :  { %9239 = vmatpush1.bf16.msra.mxu1 %v16331_v10 }
0x110b   :  { %9240 = vmatprep.subr.bf16.mxu1 %v16334_v1  ;;  %9330 = vmatpush1.bf16.msra.mxu0 %v16184_v7  ;;  %v18196_v7 = vld [vmem:[#allocation83_spill] sm:$0xff] }
0x110c   :  { %9331 = vmatprep.subr.bf16.mxu0 %v16187_v30  ;;  %v18197_v30 = vld [vmem:[#allocation54_spill] sm:$0xff] }
0x110e   :  { %9241 = vmatpush1.bf16.msra.mxu1 %v16339_v32 }
0x110f   :  { %9242 = vmatprep.subr.bf16.mxu1 %v16342_v37  ;;  %9332 = vmatpush1.bf16.msra.mxu0 %v16192_v49  ;;  %v18198_v49 = vld [vmem:[#allocation64_spill] sm:$0xff] }
0x1110   :  { %9333 = vmatprep.subr.bf16.mxu0 %v16195_v6  ;;  %v18199_v6 = vld [vmem:[#allocation25_spill] sm:$0xff] }
0x1112   :  { %9243 = vmatpush1.bf16.msra.mxu1 %v16347_v8 }
0x1113   :  { %9244 = vmatprep.subr.bf16.mxu1 %v16350_v47  ;;  %9334 = vmatpush1.bf16.msra.mxu0 %v16200_v11  ;;  %v18200_v11 = vld [vmem:[#allocation71_spill] sm:$0xff] }
0x1114   :  { %9335 = vmatprep.subr.bf16.mxu0 %v16354_v38 }
0x1116   :  { %9245 = vmatpush1.bf16.msra.mxu1 %v16357_v19 }
0x1117   :  { %9246 = vmatprep.subr.bf16.mxu1 %v16360_v17  ;;  %9336 = vmatpush1.bf16.msra.mxu0 %v16363_v57 }
0x1118   :  { %9337 = vmatprep.subr.bf16.mxu0 %v16366_v12 }
0x111a   :  { %9247 = vmatpush1.bf16.msra.mxu1 %v16369_v28 }
0x111b   :  { %9248 = vmatprep.subr.bf16.mxu1 %v16372_v54  ;;  %9338 = vmatpush1.bf16.msra.mxu0 %v16375_v51 }
0x111c   :  { %9339 = vmatprep.subr.bf16.mxu0 %v16378_v0 }
0x111e   :  { %9249 = vmatpush1.bf16.msra.mxu1 %v16381_v39 }
0x111f   :  { %9250 = vmatprep.subr.bf16.mxu1 %v16384_v52  ;;  %9340 = vmatpush1.bf16.msra.mxu0 %v16387_v20 }
0x1120   :  { %9341 = vmatprep.subr.bf16.mxu0 %v16390_v27 }
0x1122   :  { %9251 = vmatpush1.bf16.msra.mxu1 %v16622_v60 }
0x1123   :  { %9252 = vmatprep.subr.bf16.mxu1 %v16625_v16  ;;  %9342 = vmatpush1.bf16.msra.mxu0 %v16395_v2 }
0x1124   :  { %9343 = vmatprep.subr.bf16.mxu0 %v16398_v18 }
0x1126   :  { %9253 = vmatpush1.bf16.msra.mxu1 %v16630_v50 }
0x1127   :  { %9254 = vmatprep.subr.bf16.mxu1 %v16633_v41  ;;  %9344 = vmatpush1.bf16.msra.mxu0 %v16403_v23 }
0x1128   :  { %9345 = vmatprep.subr.bf16.mxu0 %v16406_v21 }
0x112a   :  { %9255 = vmatpush1.bf16.msra.mxu1 %v18194_v61 }
0x112b   :  { %9256 = vmatprep.subr.bf16.mxu1 %v18195_v24  ;;  %9346 = vmatpush1.bf16.msra.mxu0 %v18196_v7 }
0x112c   :  { %9347 = vmatprep.subr.bf16.mxu0 %v18197_v30 }
0x112e   :  { %9257 = vmatpush1.bf16.msra.mxu1 %v18198_v49 }
0x112f   :  { %9258 = vmatprep.subr.bf16.mxu1 %v18199_v6  ;;  %9348 = vmatpush1.bf16.msra.mxu0 %v18200_v11 }
0x1130   :  { %9349 = vmatprep.subr.bf16.mxu0 %v18201_v45 }
0x1132   :  { %9259 = vmatpush1.bf16.msra.mxu1 %v18202_v9 }
0x1133   :  { %9260 = vmatprep.subr.bf16.mxu1 %v18203_v31  ;;  %9350 = vmatpush1.bf16.msra.mxu0 %v18204_v22  ;;  %v18257_v22 = vld [vmem:[#allocation101_spill] sm:$0xff]  ;;  %v18258_v31 = vld [vmem:[#allocation43_spill] sm:$0xff] }
0x1134   :  { %9351 = vmatprep.subr.bf16.mxu0 %v18205_v59 }
0x1136   :  { %9261 = vmatpush1.bf16.msra.mxu1 %v18206_v48  ;;  %v18256_v48 = vld [vmem:[#allocation44_spill] sm:$0xff] }
0x1137   :  { %9262 = vmatprep.subr.bf16.mxu1 %v18207_v35  ;;  %9352 = vmatpush1.bf16.msra.mxu0 %v18208_v5  ;;  %v18255_v5 = vld [vmem:[#allocation129_spill] sm:$0xff] }
0x1138   :  { %9353 = vmatprep.subr.bf16.mxu0 %v18209_v15 }
0x113a   :  { %9263 = vmatpush1.bf16.msra.mxu1 %v18210_v34  ;;  %v18221_v34 = vld [vmem:[#allocation52_spill] sm:$0xff] }
0x113b   :  { %9264 = vmatprep.subr.bf16.mxu1 %v18211_v46  ;;  %9354 = vmatpush1.bf16.msra.mxu0 %v18212_v56  ;;  %v18222_v56 = vld [vmem:[#allocation84_spill] sm:$0xff]  ;;  %v18254_v46 = vld [vmem:[#allocation65_spill] sm:$0xff] }
0x113c   :  { %9355 = vmatprep.subr.bf16.mxu0 %v18213_v40  ;;  %v18223_v40 = vld [vmem:[#allocation34_spill] sm:$0xff] }
0x113e   :  { %9265 = vmatpush1.bf16.msra.mxu1 %v18214_v36  ;;  %v18224_v36 = vld [vmem:[#allocation93_spill] sm:$0xff] }
0x113f   :  { %9266 = vmatprep.subr.bf16.mxu1 %v18215_v14  ;;  %9356 = vmatpush1.bf16.msra.mxu0 %v18216_v25  ;;  %v18225_v14 = vld [vmem:[#allocation37_spill] sm:$0xff] }
0x1140   :  { %9357 = vmatprep.subr.bf16.mxu0 %v18217_v62  ;;  %v18226_v25 = vld [vmem:[#allocation77_spill] sm:$0xff]  ;;  %v18227_v62 = vld [vmem:[#allocation63_spill] sm:$0xff] }
0x1142   :  { %9267 = vmatpush1.bf16.msra.mxu1 %v18218_v29  ;;  %v18228_v29 = vld [vmem:[#allocation46_spill] sm:$0xff] }
0x1143   :  { %9368 = vmatprep.subr.bf16.mxu1 %v18219_v3  ;;  %9358 = vmatpush1.bf16.msra.mxu0 %v18220_v13  ;;  %v18229_v3 = vld [vmem:[#allocation24_spill] sm:$0xff] }
0x1144   :  { %9409 = vmatprep.subr.bf16.mxu0 %v18221_v34  ;;  %v18230_v13 = vld [vmem:[#allocation20_spill] sm:$0xff]  ;;  %v18231_v34 = vld [vmem:[#allocation45_spill] sm:$0xff] }
0x1145   :  { %9269 = vmatmul.mubr.bf16.vlgmr.msra.gmra.mrb[124].mxu1 %v16753_v55  ;;  %v18232_v55 = vld [vmem:[#allocation22_spill] sm:$0xff] }
0x1146   :  { %9369 = vmatpush1.bf16.msra.mxu1 %v18222_v56  ;;  %v18233_v56 = vld [vmem:[#allocation79_spill] sm:$0xff] }
0x1147   :  { %9370 = vmatprep.subr.bf16.mxu1 %v18223_v40  ;;  %v18234_v40 = vld [vmem:[#allocation57_spill] sm:$0xff] }
0x114a   :  { %9371 = vmatpush1.bf16.msra.mxu1 %v18224_v36  ;;  %v18235_v36 = vld [vmem:[#allocation56_spill] sm:$0xff] }
0x114b   :  { %9372 = vmatprep.subr.bf16.mxu1 %v18225_v14  ;;  %v18236_v14 = vld [vmem:[#allocation72_spill] sm:$0xff] }
0x114e   :  { %9373 = vmatpush1.bf16.msra.mxu1 %v18226_v25  ;;  %v18237_v25 = vld [vmem:[#allocation61_spill] sm:$0xff] }
0x114f   :  { %9374 = vmatprep.subr.bf16.mxu1 %v18227_v62  ;;  %v18238_v62 = vld [vmem:[#allocation60_spill] sm:$0xff] }
0x1152   :  { %9375 = vmatpush1.bf16.msra.mxu1 %v18228_v29  ;;  %v18239_v29 = vld [vmem:[#allocation70_spill] sm:$0xff] }
0x1153   :  { %9376 = vmatprep.subr.bf16.mxu1 %v18229_v3  ;;  %v18240_v3 = vld [vmem:[#allocation73_spill] sm:$0xff] }
0x1156   :  { %9377 = vmatpush1.bf16.msra.mxu1 %v18230_v13  ;;  %v18241_v13 = vld [vmem:[#allocation26_spill] sm:$0xff] }
0x1157   :  { %9378 = vmatprep.subr.bf16.mxu1 %v18231_v34  ;;  %v18242_v34 = vld [vmem:[#allocation30_spill] sm:$0xff] }
0x115a   :  { %9379 = vmatpush1.bf16.msra.mxu1 %v18232_v55  ;;  %v18243_v55 = vld [vmem:[#allocation89_spill] sm:$0xff] }
0x115b   :  { %9380 = vmatprep.subr.bf16.mxu1 %v18233_v56  ;;  %v18244_v56 = vld [vmem:[#allocation36_spill] sm:$0xff] }
0x115e   :  { %9381 = vmatpush1.bf16.msra.mxu1 %v18234_v40  ;;  %v18245_v40 = vld [vmem:[#allocation48_spill] sm:$0xff] }
0x115f   :  { %9382 = vmatprep.subr.bf16.mxu1 %v18235_v36  ;;  %v18246_v36 = vld [vmem:[#allocation76_spill] sm:$0xff] }
0x1162   :  { %9383 = vmatpush1.bf16.msra.mxu1 %v18236_v14  ;;  %v18247_v14 = vld [vmem:[#allocation58_spill] sm:$0xff] }
0x1163   :  { %9384 = vmatprep.subr.bf16.mxu1 %v18237_v25  ;;  %v18248_v25 = vld [vmem:[#allocation88_spill] sm:$0xff] }
0x1166   :  { %9385 = vmatpush1.bf16.msra.mxu1 %v18238_v62  ;;  %v18249_v62 = vld [vmem:[#allocation96_spill] sm:$0xff] }
0x1167   :  { %9386 = vmatprep.subr.bf16.mxu1 %v18239_v29  ;;  %v18250_v29 = vld [vmem:[#allocation85_spill] sm:$0xff] }
0x116a   :  { %9387 = vmatpush1.bf16.msra.mxu1 %v18240_v3  ;;  %v18251_v3 = vld [vmem:[#allocation33_spill] sm:$0xff] }
0x116b   :  { %9388 = vmatprep.subr.bf16.mxu1 %v18241_v13  ;;  %v18252_v13 = vld [vmem:[#allocation86_spill] sm:$0xff] }
0x116e   :  { %9389 = vmatpush1.bf16.msra.mxu1 %v18242_v34  ;;  %v18253_v34 = vld [vmem:[#allocation82_spill] sm:$0xff] }
0x116f   :  { %9390 = vmatprep.subr.bf16.mxu1 %v18243_v55 }
0x1172   :  { %9391 = vmatpush1.bf16.msra.mxu1 %v18244_v56 }
0x1173   :  { %9392 = vmatprep.subr.bf16.mxu1 %v18245_v40 }
0x1176   :  { %9393 = vmatpush1.bf16.msra.mxu1 %v18246_v36 }
0x1177   :  { %9394 = vmatprep.subr.bf16.mxu1 %v18247_v14 }
0x117a   :  { %9395 = vmatpush1.bf16.msra.mxu1 %v18248_v25 }
0x117b   :  { %9396 = vmatprep.subr.bf16.mxu1 %v18249_v62 }
0x117e   :  { %9397 = vmatpush1.bf16.msra.mxu1 %v18250_v29 }
0x117f   :  { %9398 = vmatprep.subr.bf16.mxu1 %v18251_v3 }
0x1182   :  { %9399 = vmatpush1.bf16.msra.mxu1 %v18252_v13 }
0x1183   :  { %9500 = vmatprep.subr.bf16.mxu1 %v18253_v34 }
0x11d8   :  { %v9188_v55 = vpop.f32.mrb[120].mxu1  ;;  %v9229_v56 = vpop.f32.mrb[128].mxu0 }
0x11d9   :  { %v9189_v40 = vadd.f32 %v9188_v55, %v18254_v46  ;;  %v9190_v15 = vpop.f32.mrb[121].mxu1  ;;  %v9231_v36 = vpop.f32.mrb[129].mxu0 }
0x11da   :  { %v9191_v14 = vadd.f32 %v9190_v15, %v18069_v63  ;;  %v9232_v25 = vadd.f32 %v9231_v36, %v18255_v5  ;;  %v9192_v35 = vpop.f32.mrb[122].mxu1  ;;  %v9233_v62 = vpop.f32.mrb[130].mxu0  ;;  %v9230_v36 = vadd.f32 %v9229_v56, %v18073_v58  ;;  %v18259_v5 = vld [vmem:[#allocation100_spill] sm:$0xff] }
0x11db   :  { %v9283_v29 = vadd.f32 %v9189_v40, %v18256_v48  ;;  %v9193_v59 = vpop.f32.mrb[123].mxu1  ;;  %v9234_v3 = vpop.f32.mrb[131].mxu0 }
0x11dc   :  { %v9284_v13 = vadd.f32 %v9191_v14, %v18257_v22  ;;  %v9303_v34 = vadd.f32 %v9232_v25, %v18258_v31 }
0x11dd   :  { %v11318_v9 = vmul.f32 -1.442695, %v9283_v29 }
0x11de   :  { %v11319_v45 = vmul.f32 -1.442695, %v9284_v13  ;;  %v11320_v40 = vmul.f32 -1.442695, %v9303_v34  ;;  %v18260_v34 = vld [vmem:[#allocation120_spill] sm:$0xff] }
0x11df   :  { %12753 = vpow2.f32 %v11318_v9 }
0x11e0   :  { %12755 = vpow2.f32 %v11319_v45 }
0x11e9   :  { %v12754_v55 = vpop.eup %12753 }
0x11ea   :  { %v9291_v46 = vadd.f32 1.0, %v12754_v55  ;;  %v12756_v15 = vpop.eup %12755 }
0x11eb   :  { %v9292_v59 = vadd.f32 1.0, %v12756_v15 }
0x11ec   :  { %12757 = vrcp.f32 %v9291_v46 }
0x11f6   :  { %v12758_v35 = vpop.eup %12757 }
0x11f7   :  { %v9297_v62 = vmul.f32 %v12758_v35, %v9230_v36 }
0x11f9   :  { %v9298_v48 = vadd.f32 %v9297_v62, %v18259_v5 }
0x11fb   :  { %12759 = vtanh.f32 %v9298_v48  ;;  %v18261_v48 = vld [vmem:[#allocation121_spill] sm:$0xff] }
0x11fc   :  { %12761 = vrcp.f32 %v9292_v59 }
0x11fd   :  { %12763 = vpow2.f32 %v11320_v40 }
0x1205   :  { %v12760_v31 = vpop.eup %12759 }
0x1206   :  { %v9300_v9 = vsub.f32 %v16742_v33, %v12760_v31  ;;  %v12762_v22 = vpop.eup %12761 }
0x1207   :  { %v12764_v25 = vpop.eup %12763 }
0x1208   :  { %v9301_v14 = vmul.f32 %v12762_v22, %v9300_v9  ;;  %v9311_v46 = vadd.f32 1.0, %v12764_v25 }
0x120a   :  { %v9302_v45 = vadd.f32 %v12760_v31, %v9301_v14  ;;  %12765 = vrcp.f32 %v9311_v46 }
0x1214   :  { %v12766_v55 = vpop.eup %12765 }
0x1218   :  { %v9270_v29 = vpop.f32.mrb[124].mxu1 }
0x1219   :  { %v9271_v56 = vadd.f32 %v9270_v29, %v16133_v44  ;;  %v9272_v3 = vpop.f32.mrb[125].mxu1  ;;  %v16871_v29 = vsel %vm311_vm5, %v9302_v45, %v16742_v33  ;;  %v16888_v33 = vld [vmem:[#allocation12] ss:$24 sps:$4 sm:$0xff]   ;;  %v16896_v45 = vld [vmem:[#allocation12 + $0x30] ss:$24 sps:$4 sm:$0xff]  }
0x121a   :  { %v9273_v5 = vadd.f32 %v9272_v3, %v16150_v26  ;;  %v9274_v13 = vpop.f32.mrb[126].mxu1 }
0x121b   :  { %v9304_v15 = vadd.f32 %v9271_v56, %v18260_v34  ;;  %v9275_v36 = vpop.f32.mrb[127].mxu1  ;;  %v16907_v13 = vld [vmem:[#allocation12 + $0x94] ss:$24 sps:$4 sm:$0xff]   ;;  %v18288_v34 = vld [vmem:[#allocation63_spill] sm:$0xff] }
0x121c   :  { %v9317_v35 = vmul.f32 %v12766_v55, %v9273_v5  ;;  %v16882_v5 = vpack.c.bf16 %v16871_v29, %v16871_v29  ;;  %v18287_v55 = vld [vmem:[#allocation77_spill] sm:$0xff]  ;;  %v18290_v36 = vld [vmem:[#allocation24_spill] sm:$0xff] }
0x121d   :  { %v11321_v62 = vmul.f32 -1.442695, %v9304_v15  ;;  %v18289_v15 = vld [vmem:[#allocation46_spill] sm:$0xff] }
0x121e   :  { %v9318_v59 = vadd.f32 %v9317_v35, %v18261_v48  ;;  %v18291_v35 = vld [vmem:[#allocation20_spill] sm:$0xff]  ;;  %v18293_v48 = vld [vmem:[#allocation22_spill] sm:$0xff] }
0x121f   :  { %12767 = vpow2.f32 %v11321_v62  ;;  %v18292_v62 = vld [vmem:[#allocation45_spill] sm:$0xff] }
0x1220   :  { %12769 = vtanh.f32 %v9318_v59  ;;  %v18294_v59 = vld [vmem:[#allocation79_spill] sm:$0xff] }
0x1229   :  { %v12768_v40 = vpop.eup %12767 }
0x122a   :  { %v9312_v31 = vadd.f32 1.0, %v12768_v40  ;;  %v12770_v9 = vpop.eup %12769  ;;  %v18295_v40 = vld [vmem:[#allocation57_spill] sm:$0xff] }
0x122b   :  { %v9320_v22 = vsub.f32 %v16747_v43, %v12770_v9 }
0x122c   :  { %12771 = vrcp.f32 %v9312_v31  ;;  %v18296_v31 = vld [vmem:[#allocation56_spill] sm:$0xff] }
0x1236   :  { %v12772_v14 = vpop.eup %12771 }
0x1237   :  { %v9321_v25 = vmul.f32 %v12772_v14, %v9320_v22  ;;  %v18298_v22 = vld [vmem:[#allocation61_spill] sm:$0xff]  ;;  %v18299_v14 = vld [vmem:[#allocation60_spill] sm:$0xff] }
0x1239   :  { %v9322_v46 = vadd.f32 %v12770_v9, %v9321_v25  ;;  %v18297_v9 = vld [vmem:[#allocation72_spill] sm:$0xff]  ;;  %v18300_v25 = vld [vmem:[#allocation70_spill] sm:$0xff] }
0x123b   :  { %v16876_v56 = vsel %vm310_vm4, %v9322_v46, %v16747_v43  ;;  %v16891_v43 = vld [vmem:[#allocation12 + $0x34] ss:$24 sps:$4 sm:$0xff]  }
0x123c   :  { %v9326_v3 = vpack.c.bf16 %v16876_v56, %v16876_v56  ;;  %v18301_v46 = vld [vmem:[#allocation73_spill] sm:$0xff] }
0x123e   :  { %9359 = vmatprep.mubr.bf16.mxu0 %v9326_v3  ;;  %9400 = vmatprep.mubr.bf16.mxu1 %v9326_v3 }
0x123f   :  { %9360 = vmatmul.mubr.bf16.vlgmr.msra.gmra.mrb[132].mxu0 %v16882_v5  ;;  %9401 = vmatmul.mubr.bf16.vlgmr.msra.gmra.mrb[128].mxu1 %v16882_v5 }
0x1240   :  { %9410 = vmatpush1.bf16.msra.mxu0 %v16323_v42  ;;  %9441 = vmatprep.mubr.bf16.mxu0 %v9326_v3  ;;  %v16899_v42 = vld [vmem:[#allocation12 + $0x64] ss:$24 sps:$4 sm:$0xff]  }
0x1241   :  { %9411 = vmatprep.subr.bf16.mxu0 %v16326_v53  ;;  %9501 = vmatpush1.bf16.msra.mxu1 %v16888_v33  ;;  %v16904_v53 = vld [vmem:[#allocation12 + $0x60] ss:$24 sps:$4 sm:$0xff]  }
0x1242   :  { %9502 = vmatprep.subr.bf16.mxu1 %v16891_v43  ;;  %v18302_v3 = vld [vmem:[#allocation26_spill] sm:$0xff] }
0x1244   :  { %9412 = vmatpush1.bf16.msra.mxu0 %v16331_v10  ;;  %v16912_v10 = vld [vmem:[#allocation12 + $0x90] ss:$24 sps:$4 sm:$0xff]  }
0x1245   :  { %9413 = vmatprep.subr.bf16.mxu0 %v16334_v1  ;;  %9503 = vmatpush1.bf16.msra.mxu1 %v16896_v45  ;;  %v18262_v1 = vld [vmem:[#allocation59_spill] sm:$0xff] }
0x1246   :  { %9504 = vmatprep.subr.bf16.mxu1 %v16899_v42 }
0x1248   :  { %9414 = vmatpush1.bf16.msra.mxu0 %v16339_v32  ;;  %v18263_v32 = vld [vmem:[#allocation21_spill] sm:$0xff] }
0x1249   :  { %9415 = vmatprep.subr.bf16.mxu0 %v16342_v37  ;;  %9505 = vmatpush1.bf16.msra.mxu1 %v16904_v53  ;;  %v18264_v37 = vld [vmem:[#allocation68_spill] sm:$0xff] }
0x124a   :  { %9506 = vmatprep.subr.bf16.mxu1 %v16907_v13 }
0x124c   :  { %9416 = vmatpush1.bf16.msra.mxu0 %v16347_v8  ;;  %v18265_v8 = vld [vmem:[#allocation50_spill] sm:$0xff] }
0x124d   :  { %9417 = vmatprep.subr.bf16.mxu0 %v16350_v47  ;;  %9507 = vmatpush1.bf16.msra.mxu1 %v16912_v10  ;;  %v18266_v47 = vld [vmem:[#allocation69_spill] sm:$0xff] }
0x124e   :  { %9508 = vmatprep.subr.bf16.mxu1 %v16354_v38  ;;  %v18267_v38 = vld [vmem:[#allocation23_spill] sm:$0xff] }
0x1250   :  { %9418 = vmatpush1.bf16.msra.mxu0 %v16357_v19  ;;  %v18268_v19 = vld [vmem:[#allocation98_spill] sm:$0xff] }
0x1251   :  { %9419 = vmatprep.subr.bf16.mxu0 %v16360_v17  ;;  %9509 = vmatpush1.bf16.msra.mxu1 %v16363_v57  ;;  %v18269_v17 = vld [vmem:[#allocation53_spill] sm:$0xff]  ;;  %v18270_v57 = vld [vmem:[#allocation74_spill] sm:$0xff] }
0x1252   :  { %9510 = vmatprep.subr.bf16.mxu1 %v16366_v12  ;;  %v18271_v12 = vld [vmem:[#allocation62_spill] sm:$0xff] }
0x1254   :  { %9420 = vmatpush1.bf16.msra.mxu0 %v16369_v28  ;;  %v18272_v28 = vld [vmem:[#allocation28_spill] sm:$0xff] }
0x1255   :  { %9421 = vmatprep.subr.bf16.mxu0 %v16372_v54  ;;  %9511 = vmatpush1.bf16.msra.mxu1 %v16375_v51  ;;  %v18273_v54 = vld [vmem:[#allocation90_spill] sm:$0xff]  ;;  %v18274_v51 = vld [vmem:[#allocation39_spill] sm:$0xff] }
0x1256   :  { %9512 = vmatprep.subr.bf16.mxu1 %v16378_v0  ;;  %v18275_v0 = vld [vmem:[#allocation97_spill] sm:$0xff] }
0x1258   :  { %9422 = vmatpush1.bf16.msra.mxu0 %v16381_v39  ;;  %v18276_v39 = vld [vmem:[#allocation47_spill] sm:$0xff] }
0x1259   :  { %9423 = vmatprep.subr.bf16.mxu0 %v16384_v52  ;;  %9513 = vmatpush1.bf16.msra.mxu1 %v16387_v20  ;;  %v18277_v52 = vld [vmem:[#allocation32_spill] sm:$0xff] }
0x125a   :  { %9514 = vmatprep.subr.bf16.mxu1 %v16390_v27  ;;  %v18278_v20 = vld [vmem:[#allocation40_spill] sm:$0xff]  ;;  %v18279_v27 = vld [vmem:[#allocation67_spill] sm:$0xff] }
0x125c   :  { %9424 = vmatpush1.bf16.msra.mxu0 %v16622_v60 }
0x125d   :  { %9425 = vmatprep.subr.bf16.mxu0 %v16625_v16  ;;  %9515 = vmatpush1.bf16.msra.mxu1 %v16395_v2  ;;  %v18280_v2 = vld [vmem:[#allocation75_spill] sm:$0xff] }
0x125e   :  { %9516 = vmatprep.subr.bf16.mxu1 %v16398_v18  ;;  %v18281_v18 = vld [vmem:[#allocation51_spill] sm:$0xff] }
0x1260   :  { %9426 = vmatpush1.bf16.msra.mxu0 %v16630_v50 }
0x1261   :  { %9427 = vmatprep.subr.bf16.mxu0 %v16633_v41  ;;  %9517 = vmatpush1.bf16.msra.mxu1 %v16403_v23  ;;  %v18282_v23 = vld [vmem:[#allocation52_spill] sm:$0xff] }
0x1262   :  { %9518 = vmatprep.subr.bf16.mxu1 %v16406_v21  ;;  %v18283_v21 = vld [vmem:[#allocation84_spill] sm:$0xff] }
0x1264   :  { %9428 = vmatpush1.bf16.msra.mxu0 %v18194_v61 }
0x1265   :  { %9429 = vmatprep.subr.bf16.mxu0 %v18195_v24  ;;  %9519 = vmatpush1.bf16.msra.mxu1 %v18196_v7  ;;  %v18284_v7 = vld [vmem:[#allocation34_spill] sm:$0xff] }
0x1266   :  { %9520 = vmatprep.subr.bf16.mxu1 %v18197_v30  ;;  %v18285_v30 = vld [vmem:[#allocation93_spill] sm:$0xff] }
0x1268   :  { %9430 = vmatpush1.bf16.msra.mxu0 %v18198_v49 }
0x1269   :  { %9431 = vmatprep.subr.bf16.mxu0 %v18199_v6  ;;  %9521 = vmatpush1.bf16.msra.mxu1 %v18200_v11  ;;  %v18286_v11 = vld [vmem:[#allocation37_spill] sm:$0xff] }
0x126a   :  { %9522 = vmatprep.subr.bf16.mxu1 %v18262_v1  ;;  %v18304_v1 = vld [vmem:[#allocation89_spill] sm:$0xff] }
0x126c   :  { %9432 = vmatpush1.bf16.msra.mxu0 %v18263_v32 }
0x126d   :  { %9433 = vmatprep.subr.bf16.mxu0 %v18264_v37  ;;  %9523 = vmatpush1.bf16.msra.mxu1 %v18265_v8  ;;  %v18305_v8 = vld [vmem:[#allocation36_spill] sm:$0xff] }
0x126e   :  { %9524 = vmatprep.subr.bf16.mxu1 %v18266_v47  ;;  %v18306_v47 = vld [vmem:[#allocation48_spill] sm:$0xff] }
0x1270   :  { %9434 = vmatpush1.bf16.msra.mxu0 %v18267_v38 }
0x1271   :  { %9435 = vmatprep.subr.bf16.mxu0 %v18268_v19  ;;  %9525 = vmatpush1.bf16.msra.mxu1 %v18269_v17  ;;  %v18307_v17 = vld [vmem:[#allocation76_spill] sm:$0xff] }
0x1272   :  { %9526 = vmatprep.subr.bf16.mxu1 %v18270_v57  ;;  %v18308_v57 = vld [vmem:[#allocation58_spill] sm:$0xff] }
0x1274   :  { %9436 = vmatpush1.bf16.msra.mxu0 %v18271_v12 }
0x1275   :  { %9437 = vmatprep.subr.bf16.mxu0 %v18272_v28  ;;  %9527 = vmatpush1.bf16.msra.mxu1 %v18273_v54  ;;  %v18309_v54 = vld [vmem:[#allocation88_spill] sm:$0xff] }
0x1276   :  { %9528 = vmatprep.subr.bf16.mxu1 %v18274_v51  ;;  %v18310_v51 = vld [vmem:[#allocation96_spill] sm:$0xff] }
0x1278   :  { %9438 = vmatpush1.bf16.msra.mxu0 %v18275_v0 }
0x1279   :  { %9439 = vmatprep.subr.bf16.mxu0 %v18276_v39  ;;  %9529 = vmatpush1.bf16.msra.mxu1 %v18277_v52  ;;  %v18311_v52 = vld [vmem:[#allocation85_spill] sm:$0xff] }
0x127a   :  { %9530 = vmatprep.subr.bf16.mxu1 %v18278_v20  ;;  %v18312_v20 = vld [vmem:[#allocation33_spill] sm:$0xff] }
0x127c   :  { %9440 = vmatpush1.bf16.msra.mxu0 %v18279_v27 }
0x127d   :  { %9541 = vmatprep.subr.bf16.mxu0 %v18280_v2  ;;  %9531 = vmatpush1.bf16.msra.mxu1 %v18281_v18  ;;  %v18313_v2 = vld [vmem:[#allocation86_spill] sm:$0xff] }
0x127e   :  { %9582 = vmatprep.subr.bf16.mxu1 %v18282_v23  ;;  %v12936_v18 = vld [vmem:[#allocation12 + $0x4] ss:$24 sps:$4 sm:$0xff]  }
0x127f   :  { %9442 = vmatmul.mubr.bf16.vlgmr.msra.gmra.mrb[136].mxu0 %v16882_v5  ;;  %v18303_v5 = vld [vmem:[#allocation30_spill] sm:$0xff] }
0x1280   :  { %9542 = vmatpush1.bf16.msra.mxu0 %v18283_v21 }
0x1281   :  { %9543 = vmatprep.subr.bf16.mxu0 %v18284_v7  ;;  %v18314_v7 = vld [vmem:[#allocation65_spill] sm:$0xff] }
0x1284   :  { %9544 = vmatpush1.bf16.msra.mxu0 %v18285_v30 }
0x1285   :  { %9545 = vmatprep.subr.bf16.mxu0 %v18286_v11 }
0x1288   :  { %9546 = vmatpush1.bf16.msra.mxu0 %v18287_v55 }
0x1289   :  { %9547 = vmatprep.subr.bf16.mxu0 %v18288_v34 }
0x128c   :  { %9548 = vmatpush1.bf16.msra.mxu0 %v18289_v15  ;;  %v18315_v15 = vld [vmem:[#allocation129_spill] sm:$0xff] }
0x128d   :  { %9549 = vmatprep.subr.bf16.mxu0 %v18290_v36 }
0x1290   :  { %9550 = vmatpush1.bf16.msra.mxu0 %v18291_v35 }
0x1291   :  { %9551 = vmatprep.subr.bf16.mxu0 %v18292_v62 }
0x1294   :  { %9552 = vmatpush1.bf16.msra.mxu0 %v18293_v48  ;;  %v18316_v48 = vld [vmem:[#allocation103_spill] sm:$0xff] }
0x1295   :  { %9553 = vmatprep.subr.bf16.mxu0 %v18294_v59 }
0x1298   :  { %9554 = vmatpush1.bf16.msra.mxu0 %v18295_v40 }
0x1299   :  { %9555 = vmatprep.subr.bf16.mxu0 %v18296_v31 }
0x129c   :  { %9556 = vmatpush1.bf16.msra.mxu0 %v18297_v9  ;;  %v18317_v9 = vld [vmem:[#allocation105_spill] sm:$0xff] }
0x129d   :  { %9557 = vmatprep.subr.bf16.mxu0 %v18298_v22 }
0x12a0   :  { %9558 = vmatpush1.bf16.msra.mxu0 %v18299_v14  ;;  %v18318_v14 = vld [vmem:[#allocation95_spill] sm:$0xff] }
0x12a1   :  { %9559 = vmatprep.subr.bf16.mxu0 %v18300_v25 }
0x12a4   :  { %9560 = vmatpush1.bf16.msra.mxu0 %v18301_v46 }
0x12a5   :  { %9561 = vmatprep.subr.bf16.mxu0 %v18302_v3 }
0x12a8   :  { %9562 = vmatpush1.bf16.msra.mxu0 %v18303_v5 }
0x12a9   :  { %9563 = vmatprep.subr.bf16.mxu0 %v18304_v1 }
0x12ac   :  { %9564 = vmatpush1.bf16.msra.mxu0 %v18305_v8 }
0x12ad   :  { %9565 = vmatprep.subr.bf16.mxu0 %v18306_v47 }
0x12b0   :  { %9566 = vmatpush1.bf16.msra.mxu0 %v18307_v17 }
0x12b1   :  { %9567 = vmatprep.subr.bf16.mxu0 %v18308_v57 }
0x12b4   :  { %9568 = vmatpush1.bf16.msra.mxu0 %v18309_v54  ;;  %v18319_v54 = vld [vmem:[#allocation104_spill] sm:$0xff] }
0x12b5   :  { %9569 = vmatprep.subr.bf16.mxu0 %v18310_v51 }
0x12b8   :  { %9570 = vmatpush1.bf16.msra.mxu0 %v18311_v52 }
0x12b9   :  { %9571 = vmatprep.subr.bf16.mxu0 %v18312_v20 }
0x12bc   :  { %9572 = vmatpush1.bf16.msra.mxu0 %v18313_v2 }
0x12bd   :  { %9673 = vmatprep.subr.bf16.mxu0 %v12936_v18 }
0x1312   :  { %v9361_v23 = vpop.f32.mrb[132].mxu0  ;;  %v9402_v21 = vpop.f32.mrb[128].mxu1 }
0x1313   :  { %v9362_v30 = vadd.f32 %v9361_v23, %v18314_v7  ;;  %v9363_v11 = vpop.f32.mrb[133].mxu0  ;;  %v9404_v55 = vpop.f32.mrb[129].mxu1  ;;  %v9403_v47 = vadd.f32 %v9402_v21, %v18073_v58 }
0x1314   :  { %v9364_v34 = vadd.f32 %v9363_v11, %v18069_v63  ;;  %v9405_v36 = vadd.f32 %v9404_v55, %v18315_v15  ;;  %v9365_v35 = vpop.f32.mrb[134].mxu0  ;;  %v9406_v62 = vpop.f32.mrb[130].mxu1 }
0x1315   :  { %v9456_v59 = vadd.f32 %v9362_v30, %v18316_v48  ;;  %v9366_v40 = vpop.f32.mrb[135].mxu0  ;;  %v9407_v31 = vpop.f32.mrb[131].mxu1 }
0x1316   :  { %v9457_v22 = vadd.f32 %v9364_v34, %v18317_v9  ;;  %v9476_v25 = vadd.f32 %v9405_v36, %v18318_v14  ;;  %v18320_v40 = vld [vmem:[#allocation118_spill] sm:$0xff] }
0x1317   :  { %v11322_v46 = vmul.f32 -1.442695, %v9456_v59 }
0x1318   :  { %v11323_v3 = vmul.f32 -1.442695, %v9457_v22  ;;  %v11324_v20 = vmul.f32 -1.442695, %v9476_v25  ;;  %v18321_v25 = vld [vmem:[#allocation119_spill] sm:$0xff] }
0x1319   :  { %12773 = vpow2.f32 %v11322_v46 }
0x131a   :  { %12775 = vpow2.f32 %v11323_v3 }
0x1323   :  { %v12774_v5 = vpop.eup %12773 }
0x1324   :  { %v9464_v1 = vadd.f32 1.0, %v12774_v5  ;;  %v12776_v8 = vpop.eup %12775 }
0x1325   :  { %v9465_v52 = vadd.f32 1.0, %v12776_v8 }
0x1326   :  { %12777 = vrcp.f32 %v9464_v1 }
0x1330   :  { %v12778_v17 = vpop.eup %12777 }
0x1331   :  { %v9470_v57 = vmul.f32 %v12778_v17, %v9403_v47 }
0x1333   :  { %v9471_v51 = vadd.f32 %v9470_v57, %v18319_v54 }
0x1335   :  { %12779 = vtanh.f32 %v9471_v51 }
0x1336   :  { %12781 = vrcp.f32 %v9465_v52 }
0x1337   :  { %12783 = vpow2.f32 %v11324_v20 }
0x133f   :  { %v12780_v2 = vpop.eup %12779 }
0x1340   :  { %v9473_v18 = vsub.f32 %v16871_v29, %v12780_v2  ;;  %v12782_v23 = vpop.eup %12781 }
0x1341   :  { %v12784_v11 = vpop.eup %12783 }
0x1342   :  { %v9474_v30 = vmul.f32 %v12782_v23, %v9473_v18  ;;  %v9484_v34 = vadd.f32 1.0, %v12784_v11  ;;  %v17039_v18 = vld [vmem:[#allocation12 + $0x74] ss:$24 sps:$4 sm:$0xff]   ;;  %v17044_v23 = vld [vmem:[#allocation12 + $0x70] ss:$24 sps:$4 sm:$0xff]  }
0x1343   :  { %v17062_v11 = vld [vmem:[#allocation12 + $0x104] ss:$24 sps:$4 sm:$0xff]  }
0x1344   :  { %v9475_v55 = vadd.f32 %v12780_v2, %v9474_v30  ;;  %12785 = vrcp.f32 %v9484_v34  ;;  %v17036_v2 = vld [vmem:[#allocation12 + $0x40] ss:$24 sps:$4 sm:$0xff]   ;;  %v17047_v30 = vld [vmem:[#allocation12 + $0xa4] ss:$24 sps:$4 sm:$0xff]   ;;  %v17068_v34 = vld [vmem:[#allocation12 + $0x134] ss:$24 sps:$4 sm:$0xff]  }
0x1346   :  { %v17013_v54 = vsel %vm312_vm3, %v9475_v55, %v16871_v29  ;;  %v17028_v29 = vld [vmem:[#allocation12 + $0x10] ss:$24 sps:$4 sm:$0xff]   ;;  %v17065_v55 = vld [vmem:[#allocation12 + $0x100] ss:$24 sps:$4 sm:$0xff]  }
0x1347   :  { %v17024_v20 = vpack.c.bf16 %v17013_v54, %v17013_v54 }
0x134e   :  { %v12786_v59 = vpop.eup %12785 }
0x1352   :  { %v9443_v36 = vpop.f32.mrb[136].mxu0 }
0x1353   :  { %v9444_v21 = vadd.f32 %v9443_v36, %v16133_v44  ;;  %v9445_v35 = vpop.f32.mrb[137].mxu0  ;;  %v12953_v36 = vld [vmem:[#allocation12 + $0x124] ss:$24 sps:$4 sm:$0xff]  }
0x1354   :  { %v9446_v62 = vadd.f32 %v9445_v35, %v16150_v26  ;;  %v9447_v48 = vpop.f32.mrb[138].mxu0  ;;  %v17074_v35 = vld [vmem:[#allocation12 + $0x164] ss:$24 sps:$4 sm:$0xff]  }
0x1355   :  { %v9477_v31 = vadd.f32 %v9444_v21, %v18320_v40  ;;  %v9448_v9 = vpop.f32.mrb[139].mxu0  ;;  %v17071_v21 = vld [vmem:[#allocation12 + $0x130] ss:$24 sps:$4 sm:$0xff]   ;;  %v12957_v48 = vld [vmem:[#allocation12 + $0x154] ss:$24 sps:$4 sm:$0xff]  }
0x1356   :  { %v9490_v22 = vmul.f32 %v12786_v59, %v9446_v62  ;;  %v12956_v62 = vld [vmem:[#allocation12 + $0x120] ss:$24 sps:$4 sm:$0xff]   ;;  %v12958_v59 = vld [vmem:[#allocation12 + $0x150] ss:$24 sps:$4 sm:$0xff]   ;;  %v12959_v40 = vld [vmem:[#allocation12 + $0x184] ss:$24 sps:$4 sm:$0xff]  }
0x1357   :  { %v11325_v14 = vmul.f32 -1.442695, %v9477_v31  ;;  %v12960_v31 = vld [vmem:[#allocation12 + $0x180] ss:$24 sps:$4 sm:$0xff]   ;;  %v12961_v9 = vld [vmem:[#allocation12 + $0x1b4] ss:$24 sps:$4 sm:$0xff]  }
0x1358   :  { %v9491_v46 = vadd.f32 %v9490_v22, %v18321_v25  ;;  %v12962_v22 = vld [vmem:[#allocation12 + $0x1b0] ss:$24 sps:$4 sm:$0xff]   ;;  %v12978_v25 = vld [vmem:[#allocation12 + $0x3c] ss:$24 sps:$4 sm:$0xff]  }
0x1359   :  { %12787 = vpow2.f32 %v11325_v14  ;;  %v12975_v14 = vld [vmem:[#allocation12 + $0x2d0] ss:$24 sps:$4 sm:$0xff]  }
0x135a   :  { %12789 = vtanh.f32 %v9491_v46  ;;  %v12981_v46 = vld [vmem:[#allocation12 + $0x68] ss:$24 sps:$4 sm:$0xff]  }
0x1363   :  { %v12788_v3 = vpop.eup %12787 }
0x1364   :  { %v9485_v5 = vadd.f32 1.0, %v12788_v3  ;;  %v12790_v1 = vpop.eup %12789  ;;  %v12982_v3 = vld [vmem:[#allocation12 + $0x9c] ss:$24 sps:$4 sm:$0xff]  }
0x1365   :  { %v9493_v8 = vsub.f32 %v16876_v56, %v12790_v1 }
0x1366   :  { %12791 = vrcp.f32 %v9485_v5  ;;  %v12984_v5 = vld [vmem:[#allocation12 + $0xcc] ss:$24 sps:$4 sm:$0xff]  }
0x1370   :  { %v12792_v47 = vpop.eup %12791 }
0x1371   :  { %v9494_v17 = vmul.f32 %v12792_v47, %v9493_v8  ;;  %v12986_v8 = vld [vmem:[#allocation12 + $0xfc] ss:$24 sps:$4 sm:$0xff]   ;;  %v12987_v47 = vld [vmem:[#allocation12 + $0xf8] ss:$24 sps:$4 sm:$0xff]  }
0x1373   :  { %v9495_v57 = vadd.f32 %v12790_v1, %v9494_v17  ;;  %v12985_v1 = vld [vmem:[#allocation12 + $0xc8] ss:$24 sps:$4 sm:$0xff]   ;;  %v12988_v17 = vld [vmem:[#allocation12 + $0x12c] ss:$24 sps:$4 sm:$0xff]  }
0x1375   :  { %v17018_v51 = vsel %vm309_vm2, %v9495_v57, %v16876_v56  ;;  %v17031_v56 = vld [vmem:[#allocation12 + $0x44] ss:$24 sps:$4 sm:$0xff]   ;;  %v12989_v57 = vld [vmem:[#allocation12 + $0x128] ss:$24 sps:$4 sm:$0xff]  }
0x1376   :  { %v9499_v52 = vpack.c.bf16 %v17018_v51, %v17018_v51 }
0x1378   :  { %9532 = vmatprep.mubr.bf16.mxu1 %v9499_v52  ;;  %9573 = vmatprep.mubr.bf16.mxu0 %v9499_v52 }
0x1379   :  { %9533 = vmatmul.mubr.bf16.vlgmr.msra.gmra.mrb[132].mxu1 %v17024_v20  ;;  %9574 = vmatmul.mubr.bf16.vlgmr.msra.gmra.mrb[140].mxu0 %v17024_v20 }
0x137a   :  { %9583 = vmatpush1.bf16.msra.mxu1 %v17028_v29  ;;  %9614 = vmatprep.mubr.bf16.mxu1 %v9499_v52  ;;  %v12990_v52 = vld [vmem:[#allocation12 + $0x15c] ss:$24 sps:$4 sm:$0xff]  }
0x137b   :  { %9584 = vmatprep.subr.bf16.mxu1 %v17031_v56  ;;  %9674 = vmatpush1.bf16.msra.mxu0 %v16888_v33  ;;  %v17052_v33 = vld [vmem:[#allocation12 + $0xa0] ss:$24 sps:$4 sm:$0xff]  }
0x137c   :  { %9675 = vmatprep.subr.bf16.mxu0 %v16891_v43  ;;  %v17055_v43 = vld [vmem:[#allocation12 + $0xd4] ss:$24 sps:$4 sm:$0xff]  }
0x137e   :  { %9585 = vmatpush1.bf16.msra.mxu1 %v17036_v2 }
0x137f   :  { %9586 = vmatprep.subr.bf16.mxu1 %v17039_v18  ;;  %9676 = vmatpush1.bf16.msra.mxu0 %v16896_v45  ;;  %v12945_v45 = vld [vmem:[#allocation12 + $0xc4] ss:$24 sps:$4 sm:$0xff]  }
0x1380   :  { %9677 = vmatprep.subr.bf16.mxu0 %v16899_v42  ;;  %v17059_v42 = vld [vmem:[#allocation12 + $0xd0] ss:$24 sps:$4 sm:$0xff]  }
0x1382   :  { %9587 = vmatpush1.bf16.msra.mxu1 %v17044_v23 }
0x1383   :  { %9588 = vmatprep.subr.bf16.mxu1 %v17047_v30  ;;  %9678 = vmatpush1.bf16.msra.mxu0 %v16904_v53  ;;  %v12948_v53 = vld [vmem:[#allocation12 + $0xc0] ss:$24 sps:$4 sm:$0xff]  }
0x1384   :  { %9679 = vmatprep.subr.bf16.mxu0 %v16907_v13  ;;  %v12949_v13 = vld [vmem:[#allocation12 + $0xf4] ss:$24 sps:$4 sm:$0xff]  }
0x1386   :  { %9589 = vmatpush1.bf16.msra.mxu1 %v17052_v33 }
0x1387   :  { %9590 = vmatprep.subr.bf16.mxu1 %v17055_v43  ;;  %9680 = vmatpush1.bf16.msra.mxu0 %v16912_v10  ;;  %v12952_v10 = vld [vmem:[#allocation12 + $0xf0] ss:$24 sps:$4 sm:$0xff]  }
0x1388   :  { %9681 = vmatprep.subr.bf16.mxu0 %v12945_v45  ;;  %v12992_v45 = vld [vmem:[#allocation12 + $0x18c] ss:$24 sps:$4 sm:$0xff]  }
0x138a   :  { %9591 = vmatpush1.bf16.msra.mxu1 %v17059_v42 }
0x138b   :  { %9592 = vmatprep.subr.bf16.mxu1 %v17062_v11  ;;  %9682 = vmatpush1.bf16.msra.mxu0 %v12948_v53  ;;  %v12993_v53 = vld [vmem:[#allocation12 + $0x188] ss:$24 sps:$4 sm:$0xff]  }
0x138c   :  { %9683 = vmatprep.subr.bf16.mxu0 %v12949_v13  ;;  %v12994_v13 = vld [vmem:[#allocation12 + $0x1bc] ss:$24 sps:$4 sm:$0xff]  }
0x138e   :  { %9593 = vmatpush1.bf16.msra.mxu1 %v17065_v55 }
0x138f   :  { %9594 = vmatprep.subr.bf16.mxu1 %v17068_v34  ;;  %9684 = vmatpush1.bf16.msra.mxu0 %v12952_v10  ;;  %v12995_v10 = vld [vmem:[#allocation12 + $0x1b8] ss:$24 sps:$4 sm:$0xff]  }
0x1390   :  { %9685 = vmatprep.subr.bf16.mxu0 %v12953_v36  ;;  %v12996_v36 = vld [vmem:[#allocation12 + $0x1ec] ss:$24 sps:$4 sm:$0xff]  }
0x1392   :  { %9595 = vmatpush1.bf16.msra.mxu1 %v17071_v21 }
0x1393   :  { %9596 = vmatprep.subr.bf16.mxu1 %v17074_v35  ;;  %9686 = vmatpush1.bf16.msra.mxu0 %v12956_v62  ;;  %v12997_v62 = vld [vmem:[#allocation12 + $0x1e8] ss:$24 sps:$4 sm:$0xff]  }
0x1394   :  { %9687 = vmatprep.subr.bf16.mxu0 %v12957_v48  ;;  %v12998_v48 = vld [vmem:[#allocation12 + $0x21c] ss:$24 sps:$4 sm:$0xff]  }
0x1396   :  { %9597 = vmatpush1.bf16.msra.mxu1 %v16622_v60  ;;  %v12963_v60 = vld [vmem:[#allocation12 + $0x1e4] ss:$24 sps:$4 sm:$0xff]  }
0x1397   :  { %9598 = vmatprep.subr.bf16.mxu1 %v16625_v16  ;;  %9688 = vmatpush1.bf16.msra.mxu0 %v12958_v59  ;;  %v12964_v16 = vld [vmem:[#allocation12 + $0x1e0] ss:$24 sps:$4 sm:$0xff]  }
0x1398   :  { %9689 = vmatprep.subr.bf16.mxu0 %v12959_v40  ;;  %v12999_v59 = vld [vmem:[#allocation12 + $0x218] ss:$24 sps:$4 sm:$0xff]   ;;  %v13000_v40 = vld [vmem:[#allocation12 + $0x24c] ss:$24 sps:$4 sm:$0xff]  }
0x139a   :  { %9599 = vmatpush1.bf16.msra.mxu1 %v16630_v50  ;;  %v12965_v50 = vld [vmem:[#allocation12 + $0x214] ss:$24 sps:$4 sm:$0xff]  }
0x139b   :  { %9600 = vmatprep.subr.bf16.mxu1 %v16633_v41  ;;  %9690 = vmatpush1.bf16.msra.mxu0 %v12960_v31  ;;  %v12966_v41 = vld [vmem:[#allocation12 + $0x210] ss:$24 sps:$4 sm:$0xff]  }
0x139c   :  { %9691 = vmatprep.subr.bf16.mxu0 %v12961_v9  ;;  %v13001_v31 = vld [vmem:[#allocation12 + $0x248] ss:$24 sps:$4 sm:$0xff]   ;;  %v13002_v9 = vld [vmem:[#allocation12 + $0x27c] ss:$24 sps:$4 sm:$0xff]  }
0x139e   :  { %9601 = vmatpush1.bf16.msra.mxu1 %v18194_v61  ;;  %v12967_v61 = vld [vmem:[#allocation12 + $0x244] ss:$24 sps:$4 sm:$0xff]  }
0x139f   :  { %9602 = vmatprep.subr.bf16.mxu1 %v18195_v24  ;;  %9692 = vmatpush1.bf16.msra.mxu0 %v12962_v22  ;;  %v12968_v24 = vld [vmem:[#allocation12 + $0x240] ss:$24 sps:$4 sm:$0xff]  }
0x13a0   :  { %9693 = vmatprep.subr.bf16.mxu0 %v12963_v60  ;;  %v13003_v22 = vld [vmem:[#allocation12 + $0x278] ss:$24 sps:$4 sm:$0xff]   ;;  %v13004_v60 = vld [vmem:[#allocation12 + $0x2ac] ss:$24 sps:$4 sm:$0xff]  }
0x13a2   :  { %9603 = vmatpush1.bf16.msra.mxu1 %v18198_v49  ;;  %v12969_v49 = vld [vmem:[#allocation12 + $0x274] ss:$24 sps:$4 sm:$0xff]  }
0x13a3   :  { %9604 = vmatprep.subr.bf16.mxu1 %v18199_v6  ;;  %9694 = vmatpush1.bf16.msra.mxu0 %v12964_v16  ;;  %v12970_v6 = vld [vmem:[#allocation12 + $0x270] ss:$24 sps:$4 sm:$0xff]  }
0x13a4   :  { %9695 = vmatprep.subr.bf16.mxu0 %v12965_v50  ;;  %v13005_v16 = vld [vmem:[#allocation12 + $0x2a8] ss:$24 sps:$4 sm:$0xff]   ;;  %v13006_v50 = vld [vmem:[#allocation12 + $0x2dc] ss:$24 sps:$4 sm:$0xff]  }
0x13a6   :  { %9605 = vmatpush1.bf16.msra.mxu1 %v18263_v32  ;;  %v12971_v32 = vld [vmem:[#allocation12 + $0x2a4] ss:$24 sps:$4 sm:$0xff]  }
0x13a7   :  { %9606 = vmatprep.subr.bf16.mxu1 %v18264_v37  ;;  %9696 = vmatpush1.bf16.msra.mxu0 %v12966_v41  ;;  %v12972_v37 = vld [vmem:[#allocation12 + $0x2a0] ss:$24 sps:$4 sm:$0xff]  }
0x13a8   :  { %9697 = vmatprep.subr.bf16.mxu0 %v12967_v61  ;;  %v13007_v41 = vld [vmem:[#allocation12 + $0x2d8] ss:$24 sps:$4 sm:$0xff]   ;;  %v12481_v61 = vld [vmem:[#allocation14 + $0x40] sm:$0xff]  }
0x13aa   :  { %9607 = vmatpush1.bf16.msra.mxu1 %v18267_v38  ;;  %v12973_v38 = vld [vmem:[#allocation12 + $0x2d4] ss:$24 sps:$4 sm:$0xff]  }
0x13ab   :  { %9608 = vmatprep.subr.bf16.mxu1 %v18268_v19  ;;  %9698 = vmatpush1.bf16.msra.mxu0 %v12968_v24  ;;  %v12974_v19 = vld [vmem:[#allocation12 + $0xc] ss:$24 sps:$4 sm:$0xff]  }
0x13ac   :  { %9699 = vmatprep.subr.bf16.mxu0 %v12969_v49 }
0x13ae   :  { %9609 = vmatpush1.bf16.msra.mxu1 %v18271_v12  ;;  %v12976_v12 = vld [vmem:[#allocation12 + $0x14] ss:$24 sps:$4 sm:$0xff]  }
0x13af   :  { %9610 = vmatprep.subr.bf16.mxu1 %v18272_v28  ;;  %9700 = vmatpush1.bf16.msra.mxu0 %v12970_v6  ;;  %v12977_v28 = vld [vmem:[#allocation12 + $0x8] ss:$24 sps:$4 sm:$0xff]  }
0x13b0   :  { %9701 = vmatprep.subr.bf16.mxu0 %v12971_v32 }
0x13b2   :  { %9611 = vmatpush1.bf16.msra.mxu1 %v18275_v0  ;;  %v12979_v0 = vld [vmem:[#allocation12 + $0x38] ss:$24 sps:$4 sm:$0xff]  }
0x13b3   :  { %9612 = vmatprep.subr.bf16.mxu1 %v18276_v39  ;;  %9702 = vmatpush1.bf16.msra.mxu0 %v12972_v37  ;;  %v12980_v39 = vld [vmem:[#allocation12 + $0x6c] ss:$24 sps:$4 sm:$0xff]  }
0x13b4   :  { %9703 = vmatprep.subr.bf16.mxu0 %v12973_v38 }
0x13b6   :  { %9613 = vmatpush1.bf16.msra.mxu1 %v18279_v27  ;;  %v12983_v27 = vld [vmem:[#allocation12 + $0x98] ss:$24 sps:$4 sm:$0xff]  }
0x13b7   :  { %9714 = vmatprep.subr.bf16.mxu1 %v12974_v19  ;;  %9704 = vmatpush1.bf16.msra.mxu0 %v12975_v14 }
0x13b8   :  { %9755 = vmatprep.subr.bf16.mxu0 %v12976_v12 }
0x13b9   :  { %9615 = vmatmul.mubr.bf16.vlgmr.msra.gmra.mrb[136].mxu1 %v17024_v20  ;;  %v12991_v20 = vld [vmem:[#allocation12 + $0x158] ss:$24 sps:$4 sm:$0xff]  }
0x13ba   :  { %9715 = vmatpush1.bf16.msra.mxu1 %v12977_v28  ;;  %v18322_v28 = vld [vmem:[#allocation107_spill] sm:$0xff] }
0x13bb   :  { %9716 = vmatprep.subr.bf16.mxu1 %v12978_v25 }
0x13be   :  { %9717 = vmatpush1.bf16.msra.mxu1 %v12979_v0 }
0x13bf   :  { %9718 = vmatprep.subr.bf16.mxu1 %v12980_v39 }
0x13c2   :  { %9719 = vmatpush1.bf16.msra.mxu1 %v12981_v46  ;;  %v18323_v46 = vld [vmem:[#allocation109_spill] sm:$0xff] }
0x13c3   :  { %9720 = vmatprep.subr.bf16.mxu1 %v12982_v3 }
0x13c6   :  { %9721 = vmatpush1.bf16.msra.mxu1 %v12983_v27  ;;  %v18324_v27 = vld [vmem:[#allocation35_spill] sm:$0xff] }
0x13c7   :  { %9722 = vmatprep.subr.bf16.mxu1 %v12984_v5 }
0x13ca   :  { %9723 = vmatpush1.bf16.msra.mxu1 %v12985_v1 }
0x13cb   :  { %9724 = vmatprep.subr.bf16.mxu1 %v12986_v8 }
0x13ce   :  { %9725 = vmatpush1.bf16.msra.mxu1 %v12987_v47 }
0x13cf   :  { %9726 = vmatprep.subr.bf16.mxu1 %v12988_v17 }
0x13d2   :  { %9727 = vmatpush1.bf16.msra.mxu1 %v12989_v57 }
0x13d3   :  { %9728 = vmatprep.subr.bf16.mxu1 %v12990_v52 }
0x13d6   :  { %9729 = vmatpush1.bf16.msra.mxu1 %v12991_v20 }
0x13d7   :  { %9730 = vmatprep.subr.bf16.mxu1 %v12992_v45 }
0x13da   :  { %9731 = vmatpush1.bf16.msra.mxu1 %v12993_v53  ;;  %v18325_v53 = vld [vmem:[#allocation108_spill] sm:$0xff] }
0x13db   :  { %9732 = vmatprep.subr.bf16.mxu1 %v12994_v13 }
0x13de   :  { %9733 = vmatpush1.bf16.msra.mxu1 %v12995_v10 }
0x13df   :  { %9734 = vmatprep.subr.bf16.mxu1 %v12996_v36 }
0x13e2   :  { %9735 = vmatpush1.bf16.msra.mxu1 %v12997_v62 }
0x13e3   :  { %9736 = vmatprep.subr.bf16.mxu1 %v12998_v48 }
0x13e6   :  { %9737 = vmatpush1.bf16.msra.mxu1 %v12999_v59 }
0x13e7   :  { %9738 = vmatprep.subr.bf16.mxu1 %v13000_v40 }
0x13ea   :  { %9739 = vmatpush1.bf16.msra.mxu1 %v13001_v31 }
0x13eb   :  { %9740 = vmatprep.subr.bf16.mxu1 %v13002_v9 }
0x13ee   :  { %9741 = vmatpush1.bf16.msra.mxu1 %v13003_v22 }
0x13ef   :  { %9742 = vmatprep.subr.bf16.mxu1 %v13004_v60 }
0x13f2   :  { %9743 = vmatpush1.bf16.msra.mxu1 %v13005_v16 }
0x13f3   :  { %9744 = vmatprep.subr.bf16.mxu1 %v13006_v50 }
0x13f6   :  { %9745 = vmatpush1.bf16.msra.mxu1 %v13007_v41 }
0x13f7   :  { %11451 = vmatprep.subr.bf16.mxu1 %v12481_v61 }
0x144c   :  { %v9534_v24 = vpop.f32.mrb[132].mxu1  ;;  %v9575_v49 = vpop.f32.mrb[140].mxu0 }
0x144d   :  { %v9535_v6 = vadd.f32 %v9534_v24, %v18314_v7  ;;  %v9536_v32 = vpop.f32.mrb[133].mxu1  ;;  %v9577_v37 = vpop.f32.mrb[141].mxu0  ;;  %v9576_v52 = vadd.f32 %v9575_v49, %v18073_v58  ;;  %v18326_v49 = vld [vmem:[#allocation116_spill] sm:$0xff] }
0x144e   :  { %v9537_v38 = vadd.f32 %v9536_v32, %v18069_v63  ;;  %v9578_v19 = vadd.f32 %v9577_v37, %v18315_v15  ;;  %v9538_v14 = vpop.f32.mrb[134].mxu1  ;;  %v9579_v12 = vpop.f32.mrb[142].mxu0 }
0x144f   :  { %v9629_v25 = vadd.f32 %v9535_v6, %v18322_v28  ;;  %v9539_v0 = vpop.f32.mrb[135].mxu1  ;;  %v9580_v39 = vpop.f32.mrb[143].mxu0 }
0x1450   :  { %v9630_v3 = vadd.f32 %v9537_v38, %v18323_v46  ;;  %v9649_v5 = vadd.f32 %v9578_v19, %v18324_v27  ;;  %v18327_v19 = vld [vmem:[#allocation117_spill] sm:$0xff] }
0x1451   :  { %v11326_v1 = vmul.f32 -1.442695, %v9629_v25 }
0x1452   :  { %v11327_v8 = vmul.f32 -1.442695, %v9630_v3  ;;  %v11328_v36 = vmul.f32 -1.442695, %v9649_v5 }
0x1453   :  { %12793 = vpow2.f32 %v11326_v1 }
0x1454   :  { %12795 = vpow2.f32 %v11327_v8  ;;  %v12482_v8 = vld [vmem:[#allocation14] sm:$0xff]  }
0x145d   :  { %v12794_v47 = vpop.eup %12793 }
0x145e   :  { %v9637_v17 = vadd.f32 1.0, %v12794_v47  ;;  %v12796_v57 = vpop.eup %12795  ;;  %v18328_v47 = vld [vmem:[#allocation92_spill] sm:$0xff] }
0x145f   :  { %v9638_v10 = vadd.f32 1.0, %v12796_v57 }
0x1460   :  { %12797 = vrcp.f32 %v9637_v17  ;;  %v18329_v17 = vld [vmem:[#allocation31_spill] sm:$0xff] }
0x1461   :  { %v6950_v57 = vsel %vm307_vm13, %v18329_v17, %v18328_v47  ;;  %v12512_v47 = vld [vmem:[#allocation14 + $0xb8] sm:$0xff]  }
0x146a   :  { %v12798_v20 = vpop.eup %12797 }
0x146b   :  { %v9643_v45 = vmul.f32 %v12798_v20, %v9576_v52  ;;  %v12484_v20 = vld [vmem:[#allocation14 + $0x8] sm:$0xff]  }
0x146d   :  { %v9644_v13 = vadd.f32 %v9643_v45, %v18325_v53  ;;  %v12485_v45 = vld [vmem:[#allocation14 + $0x50] sm:$0xff]  }
0x146e   :  { %v12486_v53 = vld [vmem:[#allocation14 + $0x10] sm:$0xff]  }
0x146f   :  { %12799 = vtanh.f32 %v9644_v13  ;;  %v12487_v13 = vld [vmem:[#allocation14 + $0x58] sm:$0xff]  }
0x1470   :  { %12801 = vrcp.f32 %v9638_v10  ;;  %v12489_v10 = vld [vmem:[#allocation14 + $0x60] sm:$0xff]  }
0x1471   :  { %12803 = vpow2.f32 %v11328_v36  ;;  %v18331_v36 = vld [vmem:[#allocation27_spill] sm:$0xff] }
0x1479   :  { %v12800_v62 = vpop.eup %12799 }
0x147a   :  { %v9646_v48 = vsub.f32 %v17013_v54, %v12800_v62  ;;  %v12802_v59 = vpop.eup %12801 }
0x147b   :  { %v12804_v31 = vpop.eup %12803 }
0x147c   :  { %v9647_v40 = vmul.f32 %v12802_v59, %v9646_v48  ;;  %v9657_v22 = vadd.f32 1.0, %v12804_v31  ;;  %v13010_v48 = vld [vmem:[#allocation12 + $0x190] ss:$24 sps:$4 sm:$0xff]   ;;  %v13012_v59 = vld [vmem:[#allocation12 + $0x1c0] ss:$24 sps:$4 sm:$0xff]  }
0x147d   :  { %v13015_v31 = vld [vmem:[#allocation12 + $0x224] ss:$24 sps:$4 sm:$0xff]  }
0x147e   :  { %v9648_v9 = vadd.f32 %v12800_v62, %v9647_v40  ;;  %12805 = vrcp.f32 %v9657_v22  ;;  %v13008_v62 = vld [vmem:[#allocation12 + $0x160] ss:$24 sps:$4 sm:$0xff]   ;;  %v13014_v40 = vld [vmem:[#allocation12 + $0x1f0] ss:$24 sps:$4 sm:$0xff]   ;;  %v13017_v22 = vld [vmem:[#allocation12 + $0x254] ss:$24 sps:$4 sm:$0xff]  }
0x1480   :  { %v17112_v27 = vsel %vm313_vm1, %v9648_v9, %v17013_v54  ;;  %v12483_v54 = vld [vmem:[#allocation14 + $0x48] sm:$0xff]   ;;  %v13016_v9 = vld [vmem:[#allocation12 + $0x220] ss:$24 sps:$4 sm:$0xff]  }
0x1481   :  { %v17127_v52 = vpack.c.bf16 %v17112_v27, %v17112_v27 }
0x1488   :  { %v12806_v24 = vpop.eup %12805 }
0x148c   :  { %v9616_v60 = vpop.f32.mrb[136].mxu1 }
0x148d   :  { %v9617_v16 = vadd.f32 %v9616_v60, %v16133_v44  ;;  %v9618_v50 = vpop.f32.mrb[137].mxu1  ;;  %v13018_v60 = vld [vmem:[#allocation12 + $0x250] ss:$24 sps:$4 sm:$0xff]  }
0x148e   :  { %v9619_v41 = vadd.f32 %v9618_v50, %v16150_v26  ;;  %v9620_v61 = vpop.f32.mrb[138].mxu1  ;;  %v13020_v50 = vld [vmem:[#allocation12 + $0x280] ss:$24 sps:$4 sm:$0xff]  }
0x148f   :  { %v9650_v6 = vadd.f32 %v9617_v16, %v18326_v49  ;;  %v9621_v32 = vpop.f32.mrb[139].mxu1  ;;  %v13019_v16 = vld [vmem:[#allocation12 + $0x284] ss:$24 sps:$4 sm:$0xff]   ;;  %v13022_v61 = vld [vmem:[#allocation12 + $0x2b0] ss:$24 sps:$4 sm:$0xff]  }
0x1490   :  { %v9663_v37 = vmul.f32 %v12806_v24, %v9619_v41  ;;  %v13021_v41 = vld [vmem:[#allocation12 + $0x2b4] ss:$24 sps:$4 sm:$0xff]   ;;  %v13023_v24 = vld [vmem:[#allocation12 + $0x2e4] ss:$24 sps:$4 sm:$0xff]   ;;  %v13024_v49 = vld [vmem:[#allocation12 + $0x2e0] ss:$24 sps:$4 sm:$0xff]  }
0x1491   :  { %v11329_v38 = vmul.f32 -1.442695, %v9650_v6  ;;  %v12497_v6 = vld [vmem:[#allocation14 + $0xc0] sm:$0xff]  }
0x1492   :  { %v9664_v14 = vadd.f32 %v9663_v37, %v18327_v19  ;;  %v12498_v32 = vld [vmem:[#allocation14 + $0x80] sm:$0xff]   ;;  %v12499_v37 = vld [vmem:[#allocation14 + $0xc8] sm:$0xff]   ;;  %v12501_v19 = vld [vmem:[#allocation14 + $0xd0] sm:$0xff]  }
0x1493   :  { %12807 = vpow2.f32 %v11329_v38  ;;  %v12500_v38 = vld [vmem:[#allocation14 + $0x88] sm:$0xff]  }
0x1494   :  { %12809 = vtanh.f32 %v9664_v14  ;;  %v12502_v14 = vld [vmem:[#allocation14 + $0x90] sm:$0xff]  }
0x149d   :  { %v12808_v12 = vpop.eup %12807 }
0x149e   :  { %v9658_v28 = vadd.f32 1.0, %v12808_v12  ;;  %v12810_v25 = vpop.eup %12809  ;;  %v12503_v12 = vld [vmem:[#allocation14 + $0xd8] sm:$0xff]  }
0x149f   :  { %v9666_v0 = vsub.f32 %v17018_v51, %v12810_v25 }
0x14a0   :  { %12811 = vrcp.f32 %v9658_v28  ;;  %v12504_v28 = vld [vmem:[#allocation14 + $0x98] sm:$0xff]  }
0x14aa   :  { %v12812_v39 = vpop.eup %12811 }
0x14ab   :  { %v9667_v46 = vmul.f32 %v12812_v39, %v9666_v0  ;;  %v12506_v0 = vld [vmem:[#allocation14 + $0xa0] sm:$0xff]   ;;  %v12507_v39 = vld [vmem:[#allocation14 + $0xe8] sm:$0xff]  }
0x14ad   :  { %v9668_v3 = vadd.f32 %v12810_v25, %v9667_v46  ;;  %v12505_v25 = vld [vmem:[#allocation14 + $0xe0] sm:$0xff]   ;;  %v12508_v46 = vld [vmem:[#allocation14 + $0xa8] sm:$0xff]  }
0x14af   :  { %v17117_v5 = vsel %vm308_vm0, %v9668_v3, %v17018_v51  ;;  %v9845_v51 = vpack.c.bf16 %v6950_v57, %v6950_v57  ;;  %v12509_v3 = vld [vmem:[#allocation14 + $0xf0] sm:$0xff]  }
0x14b0   :  { %v9672_v1 = vpack.c.bf16 %v17117_v5, %v17117_v5 }
0x14b2   :  { %9705 = vmatprep.mubr.bf16.mxu0 %v9672_v1  ;;  %9746 = vmatprep.mubr.bf16.mxu1 %v9672_v1 }
0x14b3   :  { %9706 = vmatmul.mubr.bf16.vlgmr.msra.gmra.mrb[144].mxu0 %v17127_v52  ;;  %9747 = vmatmul.mubr.bf16.vlgmr.msra.gmra.mrb[140].mxu1 %v17127_v52 }
0x14b4   :  { %9756 = vmatpush1.bf16.msra.mxu0 %v17028_v29  ;;  %11452 = vmatpush3.bf16.msra.mxu1 %v12482_v8  ;;  %v12488_v29 = vld [vmem:[#allocation14 + $0x18] sm:$0xff]  }
0x14b5   :  { %9787 = vmatprep.mubr.bf16.mxu0 %v9672_v1  ;;  %10143 = vmatprep.mubr.bf16.mxu1 %v9845_v51  ;;  %v12510_v1 = vld [vmem:[#allocation14 + $0xb0] sm:$0xff]   ;;  %v12511_v8 = vld [vmem:[#allocation14 + $0xf8] sm:$0xff]  }
0x14b6   :  { %9757 = vmatprep.subr.bf16.mxu0 %v17031_v56  ;;  %11453 = vmatprep.subr.bf16.mxu1 %v12483_v54  ;;  %v12490_v56 = vld [vmem:[#allocation14 + $0x20] sm:$0xff]  }
0x14b8   :  { %9758 = vmatpush1.bf16.msra.mxu0 %v17036_v2  ;;  %11454 = vmatpush3.bf16.msra.mxu1 %v12484_v20  ;;  %v12491_v2 = vld [vmem:[#allocation14 + $0x68] sm:$0xff]  }
0x14b9   :  { %9759 = vmatprep.subr.bf16.mxu0 %v17039_v18  ;;  %11455 = vmatprep.subr.bf16.mxu1 %v12485_v45  ;;  %v12492_v18 = vld [vmem:[#allocation14 + $0x28] sm:$0xff]  }
0x14bc   :  { %9760 = vmatpush1.bf16.msra.mxu0 %v17044_v23  ;;  %11456 = vmatpush3.bf16.msra.mxu1 %v12486_v53  ;;  %v12493_v23 = vld [vmem:[#allocation14 + $0x70] sm:$0xff]  }
0x14bd   :  { %9761 = vmatprep.subr.bf16.mxu0 %v17047_v30  ;;  %11457 = vmatprep.subr.bf16.mxu1 %v12487_v13  ;;  %v12494_v30 = vld [vmem:[#allocation14 + $0x30] sm:$0xff]  }
0x14c0   :  { %9762 = vmatpush1.bf16.msra.mxu0 %v17052_v33  ;;  %11458 = vmatpush3.bf16.msra.mxu1 %v12488_v29  ;;  %v12495_v33 = vld [vmem:[#allocation14 + $0x78] sm:$0xff]   ;;  %v18332_v29 = vld [vmem:[#allocation111_spill] sm:$0xff] }
0x14c1   :  { %9763 = vmatprep.subr.bf16.mxu0 %v17055_v43  ;;  %11459 = vmatprep.subr.bf16.mxu1 %v12489_v10  ;;  %v12496_v43 = vld [vmem:[#allocation14 + $0x38] sm:$0xff]  }
0x14c4   :  { %9764 = vmatpush1.bf16.msra.mxu0 %v17059_v42  ;;  %11460 = vmatpush3.bf16.msra.mxu1 %v12490_v56  ;;  %v18330_v42 = vld [vmem:[#allocation94_spill] sm:$0xff] }
0x14c5   :  { %9765 = vmatprep.subr.bf16.mxu0 %v17062_v11  ;;  %11461 = vmatprep.subr.bf16.mxu1 %v12491_v2  ;;  %v6949_v11 = vsel %vm314_vm12, %v18331_v36, %v18330_v42 }
0x14c8   :  { %9766 = vmatpush1.bf16.msra.mxu0 %v17065_v55  ;;  %11462 = vmatpush3.bf16.msra.mxu1 %v12492_v18  ;;  %v13009_v55 = vld [vmem:[#allocation12 + $0x194] ss:$24 sps:$4 sm:$0xff]  }
0x14c9   :  { %9767 = vmatprep.subr.bf16.mxu0 %v17068_v34  ;;  %11463 = vmatprep.subr.bf16.mxu1 %v12493_v23  ;;  %v9844_v34 = vpack.c.bf16 %v6949_v11, %v6949_v11  ;;  %v18333_v18 = vld [vmem:[#allocation113_spill] sm:$0xff] }
0x14cc   :  { %9768 = vmatpush1.bf16.msra.mxu0 %v17071_v21  ;;  %11464 = vmatpush3.bf16.msra.mxu1 %v12494_v30  ;;  %v13011_v21 = vld [vmem:[#allocation12 + $0x1c4] ss:$24 sps:$4 sm:$0xff]   ;;  %v18334_v30 = vld [vmem:[#allocation29_spill] sm:$0xff] }
0x14cd   :  { %9769 = vmatprep.subr.bf16.mxu0 %v17074_v35  ;;  %11465 = vmatprep.subr.bf16.mxu1 %v12495_v33  ;;  %v13013_v35 = vld [vmem:[#allocation12 + $0x1f4] ss:$24 sps:$4 sm:$0xff]  }
0x14d0   :  { %9770 = vmatpush1.bf16.msra.mxu0 %v13008_v62  ;;  %11466 = vmatpush3.bf16.msra.mxu1 %v12496_v43 }
0x14d1   :  { %9771 = vmatprep.subr.bf16.mxu0 %v13009_v55  ;;  %11473 = vmatprep.subr.bf16.mxu1 %v12497_v6 }
0x14d3   :  { %10144 = vmatmul.mubr.bf16.vlgmr.msra.gmra.mrb[144].mxu1 %v9844_v34  ;;  %v18335_v34 = vld [vmem:[#allocation112_spill] sm:$0xff] }
0x14d4   :  { %9772 = vmatpush1.bf16.msra.mxu0 %v13010_v48  ;;  %11474 = vmatpush3.bf16.msra.mxu1 %v12498_v32 }
0x14d5   :  { %9773 = vmatprep.subr.bf16.mxu0 %v13011_v21  ;;  %11475 = vmatprep.subr.bf16.mxu1 %v12499_v37 }
0x14d8   :  { %9774 = vmatpush1.bf16.msra.mxu0 %v13012_v59  ;;  %11476 = vmatpush3.bf16.msra.mxu1 %v12500_v38 }
0x14d9   :  { %9775 = vmatprep.subr.bf16.mxu0 %v13013_v35  ;;  %11477 = vmatprep.subr.bf16.mxu1 %v12501_v19  ;;  %v18336_v19 = vld [vmem:[#allocation114_spill] sm:$0xff] }
0x14dc   :  { %9776 = vmatpush1.bf16.msra.mxu0 %v13014_v40  ;;  %11478 = vmatpush3.bf16.msra.mxu1 %v12502_v14 }
0x14dd   :  { %9777 = vmatprep.subr.bf16.mxu0 %v13015_v31  ;;  %11479 = vmatprep.subr.bf16.mxu1 %v12503_v12 }
0x14e0   :  { %9778 = vmatpush1.bf16.msra.mxu0 %v13016_v9  ;;  %11480 = vmatpush3.bf16.msra.mxu1 %v12504_v28 }
0x14e1   :  { %9779 = vmatprep.subr.bf16.mxu0 %v13017_v22  ;;  %11481 = vmatprep.subr.bf16.mxu1 %v12505_v25 }
0x14e4   :  { %9780 = vmatpush1.bf16.msra.mxu0 %v13018_v60  ;;  %11482 = vmatpush3.bf16.msra.mxu1 %v12506_v0  ;;  %v18337_v0 = vld [vmem:[#allocation115_spill] sm:$0xff] }
0x14e5   :  { %9781 = vmatprep.subr.bf16.mxu0 %v13019_v16  ;;  %11483 = vmatprep.subr.bf16.mxu1 %v12507_v39 }
0x14e8   :  { %9782 = vmatpush1.bf16.msra.mxu0 %v13020_v50  ;;  %11484 = vmatpush3.bf16.msra.mxu1 %v12508_v46 }
0x14e9   :  { %9783 = vmatprep.subr.bf16.mxu0 %v13021_v41  ;;  %11485 = vmatprep.subr.bf16.mxu1 %v12509_v3 }
0x14ec   :  { %9784 = vmatpush1.bf16.msra.mxu0 %v13022_v61  ;;  %11486 = vmatpush3.bf16.msra.mxu1 %v12510_v1 }
0x14ed   :  { %9785 = vmatprep.subr.bf16.mxu0 %v13023_v24  ;;  %11487 = vmatprep.subr.bf16.mxu1 %v12511_v8 }
0x14f0   :  { %9786 = vmatpush1.bf16.msra.mxu0 %v13024_v49  ;;  %11488 = vmatpush3.bf16.msra.mxu1 %v12512_v47 }
0x14f3   :  { %9788 = vmatmul.mubr.bf16.vlgmr.msra.gmra.mrb[148].mxu0 %v17127_v52 }
0x1586   :  { %v9707_v17 = vpop.f32.mrb[144].mxu0  ;;  %v9748_v57 = vpop.f32.mrb[140].mxu1 }
0x1587   :  { %v9708_v52 = vadd.f32 %v9707_v17, %v18314_v7  ;;  %v9709_v54 = vpop.f32.mrb[145].mxu0  ;;  %v9750_v51 = vpop.f32.mrb[141].mxu1 }
0x1588   :  { %v9710_v20 = vadd.f32 %v9709_v54, %v18069_v63  ;;  %v9751_v45 = vadd.f32 %v9750_v51, %v18315_v15  ;;  %v9711_v53 = vpop.f32.mrb[146].mxu0  ;;  %v9752_v13 = vpop.f32.mrb[142].mxu1  ;;  %v9749_v15 = vadd.f32 %v9748_v57, %v18073_v58  ;;  %v11334_v51 = vld [vmem:[%s17197_s12] ss:$0 sm:$0xff] }
0x1589   :  { %v9802_v10 = vadd.f32 %v9708_v52, %v18332_v29  ;;  %v9712_v56 = vpop.f32.mrb[147].mxu0  ;;  %v9753_v2 = vpop.f32.mrb[143].mxu1 }
0x158a   :  { %v9803_v23 = vadd.f32 %v9710_v20, %v18333_v18  ;;  %v9822_v33 = vadd.f32 %v9751_v45, %v18334_v30 }
0x158b   :  { %v11330_v43 = vmul.f32 -1.442695, %v9802_v10 }
0x158c   :  { %v11331_v42 = vmul.f32 -1.442695, %v9803_v23  ;;  %v11332_v9 = vmul.f32 -1.442695, %v9822_v33 }
0x158d   :  { %12813 = vpow2.f32 %v11330_v43 }
0x158e   :  { %12815 = vpow2.f32 %v11331_v42 }
0x1597   :  { %v12814_v7 = vpop.eup %12813 }
0x1598   :  { %v9810_v36 = vadd.f32 1.0, %v12814_v7  ;;  %v12816_v63 = vpop.eup %12815 }
0x1599   :  { %v9811_v21 = vadd.f32 1.0, %v12816_v63 }
0x159a   :  { %12817 = vrcp.f32 %v9810_v36 }
0x15a4   :  { %v12818_v11 = vpop.eup %12817 }
0x15a5   :  { %v9816_v62 = vmul.f32 %v12818_v11, %v9749_v15 }
0x15a6   :  { %v11467_v55 = vpop.f32.mrb[144].mxu1 }
0x15a7   :  { %v9817_v48 = vadd.f32 %v9816_v62, %v18335_v34  ;;  %v11468_v59 = vpop.f32.mrb[145].mxu1 }
0x15a8   :  { %v11469_v35 = vadd.f32 %v11468_v59, %v11467_v55  ;;  %v11470_v40 = vpop.f32.mrb[146].mxu1 }
0x15a9   :  { %12819 = vtanh.f32 %v9817_v48  ;;  %v11471_v31 = vpop.f32.mrb[147].mxu1 }
0x15aa   :  { %12821 = vrcp.f32 %v9811_v21  ;;  %v10146_v53 = vadd.f32 %v11469_v35, %v11334_v51 }
0x15ab   :  { %12823 = vpow2.f32 %v11332_v9 }
0x15b3   :  { %v12820_v22 = vpop.eup %12819 }
0x15b4   :  { %v9819_v60 = vsub.f32 %v17112_v27, %v12820_v22  ;;  %v12822_v16 = vpop.eup %12821 }
0x15b5   :  { %v12824_v58 = vpop.eup %12823 }
0x15b6   :  { %v9820_v50 = vmul.f32 %v12822_v16, %v9819_v60  ;;  %v9830_v61 = vadd.f32 1.0, %v12824_v58 }
0x15b8   :  { %v9821_v41 = vadd.f32 %v12820_v22, %v9820_v50  ;;  %12825 = vrcp.f32 %v9830_v61 }
0x15ba   :  { %v9842_v17 = vsel %vm314_vm12, %v9821_v41, %v17112_v27 }
0x15bb   :  { %v9846_v54 = vpack.c.bf16 %v9842_v17, %v9842_v17 }
0x15c2   :  { %v12826_v38 = vpop.eup %12825 }
0x15c6   :  { %v9789_v24 = vpop.f32.mrb[148].mxu0 }
0x15c7   :  { %v9790_v49 = vadd.f32 %v9789_v24, %v16133_v44  ;;  %v9791_v6 = vpop.f32.mrb[149].mxu0 }
0x15c8   :  { %v9792_v32 = vadd.f32 %v9791_v6, %v16150_v26  ;;  %v9793_v37 = vpop.f32.mrb[150].mxu0 }
0x15c9   :  { %v9823_v14 = vadd.f32 %v9790_v49, %v18336_v19  ;;  %v9794_v12 = vpop.f32.mrb[151].mxu0 }
0x15ca   :  { %v9836_v28 = vmul.f32 %v12826_v38, %v9792_v32 }
0x15cb   :  { %v11333_v25 = vmul.f32 -1.442695, %v9823_v14 }
0x15cc   :  { %v9837_v39 = vadd.f32 %v9836_v28, %v18337_v0 }
0x15cd   :  { %12827 = vpow2.f32 %v11333_v25 }
0x15ce   :  { %12829 = vtanh.f32 %v9837_v39 }
0x15d7   :  { %v12828_v46 = vpop.eup %12827 }
0x15d8   :  { %v9831_v3 = vadd.f32 1.0, %v12828_v46  ;;  %v12830_v1 = vpop.eup %12829 }
0x15d9   :  { %v9839_v44 = vsub.f32 %v17117_v5, %v12830_v1 }
0x15da   :  { %12831 = vrcp.f32 %v9831_v3 }
0x15e4   :  { %v12832_v8 = vpop.eup %12831 }
0x15e5   :  { %v9840_v47 = vmul.f32 %v12832_v8, %v9839_v44 }
0x15e7   :  { %v9841_v26 = vadd.f32 %v12830_v1, %v9840_v47 }
0x15e9   :  { %v9843_v57 = vsel %vm307_vm13, %v9841_v26, %v17117_v5 }
0x15ea   :  { %v9847_v52 = vpack.c.bf16 %v9843_v57, %v9843_v57 }
0x15ec   :  { %10183 = vmatprep.mubr.bf16.mxu1 %v9847_v52 }
0x15ed   :  { %10184 = vmatmul.mubr.bf16.vlgmr.msra.gmra.mrb[148].mxu1 %v9846_v54 }
0x16c0   :  { %v11489_v20 = vpop.f32.mrb[148].mxu1 }
0x16c1   :  { %v11490_v45 = vpop.f32.mrb[149].mxu1 }
0x16c2   :  { %v11491_v13 = vadd.f32 %v11490_v45, %v11489_v20  ;;  %v11492_v29 = vpop.f32.mrb[150].mxu1 }
0x16c3   :  { %v11493_v10 = vpop.f32.mrb[151].mxu1 }
0x16c4   :  { %v10186_v27 = vadd.f32 %v11491_v13, %v10146_v53 }
0x16c6   :  { %v10191_v56 = vmax.f32 %v10186_v27, 0.0 }
0x16c8   :  { %10192 = vst [vmem:[#allocation15] sm:$0xff] %v10191_v56 }
0x16c9   :  { %13146 = shalt.err (!%p13143_p2)
}
0x16ca   :  { %s13147_s20 = scalar_lea.hbm %s17198_s13, 128 }
0x16cb   :  { %p13148_p3 = scmp.ne.s32.totalorder %s17198_s13, %s13147_s20  ;;  %p13151_p4 = scmp.lt.u32.totalorder %s13147_s20, %s17198_s13 }
0x16cd   :  { %p13153_p5 = pnand %p13151_p4, %p13148_p3 }
0x16cf   :  { %13156 = shalt.err (!%p13153_p5)
}
0x16d0   :  { %10202 = dma.vmem_to_hbm [thread:$0]  %s10200_s5, 128, %s17198_s13, [#allocation8]  }
0x16d1   :  { %13163 = dma.done.wait [#allocation8], 128  }
0x16d2   :  { %13164 = vsyncadd [#allocation8], 4294967168 }
0x16d3   :  { %10206 = vsyncpa [#allocation7], 1 }
0x16d4   :  { %10207 = vsyncpa [#allocation10], 1 }
0x16d5   :  { %10208 = vsyncpa [#allocation13], 1 }
0x16d6   :  { %10209 = vsyncpa [#allocation8], 1 }

</bundles_post_ra>
